<compile_context>
chip_gen: v6e
topology: v6e:2x2x1
jax: 0.10.0
libtpu: 0.0.40
codegen_flags: <defaults>
</compile_context>

<pallas_src>
import functools
import math

import jax
import jax.numpy as jnp
from jax import lax
from jax.experimental import pallas as pl
from jax.experimental.pallas import tpu as pltpu

H1 = 128   # hidden size of lstm_1
H2 = 64    # hidden size of lstm_2


# ----------------------------------------------------------------------------
# Pallas kernel: fused 2-layer bidirectional LSTM over the full sequence.
# ----------------------------------------------------------------------------
def _encoder_kernel(x_ref, wih1_ref, whh1_ref, b1_ref,
                    wih2_ref, whh2_ref, b2_ref,
                    out2_ref, h_n_ref, c_n_ref,
                    gx1_ref, out1_ref, gx2_ref,
                    *, h1, h2, seq_len, batch_pad):
    """Fused PyTorch-Encoder forward (two stacked bidirectional LSTMs).

    Time-major row layout everywhere: row t * Bp + b  <->  (batch b, time t).

    x_ref    : (T*Bp, D)      bf16  layer-1 input
    wih1_ref : (D, 8*H1)      bf16  [W_ih_fwd^T | W_ih_rev^T] of lstm_1
    whh1_ref : (2*H1, 8*H1)   bf16  blockdiag(W_hh_fwd^T, W_hh_rev^T) of lstm_1
    b1_ref   : (1, 8*H1)      f32   [b_fwd | b_rev], each b = b_ih + b_hh
    wih2/whh2/b2              same for lstm_2 (input 2*H1, hidden H2)
    out2_ref : (T*Bp, 2*H2)   f32   layer-2 output, lanes [:H2]=fwd, [H2:]=rev
    h_n_ref  : (2*Bp, H2)     f32   rows [:Bp]=fwd final h, [Bp:]=rev final h
    c_n_ref  : (2*Bp, H2)     f32   final cell states, same layout
    gx1_ref  : (T*Bp, 8*H1)   f32   scratch: hoisted lstm_1 input projection
    out1_ref : (T*Bp, 2*H1)   bf16  scratch: lstm_1 output (never leaves VMEM)
    gx2_ref  : (T*Bp, 8*H2)   f32   scratch: hoisted lstm_2 input projection
    Gate order inside every 4H block is PyTorch's (i, f, g, o).
    """
    T, B = seq_len, batch_pad

    def act(gates, c_prev, hid):
        # Gate / cell math in f32 (VPU + EUP).
        i_g = jax.nn.sigmoid(gates[:, 0 * hid:1 * hid])
        f_g = jax.nn.sigmoid(gates[:, 1 * hid:2 * hid])
        g_g = jnp.tanh(gates[:, 2 * hid:3 * hid])
        o_g = jax.nn.sigmoid(gates[:, 3 * hid:4 * hid])
        c_new = f_g * c_prev + i_g * g_g
        h_new = o_g * jnp.tanh(c_new)
        return h_new, c_new

    def run_layer(gx_ref, whh_ref, out_ref, hid, out_dtype):
        """Bidirectional recurrence over T steps; returns final (h_f,h_r,c_f,c_r)."""

        def step(i, carry):
            h_f, h_r, c_f, c_r = carry
            t_r = T - 1 - i                               # reverse time index
            row_f = pl.multiple_of(i * B, 8)              # sublane-aligned rows
            row_r = pl.multiple_of(t_r * B, 8)

            # ONE block-diagonal recurrent matmul covering both directions
            # (bf16 operands, f32 accumulation) on the serial critical path.
            h_cat = jnp.concatenate([h_f, h_r], axis=-1).astype(jnp.bfloat16)
            g_all = jnp.dot(h_cat, whh_ref[...],
                            preferred_element_type=jnp.float32)   # (B, 8*hid)

            # Hoisted x-projections: forward uses time i, reverse uses time t_r.
            g_f = gx_ref[pl.ds(row_f, B), 0:4 * hid] + g_all[:, 0:4 * hid]
            g_r = gx_ref[pl.ds(row_r, B), 4 * hid:8 * hid] + g_all[:, 4 * hid:8 * hid]

            h_f, c_f = act(g_f, c_f, hid)
            h_r, c_r = act(g_r, c_r, hid)

            out_ref[pl.ds(row_f, B), 0:hid] = h_f.astype(out_dtype)
            out_ref[pl.ds(row_r, B), hid:2 * hid] = h_r.astype(out_dtype)
            return (h_f, h_r, c_f, c_r)

        z = jnp.zeros((B, hid), jnp.float32)
        # T is small & static here: fully unroll so the scheduler can overlap
        # consecutive steps.  TODO(synk): unroll=2..4 for production T.
        return lax.fori_loop(0, T, step, (z, z, z, z), unroll=True)

    # ---- Layer 1: hoisted input projection (one MXU matmul, bias folded). ----
    gx1_ref[...] = (
        jnp.dot(x_ref[...], wih1_ref[...], preferred_element_type=jnp.float32)
        + b1_ref[...])
    run_layer(gx1_ref, whh1_ref, out1_ref, h1, jnp.bfloat16)

    # ---- Layer 2: input projection consumes the VMEM-resident bf16 out1. ----
    # (nn.Dropout between the layers is identity in eval mode.)
    gx2_ref[...] = (
        jnp.dot(out1_ref[...], wih2_ref[...], preferred_element_type=jnp.float32)
        + b2_ref[...])
    h_f2, h_r2, c_f2, c_r2 = run_layer(gx2_ref, whh2_ref, out2_ref, h2,
                                       jnp.float32)

    # Final states of lstm_2 == the Encoder's (h_n, c_n).
    h_n_ref[0:B, :] = h_f2
    h_n_ref[B:2 * B, :] = h_r2
    c_n_ref[0:B, :] = c_f2
    c_n_ref[B:2 * B, :] = c_r2


# ----------------------------------------------------------------------------
# Wrapper: single pallas_call for the whole Encoder.
# ----------------------------------------------------------------------------
def _block_diag(a, b):
    """blockdiag of two (H, 4H) matrices -> (2H, 8H)."""
    h, g = a.shape
    z = jnp.zeros((h, g), a.dtype)
    return jnp.concatenate(
        [jnp.concatenate([a, z], axis=1),
         jnp.concatenate([z, b], axis=1)], axis=0)


def _vmem_tile_bytes(shape, dtype):
    """VMEM bytes of a 2-D array after (8, 128) layout padding."""
    r = -(-shape[0] // 8) * 8
    c = -(-shape[1] // 128) * 128
    return r * c * jnp.dtype(dtype).itemsize


def encoder_forward(x, params_l1, params_l2):
    """x: (B, T, input_dim) f32.  Returns (out_2, (h_n, c_n)) like nn.Module."""
    B, T, D = x.shape
    Bp = -(-B // 8) * 8                 # pad batch to a sublane multiple
    TBp = T * Bp

    # Time-major, batch-padded layout: row t*Bp + b  <->  x[b, t, :].
    x_tm = jnp.transpose(x, (1, 0, 2))
    if Bp != B:
        x_tm = jnp.pad(x_tm, ((0, 0), (0, Bp - B), (0, 0)))
    x_tm = x_tm.reshape(TBp, D).astype(jnp.bfloat16)

    wih1 = jnp.concatenate([params_l1["w_ih_f"], params_l1["w_ih_r"]],
                           axis=1).astype(jnp.bfloat16)            # (D, 8H1)
    whh1 = _block_diag(params_l1["w_hh_f"],
                       params_l1["w_hh_r"]).astype(jnp.bfloat16)   # (2H1, 8H1)
    b1 = jnp.concatenate([params_l1["b_f"], params_l1["b_r"]],
                         axis=1).astype(jnp.float32)               # (1, 8H1)
    wih2 = jnp.concatenate([params_l2["w_ih_f"], params_l2["w_ih_r"]],
                           axis=1).astype(jnp.bfloat16)            # (2H1, 8H2)
    whh2 = _block_diag(params_l2["w_hh_f"],
                       params_l2["w_hh_r"]).astype(jnp.bfloat16)   # (2H2, 8H2)
    b2 = jnp.concatenate([params_l2["b_f"], params_l2["b_r"]],
                         axis=1).astype(jnp.float32)               # (1, 8H2)

    io_shapes = [
        ((TBp, D), jnp.bfloat16), ((D, 8 * H1), jnp.bfloat16),
        ((2 * H1, 8 * H1), jnp.bfloat16), ((1, 8 * H1), jnp.float32),
        ((2 * H1, 8 * H2), jnp.bfloat16), ((2 * H2, 8 * H2), jnp.bfloat16),
        ((1, 8 * H2), jnp.float32),
        ((TBp, 2 * H2), jnp.float32), ((2 * Bp, H2), jnp.float32),
        ((2 * Bp, H2), jnp.float32),
    ]
    scratch_shapes_l = [
        ((TBp, 8 * H1), jnp.float32), ((TBp, 2 * H1), jnp.bfloat16),
        ((TBp, 8 * H2), jnp.float32),
    ]
    io_bytes = sum(_vmem_tile_bytes(s, d) for s, d in io_shapes)
    scratch_bytes = sum(_vmem_tile_bytes(s, d) for s, d in scratch_shapes_l)
    # in/out specs are double-buffered by default; add margin, floor at 16 MiB.
    vmem_limit = int(min(112 * 2 ** 20,
                         max(16 * 2 ** 20,
                             2 * io_bytes + scratch_bytes + 4 * 2 ** 20)))

    flops = (2 * TBp * D * 8 * H1                 # layer-1 input projection
             + 2 * T * Bp * (2 * H1) * (8 * H1)   # layer-1 recurrence (blockdiag)
             + 2 * TBp * (2 * H1) * (8 * H2)      # layer-2 input projection
             + 2 * T * Bp * (2 * H2) * (8 * H2)   # layer-2 recurrence
             + 20 * TBp * (H1 + H2))              # gate elementwise (rough)
    transcendentals = 10 * TBp * (H1 + H2)
    bytes_accessed = sum(math.prod(s) * jnp.dtype(d).itemsize
                         for s, d in io_shapes)

    kernel = functools.partial(_encoder_kernel, h1=H1, h2=H2,
                               seq_len=T, batch_pad=Bp)

    out2_tm, h_n2, c_n2 = pl.pallas_call(
        kernel,
        grid=(1,),
        in_specs=[
            pl.BlockSpec((TBp, D), lambda i: (0, 0)),
            pl.BlockSpec((D, 8 * H1), lambda i: (0, 0)),
            pl.BlockSpec((2 * H1, 8 * H1), lambda i: (0, 0)),
            pl.BlockSpec((1, 8 * H1), lambda i: (0, 0)),
            pl.BlockSpec((2 * H1, 8 * H2), lambda i: (0, 0)),
            pl.BlockSpec((2 * H2, 8 * H2), lambda i: (0, 0)),
            pl.BlockSpec((1, 8 * H2), lambda i: (0, 0)),
        ],
        out_specs=(
            pl.BlockSpec((TBp, 2 * H2), lambda i: (0, 0)),
            pl.BlockSpec((2 * Bp, H2), lambda i: (0, 0)),
            pl.BlockSpec((2 * Bp, H2), lambda i: (0, 0)),
        ),
        out_shape=(
            jax.ShapeDtypeStruct((TBp, 2 * H2), jnp.float32),
            jax.ShapeDtypeStruct((2 * Bp, H2), jnp.float32),
            jax.ShapeDtypeStruct((2 * Bp, H2), jnp.float32),
        ),
        scratch_shapes=[
            pltpu.VMEM((TBp, 8 * H1), jnp.float32),   # gx1
            pltpu.VMEM((TBp, 2 * H1), jnp.bfloat16),  # layer-1 output (bf16)
            pltpu.VMEM((TBp, 8 * H2), jnp.float32),   # gx2
        ],
        compiler_params=pltpu.CompilerParams(
            dimension_semantics=("arbitrary",),
            vmem_limit_bytes=vmem_limit),
        cost_estimate=pl.CostEstimate(
            flops=int(flops), transcendentals=int(transcendentals),
            bytes_accessed=int(bytes_accessed)),
    )(x_tm, wih1, whh1, b1, wih2, whh2, b2)

    out_2 = jnp.transpose(out2_tm.reshape(T, Bp, 2 * H2)[:, :B, :], (1, 0, 2))
    h_n = h_n2.reshape(2, Bp, H2)[:, :B, :]
    c_n = c_n2.reshape(2, Bp, H2)[:, :B, :]
    return out_2, (h_n, c_n)


# ----------------------------------------------------------------------------
# Pure-JAX fp32 reference (correctness check for the Pallas kernel).
# ----------------------------------------------------------------------------
def _lstm_dir_ref(x, w_ih, w_hh, b, reverse):
    B, T, _ = x.shape
    H = w_hh.shape[0]
    h = jnp.zeros((B, H), jnp.float32)
    c = jnp.zeros((B, H), jnp.float32)
    out = [None] * T
    ts = range(T - 1, -1, -1) if reverse else range(T)
    for t in ts:
        g = x[:, t, :] @ w_ih + h @ w_hh + b
        i_g = jax.nn.sigmoid(g[:, 0 * H:1 * H])
        f_g = jax.nn.sigmoid(g[:, 1 * H:2 * H])
        g_g = jnp.tanh(g[:, 2 * H:3 * H])
        o_g = jax.nn.sigmoid(g[:, 3 * H:4 * H])
        c = f_g * c + i_g * g_g
        h = o_g * jnp.tanh(c)
        out[t] = h
    return jnp.stack(out, axis=1), h, c


def encoder_ref(x, params_l1, params_l2):
    def bilstm(xx, p):
        of, hf, cf = _lstm_dir_ref(xx, p["w_ih_f"], p["w_hh_f"], p["b_f"], False)
        orr, hr, cr = _lstm_dir_ref(xx, p["w_ih_r"], p["w_hh_r"], p["b_r"], True)
        return (jnp.concatenate([of, orr], axis=-1),
                jnp.stack([hf, hr], axis=0), jnp.stack([cf, cr], axis=0))
    o1, _, _ = bilstm(x, params_l1)
    o2, h_n, c_n = bilstm(o1, params_l2)
    return o2, h_n, c_n


# ----------------------------------------------------------------------------
# Deterministic parameter init (PyTorch LSTM uses U(-1/sqrt(H), 1/sqrt(H))).
# ----------------------------------------------------------------------------
def init_bidir_lstm_params(key, input_dim, hidden):
    k = 1.0 / float(hidden) ** 0.5
    keys = jax.random.split(key, 8)

    def u(kk, shape):
        return jax.random.uniform(kk, shape, jnp.float32, minval=-k, maxval=k)

    return {
        # stored transposed relative to PyTorch (weight_ih: (4H, D) -> (D, 4H))
        "w_ih_f": u(keys[0], (input_dim, 4 * hidden)),
        "w_hh_f": u(keys[1], (hidden, 4 * hidden)),
        "b_f": u(keys[2], (1, 4 * hidden)) + u(keys[3], (1, 4 * hidden)),
        "w_ih_r": u(keys[4], (input_dim, 4 * hidden)),
        "w_hh_r": u(keys[5], (hidden, 4 * hidden)),
        "b_r": u(keys[6], (1, 4 * hidden)) + u(keys[7], (1, 4 * hidden)),
    }


if __name__ == "__main__":
    B, T, INPUT_DIM = 2, 8, 16

    key = jax.random.PRNGKey(0)
    kx, k1, k2 = jax.random.split(key, 3)

    x = jax.random.normal(kx, (B, T, INPUT_DIM), jnp.float32)
    params_l1 = init_bidir_lstm_params(k1, INPUT_DIM, H1)   # lstm_1
    params_l2 = init_bidir_lstm_params(k2, 2 * H1, H2)      # lstm_2

    fwd = jax.jit(encoder_forward)
    out_2, (h_n, c_n) = fwd(x, params_l1, params_l2)
    out_2, h_n, c_n = jax.block_until_ready((out_2, h_n, c_n))

    assert out_2.shape == (B, T, 2 * H2), out_2.shape
    assert h_n.shape == (2, B, H2), h_n.shape
    assert c_n.shape == (2, B, H2), c_n.shape
    assert bool(jnp.all(jnp.isfinite(out_2)))
    assert bool(jnp.all(jnp.isfinite(h_n)))
    assert bool(jnp.all(jnp.isfinite(c_n)))

    # Numerical check against a pure-JAX fp32 reference (loose tolerance
    # because the kernel uses bf16 MXU operands with f32 accumulation).
    ref_out, ref_h, ref_c = jax.jit(encoder_ref)(x, params_l1, params_l2)
    max_err = float(jnp.max(jnp.abs(out_2 - ref_out)))
    assert bool(jnp.allclose(out_2, ref_out, rtol=5e-2, atol=5e-2)), max_err
    assert bool(jnp.allclose(h_n, ref_h, rtol=5e-2, atol=5e-2))
    assert bool(jnp.allclose(c_n, ref_c, rtol=5e-2, atol=5e-2))

    print("KERNEL_OK")
</pallas_src>

<mosaic_0001>
module attributes {stable_mosaic.version = 11 : i64} {
  func.func @_encoder_kernel(%arg0: i32, %arg1: memref<64x16xbf16, #tpu.memory_space<vmem>>, %arg2: memref<16x1024xbf16, #tpu.memory_space<vmem>>, %arg3: memref<256x1024xbf16, #tpu.memory_space<vmem>>, %arg4: memref<1x1024xf32, #tpu.memory_space<vmem>>, %arg5: memref<256x512xbf16, #tpu.memory_space<vmem>>, %arg6: memref<128x512xbf16, #tpu.memory_space<vmem>>, %arg7: memref<1x512xf32, #tpu.memory_space<vmem>>, %arg8: memref<64x128xf32, #tpu.memory_space<vmem>>, %arg9: memref<16x64xf32, #tpu.memory_space<vmem>>, %arg10: memref<16x64xf32, #tpu.memory_space<vmem>>, %arg11: memref<64x1024xf32, #tpu.memory_space<vmem>>, %arg12: memref<64x256xbf16, #tpu.memory_space<vmem>>, %arg13: memref<64x512xf32, #tpu.memory_space<vmem>>) attributes {dimension_semantics = [#tpu.dimension_semantics<arbitrary>], iteration_bounds = array<i64: 1>, scalar_prefetch = 0 : i64, scratch_operands = 3 : i64, tpu.core_type = #tpu.core_type<tc>, window_params = [{pipeline_mode = #tpu.pipeline_mode<synchronous>, transform_indices = @transform_0, window_bounds = array<i64: 64, 16>}, {pipeline_mode = #tpu.pipeline_mode<synchronous>, transform_indices = @transform_1, window_bounds = array<i64: 16, 1024>}, {pipeline_mode = #tpu.pipeline_mode<synchronous>, transform_indices = @transform_2, window_bounds = array<i64: 256, 1024>}, {pipeline_mode = #tpu.pipeline_mode<synchronous>, transform_indices = @transform_3, window_bounds = array<i64: 1, 1024>}, {pipeline_mode = #tpu.pipeline_mode<synchronous>, transform_indices = @transform_4, window_bounds = array<i64: 256, 512>}, {pipeline_mode = #tpu.pipeline_mode<synchronous>, transform_indices = @transform_5, window_bounds = array<i64: 128, 512>}, {pipeline_mode = #tpu.pipeline_mode<synchronous>, transform_indices = @transform_6, window_bounds = array<i64: 1, 512>}, {pipeline_mode = #tpu.pipeline_mode<synchronous>, transform_indices = @transform_7, window_bounds = array<i64: 64, 128>}, {pipeline_mode = #tpu.pipeline_mode<synchronous>, transform_indices = @transform_8, window_bounds = array<i64: 16, 64>}, {pipeline_mode = #tpu.pipeline_mode<synchronous>, transform_indices = @transform_9, window_bounds = array<i64: 16, 64>}]} {
    %c0 = arith.constant 0 : index
    %c0_0 = arith.constant 0 : index
    %0 = vector.load %arg1[%c0, %c0_0] : memref<64x16xbf16, #tpu.memory_space<vmem>>, vector<64x16xbf16>
    %c0_1 = arith.constant 0 : index
    %c0_2 = arith.constant 0 : index
    %1 = vector.load %arg2[%c0_1, %c0_2] : memref<16x1024xbf16, #tpu.memory_space<vmem>>, vector<16x1024xbf16>
    %cst = arith.constant dense<0.000000e+00> : vector<64x1024xf32>
    %2 = tpu.matmul %0, %1, %cst {dimension_numbers = #tpu.dot_dimension_numbers<[1], [0], [0], [1], [0, 0, 1, 1], [], []>} : vector<64x16xbf16>, vector<16x1024xbf16>, vector<64x1024xf32> -> vector<64x1024xf32>
    %c0_3 = arith.constant 0 : index
    %c0_4 = arith.constant 0 : index
    %3 = vector.load %arg4[%c0_3, %c0_4] : memref<1x1024xf32, #tpu.memory_space<vmem>>, vector<1x1024xf32>
    %4 = vector.broadcast %3 : vector<1x1024xf32> to vector<64x1024xf32>
    %5 = arith.addf %2, %4 : vector<64x1024xf32>
    %c0_5 = arith.constant 0 : index
    %c0_6 = arith.constant 0 : index
    %6 = vector.load %arg11[%c0_5, %c0_6] : memref<64x1024xf32, #tpu.memory_space<vmem>>, vector<64x1024xf32>
    tpu.vector_store %arg11[%c0_5, %c0_6], %5 {strides = array<i32>} : memref<64x1024xf32, #tpu.memory_space<vmem>>, vector<64x1024xf32>,
    %cst_7 = arith.constant 0.000000e+00 : f32
    %7 = vector.broadcast %cst_7 : f32 to vector<8x128xf32>
    %c0_i32 = arith.constant 0 : i32
    %c7_i32 = arith.constant 7 : i32
    %8 = arith.subi %c7_i32, %c0_i32 : i32
    %c8_i32 = arith.constant 8 : i32
    %9 = arith.muli %c0_i32, %c8_i32 : i32
    %10 = tpu.assume_multiple %9, 8 : i32
    %c8_i32_8 = arith.constant 8 : i32
    %11 = arith.muli %8, %c8_i32_8 : i32
    %12 = tpu.assume_multiple %11, 8 : i32
    %13 = tpu.concatenate %7, %7 in 1 : vector<8x128xf32>, vector<8x128xf32> -> vector<8x256xf32>
    %14 = arith.truncf %13 : vector<8x256xf32> to vector<8x256xbf16>
    %c0_9 = arith.constant 0 : index
    %c0_10 = arith.constant 0 : index
    %15 = vector.load %arg3[%c0_9, %c0_10] : memref<256x1024xbf16, #tpu.memory_space<vmem>>, vector<256x1024xbf16>
    %cst_11 = arith.constant dense<0.000000e+00> : vector<8x1024xf32>
    %16 = tpu.matmul %14, %15, %cst_11 {dimension_numbers = #tpu.dot_dimension_numbers<[1], [0], [0], [1], [0, 0, 1, 1], [], []>} : vector<8x256xbf16>, vector<256x1024xbf16>, vector<8x1024xf32> -> vector<8x1024xf32>
    %17 = arith.index_cast %10 : i32 to index
    %c0_12 = arith.constant 0 : index
    %18 = vector.load %arg11[%17, %c0_12] : memref<64x1024xf32, #tpu.memory_space<vmem>>, vector<8x512xf32>
    %19 = vector.extract_strided_slice %16 {offsets = [0, 0], sizes = [8, 512], strides = [1, 1]} : vector<8x1024xf32> to vector<8x512xf32>
    %20 = arith.addf %18, %19 : vector<8x512xf32>
    %21 = arith.index_cast %12 : i32 to index
    %c512 = arith.constant 512 : index
    %22 = vector.load %arg11[%21, %c512] : memref<64x1024xf32, #tpu.memory_space<vmem>>, vector<8x512xf32>
    %23 = vector.extract_strided_slice %16 {offsets = [0, 512], sizes = [8, 512], strides = [1, 1]} : vector<8x1024xf32> to vector<8x512xf32>
    %24 = arith.addf %22, %23 : vector<8x512xf32>
    %25 = vector.extract_strided_slice %20 {offsets = [0, 0], sizes = [8, 128], strides = [1, 1]} : vector<8x512xf32> to vector<8x128xf32>
    %26 = arith.negf %25 : vector<8x128xf32>
    %27 = math.exp %26 : vector<8x128xf32>
    %cst_13 = arith.constant 1.000000e+00 : f32
    %28 = vector.broadcast %cst_13 : f32 to vector<8x128xf32>
    %29 = arith.addf %28, %27 : vector<8x128xf32>
    %30 = arith.divf %28, %29 : vector<8x128xf32>
    %31 = vector.extract_strided_slice %20 {offsets = [0, 128], sizes = [8, 128], strides = [1, 1]} : vector<8x512xf32> to vector<8x128xf32>
    %32 = arith.negf %31 : vector<8x128xf32>
    %33 = math.exp %32 : vector<8x128xf32>
    %cst_14 = arith.constant 1.000000e+00 : f32
    %34 = vector.broadcast %cst_14 : f32 to vector<8x128xf32>
    %35 = arith.addf %34, %33 : vector<8x128xf32>
    %36 = arith.divf %34, %35 : vector<8x128xf32>
    %37 = vector.extract_strided_slice %20 {offsets = [0, 256], sizes = [8, 128], strides = [1, 1]} : vector<8x512xf32> to vector<8x128xf32>
    %38 = math.tanh %37 : vector<8x128xf32>
    %39 = vector.extract_strided_slice %20 {offsets = [0, 384], sizes = [8, 128], strides = [1, 1]} : vector<8x512xf32> to vector<8x128xf32>
    %40 = arith.negf %39 : vector<8x128xf32>
    %41 = math.exp %40 : vector<8x128xf32>
    %cst_15 = arith.constant 1.000000e+00 : f32
    %42 = vector.broadcast %cst_15 : f32 to vector<8x128xf32>
    %43 = arith.addf %42, %41 : vector<8x128xf32>
    %44 = arith.divf %42, %43 : vector<8x128xf32>
    %45 = arith.mulf %36, %7 : vector<8x128xf32>
    %46 = arith.mulf %30, %38 : vector<8x128xf32>
    %47 = arith.addf %45, %46 : vector<8x128xf32>
    %48 = math.tanh %47 : vector<8x128xf32>
    %49 = arith.mulf %44, %48 : vector<8x128xf32>
    %50 = vector.extract_strided_slice %24 {offsets = [0, 0], sizes = [8, 128], strides = [1, 1]} : vector<8x512xf32> to vector<8x128xf32>
    %51 = arith.negf %50 : vector<8x128xf32>
    %52 = math.exp %51 : vector<8x128xf32>
    %cst_16 = arith.constant 1.000000e+00 : f32
    %53 = vector.broadcast %cst_16 : f32 to vector<8x128xf32>
    %54 = arith.addf %53, %52 : vector<8x128xf32>
    %55 = arith.divf %53, %54 : vector<8x128xf32>
    %56 = vector.extract_strided_slice %24 {offsets = [0, 128], sizes = [8, 128], strides = [1, 1]} : vector<8x512xf32> to vector<8x128xf32>
    %57 = arith.negf %56 : vector<8x128xf32>
    %58 = math.exp %57 : vector<8x128xf32>
    %cst_17 = arith.constant 1.000000e+00 : f32
    %59 = vector.broadcast %cst_17 : f32 to vector<8x128xf32>
    %60 = arith.addf %59, %58 : vector<8x128xf32>
    %61 = arith.divf %59, %60 : vector<8x128xf32>
    %62 = vector.extract_strided_slice %24 {offsets = [0, 256], sizes = [8, 128], strides = [1, 1]} : vector<8x512xf32> to vector<8x128xf32>
    %63 = math.tanh %62 : vector<8x128xf32>
    %64 = vector.extract_strided_slice %24 {offsets = [0, 384], sizes = [8, 128], strides = [1, 1]} : vector<8x512xf32> to vector<8x128xf32>
    %65 = arith.negf %64 : vector<8x128xf32>
    %66 = math.exp %65 : vector<8x128xf32>
    %cst_18 = arith.constant 1.000000e+00 : f32
    %67 = vector.broadcast %cst_18 : f32 to vector<8x128xf32>
    %68 = arith.addf %67, %66 : vector<8x128xf32>
    %69 = arith.divf %67, %68 : vector<8x128xf32>
    %70 = arith.mulf %61, %7 : vector<8x128xf32>
    %71 = arith.mulf %55, %63 : vector<8x128xf32>
    %72 = arith.addf %70, %71 : vector<8x128xf32>
    %73 = math.tanh %72 : vector<8x128xf32>
    %74 = arith.mulf %69, %73 : vector<8x128xf32>
    %75 = arith.truncf %49 : vector<8x128xf32> to vector<8x128xbf16>
    %76 = arith.index_cast %10 : i32 to index
    %c0_19 = arith.constant 0 : index
    %77 = vector.load %arg12[%76, %c0_19] : memref<64x256xbf16, #tpu.memory_space<vmem>>, vector<8x128xbf16>
    tpu.vector_store %arg12[%76, %c0_19], %75 {strides = array<i32>} : memref<64x256xbf16, #tpu.memory_space<vmem>>, vector<8x128xbf16>,
    %78 = arith.truncf %74 : vector<8x128xf32> to vector<8x128xbf16>
    %79 = arith.index_cast %12 : i32 to index
    %c128 = arith.constant 128 : index
    %80 = vector.load %arg12[%79, %c128] : memref<64x256xbf16, #tpu.memory_space<vmem>>, vector<8x128xbf16>
    tpu.vector_store %arg12[%79, %c128], %78 {strides = array<i32>} : memref<64x256xbf16, #tpu.memory_space<vmem>>, vector<8x128xbf16>,
    %c1_i32 = arith.constant 1 : i32
    %c7_i32_20 = arith.constant 7 : i32
    %81 = arith.subi %c7_i32_20, %c1_i32 : i32
    %c8_i32_21 = arith.constant 8 : i32
    %82 = arith.muli %c1_i32, %c8_i32_21 : i32
    %83 = tpu.assume_multiple %82, 8 : i32
    %c8_i32_22 = arith.constant 8 : i32
    %84 = arith.muli %81, %c8_i32_22 : i32
    %85 = tpu.assume_multiple %84, 8 : i32
    %86 = tpu.concatenate %49, %74 in 1 : vector<8x128xf32>, vector<8x128xf32> -> vector<8x256xf32>
    %87 = arith.truncf %86 : vector<8x256xf32> to vector<8x256xbf16>
    %c0_23 = arith.constant 0 : index
    %c0_24 = arith.constant 0 : index
    %88 = vector.load %arg3[%c0_23, %c0_24] : memref<256x1024xbf16, #tpu.memory_space<vmem>>, vector<256x1024xbf16>
    %cst_25 = arith.constant dense<0.000000e+00> : vector<8x1024xf32>
    %89 = tpu.matmul %87, %88, %cst_25 {dimension_numbers = #tpu.dot_dimension_numbers<[1], [0], [0], [1], [0, 0, 1, 1], [], []>} : vector<8x256xbf16>, vector<256x1024xbf16>, vector<8x1024xf32> -> vector<8x1024xf32>
    %90 = arith.index_cast %83 : i32 to index
    %c0_26 = arith.constant 0 : index
    %91 = vector.load %arg11[%90, %c0_26] : memref<64x1024xf32, #tpu.memory_space<vmem>>, vector<8x512xf32>
    %92 = vector.extract_strided_slice %89 {offsets = [0, 0], sizes = [8, 512], strides = [1, 1]} : vector<8x1024xf32> to vector<8x512xf32>
    %93 = arith.addf %91, %92 : vector<8x512xf32>
    %94 = arith.index_cast %85 : i32 to index
    %c512_27 = arith.constant 512 : index
    %95 = vector.load %arg11[%94, %c512_27] : memref<64x1024xf32, #tpu.memory_space<vmem>>, vector<8x512xf32>
    %96 = vector.extract_strided_slice %89 {offsets = [0, 512], sizes = [8, 512], strides = [1, 1]} : vector<8x1024xf32> to vector<8x512xf32>
    %97 = arith.addf %95, %96 : vector<8x512xf32>
    %98 = vector.extract_strided_slice %93 {offsets = [0, 0], sizes = [8, 128], strides = [1, 1]} : vector<8x512xf32> to vector<8x128xf32>
    %99 = arith.negf %98 : vector<8x128xf32>
    %100 = math.exp %99 : vector<8x128xf32>
    %cst_28 = arith.constant 1.000000e+00 : f32
    %101 = vector.broadcast %cst_28 : f32 to vector<8x128xf32>
    %102 = arith.addf %101, %100 : vector<8x128xf32>
    %103 = arith.divf %101, %102 : vector<8x128xf32>
    %104 = vector.extract_strided_slice %93 {offsets = [0, 128], sizes = [8, 128], strides = [1, 1]} : vector<8x512xf32> to vector<8x128xf32>
    %105 = arith.negf %104 : vector<8x128xf32>
    %106 = math.exp %105 : vector<8x128xf32>
    %cst_29 = arith.constant 1.000000e+00 : f32
    %107 = vector.broadcast %cst_29 : f32 to vector<8x128xf32>
    %108 = arith.addf %107, %106 : vector<8x128xf32>
    %109 = arith.divf %107, %108 : vector<8x128xf32>
    %110 = vector.extract_strided_slice %93 {offsets = [0, 256], sizes = [8, 128], strides = [1, 1]} : vector<8x512xf32> to vector<8x128xf32>
    %111 = math.tanh %110 : vector<8x128xf32>
    %112 = vector.extract_strided_slice %93 {offsets = [0, 384], sizes = [8, 128], strides = [1, 1]} : vector<8x512xf32> to vector<8x128xf32>
    %113 = arith.negf %112 : vector<8x128xf32>
    %114 = math.exp %113 : vector<8x128xf32>
    %cst_30 = arith.constant 1.000000e+00 : f32
    %115 = vector.broadcast %cst_30 : f32 to vector<8x128xf32>
    %116 = arith.addf %115, %114 : vector<8x128xf32>
    %117 = arith.divf %115, %116 : vector<8x128xf32>
    %118 = arith.mulf %109, %47 : vector<8x128xf32>
    %119 = arith.mulf %103, %111 : vector<8x128xf32>
    %120 = arith.addf %118, %119 : vector<8x128xf32>
    %121 = math.tanh %120 : vector<8x128xf32>
    %122 = arith.mulf %117, %121 : vector<8x128xf32>
    %123 = vector.extract_strided_slice %97 {offsets = [0, 0], sizes = [8, 128], strides = [1, 1]} : vector<8x512xf32> to vector<8x128xf32>
    %124 = arith.negf %123 : vector<8x128xf32>
    %125 = math.exp %124 : vector<8x128xf32>
    %cst_31 = arith.constant 1.000000e+00 : f32
    %126 = vector.broadcast %cst_31 : f32 to vector<8x128xf32>
    %127 = arith.addf %126, %125 : vector<8x128xf32>
    %128 = arith.divf %126, %127 : vector<8x128xf32>
    %129 = vector.extract_strided_slice %97 {offsets = [0, 128], sizes = [8, 128], strides = [1, 1]} : vector<8x512xf32> to vector<8x128xf32>
    %130 = arith.negf %129 : vector<8x128xf32>
    %131 = math.exp %130 : vector<8x128xf32>
    %cst_32 = arith.constant 1.000000e+00 : f32
    %132 = vector.broadcast %cst_32 : f32 to vector<8x128xf32>
    %133 = arith.addf %132, %131 : vector<8x128xf32>
    %134 = arith.divf %132, %133 : vector<8x128xf32>
    %135 = vector.extract_strided_slice %97 {offsets = [0, 256], sizes = [8, 128], strides = [1, 1]} : vector<8x512xf32> to vector<8x128xf32>
    %136 = math.tanh %135 : vector<8x128xf32>
    %137 = vector.extract_strided_slice %97 {offsets = [0, 384], sizes = [8, 128], strides = [1, 1]} : vector<8x512xf32> to vector<8x128xf32>
    %138 = arith.negf %137 : vector<8x128xf32>
    %139 = math.exp %138 : vector<8x128xf32>
    %cst_33 = arith.constant 1.000000e+00 : f32
    %140 = vector.broadcast %cst_33 : f32 to vector<8x128xf32>
    %141 = arith.addf %140, %139 : vector<8x128xf32>
    %142 = arith.divf %140, %141 : vector<8x128xf32>
    %143 = arith.mulf %134, %72 : vector<8x128xf32>
    %144 = arith.mulf %128, %136 : vector<8x128xf32>
    %145 = arith.addf %143, %144 : vector<8x128xf32>
    %146 = math.tanh %145 : vector<8x128xf32>
    %147 = arith.mulf %142, %146 : vector<8x128xf32>
    %148 = arith.truncf %122 : vector<8x128xf32> to vector<8x128xbf16>
    %149 = arith.index_cast %83 : i32 to index
    %c0_34 = arith.constant 0 : index
    %150 = vector.load %arg12[%149, %c0_34] : memref<64x256xbf16, #tpu.memory_space<vmem>>, vector<8x128xbf16>
    tpu.vector_store %arg12[%149, %c0_34], %148 {strides = array<i32>} : memref<64x256xbf16, #tpu.memory_space<vmem>>, vector<8x128xbf16>,
    %151 = arith.truncf %147 : vector<8x128xf32> to vector<8x128xbf16>
    %152 = arith.index_cast %85 : i32 to index
    %c128_35 = arith.constant 128 : index
    %153 = vector.load %arg12[%152, %c128_35] : memref<64x256xbf16, #tpu.memory_space<vmem>>, vector<8x128xbf16>
    tpu.vector_store %arg12[%152, %c128_35], %151 {strides = array<i32>} : memref<64x256xbf16, #tpu.memory_space<vmem>>, vector<8x128xbf16>,
    %c2_i32 = arith.constant 2 : i32
    %c7_i32_36 = arith.constant 7 : i32
    %154 = arith.subi %c7_i32_36, %c2_i32 : i32
    %c8_i32_37 = arith.constant 8 : i32
    %155 = arith.muli %c2_i32, %c8_i32_37 : i32
    %156 = tpu.assume_multiple %155, 8 : i32
    %c8_i32_38 = arith.constant 8 : i32
    %157 = arith.muli %154, %c8_i32_38 : i32
    %158 = tpu.assume_multiple %157, 8 : i32
    %159 = tpu.concatenate %122, %147 in 1 : vector<8x128xf32>, vector<8x128xf32> -> vector<8x256xf32>
    %160 = arith.truncf %159 : vector<8x256xf32> to vector<8x256xbf16>
    %c0_39 = arith.constant 0 : index
    %c0_40 = arith.constant 0 : index
    %161 = vector.load %arg3[%c0_39, %c0_40] : memref<256x1024xbf16, #tpu.memory_space<vmem>>, vector<256x1024xbf16>
    %cst_41 = arith.constant dense<0.000000e+00> : vector<8x1024xf32>
    %162 = tpu.matmul %160, %161, %cst_41 {dimension_numbers = #tpu.dot_dimension_numbers<[1], [0], [0], [1], [0, 0, 1, 1], [], []>} : vector<8x256xbf16>, vector<256x1024xbf16>, vector<8x1024xf32> -> vector<8x1024xf32>
    %163 = arith.index_cast %156 : i32 to index
    %c0_42 = arith.constant 0 : index
    %164 = vector.load %arg11[%163, %c0_42] : memref<64x1024xf32, #tpu.memory_space<vmem>>, vector<8x512xf32>
    %165 = vector.extract_strided_slice %162 {offsets = [0, 0], sizes = [8, 512], strides = [1, 1]} : vector<8x1024xf32> to vector<8x512xf32>
    %166 = arith.addf %164, %165 : vector<8x512xf32>
    %167 = arith.index_cast %158 : i32 to index
    %c512_43 = arith.constant 512 : index
    %168 = vector.load %arg11[%167, %c512_43] : memref<64x1024xf32, #tpu.memory_space<vmem>>, vector<8x512xf32>
    %169 = vector.extract_strided_slice %162 {offsets = [0, 512], sizes = [8, 512], strides = [1, 1]} : vector<8x1024xf32> to vector<8x512xf32>
    %170 = arith.addf %168, %169 : vector<8x512xf32>
    %171 = vector.extract_strided_slice %166 {offsets = [0, 0], sizes = [8, 128], strides = [1, 1]} : vector<8x512xf32> to vector<8x128xf32>
    %172 = arith.negf %171 : vector<8x128xf32>
    %173 = math.exp %172 : vector<8x128xf32>
    %cst_44 = arith.constant 1.000000e+00 : f32
    %174 = vector.broadcast %cst_44 : f32 to vector<8x128xf32>
    %175 = arith.addf %174, %173 : vector<8x128xf32>
    %176 = arith.divf %174, %175 : vector<8x128xf32>
    %177 = vector.extract_strided_slice %166 {offsets = [0, 128], sizes = [8, 128], strides = [1, 1]} : vector<8x512xf32> to vector<8x128xf32>
    %178 = arith.negf %177 : vector<8x128xf32>
    %179 = math.exp %178 : vector<8x128xf32>
    %cst_45 = arith.constant 1.000000e+00 : f32
    %180 = vector.broadcast %cst_45 : f32 to vector<8x128xf32>
    %181 = arith.addf %180, %179 : vector<8x128xf32>
    %182 = arith.divf %180, %181 : vector<8x128xf32>
    %183 = vector.extract_strided_slice %166 {offsets = [0, 256], sizes = [8, 128], strides = [1, 1]} : vector<8x512xf32> to vector<8x128xf32>
    %184 = math.tanh %183 : vector<8x128xf32>
    %185 = vector.extract_strided_slice %166 {offsets = [0, 384], sizes = [8, 128], strides = [1, 1]} : vector<8x512xf32> to vector<8x128xf32>
    %186 = arith.negf %185 : vector<8x128xf32>
    %187 = math.exp %186 : vector<8x128xf32>
    %cst_46 = arith.constant 1.000000e+00 : f32
    %188 = vector.broadcast %cst_46 : f32 to vector<8x128xf32>
    %189 = arith.addf %188, %187 : vector<8x128xf32>
    %190 = arith.divf %188, %189 : vector<8x128xf32>
    %191 = arith.mulf %182, %120 : vector<8x128xf32>
    %192 = arith.mulf %176, %184 : vector<8x128xf32>
    %193 = arith.addf %191, %192 : vector<8x128xf32>
    %194 = math.tanh %193 : vector<8x128xf32>
    %195 = arith.mulf %190, %194 : vector<8x128xf32>
    %196 = vector.extract_strided_slice %170 {offsets = [0, 0], sizes = [8, 128], strides = [1, 1]} : vector<8x512xf32> to vector<8x128xf32>
    %197 = arith.negf %196 : vector<8x128xf32>
    %198 = math.exp %197 : vector<8x128xf32>
    %cst_47 = arith.constant 1.000000e+00 : f32
    %199 = vector.broadcast %cst_47 : f32 to vector<8x128xf32>
    %200 = arith.addf %199, %198 : vector<8x128xf32>
    %201 = arith.divf %199, %200 : vector<8x128xf32>
    %202 = vector.extract_strided_slice %170 {offsets = [0, 128], sizes = [8, 128], strides = [1, 1]} : vector<8x512xf32> to vector<8x128xf32>
    %203 = arith.negf %202 : vector<8x128xf32>
    %204 = math.exp %203 : vector<8x128xf32>
    %cst_48 = arith.constant 1.000000e+00 : f32
    %205 = vector.broadcast %cst_48 : f32 to vector<8x128xf32>
    %206 = arith.addf %205, %204 : vector<8x128xf32>
    %207 = arith.divf %205, %206 : vector<8x128xf32>
    %208 = vector.extract_strided_slice %170 {offsets = [0, 256], sizes = [8, 128], strides = [1, 1]} : vector<8x512xf32> to vector<8x128xf32>
    %209 = math.tanh %208 : vector<8x128xf32>
    %210 = vector.extract_strided_slice %170 {offsets = [0, 384], sizes = [8, 128], strides = [1, 1]} : vector<8x512xf32> to vector<8x128xf32>
    %211 = arith.negf %210 : vector<8x128xf32>
    %212 = math.exp %211 : vector<8x128xf32>
    %cst_49 = arith.constant 1.000000e+00 : f32
    %213 = vector.broadcast %cst_49 : f32 to vector<8x128xf32>
    %214 = arith.addf %213, %212 : vector<8x128xf32>
    %215 = arith.divf %213, %214 : vector<8x128xf32>
    %216 = arith.mulf %207, %145 : vector<8x128xf32>
    %217 = arith.mulf %201, %209 : vector<8x128xf32>
    %218 = arith.addf %216, %217 : vector<8x128xf32>
    %219 = math.tanh %218 : vector<8x128xf32>
    %220 = arith.mulf %215, %219 : vector<8x128xf32>
    %221 = arith.truncf %195 : vector<8x128xf32> to vector<8x128xbf16>
    %222 = arith.index_cast %156 : i32 to index
    %c0_50 = arith.constant 0 : index
    %223 = vector.load %arg12[%222, %c0_50] : memref<64x256xbf16, #tpu.memory_space<vmem>>, vector<8x128xbf16>
    tpu.vector_store %arg12[%222, %c0_50], %221 {strides = array<i32>} : memref<64x256xbf16, #tpu.memory_space<vmem>>, vector<8x128xbf16>,
    %224 = arith.truncf %220 : vector<8x128xf32> to vector<8x128xbf16>
    %225 = arith.index_cast %158 : i32 to index
    %c128_51 = arith.constant 128 : index
    %226 = vector.load %arg12[%225, %c128_51] : memref<64x256xbf16, #tpu.memory_space<vmem>>, vector<8x128xbf16>
    tpu.vector_store %arg12[%225, %c128_51], %224 {strides = array<i32>} : memref<64x256xbf16, #tpu.memory_space<vmem>>, vector<8x128xbf16>,
    %c3_i32 = arith.constant 3 : i32
    %c7_i32_52 = arith.constant 7 : i32
    %227 = arith.subi %c7_i32_52, %c3_i32 : i32
    %c8_i32_53 = arith.constant 8 : i32
    %228 = arith.muli %c3_i32, %c8_i32_53 : i32
    %229 = tpu.assume_multiple %228, 8 : i32
    %c8_i32_54 = arith.constant 8 : i32
    %230 = arith.muli %227, %c8_i32_54 : i32
    %231 = tpu.assume_multiple %230, 8 : i32
    %232 = tpu.concatenate %195, %220 in 1 : vector<8x128xf32>, vector<8x128xf32> -> vector<8x256xf32>
    %233 = arith.truncf %232 : vector<8x256xf32> to vector<8x256xbf16>
    %c0_55 = arith.constant 0 : index
    %c0_56 = arith.constant 0 : index
    %234 = vector.load %arg3[%c0_55, %c0_56] : memref<256x1024xbf16, #tpu.memory_space<vmem>>, vector<256x1024xbf16>
    %cst_57 = arith.constant dense<0.000000e+00> : vector<8x1024xf32>
    %235 = tpu.matmul %233, %234, %cst_57 {dimension_numbers = #tpu.dot_dimension_numbers<[1], [0], [0], [1], [0, 0, 1, 1], [], []>} : vector<8x256xbf16>, vector<256x1024xbf16>, vector<8x1024xf32> -> vector<8x1024xf32>
    %236 = arith.index_cast %229 : i32 to index
    %c0_58 = arith.constant 0 : index
    %237 = vector.load %arg11[%236, %c0_58] : memref<64x1024xf32, #tpu.memory_space<vmem>>, vector<8x512xf32>
    %238 = vector.extract_strided_slice %235 {offsets = [0, 0], sizes = [8, 512], strides = [1, 1]} : vector<8x1024xf32> to vector<8x512xf32>
    %239 = arith.addf %237, %238 : vector<8x512xf32>
    %240 = arith.index_cast %231 : i32 to index
    %c512_59 = arith.constant 512 : index
    %241 = vector.load %arg11[%240, %c512_59] : memref<64x1024xf32, #tpu.memory_space<vmem>>, vector<8x512xf32>
    %242 = vector.extract_strided_slice %235 {offsets = [0, 512], sizes = [8, 512], strides = [1, 1]} : vector<8x1024xf32> to vector<8x512xf32>
    %243 = arith.addf %241, %242 : vector<8x512xf32>
    %244 = vector.extract_strided_slice %239 {offsets = [0, 0], sizes = [8, 128], strides = [1, 1]} : vector<8x512xf32> to vector<8x128xf32>
    %245 = arith.negf %244 : vector<8x128xf32>
    %246 = math.exp %245 : vector<8x128xf32>
    %cst_60 = arith.constant 1.000000e+00 : f32
    %247 = vector.broadcast %cst_60 : f32 to vector<8x128xf32>
    %248 = arith.addf %247, %246 : vector<8x128xf32>
    %249 = arith.divf %247, %248 : vector<8x128xf32>
    %250 = vector.extract_strided_slice %239 {offsets = [0, 128], sizes = [8, 128], strides = [1, 1]} : vector<8x512xf32> to vector<8x128xf32>
    %251 = arith.negf %250 : vector<8x128xf32>
    %252 = math.exp %251 : vector<8x128xf32>
    %cst_61 = arith.constant 1.000000e+00 : f32
    %253 = vector.broadcast %cst_61 : f32 to vector<8x128xf32>
    %254 = arith.addf %253, %252 : vector<8x128xf32>
    %255 = arith.divf %253, %254 : vector<8x128xf32>
    %256 = vector.extract_strided_slice %239 {offsets = [0, 256], sizes = [8, 128], strides = [1, 1]} : vector<8x512xf32> to vector<8x128xf32>
    %257 = math.tanh %256 : vector<8x128xf32>
    %258 = vector.extract_strided_slice %239 {offsets = [0, 384], sizes = [8, 128], strides = [1, 1]} : vector<8x512xf32> to vector<8x128xf32>
    %259 = arith.negf %258 : vector<8x128xf32>
    %260 = math.exp %259 : vector<8x128xf32>
    %cst_62 = arith.constant 1.000000e+00 : f32
    %261 = vector.broadcast %cst_62 : f32 to vector<8x128xf32>
    %262 = arith.addf %261, %260 : vector<8x128xf32>
    %263 = arith.divf %261, %262 : vector<8x128xf32>
    %264 = arith.mulf %255, %193 : vector<8x128xf32>
    %265 = arith.mulf %249, %257 : vector<8x128xf32>
    %266 = arith.addf %264, %265 : vector<8x128xf32>
    %267 = math.tanh %266 : vector<8x128xf32>
    %268 = arith.mulf %263, %267 : vector<8x128xf32>
    %269 = vector.extract_strided_slice %243 {offsets = [0, 0], sizes = [8, 128], strides = [1, 1]} : vector<8x512xf32> to vector<8x128xf32>
    %270 = arith.negf %269 : vector<8x128xf32>
    %271 = math.exp %270 : vector<8x128xf32>
    %cst_63 = arith.constant 1.000000e+00 : f32
    %272 = vector.broadcast %cst_63 : f32 to vector<8x128xf32>
    %273 = arith.addf %272, %271 : vector<8x128xf32>
    %274 = arith.divf %272, %273 : vector<8x128xf32>
    %275 = vector.extract_strided_slice %243 {offsets = [0, 128], sizes = [8, 128], strides = [1, 1]} : vector<8x512xf32> to vector<8x128xf32>
    %276 = arith.negf %275 : vector<8x128xf32>
    %277 = math.exp %276 : vector<8x128xf32>
    %cst_64 = arith.constant 1.000000e+00 : f32
    %278 = vector.broadcast %cst_64 : f32 to vector<8x128xf32>
    %279 = arith.addf %278, %277 : vector<8x128xf32>
    %280 = arith.divf %278, %279 : vector<8x128xf32>
    %281 = vector.extract_strided_slice %243 {offsets = [0, 256], sizes = [8, 128], strides = [1, 1]} : vector<8x512xf32> to vector<8x128xf32>
    %282 = math.tanh %281 : vector<8x128xf32>
    %283 = vector.extract_strided_slice %243 {offsets = [0, 384], sizes = [8, 128], strides = [1, 1]} : vector<8x512xf32> to vector<8x128xf32>
    %284 = arith.negf %283 : vector<8x128xf32>
    %285 = math.exp %284 : vector<8x128xf32>
    %cst_65 = arith.constant 1.000000e+00 : f32
    %286 = vector.broadcast %cst_65 : f32 to vector<8x128xf32>
    %287 = arith.addf %286, %285 : vector<8x128xf32>
    %288 = arith.divf %286, %287 : vector<8x128xf32>
    %289 = arith.mulf %280, %218 : vector<8x128xf32>
    %290 = arith.mulf %274, %282 : vector<8x128xf32>
    %291 = arith.addf %289, %290 : vector<8x128xf32>
    %292 = math.tanh %291 : vector<8x128xf32>
    %293 = arith.mulf %288, %292 : vector<8x128xf32>
    %294 = arith.truncf %268 : vector<8x128xf32> to vector<8x128xbf16>
    %295 = arith.index_cast %229 : i32 to index
    %c0_66 = arith.constant 0 : index
    %296 = vector.load %arg12[%295, %c0_66] : memref<64x256xbf16, #tpu.memory_space<vmem>>, vector<8x128xbf16>
    tpu.vector_store %arg12[%295, %c0_66], %294 {strides = array<i32>} : memref<64x256xbf16, #tpu.memory_space<vmem>>, vector<8x128xbf16>,
    %297 = arith.truncf %293 : vector<8x128xf32> to vector<8x128xbf16>
    %298 = arith.index_cast %231 : i32 to index
    %c128_67 = arith.constant 128 : index
    %299 = vector.load %arg12[%298, %c128_67] : memref<64x256xbf16, #tpu.memory_space<vmem>>, vector<8x128xbf16>
    tpu.vector_store %arg12[%298, %c128_67], %297 {strides = array<i32>} : memref<64x256xbf16, #tpu.memory_space<vmem>>, vector<8x128xbf16>,
    %c4_i32 = arith.constant 4 : i32
    %c7_i32_68 = arith.constant 7 : i32
    %300 = arith.subi %c7_i32_68, %c4_i32 : i32
    %c8_i32_69 = arith.constant 8 : i32
    %301 = arith.muli %c4_i32, %c8_i32_69 : i32
    %302 = tpu.assume_multiple %301, 8 : i32
    %c8_i32_70 = arith.constant 8 : i32
    %303 = arith.muli %300, %c8_i32_70 : i32
    %304 = tpu.assume_multiple %303, 8 : i32
    %305 = tpu.concatenate %268, %293 in 1 : vector<8x128xf32>, vector<8x128xf32> -> vector<8x256xf32>
    %306 = arith.truncf %305 : vector<8x256xf32> to vector<8x256xbf16>
    %c0_71 = arith.constant 0 : index
    %c0_72 = arith.constant 0 : index
    %307 = vector.load %arg3[%c0_71, %c0_72] : memref<256x1024xbf16, #tpu.memory_space<vmem>>, vector<256x1024xbf16>
    %cst_73 = arith.constant dense<0.000000e+00> : vector<8x1024xf32>
    %308 = tpu.matmul %306, %307, %cst_73 {dimension_numbers = #tpu.dot_dimension_numbers<[1], [0], [0], [1], [0, 0, 1, 1], [], []>} : vector<8x256xbf16>, vector<256x1024xbf16>, vector<8x1024xf32> -> vector<8x1024xf32>
    %309 = arith.index_cast %302 : i32 to index
    %c0_74 = arith.constant 0 : index
    %310 = vector.load %arg11[%309, %c0_74] : memref<64x1024xf32, #tpu.memory_space<vmem>>, vector<8x512xf32>
    %311 = vector.extract_strided_slice %308 {offsets = [0, 0], sizes = [8, 512], strides = [1, 1]} : vector<8x1024xf32> to vector<8x512xf32>
    %312 = arith.addf %310, %311 : vector<8x512xf32>
    %313 = arith.index_cast %304 : i32 to index
    %c512_75 = arith.constant 512 : index
    %314 = vector.load %arg11[%313, %c512_75] : memref<64x1024xf32, #tpu.memory_space<vmem>>, vector<8x512xf32>
    %315 = vector.extract_strided_slice %308 {offsets = [0, 512], sizes = [8, 512], strides = [1, 1]} : vector<8x1024xf32> to vector<8x512xf32>
    %316 = arith.addf %314, %315 : vector<8x512xf32>
    %317 = vector.extract_strided_slice %312 {offsets = [0, 0], sizes = [8, 128], strides = [1, 1]} : vector<8x512xf32> to vector<8x128xf32>
    %318 = arith.negf %317 : vector<8x128xf32>
    %319 = math.exp %318 : vector<8x128xf32>
    %cst_76 = arith.constant 1.000000e+00 : f32
    %320 = vector.broadcast %cst_76 : f32 to vector<8x128xf32>
    %321 = arith.addf %320, %319 : vector<8x128xf32>
    %322 = arith.divf %320, %321 : vector<8x128xf32>
    %323 = vector.extract_strided_slice %312 {offsets = [0, 128], sizes = [8, 128], strides = [1, 1]} : vector<8x512xf32> to vector<8x128xf32>
    %324 = arith.negf %323 : vector<8x128xf32>
    %325 = math.exp %324 : vector<8x128xf32>
    %cst_77 = arith.constant 1.000000e+00 : f32
    %326 = vector.broadcast %cst_77 : f32 to vector<8x128xf32>
    %327 = arith.addf %326, %325 : vector<8x128xf32>
    %328 = arith.divf %326, %327 : vector<8x128xf32>
    %329 = vector.extract_strided_slice %312 {offsets = [0, 256], sizes = [8, 128], strides = [1, 1]} : vector<8x512xf32> to vector<8x128xf32>
    %330 = math.tanh %329 : vector<8x128xf32>
    %331 = vector.extract_strided_slice %312 {offsets = [0, 384], sizes = [8, 128], strides = [1, 1]} : vector<8x512xf32> to vector<8x128xf32>
    %332 = arith.negf %331 : vector<8x128xf32>
    %333 = math.exp %332 : vector<8x128xf32>
    %cst_78 = arith.constant 1.000000e+00 : f32
    %334 = vector.broadcast %cst_78 : f32 to vector<8x128xf32>
    %335 = arith.addf %334, %333 : vector<8x128xf32>
    %336 = arith.divf %334, %335 : vector<8x128xf32>
    %337 = arith.mulf %328, %266 : vector<8x128xf32>
    %338 = arith.mulf %322, %330 : vector<8x128xf32>
    %339 = arith.addf %337, %338 : vector<8x128xf32>
    %340 = math.tanh %339 : vector<8x128xf32>
    %341 = arith.mulf %336, %340 : vector<8x128xf32>
    %342 = vector.extract_strided_slice %316 {offsets = [0, 0], sizes = [8, 128], strides = [1, 1]} : vector<8x512xf32> to vector<8x128xf32>
    %343 = arith.negf %342 : vector<8x128xf32>
    %344 = math.exp %343 : vector<8x128xf32>
    %cst_79 = arith.constant 1.000000e+00 : f32
    %345 = vector.broadcast %cst_79 : f32 to vector<8x128xf32>
    %346 = arith.addf %345, %344 : vector<8x128xf32>
    %347 = arith.divf %345, %346 : vector<8x128xf32>
    %348 = vector.extract_strided_slice %316 {offsets = [0, 128], sizes = [8, 128], strides = [1, 1]} : vector<8x512xf32> to vector<8x128xf32>
    %349 = arith.negf %348 : vector<8x128xf32>
    %350 = math.exp %349 : vector<8x128xf32>
    %cst_80 = arith.constant 1.000000e+00 : f32
    %351 = vector.broadcast %cst_80 : f32 to vector<8x128xf32>
    %352 = arith.addf %351, %350 : vector<8x128xf32>
    %353 = arith.divf %351, %352 : vector<8x128xf32>
    %354 = vector.extract_strided_slice %316 {offsets = [0, 256], sizes = [8, 128], strides = [1, 1]} : vector<8x512xf32> to vector<8x128xf32>
    %355 = math.tanh %354 : vector<8x128xf32>
    %356 = vector.extract_strided_slice %316 {offsets = [0, 384], sizes = [8, 128], strides = [1, 1]} : vector<8x512xf32> to vector<8x128xf32>
    %357 = arith.negf %356 : vector<8x128xf32>
    %358 = math.exp %357 : vector<8x128xf32>
    %cst_81 = arith.constant 1.000000e+00 : f32
    %359 = vector.broadcast %cst_81 : f32 to vector<8x128xf32>
    %360 = arith.addf %359, %358 : vector<8x128xf32>
    %361 = arith.divf %359, %360 : vector<8x128xf32>
    %362 = arith.mulf %353, %291 : vector<8x128xf32>
    %363 = arith.mulf %347, %355 : vector<8x128xf32>
    %364 = arith.addf %362, %363 : vector<8x128xf32>
    %365 = math.tanh %364 : vector<8x128xf32>
    %366 = arith.mulf %361, %365 : vector<8x128xf32>
    %367 = arith.truncf %341 : vector<8x128xf32> to vector<8x128xbf16>
    %368 = arith.index_cast %302 : i32 to index
    %c0_82 = arith.constant 0 : index
    %369 = vector.load %arg12[%368, %c0_82] : memref<64x256xbf16, #tpu.memory_space<vmem>>, vector<8x128xbf16>
    tpu.vector_store %arg12[%368, %c0_82], %367 {strides = array<i32>} : memref<64x256xbf16, #tpu.memory_space<vmem>>, vector<8x128xbf16>,
    %370 = arith.truncf %366 : vector<8x128xf32> to vector<8x128xbf16>
    %371 = arith.index_cast %304 : i32 to index
    %c128_83 = arith.constant 128 : index
    %372 = vector.load %arg12[%371, %c128_83] : memref<64x256xbf16, #tpu.memory_space<vmem>>, vector<8x128xbf16>
    tpu.vector_store %arg12[%371, %c128_83], %370 {strides = array<i32>} : memref<64x256xbf16, #tpu.memory_space<vmem>>, vector<8x128xbf16>,
    %c5_i32 = arith.constant 5 : i32
    %c7_i32_84 = arith.constant 7 : i32
    %373 = arith.subi %c7_i32_84, %c5_i32 : i32
    %c8_i32_85 = arith.constant 8 : i32
    %374 = arith.muli %c5_i32, %c8_i32_85 : i32
    %375 = tpu.assume_multiple %374, 8 : i32
    %c8_i32_86 = arith.constant 8 : i32
    %376 = arith.muli %373, %c8_i32_86 : i32
    %377 = tpu.assume_multiple %376, 8 : i32
    %378 = tpu.concatenate %341, %366 in 1 : vector<8x128xf32>, vector<8x128xf32> -> vector<8x256xf32>
    %379 = arith.truncf %378 : vector<8x256xf32> to vector<8x256xbf16>
    %c0_87 = arith.constant 0 : index
    %c0_88 = arith.constant 0 : index
    %380 = vector.load %arg3[%c0_87, %c0_88] : memref<256x1024xbf16, #tpu.memory_space<vmem>>, vector<256x1024xbf16>
    %cst_89 = arith.constant dense<0.000000e+00> : vector<8x1024xf32>
    %381 = tpu.matmul %379, %380, %cst_89 {dimension_numbers = #tpu.dot_dimension_numbers<[1], [0], [0], [1], [0, 0, 1, 1], [], []>} : vector<8x256xbf16>, vector<256x1024xbf16>, vector<8x1024xf32> -> vector<8x1024xf32>
    %382 = arith.index_cast %375 : i32 to index
    %c0_90 = arith.constant 0 : index
    %383 = vector.load %arg11[%382, %c0_90] : memref<64x1024xf32, #tpu.memory_space<vmem>>, vector<8x512xf32>
    %384 = vector.extract_strided_slice %381 {offsets = [0, 0], sizes = [8, 512], strides = [1, 1]} : vector<8x1024xf32> to vector<8x512xf32>
    %385 = arith.addf %383, %384 : vector<8x512xf32>
    %386 = arith.index_cast %377 : i32 to index
    %c512_91 = arith.constant 512 : index
    %387 = vector.load %arg11[%386, %c512_91] : memref<64x1024xf32, #tpu.memory_space<vmem>>, vector<8x512xf32>
    %388 = vector.extract_strided_slice %381 {offsets = [0, 512], sizes = [8, 512], strides = [1, 1]} : vector<8x1024xf32> to vector<8x512xf32>
    %389 = arith.addf %387, %388 : vector<8x512xf32>
    %390 = vector.extract_strided_slice %385 {offsets = [0, 0], sizes = [8, 128], strides = [1, 1]} : vector<8x512xf32> to vector<8x128xf32>
    %391 = arith.negf %390 : vector<8x128xf32>
    %392 = math.exp %391 : vector<8x128xf32>
    %cst_92 = arith.constant 1.000000e+00 : f32
    %393 = vector.broadcast %cst_92 : f32 to vector<8x128xf32>
    %394 = arith.addf %393, %392 : vector<8x128xf32>
    %395 = arith.divf %393, %394 : vector<8x128xf32>
    %396 = vector.extract_strided_slice %385 {offsets = [0, 128], sizes = [8, 128], strides = [1, 1]} : vector<8x512xf32> to vector<8x128xf32>
    %397 = arith.negf %396 : vector<8x128xf32>
    %398 = math.exp %397 : vector<8x128xf32>
    %cst_93 = arith.constant 1.000000e+00 : f32
    %399 = vector.broadcast %cst_93 : f32 to vector<8x128xf32>
    %400 = arith.addf %399, %398 : vector<8x128xf32>
    %401 = arith.divf %399, %400 : vector<8x128xf32>
    %402 = vector.extract_strided_slice %385 {offsets = [0, 256], sizes = [8, 128], strides = [1, 1]} : vector<8x512xf32> to vector<8x128xf32>
    %403 = math.tanh %402 : vector<8x128xf32>
    %404 = vector.extract_strided_slice %385 {offsets = [0, 384], sizes = [8, 128], strides = [1, 1]} : vector<8x512xf32> to vector<8x128xf32>
    %405 = arith.negf %404 : vector<8x128xf32>
    %406 = math.exp %405 : vector<8x128xf32>
    %cst_94 = arith.constant 1.000000e+00 : f32
    %407 = vector.broadcast %cst_94 : f32 to vector<8x128xf32>
    %408 = arith.addf %407, %406 : vector<8x128xf32>
    %409 = arith.divf %407, %408 : vector<8x128xf32>
    %410 = arith.mulf %401, %339 : vector<8x128xf32>
    %411 = arith.mulf %395, %403 : vector<8x128xf32>
    %412 = arith.addf %410, %411 : vector<8x128xf32>
    %413 = math.tanh %412 : vector<8x128xf32>
    %414 = arith.mulf %409, %413 : vector<8x128xf32>
    %415 = vector.extract_strided_slice %389 {offsets = [0, 0], sizes = [8, 128], strides = [1, 1]} : vector<8x512xf32> to vector<8x128xf32>
    %416 = arith.negf %415 : vector<8x128xf32>
    %417 = math.exp %416 : vector<8x128xf32>
    %cst_95 = arith.constant 1.000000e+00 : f32
    %418 = vector.broadcast %cst_95 : f32 to vector<8x128xf32>
    %419 = arith.addf %418, %417 : vector<8x128xf32>
    %420 = arith.divf %418, %419 : vector<8x128xf32>
    %421 = vector.extract_strided_slice %389 {offsets = [0, 128], sizes = [8, 128], strides = [1, 1]} : vector<8x512xf32> to vector<8x128xf32>
    %422 = arith.negf %421 : vector<8x128xf32>
    %423 = math.exp %422 : vector<8x128xf32>
    %cst_96 = arith.constant 1.000000e+00 : f32
    %424 = vector.broadcast %cst_96 : f32 to vector<8x128xf32>
    %425 = arith.addf %424, %423 : vector<8x128xf32>
    %426 = arith.divf %424, %425 : vector<8x128xf32>
    %427 = vector.extract_strided_slice %389 {offsets = [0, 256], sizes = [8, 128], strides = [1, 1]} : vector<8x512xf32> to vector<8x128xf32>
    %428 = math.tanh %427 : vector<8x128xf32>
    %429 = vector.extract_strided_slice %389 {offsets = [0, 384], sizes = [8, 128], strides = [1, 1]} : vector<8x512xf32> to vector<8x128xf32>
    %430 = arith.negf %429 : vector<8x128xf32>
    %431 = math.exp %430 : vector<8x128xf32>
    %cst_97 = arith.constant 1.000000e+00 : f32
    %432 = vector.broadcast %cst_97 : f32 to vector<8x128xf32>
    %433 = arith.addf %432, %431 : vector<8x128xf32>
    %434 = arith.divf %432, %433 : vector<8x128xf32>
    %435 = arith.mulf %426, %364 : vector<8x128xf32>
    %436 = arith.mulf %420, %428 : vector<8x128xf32>
    %437 = arith.addf %435, %436 : vector<8x128xf32>
    %438 = math.tanh %437 : vector<8x128xf32>
    %439 = arith.mulf %434, %438 : vector<8x128xf32>
    %440 = arith.truncf %414 : vector<8x128xf32> to vector<8x128xbf16>
    %441 = arith.index_cast %375 : i32 to index
    %c0_98 = arith.constant 0 : index
    %442 = vector.load %arg12[%441, %c0_98] : memref<64x256xbf16, #tpu.memory_space<vmem>>, vector<8x128xbf16>
    tpu.vector_store %arg12[%441, %c0_98], %440 {strides = array<i32>} : memref<64x256xbf16, #tpu.memory_space<vmem>>, vector<8x128xbf16>,
    %443 = arith.truncf %439 : vector<8x128xf32> to vector<8x128xbf16>
    %444 = arith.index_cast %377 : i32 to index
    %c128_99 = arith.constant 128 : index
    %445 = vector.load %arg12[%444, %c128_99] : memref<64x256xbf16, #tpu.memory_space<vmem>>, vector<8x128xbf16>
    tpu.vector_store %arg12[%444, %c128_99], %443 {strides = array<i32>} : memref<64x256xbf16, #tpu.memory_space<vmem>>, vector<8x128xbf16>,
    %c6_i32 = arith.constant 6 : i32
    %c7_i32_100 = arith.constant 7 : i32
    %446 = arith.subi %c7_i32_100, %c6_i32 : i32
    %c8_i32_101 = arith.constant 8 : i32
    %447 = arith.muli %c6_i32, %c8_i32_101 : i32
    %448 = tpu.assume_multiple %447, 8 : i32
    %c8_i32_102 = arith.constant 8 : i32
    %449 = arith.muli %446, %c8_i32_102 : i32
    %450 = tpu.assume_multiple %449, 8 : i32
    %451 = tpu.concatenate %414, %439 in 1 : vector<8x128xf32>, vector<8x128xf32> -> vector<8x256xf32>
    %452 = arith.truncf %451 : vector<8x256xf32> to vector<8x256xbf16>
    %c0_103 = arith.constant 0 : index
    %c0_104 = arith.constant 0 : index
    %453 = vector.load %arg3[%c0_103, %c0_104] : memref<256x1024xbf16, #tpu.memory_space<vmem>>, vector<256x1024xbf16>
    %cst_105 = arith.constant dense<0.000000e+00> : vector<8x1024xf32>
    %454 = tpu.matmul %452, %453, %cst_105 {dimension_numbers = #tpu.dot_dimension_numbers<[1], [0], [0], [1], [0, 0, 1, 1], [], []>} : vector<8x256xbf16>, vector<256x1024xbf16>, vector<8x1024xf32> -> vector<8x1024xf32>
    %455 = arith.index_cast %448 : i32 to index
    %c0_106 = arith.constant 0 : index
    %456 = vector.load %arg11[%455, %c0_106] : memref<64x1024xf32, #tpu.memory_space<vmem>>, vector<8x512xf32>
    %457 = vector.extract_strided_slice %454 {offsets = [0, 0], sizes = [8, 512], strides = [1, 1]} : vector<8x1024xf32> to vector<8x512xf32>
    %458 = arith.addf %456, %457 : vector<8x512xf32>
    %459 = arith.index_cast %450 : i32 to index
    %c512_107 = arith.constant 512 : index
    %460 = vector.load %arg11[%459, %c512_107] : memref<64x1024xf32, #tpu.memory_space<vmem>>, vector<8x512xf32>
    %461 = vector.extract_strided_slice %454 {offsets = [0, 512], sizes = [8, 512], strides = [1, 1]} : vector<8x1024xf32> to vector<8x512xf32>
    %462 = arith.addf %460, %461 : vector<8x512xf32>
    %463 = vector.extract_strided_slice %458 {offsets = [0, 0], sizes = [8, 128], strides = [1, 1]} : vector<8x512xf32> to vector<8x128xf32>
    %464 = arith.negf %463 : vector<8x128xf32>
    %465 = math.exp %464 : vector<8x128xf32>
    %cst_108 = arith.constant 1.000000e+00 : f32
    %466 = vector.broadcast %cst_108 : f32 to vector<8x128xf32>
    %467 = arith.addf %466, %465 : vector<8x128xf32>
    %468 = arith.divf %466, %467 : vector<8x128xf32>
    %469 = vector.extract_strided_slice %458 {offsets = [0, 128], sizes = [8, 128], strides = [1, 1]} : vector<8x512xf32> to vector<8x128xf32>
    %470 = arith.negf %469 : vector<8x128xf32>
    %471 = math.exp %470 : vector<8x128xf32>
    %cst_109 = arith.constant 1.000000e+00 : f32
    %472 = vector.broadcast %cst_109 : f32 to vector<8x128xf32>
    %473 = arith.addf %472, %471 : vector<8x128xf32>
    %474 = arith.divf %472, %473 : vector<8x128xf32>
    %475 = vector.extract_strided_slice %458 {offsets = [0, 256], sizes = [8, 128], strides = [1, 1]} : vector<8x512xf32> to vector<8x128xf32>
    %476 = math.tanh %475 : vector<8x128xf32>
    %477 = vector.extract_strided_slice %458 {offsets = [0, 384], sizes = [8, 128], strides = [1, 1]} : vector<8x512xf32> to vector<8x128xf32>
    %478 = arith.negf %477 : vector<8x128xf32>
    %479 = math.exp %478 : vector<8x128xf32>
    %cst_110 = arith.constant 1.000000e+00 : f32
    %480 = vector.broadcast %cst_110 : f32 to vector<8x128xf32>
    %481 = arith.addf %480, %479 : vector<8x128xf32>
    %482 = arith.divf %480, %481 : vector<8x128xf32>
    %483 = arith.mulf %474, %412 : vector<8x128xf32>
    %484 = arith.mulf %468, %476 : vector<8x128xf32>
    %485 = arith.addf %483, %484 : vector<8x128xf32>
    %486 = math.tanh %485 : vector<8x128xf32>
    %487 = arith.mulf %482, %486 : vector<8x128xf32>
    %488 = vector.extract_strided_slice %462 {offsets = [0, 0], sizes = [8, 128], strides = [1, 1]} : vector<8x512xf32> to vector<8x128xf32>
    %489 = arith.negf %488 : vector<8x128xf32>
    %490 = math.exp %489 : vector<8x128xf32>
    %cst_111 = arith.constant 1.000000e+00 : f32
    %491 = vector.broadcast %cst_111 : f32 to vector<8x128xf32>
    %492 = arith.addf %491, %490 : vector<8x128xf32>
    %493 = arith.divf %491, %492 : vector<8x128xf32>
    %494 = vector.extract_strided_slice %462 {offsets = [0, 128], sizes = [8, 128], strides = [1, 1]} : vector<8x512xf32> to vector<8x128xf32>
    %495 = arith.negf %494 : vector<8x128xf32>
    %496 = math.exp %495 : vector<8x128xf32>
    %cst_112 = arith.constant 1.000000e+00 : f32
    %497 = vector.broadcast %cst_112 : f32 to vector<8x128xf32>
    %498 = arith.addf %497, %496 : vector<8x128xf32>
    %499 = arith.divf %497, %498 : vector<8x128xf32>
    %500 = vector.extract_strided_slice %462 {offsets = [0, 256], sizes = [8, 128], strides = [1, 1]} : vector<8x512xf32> to vector<8x128xf32>
    %501 = math.tanh %500 : vector<8x128xf32>
    %502 = vector.extract_strided_slice %462 {offsets = [0, 384], sizes = [8, 128], strides = [1, 1]} : vector<8x512xf32> to vector<8x128xf32>
    %503 = arith.negf %502 : vector<8x128xf32>
    %504 = math.exp %503 : vector<8x128xf32>
    %cst_113 = arith.constant 1.000000e+00 : f32
    %505 = vector.broadcast %cst_113 : f32 to vector<8x128xf32>
    %506 = arith.addf %505, %504 : vector<8x128xf32>
    %507 = arith.divf %505, %506 : vector<8x128xf32>
    %508 = arith.mulf %499, %437 : vector<8x128xf32>
    %509 = arith.mulf %493, %501 : vector<8x128xf32>
    %510 = arith.addf %508, %509 : vector<8x128xf32>
    %511 = math.tanh %510 : vector<8x128xf32>
    %512 = arith.mulf %507, %511 : vector<8x128xf32>
    %513 = arith.truncf %487 : vector<8x128xf32> to vector<8x128xbf16>
    %514 = arith.index_cast %448 : i32 to index
    %c0_114 = arith.constant 0 : index
    %515 = vector.load %arg12[%514, %c0_114] : memref<64x256xbf16, #tpu.memory_space<vmem>>, vector<8x128xbf16>
    tpu.vector_store %arg12[%514, %c0_114], %513 {strides = array<i32>} : memref<64x256xbf16, #tpu.memory_space<vmem>>, vector<8x128xbf16>,
    %516 = arith.truncf %512 : vector<8x128xf32> to vector<8x128xbf16>
    %517 = arith.index_cast %450 : i32 to index
    %c128_115 = arith.constant 128 : index
    %518 = vector.load %arg12[%517, %c128_115] : memref<64x256xbf16, #tpu.memory_space<vmem>>, vector<8x128xbf16>
    tpu.vector_store %arg12[%517, %c128_115], %516 {strides = array<i32>} : memref<64x256xbf16, #tpu.memory_space<vmem>>, vector<8x128xbf16>,
    %c7_i32_116 = arith.constant 7 : i32
    %c7_i32_117 = arith.constant 7 : i32
    %519 = arith.subi %c7_i32_117, %c7_i32_116 : i32
    %c8_i32_118 = arith.constant 8 : i32
    %520 = arith.muli %c7_i32_116, %c8_i32_118 : i32
    %521 = tpu.assume_multiple %520, 8 : i32
    %c8_i32_119 = arith.constant 8 : i32
    %522 = arith.muli %519, %c8_i32_119 : i32
    %523 = tpu.assume_multiple %522, 8 : i32
    %524 = tpu.concatenate %487, %512 in 1 : vector<8x128xf32>, vector<8x128xf32> -> vector<8x256xf32>
    %525 = arith.truncf %524 : vector<8x256xf32> to vector<8x256xbf16>
    %c0_120 = arith.constant 0 : index
    %c0_121 = arith.constant 0 : index
    %526 = vector.load %arg3[%c0_120, %c0_121] : memref<256x1024xbf16, #tpu.memory_space<vmem>>, vector<256x1024xbf16>
    %cst_122 = arith.constant dense<0.000000e+00> : vector<8x1024xf32>
    %527 = tpu.matmul %525, %526, %cst_122 {dimension_numbers = #tpu.dot_dimension_numbers<[1], [0], [0], [1], [0, 0, 1, 1], [], []>} : vector<8x256xbf16>, vector<256x1024xbf16>, vector<8x1024xf32> -> vector<8x1024xf32>
    %528 = arith.index_cast %521 : i32 to index
    %c0_123 = arith.constant 0 : index
    %529 = vector.load %arg11[%528, %c0_123] : memref<64x1024xf32, #tpu.memory_space<vmem>>, vector<8x512xf32>
    %530 = vector.extract_strided_slice %527 {offsets = [0, 0], sizes = [8, 512], strides = [1, 1]} : vector<8x1024xf32> to vector<8x512xf32>
    %531 = arith.addf %529, %530 : vector<8x512xf32>
    %532 = arith.index_cast %523 : i32 to index
    %c512_124 = arith.constant 512 : index
    %533 = vector.load %arg11[%532, %c512_124] : memref<64x1024xf32, #tpu.memory_space<vmem>>, vector<8x512xf32>
    %534 = vector.extract_strided_slice %527 {offsets = [0, 512], sizes = [8, 512], strides = [1, 1]} : vector<8x1024xf32> to vector<8x512xf32>
    %535 = arith.addf %533, %534 : vector<8x512xf32>
    %536 = vector.extract_strided_slice %531 {offsets = [0, 0], sizes = [8, 128], strides = [1, 1]} : vector<8x512xf32> to vector<8x128xf32>
    %537 = arith.negf %536 : vector<8x128xf32>
    %538 = math.exp %537 : vector<8x128xf32>
    %cst_125 = arith.constant 1.000000e+00 : f32
    %539 = vector.broadcast %cst_125 : f32 to vector<8x128xf32>
    %540 = arith.addf %539, %538 : vector<8x128xf32>
    %541 = arith.divf %539, %540 : vector<8x128xf32>
    %542 = vector.extract_strided_slice %531 {offsets = [0, 128], sizes = [8, 128], strides = [1, 1]} : vector<8x512xf32> to vector<8x128xf32>
    %543 = arith.negf %542 : vector<8x128xf32>
    %544 = math.exp %543 : vector<8x128xf32>
    %cst_126 = arith.constant 1.000000e+00 : f32
    %545 = vector.broadcast %cst_126 : f32 to vector<8x128xf32>
    %546 = arith.addf %545, %544 : vector<8x128xf32>
    %547 = arith.divf %545, %546 : vector<8x128xf32>
    %548 = vector.extract_strided_slice %531 {offsets = [0, 256], sizes = [8, 128], strides = [1, 1]} : vector<8x512xf32> to vector<8x128xf32>
    %549 = math.tanh %548 : vector<8x128xf32>
    %550 = vector.extract_strided_slice %531 {offsets = [0, 384], sizes = [8, 128], strides = [1, 1]} : vector<8x512xf32> to vector<8x128xf32>
    %551 = arith.negf %550 : vector<8x128xf32>
    %552 = math.exp %551 : vector<8x128xf32>
    %cst_127 = arith.constant 1.000000e+00 : f32
    %553 = vector.broadcast %cst_127 : f32 to vector<8x128xf32>
    %554 = arith.addf %553, %552 : vector<8x128xf32>
    %555 = arith.divf %553, %554 : vector<8x128xf32>
    %556 = arith.mulf %547, %485 : vector<8x128xf32>
    %557 = arith.mulf %541, %549 : vector<8x128xf32>
    %558 = arith.addf %556, %557 : vector<8x128xf32>
    %559 = math.tanh %558 : vector<8x128xf32>
    %560 = arith.mulf %555, %559 : vector<8x128xf32>
    %561 = vector.extract_strided_slice %535 {offsets = [0, 0], sizes = [8, 128], strides = [1, 1]} : vector<8x512xf32> to vector<8x128xf32>
    %562 = arith.negf %561 : vector<8x128xf32>
    %563 = math.exp %562 : vector<8x128xf32>
    %cst_128 = arith.constant 1.000000e+00 : f32
    %564 = vector.broadcast %cst_128 : f32 to vector<8x128xf32>
    %565 = arith.addf %564, %563 : vector<8x128xf32>
    %566 = arith.divf %564, %565 : vector<8x128xf32>
    %567 = vector.extract_strided_slice %535 {offsets = [0, 128], sizes = [8, 128], strides = [1, 1]} : vector<8x512xf32> to vector<8x128xf32>
    %568 = arith.negf %567 : vector<8x128xf32>
    %569 = math.exp %568 : vector<8x128xf32>
    %cst_129 = arith.constant 1.000000e+00 : f32
    %570 = vector.broadcast %cst_129 : f32 to vector<8x128xf32>
    %571 = arith.addf %570, %569 : vector<8x128xf32>
    %572 = arith.divf %570, %571 : vector<8x128xf32>
    %573 = vector.extract_strided_slice %535 {offsets = [0, 256], sizes = [8, 128], strides = [1, 1]} : vector<8x512xf32> to vector<8x128xf32>
    %574 = math.tanh %573 : vector<8x128xf32>
    %575 = vector.extract_strided_slice %535 {offsets = [0, 384], sizes = [8, 128], strides = [1, 1]} : vector<8x512xf32> to vector<8x128xf32>
    %576 = arith.negf %575 : vector<8x128xf32>
    %577 = math.exp %576 : vector<8x128xf32>
    %cst_130 = arith.constant 1.000000e+00 : f32
    %578 = vector.broadcast %cst_130 : f32 to vector<8x128xf32>
    %579 = arith.addf %578, %577 : vector<8x128xf32>
    %580 = arith.divf %578, %579 : vector<8x128xf32>
    %581 = arith.mulf %572, %510 : vector<8x128xf32>
    %582 = arith.mulf %566, %574 : vector<8x128xf32>
    %583 = arith.addf %581, %582 : vector<8x128xf32>
    %584 = math.tanh %583 : vector<8x128xf32>
    %585 = arith.mulf %580, %584 : vector<8x128xf32>
    %586 = arith.truncf %560 : vector<8x128xf32> to vector<8x128xbf16>
    %587 = arith.index_cast %521 : i32 to index
    %c0_131 = arith.constant 0 : index
    %588 = vector.load %arg12[%587, %c0_131] : memref<64x256xbf16, #tpu.memory_space<vmem>>, vector<8x128xbf16>
    tpu.vector_store %arg12[%587, %c0_131], %586 {strides = array<i32>} : memref<64x256xbf16, #tpu.memory_space<vmem>>, vector<8x128xbf16>,
    %589 = arith.truncf %585 : vector<8x128xf32> to vector<8x128xbf16>
    %590 = arith.index_cast %523 : i32 to index
    %c128_132 = arith.constant 128 : index
    %591 = vector.load %arg12[%590, %c128_132] : memref<64x256xbf16, #tpu.memory_space<vmem>>, vector<8x128xbf16>
    tpu.vector_store %arg12[%590, %c128_132], %589 {strides = array<i32>} : memref<64x256xbf16, #tpu.memory_space<vmem>>, vector<8x128xbf16>,
    %c8_i32_133 = arith.constant 8 : i32
    %c0_134 = arith.constant 0 : index
    %c0_135 = arith.constant 0 : index
    %592 = vector.load %arg12[%c0_134, %c0_135] : memref<64x256xbf16, #tpu.memory_space<vmem>>, vector<64x256xbf16>
    %c0_136 = arith.constant 0 : index
    %c0_137 = arith.constant 0 : index
    %593 = vector.load %arg5[%c0_136, %c0_137] : memref<256x512xbf16, #tpu.memory_space<vmem>>, vector<256x512xbf16>
    %cst_138 = arith.constant dense<0.000000e+00> : vector<64x512xf32>
    %594 = tpu.matmul %592, %593, %cst_138 {dimension_numbers = #tpu.dot_dimension_numbers<[1], [0], [0], [1], [0, 0, 1, 1], [], []>} : vector<64x256xbf16>, vector<256x512xbf16>, vector<64x512xf32> -> vector<64x512xf32>
    %c0_139 = arith.constant 0 : index
    %c0_140 = arith.constant 0 : index
    %595 = vector.load %arg7[%c0_139, %c0_140] : memref<1x512xf32, #tpu.memory_space<vmem>>, vector<1x512xf32>
    %596 = vector.broadcast %595 : vector<1x512xf32> to vector<64x512xf32>
    %597 = arith.addf %594, %596 : vector<64x512xf32>
    %c0_141 = arith.constant 0 : index
    %c0_142 = arith.constant 0 : index
    %598 = vector.load %arg13[%c0_141, %c0_142] : memref<64x512xf32, #tpu.memory_space<vmem>>, vector<64x512xf32>
    tpu.vector_store %arg13[%c0_141, %c0_142], %597 {strides = array<i32>} : memref<64x512xf32, #tpu.memory_space<vmem>>, vector<64x512xf32>,
    %cst_143 = arith.constant 0.000000e+00 : f32
    %599 = vector.broadcast %cst_143 : f32 to vector<8x64xf32>
    %c0_i32_144 = arith.constant 0 : i32
    %c7_i32_145 = arith.constant 7 : i32
    %600 = arith.subi %c7_i32_145, %c0_i32_144 : i32
    %c8_i32_146 = arith.constant 8 : i32
    %601 = arith.muli %c0_i32_144, %c8_i32_146 : i32
    %602 = tpu.assume_multiple %601, 8 : i32
    %c8_i32_147 = arith.constant 8 : i32
    %603 = arith.muli %600, %c8_i32_147 : i32
    %604 = tpu.assume_multiple %603, 8 : i32
    %605 = tpu.concatenate %599, %599 in 1 : vector<8x64xf32>, vector<8x64xf32> -> vector<8x128xf32>
    %606 = arith.truncf %605 : vector<8x128xf32> to vector<8x128xbf16>
    %c0_148 = arith.constant 0 : index
    %c0_149 = arith.constant 0 : index
    %607 = vector.load %arg6[%c0_148, %c0_149] : memref<128x512xbf16, #tpu.memory_space<vmem>>, vector<128x512xbf16>
    %cst_150 = arith.constant dense<0.000000e+00> : vector<8x512xf32>
    %608 = tpu.matmul %606, %607, %cst_150 {dimension_numbers = #tpu.dot_dimension_numbers<[1], [0], [0], [1], [0, 0, 1, 1], [], []>} : vector<8x128xbf16>, vector<128x512xbf16>, vector<8x512xf32> -> vector<8x512xf32>
    %609 = arith.index_cast %602 : i32 to index
    %c0_151 = arith.constant 0 : index
    %610 = vector.load %arg13[%609, %c0_151] : memref<64x512xf32, #tpu.memory_space<vmem>>, vector<8x256xf32>
    %611 = vector.extract_strided_slice %608 {offsets = [0, 0], sizes = [8, 256], strides = [1, 1]} : vector<8x512xf32> to vector<8x256xf32>
    %612 = arith.addf %610, %611 : vector<8x256xf32>
    %613 = arith.index_cast %604 : i32 to index
    %c256 = arith.constant 256 : index
    %614 = vector.load %arg13[%613, %c256] : memref<64x512xf32, #tpu.memory_space<vmem>>, vector<8x256xf32>
    %615 = vector.extract_strided_slice %608 {offsets = [0, 256], sizes = [8, 256], strides = [1, 1]} : vector<8x512xf32> to vector<8x256xf32>
    %616 = arith.addf %614, %615 : vector<8x256xf32>
    %617 = vector.extract_strided_slice %612 {offsets = [0, 0], sizes = [8, 64], strides = [1, 1]} : vector<8x256xf32> to vector<8x64xf32>
    %618 = arith.negf %617 : vector<8x64xf32>
    %619 = math.exp %618 : vector<8x64xf32>
    %cst_152 = arith.constant 1.000000e+00 : f32
    %620 = vector.broadcast %cst_152 : f32 to vector<8x64xf32>
    %621 = arith.addf %620, %619 : vector<8x64xf32>
    %622 = arith.divf %620, %621 : vector<8x64xf32>
    %623 = vector.extract_strided_slice %612 {offsets = [0, 64], sizes = [8, 64], strides = [1, 1]} : vector<8x256xf32> to vector<8x64xf32>
    %624 = arith.negf %623 : vector<8x64xf32>
    %625 = math.exp %624 : vector<8x64xf32>
    %cst_153 = arith.constant 1.000000e+00 : f32
    %626 = vector.broadcast %cst_153 : f32 to vector<8x64xf32>
    %627 = arith.addf %626, %625 : vector<8x64xf32>
    %628 = arith.divf %626, %627 : vector<8x64xf32>
    %629 = vector.extract_strided_slice %612 {offsets = [0, 128], sizes = [8, 64], strides = [1, 1]} : vector<8x256xf32> to vector<8x64xf32>
    %630 = math.tanh %629 : vector<8x64xf32>
    %631 = vector.extract_strided_slice %612 {offsets = [0, 192], sizes = [8, 64], strides = [1, 1]} : vector<8x256xf32> to vector<8x64xf32>
    %632 = arith.negf %631 : vector<8x64xf32>
    %633 = math.exp %632 : vector<8x64xf32>
    %cst_154 = arith.constant 1.000000e+00 : f32
    %634 = vector.broadcast %cst_154 : f32 to vector<8x64xf32>
    %635 = arith.addf %634, %633 : vector<8x64xf32>
    %636 = arith.divf %634, %635 : vector<8x64xf32>
    %637 = arith.mulf %628, %599 : vector<8x64xf32>
    %638 = arith.mulf %622, %630 : vector<8x64xf32>
    %639 = arith.addf %637, %638 : vector<8x64xf32>
    %640 = math.tanh %639 : vector<8x64xf32>
    %641 = arith.mulf %636, %640 : vector<8x64xf32>
    %642 = vector.extract_strided_slice %616 {offsets = [0, 0], sizes = [8, 64], strides = [1, 1]} : vector<8x256xf32> to vector<8x64xf32>
    %643 = arith.negf %642 : vector<8x64xf32>
    %644 = math.exp %643 : vector<8x64xf32>
    %cst_155 = arith.constant 1.000000e+00 : f32
    %645 = vector.broadcast %cst_155 : f32 to vector<8x64xf32>
    %646 = arith.addf %645, %644 : vector<8x64xf32>
    %647 = arith.divf %645, %646 : vector<8x64xf32>
    %648 = vector.extract_strided_slice %616 {offsets = [0, 64], sizes = [8, 64], strides = [1, 1]} : vector<8x256xf32> to vector<8x64xf32>
    %649 = arith.negf %648 : vector<8x64xf32>
    %650 = math.exp %649 : vector<8x64xf32>
    %cst_156 = arith.constant 1.000000e+00 : f32
    %651 = vector.broadcast %cst_156 : f32 to vector<8x64xf32>
    %652 = arith.addf %651, %650 : vector<8x64xf32>
    %653 = arith.divf %651, %652 : vector<8x64xf32>
    %654 = vector.extract_strided_slice %616 {offsets = [0, 128], sizes = [8, 64], strides = [1, 1]} : vector<8x256xf32> to vector<8x64xf32>
    %655 = math.tanh %654 : vector<8x64xf32>
    %656 = vector.extract_strided_slice %616 {offsets = [0, 192], sizes = [8, 64], strides = [1, 1]} : vector<8x256xf32> to vector<8x64xf32>
    %657 = arith.negf %656 : vector<8x64xf32>
    %658 = math.exp %657 : vector<8x64xf32>
    %cst_157 = arith.constant 1.000000e+00 : f32
    %659 = vector.broadcast %cst_157 : f32 to vector<8x64xf32>
    %660 = arith.addf %659, %658 : vector<8x64xf32>
    %661 = arith.divf %659, %660 : vector<8x64xf32>
    %662 = arith.mulf %653, %599 : vector<8x64xf32>
    %663 = arith.mulf %647, %655 : vector<8x64xf32>
    %664 = arith.addf %662, %663 : vector<8x64xf32>
    %665 = math.tanh %664 : vector<8x64xf32>
    %666 = arith.mulf %661, %665 : vector<8x64xf32>
    %667 = arith.index_cast %602 : i32 to index
    %c0_158 = arith.constant 0 : index
    %668 = vector.load %arg8[%667, %c0_158] : memref<64x128xf32, #tpu.memory_space<vmem>>, vector<8x64xf32>
    tpu.vector_store %arg8[%667, %c0_158], %641 {strides = array<i32>} : memref<64x128xf32, #tpu.memory_space<vmem>>, vector<8x64xf32>,
    %669 = arith.index_cast %604 : i32 to index
    %c64 = arith.constant 64 : index
    %670 = vector.load %arg8[%669, %c64] : memref<64x128xf32, #tpu.memory_space<vmem>>, vector<8x64xf32>
    tpu.vector_store %arg8[%669, %c64], %666 {strides = array<i32>} : memref<64x128xf32, #tpu.memory_space<vmem>>, vector<8x64xf32>,
    %c1_i32_159 = arith.constant 1 : i32
    %c7_i32_160 = arith.constant 7 : i32
    %671 = arith.subi %c7_i32_160, %c1_i32_159 : i32
    %c8_i32_161 = arith.constant 8 : i32
    %672 = arith.muli %c1_i32_159, %c8_i32_161 : i32
    %673 = tpu.assume_multiple %672, 8 : i32
    %c8_i32_162 = arith.constant 8 : i32
    %674 = arith.muli %671, %c8_i32_162 : i32
    %675 = tpu.assume_multiple %674, 8 : i32
    %676 = tpu.concatenate %641, %666 in 1 : vector<8x64xf32>, vector<8x64xf32> -> vector<8x128xf32>
    %677 = arith.truncf %676 : vector<8x128xf32> to vector<8x128xbf16>
    %c0_163 = arith.constant 0 : index
    %c0_164 = arith.constant 0 : index
    %678 = vector.load %arg6[%c0_163, %c0_164] : memref<128x512xbf16, #tpu.memory_space<vmem>>, vector<128x512xbf16>
    %cst_165 = arith.constant dense<0.000000e+00> : vector<8x512xf32>
    %679 = tpu.matmul %677, %678, %cst_165 {dimension_numbers = #tpu.dot_dimension_numbers<[1], [0], [0], [1], [0, 0, 1, 1], [], []>} : vector<8x128xbf16>, vector<128x512xbf16>, vector<8x512xf32> -> vector<8x512xf32>
    %680 = arith.index_cast %673 : i32 to index
    %c0_166 = arith.constant 0 : index
    %681 = vector.load %arg13[%680, %c0_166] : memref<64x512xf32, #tpu.memory_space<vmem>>, vector<8x256xf32>
    %682 = vector.extract_strided_slice %679 {offsets = [0, 0], sizes = [8, 256], strides = [1, 1]} : vector<8x512xf32> to vector<8x256xf32>
    %683 = arith.addf %681, %682 : vector<8x256xf32>
    %684 = arith.index_cast %675 : i32 to index
    %c256_167 = arith.constant 256 : index
    %685 = vector.load %arg13[%684, %c256_167] : memref<64x512xf32, #tpu.memory_space<vmem>>, vector<8x256xf32>
    %686 = vector.extract_strided_slice %679 {offsets = [0, 256], sizes = [8, 256], strides = [1, 1]} : vector<8x512xf32> to vector<8x256xf32>
    %687 = arith.addf %685, %686 : vector<8x256xf32>
    %688 = vector.extract_strided_slice %683 {offsets = [0, 0], sizes = [8, 64], strides = [1, 1]} : vector<8x256xf32> to vector<8x64xf32>
    %689 = arith.negf %688 : vector<8x64xf32>
    %690 = math.exp %689 : vector<8x64xf32>
    %cst_168 = arith.constant 1.000000e+00 : f32
    %691 = vector.broadcast %cst_168 : f32 to vector<8x64xf32>
    %692 = arith.addf %691, %690 : vector<8x64xf32>
    %693 = arith.divf %691, %692 : vector<8x64xf32>
    %694 = vector.extract_strided_slice %683 {offsets = [0, 64], sizes = [8, 64], strides = [1, 1]} : vector<8x256xf32> to vector<8x64xf32>
    %695 = arith.negf %694 : vector<8x64xf32>
    %696 = math.exp %695 : vector<8x64xf32>
    %cst_169 = arith.constant 1.000000e+00 : f32
    %697 = vector.broadcast %cst_169 : f32 to vector<8x64xf32>
    %698 = arith.addf %697, %696 : vector<8x64xf32>
    %699 = arith.divf %697, %698 : vector<8x64xf32>
    %700 = vector.extract_strided_slice %683 {offsets = [0, 128], sizes = [8, 64], strides = [1, 1]} : vector<8x256xf32> to vector<8x64xf32>
    %701 = math.tanh %700 : vector<8x64xf32>
    %702 = vector.extract_strided_slice %683 {offsets = [0, 192], sizes = [8, 64], strides = [1, 1]} : vector<8x256xf32> to vector<8x64xf32>
    %703 = arith.negf %702 : vector<8x64xf32>
    %704 = math.exp %703 : vector<8x64xf32>
    %cst_170 = arith.constant 1.000000e+00 : f32
    %705 = vector.broadcast %cst_170 : f32 to vector<8x64xf32>
    %706 = arith.addf %705, %704 : vector<8x64xf32>
    %707 = arith.divf %705, %706 : vector<8x64xf32>
    %708 = arith.mulf %699, %639 : vector<8x64xf32>
    %709 = arith.mulf %693, %701 : vector<8x64xf32>
    %710 = arith.addf %708, %709 : vector<8x64xf32>
    %711 = math.tanh %710 : vector<8x64xf32>
    %712 = arith.mulf %707, %711 : vector<8x64xf32>
    %713 = vector.extract_strided_slice %687 {offsets = [0, 0], sizes = [8, 64], strides = [1, 1]} : vector<8x256xf32> to vector<8x64xf32>
    %714 = arith.negf %713 : vector<8x64xf32>
    %715 = math.exp %714 : vector<8x64xf32>
    %cst_171 = arith.constant 1.000000e+00 : f32
    %716 = vector.broadcast %cst_171 : f32 to vector<8x64xf32>
    %717 = arith.addf %716, %715 : vector<8x64xf32>
    %718 = arith.divf %716, %717 : vector<8x64xf32>
    %719 = vector.extract_strided_slice %687 {offsets = [0, 64], sizes = [8, 64], strides = [1, 1]} : vector<8x256xf32> to vector<8x64xf32>
    %720 = arith.negf %719 : vector<8x64xf32>
    %721 = math.exp %720 : vector<8x64xf32>
    %cst_172 = arith.constant 1.000000e+00 : f32
    %722 = vector.broadcast %cst_172 : f32 to vector<8x64xf32>
    %723 = arith.addf %722, %721 : vector<8x64xf32>
    %724 = arith.divf %722, %723 : vector<8x64xf32>
    %725 = vector.extract_strided_slice %687 {offsets = [0, 128], sizes = [8, 64], strides = [1, 1]} : vector<8x256xf32> to vector<8x64xf32>
    %726 = math.tanh %725 : vector<8x64xf32>
    %727 = vector.extract_strided_slice %687 {offsets = [0, 192], sizes = [8, 64], strides = [1, 1]} : vector<8x256xf32> to vector<8x64xf32>
    %728 = arith.negf %727 : vector<8x64xf32>
    %729 = math.exp %728 : vector<8x64xf32>
    %cst_173 = arith.constant 1.000000e+00 : f32
    %730 = vector.broadcast %cst_173 : f32 to vector<8x64xf32>
    %731 = arith.addf %730, %729 : vector<8x64xf32>
    %732 = arith.divf %730, %731 : vector<8x64xf32>
    %733 = arith.mulf %724, %664 : vector<8x64xf32>
    %734 = arith.mulf %718, %726 : vector<8x64xf32>
    %735 = arith.addf %733, %734 : vector<8x64xf32>
    %736 = math.tanh %735 : vector<8x64xf32>
    %737 = arith.mulf %732, %736 : vector<8x64xf32>
    %738 = arith.index_cast %673 : i32 to index
    %c0_174 = arith.constant 0 : index
    %739 = vector.load %arg8[%738, %c0_174] : memref<64x128xf32, #tpu.memory_space<vmem>>, vector<8x64xf32>
    tpu.vector_store %arg8[%738, %c0_174], %712 {strides = array<i32>} : memref<64x128xf32, #tpu.memory_space<vmem>>, vector<8x64xf32>,
    %740 = arith.index_cast %675 : i32 to index
    %c64_175 = arith.constant 64 : index
    %741 = vector.load %arg8[%740, %c64_175] : memref<64x128xf32, #tpu.memory_space<vmem>>, vector<8x64xf32>
    tpu.vector_store %arg8[%740, %c64_175], %737 {strides = array<i32>} : memref<64x128xf32, #tpu.memory_space<vmem>>, vector<8x64xf32>,
    %c2_i32_176 = arith.constant 2 : i32
    %c7_i32_177 = arith.constant 7 : i32
    %742 = arith.subi %c7_i32_177, %c2_i32_176 : i32
    %c8_i32_178 = arith.constant 8 : i32
    %743 = arith.muli %c2_i32_176, %c8_i32_178 : i32
    %744 = tpu.assume_multiple %743, 8 : i32
    %c8_i32_179 = arith.constant 8 : i32
    %745 = arith.muli %742, %c8_i32_179 : i32
    %746 = tpu.assume_multiple %745, 8 : i32
    %747 = tpu.concatenate %712, %737 in 1 : vector<8x64xf32>, vector<8x64xf32> -> vector<8x128xf32>
    %748 = arith.truncf %747 : vector<8x128xf32> to vector<8x128xbf16>
    %c0_180 = arith.constant 0 : index
    %c0_181 = arith.constant 0 : index
    %749 = vector.load %arg6[%c0_180, %c0_181] : memref<128x512xbf16, #tpu.memory_space<vmem>>, vector<128x512xbf16>
    %cst_182 = arith.constant dense<0.000000e+00> : vector<8x512xf32>
    %750 = tpu.matmul %748, %749, %cst_182 {dimension_numbers = #tpu.dot_dimension_numbers<[1], [0], [0], [1], [0, 0, 1, 1], [], []>} : vector<8x128xbf16>, vector<128x512xbf16>, vector<8x512xf32> -> vector<8x512xf32>
    %751 = arith.index_cast %744 : i32 to index
    %c0_183 = arith.constant 0 : index
    %752 = vector.load %arg13[%751, %c0_183] : memref<64x512xf32, #tpu.memory_space<vmem>>, vector<8x256xf32>
    %753 = vector.extract_strided_slice %750 {offsets = [0, 0], sizes = [8, 256], strides = [1, 1]} : vector<8x512xf32> to vector<8x256xf32>
    %754 = arith.addf %752, %753 : vector<8x256xf32>
    %755 = arith.index_cast %746 : i32 to index
    %c256_184 = arith.constant 256 : index
    %756 = vector.load %arg13[%755, %c256_184] : memref<64x512xf32, #tpu.memory_space<vmem>>, vector<8x256xf32>
    %757 = vector.extract_strided_slice %750 {offsets = [0, 256], sizes = [8, 256], strides = [1, 1]} : vector<8x512xf32> to vector<8x256xf32>
    %758 = arith.addf %756, %757 : vector<8x256xf32>
    %759 = vector.extract_strided_slice %754 {offsets = [0, 0], sizes = [8, 64], strides = [1, 1]} : vector<8x256xf32> to vector<8x64xf32>
    %760 = arith.negf %759 : vector<8x64xf32>
    %761 = math.exp %760 : vector<8x64xf32>
    %cst_185 = arith.constant 1.000000e+00 : f32
    %762 = vector.broadcast %cst_185 : f32 to vector<8x64xf32>
    %763 = arith.addf %762, %761 : vector<8x64xf32>
    %764 = arith.divf %762, %763 : vector<8x64xf32>
    %765 = vector.extract_strided_slice %754 {offsets = [0, 64], sizes = [8, 64], strides = [1, 1]} : vector<8x256xf32> to vector<8x64xf32>
    %766 = arith.negf %765 : vector<8x64xf32>
    %767 = math.exp %766 : vector<8x64xf32>
    %cst_186 = arith.constant 1.000000e+00 : f32
    %768 = vector.broadcast %cst_186 : f32 to vector<8x64xf32>
    %769 = arith.addf %768, %767 : vector<8x64xf32>
    %770 = arith.divf %768, %769 : vector<8x64xf32>
    %771 = vector.extract_strided_slice %754 {offsets = [0, 128], sizes = [8, 64], strides = [1, 1]} : vector<8x256xf32> to vector<8x64xf32>
    %772 = math.tanh %771 : vector<8x64xf32>
    %773 = vector.extract_strided_slice %754 {offsets = [0, 192], sizes = [8, 64], strides = [1, 1]} : vector<8x256xf32> to vector<8x64xf32>
    %774 = arith.negf %773 : vector<8x64xf32>
    %775 = math.exp %774 : vector<8x64xf32>
    %cst_187 = arith.constant 1.000000e+00 : f32
    %776 = vector.broadcast %cst_187 : f32 to vector<8x64xf32>
    %777 = arith.addf %776, %775 : vector<8x64xf32>
    %778 = arith.divf %776, %777 : vector<8x64xf32>
    %779 = arith.mulf %770, %710 : vector<8x64xf32>
    %780 = arith.mulf %764, %772 : vector<8x64xf32>
    %781 = arith.addf %779, %780 : vector<8x64xf32>
    %782 = math.tanh %781 : vector<8x64xf32>
    %783 = arith.mulf %778, %782 : vector<8x64xf32>
    %784 = vector.extract_strided_slice %758 {offsets = [0, 0], sizes = [8, 64], strides = [1, 1]} : vector<8x256xf32> to vector<8x64xf32>
    %785 = arith.negf %784 : vector<8x64xf32>
    %786 = math.exp %785 : vector<8x64xf32>
    %cst_188 = arith.constant 1.000000e+00 : f32
    %787 = vector.broadcast %cst_188 : f32 to vector<8x64xf32>
    %788 = arith.addf %787, %786 : vector<8x64xf32>
    %789 = arith.divf %787, %788 : vector<8x64xf32>
    %790 = vector.extract_strided_slice %758 {offsets = [0, 64], sizes = [8, 64], strides = [1, 1]} : vector<8x256xf32> to vector<8x64xf32>
    %791 = arith.negf %790 : vector<8x64xf32>
    %792 = math.exp %791 : vector<8x64xf32>
    %cst_189 = arith.constant 1.000000e+00 : f32
    %793 = vector.broadcast %cst_189 : f32 to vector<8x64xf32>
    %794 = arith.addf %793, %792 : vector<8x64xf32>
    %795 = arith.divf %793, %794 : vector<8x64xf32>
    %796 = vector.extract_strided_slice %758 {offsets = [0, 128], sizes = [8, 64], strides = [1, 1]} : vector<8x256xf32> to vector<8x64xf32>
    %797 = math.tanh %796 : vector<8x64xf32>
    %798 = vector.extract_strided_slice %758 {offsets = [0, 192], sizes = [8, 64], strides = [1, 1]} : vector<8x256xf32> to vector<8x64xf32>
    %799 = arith.negf %798 : vector<8x64xf32>
    %800 = math.exp %799 : vector<8x64xf32>
    %cst_190 = arith.constant 1.000000e+00 : f32
    %801 = vector.broadcast %cst_190 : f32 to vector<8x64xf32>
    %802 = arith.addf %801, %800 : vector<8x64xf32>
    %803 = arith.divf %801, %802 : vector<8x64xf32>
    %804 = arith.mulf %795, %735 : vector<8x64xf32>
    %805 = arith.mulf %789, %797 : vector<8x64xf32>
    %806 = arith.addf %804, %805 : vector<8x64xf32>
    %807 = math.tanh %806 : vector<8x64xf32>
    %808 = arith.mulf %803, %807 : vector<8x64xf32>
    %809 = arith.index_cast %744 : i32 to index
    %c0_191 = arith.constant 0 : index
    %810 = vector.load %arg8[%809, %c0_191] : memref<64x128xf32, #tpu.memory_space<vmem>>, vector<8x64xf32>
    tpu.vector_store %arg8[%809, %c0_191], %783 {strides = array<i32>} : memref<64x128xf32, #tpu.memory_space<vmem>>, vector<8x64xf32>,
    %811 = arith.index_cast %746 : i32 to index
    %c64_192 = arith.constant 64 : index
    %812 = vector.load %arg8[%811, %c64_192] : memref<64x128xf32, #tpu.memory_space<vmem>>, vector<8x64xf32>
    tpu.vector_store %arg8[%811, %c64_192], %808 {strides = array<i32>} : memref<64x128xf32, #tpu.memory_space<vmem>>, vector<8x64xf32>,
    %c3_i32_193 = arith.constant 3 : i32
    %c7_i32_194 = arith.constant 7 : i32
    %813 = arith.subi %c7_i32_194, %c3_i32_193 : i32
    %c8_i32_195 = arith.constant 8 : i32
    %814 = arith.muli %c3_i32_193, %c8_i32_195 : i32
    %815 = tpu.assume_multiple %814, 8 : i32
    %c8_i32_196 = arith.constant 8 : i32
    %816 = arith.muli %813, %c8_i32_196 : i32
    %817 = tpu.assume_multiple %816, 8 : i32
    %818 = tpu.concatenate %783, %808 in 1 : vector<8x64xf32>, vector<8x64xf32> -> vector<8x128xf32>
    %819 = arith.truncf %818 : vector<8x128xf32> to vector<8x128xbf16>
    %c0_197 = arith.constant 0 : index
    %c0_198 = arith.constant 0 : index
    %820 = vector.load %arg6[%c0_197, %c0_198] : memref<128x512xbf16, #tpu.memory_space<vmem>>, vector<128x512xbf16>
    %cst_199 = arith.constant dense<0.000000e+00> : vector<8x512xf32>
    %821 = tpu.matmul %819, %820, %cst_199 {dimension_numbers = #tpu.dot_dimension_numbers<[1], [0], [0], [1], [0, 0, 1, 1], [], []>} : vector<8x128xbf16>, vector<128x512xbf16>, vector<8x512xf32> -> vector<8x512xf32>
    %822 = arith.index_cast %815 : i32 to index
    %c0_200 = arith.constant 0 : index
    %823 = vector.load %arg13[%822, %c0_200] : memref<64x512xf32, #tpu.memory_space<vmem>>, vector<8x256xf32>
    %824 = vector.extract_strided_slice %821 {offsets = [0, 0], sizes = [8, 256], strides = [1, 1]} : vector<8x512xf32> to vector<8x256xf32>
    %825 = arith.addf %823, %824 : vector<8x256xf32>
    %826 = arith.index_cast %817 : i32 to index
    %c256_201 = arith.constant 256 : index
    %827 = vector.load %arg13[%826, %c256_201] : memref<64x512xf32, #tpu.memory_space<vmem>>, vector<8x256xf32>
    %828 = vector.extract_strided_slice %821 {offsets = [0, 256], sizes = [8, 256], strides = [1, 1]} : vector<8x512xf32> to vector<8x256xf32>
    %829 = arith.addf %827, %828 : vector<8x256xf32>
    %830 = vector.extract_strided_slice %825 {offsets = [0, 0], sizes = [8, 64], strides = [1, 1]} : vector<8x256xf32> to vector<8x64xf32>
    %831 = arith.negf %830 : vector<8x64xf32>
    %832 = math.exp %831 : vector<8x64xf32>
    %cst_202 = arith.constant 1.000000e+00 : f32
    %833 = vector.broadcast %cst_202 : f32 to vector<8x64xf32>
    %834 = arith.addf %833, %832 : vector<8x64xf32>
    %835 = arith.divf %833, %834 : vector<8x64xf32>
    %836 = vector.extract_strided_slice %825 {offsets = [0, 64], sizes = [8, 64], strides = [1, 1]} : vector<8x256xf32> to vector<8x64xf32>
    %837 = arith.negf %836 : vector<8x64xf32>
    %838 = math.exp %837 : vector<8x64xf32>
    %cst_203 = arith.constant 1.000000e+00 : f32
    %839 = vector.broadcast %cst_203 : f32 to vector<8x64xf32>
    %840 = arith.addf %839, %838 : vector<8x64xf32>
    %841 = arith.divf %839, %840 : vector<8x64xf32>
    %842 = vector.extract_strided_slice %825 {offsets = [0, 128], sizes = [8, 64], strides = [1, 1]} : vector<8x256xf32> to vector<8x64xf32>
    %843 = math.tanh %842 : vector<8x64xf32>
    %844 = vector.extract_strided_slice %825 {offsets = [0, 192], sizes = [8, 64], strides = [1, 1]} : vector<8x256xf32> to vector<8x64xf32>
    %845 = arith.negf %844 : vector<8x64xf32>
    %846 = math.exp %845 : vector<8x64xf32>
    %cst_204 = arith.constant 1.000000e+00 : f32
    %847 = vector.broadcast %cst_204 : f32 to vector<8x64xf32>
    %848 = arith.addf %847, %846 : vector<8x64xf32>
    %849 = arith.divf %847, %848 : vector<8x64xf32>
    %850 = arith.mulf %841, %781 : vector<8x64xf32>
    %851 = arith.mulf %835, %843 : vector<8x64xf32>
    %852 = arith.addf %850, %851 : vector<8x64xf32>
    %853 = math.tanh %852 : vector<8x64xf32>
    %854 = arith.mulf %849, %853 : vector<8x64xf32>
    %855 = vector.extract_strided_slice %829 {offsets = [0, 0], sizes = [8, 64], strides = [1, 1]} : vector<8x256xf32> to vector<8x64xf32>
    %856 = arith.negf %855 : vector<8x64xf32>
    %857 = math.exp %856 : vector<8x64xf32>
    %cst_205 = arith.constant 1.000000e+00 : f32
    %858 = vector.broadcast %cst_205 : f32 to vector<8x64xf32>
    %859 = arith.addf %858, %857 : vector<8x64xf32>
    %860 = arith.divf %858, %859 : vector<8x64xf32>
    %861 = vector.extract_strided_slice %829 {offsets = [0, 64], sizes = [8, 64], strides = [1, 1]} : vector<8x256xf32> to vector<8x64xf32>
    %862 = arith.negf %861 : vector<8x64xf32>
    %863 = math.exp %862 : vector<8x64xf32>
    %cst_206 = arith.constant 1.000000e+00 : f32
    %864 = vector.broadcast %cst_206 : f32 to vector<8x64xf32>
    %865 = arith.addf %864, %863 : vector<8x64xf32>
    %866 = arith.divf %864, %865 : vector<8x64xf32>
    %867 = vector.extract_strided_slice %829 {offsets = [0, 128], sizes = [8, 64], strides = [1, 1]} : vector<8x256xf32> to vector<8x64xf32>
    %868 = math.tanh %867 : vector<8x64xf32>
    %869 = vector.extract_strided_slice %829 {offsets = [0, 192], sizes = [8, 64], strides = [1, 1]} : vector<8x256xf32> to vector<8x64xf32>
    %870 = arith.negf %869 : vector<8x64xf32>
    %871 = math.exp %870 : vector<8x64xf32>
    %cst_207 = arith.constant 1.000000e+00 : f32
    %872 = vector.broadcast %cst_207 : f32 to vector<8x64xf32>
    %873 = arith.addf %872, %871 : vector<8x64xf32>
    %874 = arith.divf %872, %873 : vector<8x64xf32>
    %875 = arith.mulf %866, %806 : vector<8x64xf32>
    %876 = arith.mulf %860, %868 : vector<8x64xf32>
    %877 = arith.addf %875, %876 : vector<8x64xf32>
    %878 = math.tanh %877 : vector<8x64xf32>
    %879 = arith.mulf %874, %878 : vector<8x64xf32>
    %880 = arith.index_cast %815 : i32 to index
    %c0_208 = arith.constant 0 : index
    %881 = vector.load %arg8[%880, %c0_208] : memref<64x128xf32, #tpu.memory_space<vmem>>, vector<8x64xf32>
    tpu.vector_store %arg8[%880, %c0_208], %854 {strides = array<i32>} : memref<64x128xf32, #tpu.memory_space<vmem>>, vector<8x64xf32>,
    %882 = arith.index_cast %817 : i32 to index
    %c64_209 = arith.constant 64 : index
    %883 = vector.load %arg8[%882, %c64_209] : memref<64x128xf32, #tpu.memory_space<vmem>>, vector<8x64xf32>
    tpu.vector_store %arg8[%882, %c64_209], %879 {strides = array<i32>} : memref<64x128xf32, #tpu.memory_space<vmem>>, vector<8x64xf32>,
    %c4_i32_210 = arith.constant 4 : i32
    %c7_i32_211 = arith.constant 7 : i32
    %884 = arith.subi %c7_i32_211, %c4_i32_210 : i32
    %c8_i32_212 = arith.constant 8 : i32
    %885 = arith.muli %c4_i32_210, %c8_i32_212 : i32
    %886 = tpu.assume_multiple %885, 8 : i32
    %c8_i32_213 = arith.constant 8 : i32
    %887 = arith.muli %884, %c8_i32_213 : i32
    %888 = tpu.assume_multiple %887, 8 : i32
    %889 = tpu.concatenate %854, %879 in 1 : vector<8x64xf32>, vector<8x64xf32> -> vector<8x128xf32>
    %890 = arith.truncf %889 : vector<8x128xf32> to vector<8x128xbf16>
    %c0_214 = arith.constant 0 : index
    %c0_215 = arith.constant 0 : index
    %891 = vector.load %arg6[%c0_214, %c0_215] : memref<128x512xbf16, #tpu.memory_space<vmem>>, vector<128x512xbf16>
    %cst_216 = arith.constant dense<0.000000e+00> : vector<8x512xf32>
    %892 = tpu.matmul %890, %891, %cst_216 {dimension_numbers = #tpu.dot_dimension_numbers<[1], [0], [0], [1], [0, 0, 1, 1], [], []>} : vector<8x128xbf16>, vector<128x512xbf16>, vector<8x512xf32> -> vector<8x512xf32>
    %893 = arith.index_cast %886 : i32 to index
    %c0_217 = arith.constant 0 : index
    %894 = vector.load %arg13[%893, %c0_217] : memref<64x512xf32, #tpu.memory_space<vmem>>, vector<8x256xf32>
    %895 = vector.extract_strided_slice %892 {offsets = [0, 0], sizes = [8, 256], strides = [1, 1]} : vector<8x512xf32> to vector<8x256xf32>
    %896 = arith.addf %894, %895 : vector<8x256xf32>
    %897 = arith.index_cast %888 : i32 to index
    %c256_218 = arith.constant 256 : index
    %898 = vector.load %arg13[%897, %c256_218] : memref<64x512xf32, #tpu.memory_space<vmem>>, vector<8x256xf32>
    %899 = vector.extract_strided_slice %892 {offsets = [0, 256], sizes = [8, 256], strides = [1, 1]} : vector<8x512xf32> to vector<8x256xf32>
    %900 = arith.addf %898, %899 : vector<8x256xf32>
    %901 = vector.extract_strided_slice %896 {offsets = [0, 0], sizes = [8, 64], strides = [1, 1]} : vector<8x256xf32> to vector<8x64xf32>
    %902 = arith.negf %901 : vector<8x64xf32>
    %903 = math.exp %902 : vector<8x64xf32>
    %cst_219 = arith.constant 1.000000e+00 : f32
    %904 = vector.broadcast %cst_219 : f32 to vector<8x64xf32>
    %905 = arith.addf %904, %903 : vector<8x64xf32>
    %906 = arith.divf %904, %905 : vector<8x64xf32>
    %907 = vector.extract_strided_slice %896 {offsets = [0, 64], sizes = [8, 64], strides = [1, 1]} : vector<8x256xf32> to vector<8x64xf32>
    %908 = arith.negf %907 : vector<8x64xf32>
    %909 = math.exp %908 : vector<8x64xf32>
    %cst_220 = arith.constant 1.000000e+00 : f32
    %910 = vector.broadcast %cst_220 : f32 to vector<8x64xf32>
    %911 = arith.addf %910, %909 : vector<8x64xf32>
    %912 = arith.divf %910, %911 : vector<8x64xf32>
    %913 = vector.extract_strided_slice %896 {offsets = [0, 128], sizes = [8, 64], strides = [1, 1]} : vector<8x256xf32> to vector<8x64xf32>
    %914 = math.tanh %913 : vector<8x64xf32>
    %915 = vector.extract_strided_slice %896 {offsets = [0, 192], sizes = [8, 64], strides = [1, 1]} : vector<8x256xf32> to vector<8x64xf32>
    %916 = arith.negf %915 : vector<8x64xf32>
    %917 = math.exp %916 : vector<8x64xf32>
    %cst_221 = arith.constant 1.000000e+00 : f32
    %918 = vector.broadcast %cst_221 : f32 to vector<8x64xf32>
    %919 = arith.addf %918, %917 : vector<8x64xf32>
    %920 = arith.divf %918, %919 : vector<8x64xf32>
    %921 = arith.mulf %912, %852 : vector<8x64xf32>
    %922 = arith.mulf %906, %914 : vector<8x64xf32>
    %923 = arith.addf %921, %922 : vector<8x64xf32>
    %924 = math.tanh %923 : vector<8x64xf32>
    %925 = arith.mulf %920, %924 : vector<8x64xf32>
    %926 = vector.extract_strided_slice %900 {offsets = [0, 0], sizes = [8, 64], strides = [1, 1]} : vector<8x256xf32> to vector<8x64xf32>
    %927 = arith.negf %926 : vector<8x64xf32>
    %928 = math.exp %927 : vector<8x64xf32>
    %cst_222 = arith.constant 1.000000e+00 : f32
    %929 = vector.broadcast %cst_222 : f32 to vector<8x64xf32>
    %930 = arith.addf %929, %928 : vector<8x64xf32>
    %931 = arith.divf %929, %930 : vector<8x64xf32>
    %932 = vector.extract_strided_slice %900 {offsets = [0, 64], sizes = [8, 64], strides = [1, 1]} : vector<8x256xf32> to vector<8x64xf32>
    %933 = arith.negf %932 : vector<8x64xf32>
    %934 = math.exp %933 : vector<8x64xf32>
    %cst_223 = arith.constant 1.000000e+00 : f32
    %935 = vector.broadcast %cst_223 : f32 to vector<8x64xf32>
    %936 = arith.addf %935, %934 : vector<8x64xf32>
    %937 = arith.divf %935, %936 : vector<8x64xf32>
    %938 = vector.extract_strided_slice %900 {offsets = [0, 128], sizes = [8, 64], strides = [1, 1]} : vector<8x256xf32> to vector<8x64xf32>
    %939 = math.tanh %938 : vector<8x64xf32>
    %940 = vector.extract_strided_slice %900 {offsets = [0, 192], sizes = [8, 64], strides = [1, 1]} : vector<8x256xf32> to vector<8x64xf32>
    %941 = arith.negf %940 : vector<8x64xf32>
    %942 = math.exp %941 : vector<8x64xf32>
    %cst_224 = arith.constant 1.000000e+00 : f32
    %943 = vector.broadcast %cst_224 : f32 to vector<8x64xf32>
    %944 = arith.addf %943, %942 : vector<8x64xf32>
    %945 = arith.divf %943, %944 : vector<8x64xf32>
    %946 = arith.mulf %937, %877 : vector<8x64xf32>
    %947 = arith.mulf %931, %939 : vector<8x64xf32>
    %948 = arith.addf %946, %947 : vector<8x64xf32>
    %949 = math.tanh %948 : vector<8x64xf32>
    %950 = arith.mulf %945, %949 : vector<8x64xf32>
    %951 = arith.index_cast %886 : i32 to index
    %c0_225 = arith.constant 0 : index
    %952 = vector.load %arg8[%951, %c0_225] : memref<64x128xf32, #tpu.memory_space<vmem>>, vector<8x64xf32>
    tpu.vector_store %arg8[%951, %c0_225], %925 {strides = array<i32>} : memref<64x128xf32, #tpu.memory_space<vmem>>, vector<8x64xf32>,
    %953 = arith.index_cast %888 : i32 to index
    %c64_226 = arith.constant 64 : index
    %954 = vector.load %arg8[%953, %c64_226] : memref<64x128xf32, #tpu.memory_space<vmem>>, vector<8x64xf32>
    tpu.vector_store %arg8[%953, %c64_226], %950 {strides = array<i32>} : memref<64x128xf32, #tpu.memory_space<vmem>>, vector<8x64xf32>,
    %c5_i32_227 = arith.constant 5 : i32
    %c7_i32_228 = arith.constant 7 : i32
    %955 = arith.subi %c7_i32_228, %c5_i32_227 : i32
    %c8_i32_229 = arith.constant 8 : i32
    %956 = arith.muli %c5_i32_227, %c8_i32_229 : i32
    %957 = tpu.assume_multiple %956, 8 : i32
    %c8_i32_230 = arith.constant 8 : i32
    %958 = arith.muli %955, %c8_i32_230 : i32
    %959 = tpu.assume_multiple %958, 8 : i32
    %960 = tpu.concatenate %925, %950 in 1 : vector<8x64xf32>, vector<8x64xf32> -> vector<8x128xf32>
    %961 = arith.truncf %960 : vector<8x128xf32> to vector<8x128xbf16>
    %c0_231 = arith.constant 0 : index
    %c0_232 = arith.constant 0 : index
    %962 = vector.load %arg6[%c0_231, %c0_232] : memref<128x512xbf16, #tpu.memory_space<vmem>>, vector<128x512xbf16>
    %cst_233 = arith.constant dense<0.000000e+00> : vector<8x512xf32>
    %963 = tpu.matmul %961, %962, %cst_233 {dimension_numbers = #tpu.dot_dimension_numbers<[1], [0], [0], [1], [0, 0, 1, 1], [], []>} : vector<8x128xbf16>, vector<128x512xbf16>, vector<8x512xf32> -> vector<8x512xf32>
    %964 = arith.index_cast %957 : i32 to index
    %c0_234 = arith.constant 0 : index
    %965 = vector.load %arg13[%964, %c0_234] : memref<64x512xf32, #tpu.memory_space<vmem>>, vector<8x256xf32>
    %966 = vector.extract_strided_slice %963 {offsets = [0, 0], sizes = [8, 256], strides = [1, 1]} : vector<8x512xf32> to vector<8x256xf32>
    %967 = arith.addf %965, %966 : vector<8x256xf32>
    %968 = arith.index_cast %959 : i32 to index
    %c256_235 = arith.constant 256 : index
    %969 = vector.load %arg13[%968, %c256_235] : memref<64x512xf32, #tpu.memory_space<vmem>>, vector<8x256xf32>
    %970 = vector.extract_strided_slice %963 {offsets = [0, 256], sizes = [8, 256], strides = [1, 1]} : vector<8x512xf32> to vector<8x256xf32>
    %971 = arith.addf %969, %970 : vector<8x256xf32>
    %972 = vector.extract_strided_slice %967 {offsets = [0, 0], sizes = [8, 64], strides = [1, 1]} : vector<8x256xf32> to vector<8x64xf32>
    %973 = arith.negf %972 : vector<8x64xf32>
    %974 = math.exp %973 : vector<8x64xf32>
    %cst_236 = arith.constant 1.000000e+00 : f32
    %975 = vector.broadcast %cst_236 : f32 to vector<8x64xf32>
    %976 = arith.addf %975, %974 : vector<8x64xf32>
    %977 = arith.divf %975, %976 : vector<8x64xf32>
    %978 = vector.extract_strided_slice %967 {offsets = [0, 64], sizes = [8, 64], strides = [1, 1]} : vector<8x256xf32> to vector<8x64xf32>
    %979 = arith.negf %978 : vector<8x64xf32>
    %980 = math.exp %979 : vector<8x64xf32>
    %cst_237 = arith.constant 1.000000e+00 : f32
    %981 = vector.broadcast %cst_237 : f32 to vector<8x64xf32>
    %982 = arith.addf %981, %980 : vector<8x64xf32>
    %983 = arith.divf %981, %982 : vector<8x64xf32>
    %984 = vector.extract_strided_slice %967 {offsets = [0, 128], sizes = [8, 64], strides = [1, 1]} : vector<8x256xf32> to vector<8x64xf32>
    %985 = math.tanh %984 : vector<8x64xf32>
    %986 = vector.extract_strided_slice %967 {offsets = [0, 192], sizes = [8, 64], strides = [1, 1]} : vector<8x256xf32> to vector<8x64xf32>
    %987 = arith.negf %986 : vector<8x64xf32>
    %988 = math.exp %987 : vector<8x64xf32>
    %cst_238 = arith.constant 1.000000e+00 : f32
    %989 = vector.broadcast %cst_238 : f32 to vector<8x64xf32>
    %990 = arith.addf %989, %988 : vector<8x64xf32>
    %991 = arith.divf %989, %990 : vector<8x64xf32>
    %992 = arith.mulf %983, %923 : vector<8x64xf32>
    %993 = arith.mulf %977, %985 : vector<8x64xf32>
    %994 = arith.addf %992, %993 : vector<8x64xf32>
    %995 = math.tanh %994 : vector<8x64xf32>
    %996 = arith.mulf %991, %995 : vector<8x64xf32>
    %997 = vector.extract_strided_slice %971 {offsets = [0, 0], sizes = [8, 64], strides = [1, 1]} : vector<8x256xf32> to vector<8x64xf32>
    %998 = arith.negf %997 : vector<8x64xf32>
    %999 = math.exp %998 : vector<8x64xf32>
    %cst_239 = arith.constant 1.000000e+00 : f32
    %1000 = vector.broadcast %cst_239 : f32 to vector<8x64xf32>
    %1001 = arith.addf %1000, %999 : vector<8x64xf32>
    %1002 = arith.divf %1000, %1001 : vector<8x64xf32>
    %1003 = vector.extract_strided_slice %971 {offsets = [0, 64], sizes = [8, 64], strides = [1, 1]} : vector<8x256xf32> to vector<8x64xf32>
    %1004 = arith.negf %1003 : vector<8x64xf32>
    %1005 = math.exp %1004 : vector<8x64xf32>
    %cst_240 = arith.constant 1.000000e+00 : f32
    %1006 = vector.broadcast %cst_240 : f32 to vector<8x64xf32>
    %1007 = arith.addf %1006, %1005 : vector<8x64xf32>
    %1008 = arith.divf %1006, %1007 : vector<8x64xf32>
    %1009 = vector.extract_strided_slice %971 {offsets = [0, 128], sizes = [8, 64], strides = [1, 1]} : vector<8x256xf32> to vector<8x64xf32>
    %1010 = math.tanh %1009 : vector<8x64xf32>
    %1011 = vector.extract_strided_slice %971 {offsets = [0, 192], sizes = [8, 64], strides = [1, 1]} : vector<8x256xf32> to vector<8x64xf32>
    %1012 = arith.negf %1011 : vector<8x64xf32>
    %1013 = math.exp %1012 : vector<8x64xf32>
    %cst_241 = arith.constant 1.000000e+00 : f32
    %1014 = vector.broadcast %cst_241 : f32 to vector<8x64xf32>
    %1015 = arith.addf %1014, %1013 : vector<8x64xf32>
    %1016 = arith.divf %1014, %1015 : vector<8x64xf32>
    %1017 = arith.mulf %1008, %948 : vector<8x64xf32>
    %1018 = arith.mulf %1002, %1010 : vector<8x64xf32>
    %1019 = arith.addf %1017, %1018 : vector<8x64xf32>
    %1020 = math.tanh %1019 : vector<8x64xf32>
    %1021 = arith.mulf %1016, %1020 : vector<8x64xf32>
    %1022 = arith.index_cast %957 : i32 to index
    %c0_242 = arith.constant 0 : index
    %1023 = vector.load %arg8[%1022, %c0_242] : memref<64x128xf32, #tpu.memory_space<vmem>>, vector<8x64xf32>
    tpu.vector_store %arg8[%1022, %c0_242], %996 {strides = array<i32>} : memref<64x128xf32, #tpu.memory_space<vmem>>, vector<8x64xf32>,
    %1024 = arith.index_cast %959 : i32 to index
    %c64_243 = arith.constant 64 : index
    %1025 = vector.load %arg8[%1024, %c64_243] : memref<64x128xf32, #tpu.memory_space<vmem>>, vector<8x64xf32>
    tpu.vector_store %arg8[%1024, %c64_243], %1021 {strides = array<i32>} : memref<64x128xf32, #tpu.memory_space<vmem>>, vector<8x64xf32>,
    %c6_i32_244 = arith.constant 6 : i32
    %c7_i32_245 = arith.constant 7 : i32
    %1026 = arith.subi %c7_i32_245, %c6_i32_244 : i32
    %c8_i32_246 = arith.constant 8 : i32
    %1027 = arith.muli %c6_i32_244, %c8_i32_246 : i32
    %1028 = tpu.assume_multiple %1027, 8 : i32
    %c8_i32_247 = arith.constant 8 : i32
    %1029 = arith.muli %1026, %c8_i32_247 : i32
    %1030 = tpu.assume_multiple %1029, 8 : i32
    %1031 = tpu.concatenate %996, %1021 in 1 : vector<8x64xf32>, vector<8x64xf32> -> vector<8x128xf32>
    %1032 = arith.truncf %1031 : vector<8x128xf32> to vector<8x128xbf16>
    %c0_248 = arith.constant 0 : index
    %c0_249 = arith.constant 0 : index
    %1033 = vector.load %arg6[%c0_248, %c0_249] : memref<128x512xbf16, #tpu.memory_space<vmem>>, vector<128x512xbf16>
    %cst_250 = arith.constant dense<0.000000e+00> : vector<8x512xf32>
    %1034 = tpu.matmul %1032, %1033, %cst_250 {dimension_numbers = #tpu.dot_dimension_numbers<[1], [0], [0], [1], [0, 0, 1, 1], [], []>} : vector<8x128xbf16>, vector<128x512xbf16>, vector<8x512xf32> -> vector<8x512xf32>
    %1035 = arith.index_cast %1028 : i32 to index
    %c0_251 = arith.constant 0 : index
    %1036 = vector.load %arg13[%1035, %c0_251] : memref<64x512xf32, #tpu.memory_space<vmem>>, vector<8x256xf32>
    %1037 = vector.extract_strided_slice %1034 {offsets = [0, 0], sizes = [8, 256], strides = [1, 1]} : vector<8x512xf32> to vector<8x256xf32>
    %1038 = arith.addf %1036, %1037 : vector<8x256xf32>
    %1039 = arith.index_cast %1030 : i32 to index
    %c256_252 = arith.constant 256 : index
    %1040 = vector.load %arg13[%1039, %c256_252] : memref<64x512xf32, #tpu.memory_space<vmem>>, vector<8x256xf32>
    %1041 = vector.extract_strided_slice %1034 {offsets = [0, 256], sizes = [8, 256], strides = [1, 1]} : vector<8x512xf32> to vector<8x256xf32>
    %1042 = arith.addf %1040, %1041 : vector<8x256xf32>
    %1043 = vector.extract_strided_slice %1038 {offsets = [0, 0], sizes = [8, 64], strides = [1, 1]} : vector<8x256xf32> to vector<8x64xf32>
    %1044 = arith.negf %1043 : vector<8x64xf32>
    %1045 = math.exp %1044 : vector<8x64xf32>
    %cst_253 = arith.constant 1.000000e+00 : f32
    %1046 = vector.broadcast %cst_253 : f32 to vector<8x64xf32>
    %1047 = arith.addf %1046, %1045 : vector<8x64xf32>
    %1048 = arith.divf %1046, %1047 : vector<8x64xf32>
    %1049 = vector.extract_strided_slice %1038 {offsets = [0, 64], sizes = [8, 64], strides = [1, 1]} : vector<8x256xf32> to vector<8x64xf32>
    %1050 = arith.negf %1049 : vector<8x64xf32>
    %1051 = math.exp %1050 : vector<8x64xf32>
    %cst_254 = arith.constant 1.000000e+00 : f32
    %1052 = vector.broadcast %cst_254 : f32 to vector<8x64xf32>
    %1053 = arith.addf %1052, %1051 : vector<8x64xf32>
    %1054 = arith.divf %1052, %1053 : vector<8x64xf32>
    %1055 = vector.extract_strided_slice %1038 {offsets = [0, 128], sizes = [8, 64], strides = [1, 1]} : vector<8x256xf32> to vector<8x64xf32>
    %1056 = math.tanh %1055 : vector<8x64xf32>
    %1057 = vector.extract_strided_slice %1038 {offsets = [0, 192], sizes = [8, 64], strides = [1, 1]} : vector<8x256xf32> to vector<8x64xf32>
    %1058 = arith.negf %1057 : vector<8x64xf32>
    %1059 = math.exp %1058 : vector<8x64xf32>
    %cst_255 = arith.constant 1.000000e+00 : f32
    %1060 = vector.broadcast %cst_255 : f32 to vector<8x64xf32>
    %1061 = arith.addf %1060, %1059 : vector<8x64xf32>
    %1062 = arith.divf %1060, %1061 : vector<8x64xf32>
    %1063 = arith.mulf %1054, %994 : vector<8x64xf32>
    %1064 = arith.mulf %1048, %1056 : vector<8x64xf32>
    %1065 = arith.addf %1063, %1064 : vector<8x64xf32>
    %1066 = math.tanh %1065 : vector<8x64xf32>
    %1067 = arith.mulf %1062, %1066 : vector<8x64xf32>
    %1068 = vector.extract_strided_slice %1042 {offsets = [0, 0], sizes = [8, 64], strides = [1, 1]} : vector<8x256xf32> to vector<8x64xf32>
    %1069 = arith.negf %1068 : vector<8x64xf32>
    %1070 = math.exp %1069 : vector<8x64xf32>
    %cst_256 = arith.constant 1.000000e+00 : f32
    %1071 = vector.broadcast %cst_256 : f32 to vector<8x64xf32>
    %1072 = arith.addf %1071, %1070 : vector<8x64xf32>
    %1073 = arith.divf %1071, %1072 : vector<8x64xf32>
    %1074 = vector.extract_strided_slice %1042 {offsets = [0, 64], sizes = [8, 64], strides = [1, 1]} : vector<8x256xf32> to vector<8x64xf32>
    %1075 = arith.negf %1074 : vector<8x64xf32>
    %1076 = math.exp %1075 : vector<8x64xf32>
    %cst_257 = arith.constant 1.000000e+00 : f32
    %1077 = vector.broadcast %cst_257 : f32 to vector<8x64xf32>
    %1078 = arith.addf %1077, %1076 : vector<8x64xf32>
    %1079 = arith.divf %1077, %1078 : vector<8x64xf32>
    %1080 = vector.extract_strided_slice %1042 {offsets = [0, 128], sizes = [8, 64], strides = [1, 1]} : vector<8x256xf32> to vector<8x64xf32>
    %1081 = math.tanh %1080 : vector<8x64xf32>
    %1082 = vector.extract_strided_slice %1042 {offsets = [0, 192], sizes = [8, 64], strides = [1, 1]} : vector<8x256xf32> to vector<8x64xf32>
    %1083 = arith.negf %1082 : vector<8x64xf32>
    %1084 = math.exp %1083 : vector<8x64xf32>
    %cst_258 = arith.constant 1.000000e+00 : f32
    %1085 = vector.broadcast %cst_258 : f32 to vector<8x64xf32>
    %1086 = arith.addf %1085, %1084 : vector<8x64xf32>
    %1087 = arith.divf %1085, %1086 : vector<8x64xf32>
    %1088 = arith.mulf %1079, %1019 : vector<8x64xf32>
    %1089 = arith.mulf %1073, %1081 : vector<8x64xf32>
    %1090 = arith.addf %1088, %1089 : vector<8x64xf32>
    %1091 = math.tanh %1090 : vector<8x64xf32>
    %1092 = arith.mulf %1087, %1091 : vector<8x64xf32>
    %1093 = arith.index_cast %1028 : i32 to index
    %c0_259 = arith.constant 0 : index
    %1094 = vector.load %arg8[%1093, %c0_259] : memref<64x128xf32, #tpu.memory_space<vmem>>, vector<8x64xf32>
    tpu.vector_store %arg8[%1093, %c0_259], %1067 {strides = array<i32>} : memref<64x128xf32, #tpu.memory_space<vmem>>, vector<8x64xf32>,
    %1095 = arith.index_cast %1030 : i32 to index
    %c64_260 = arith.constant 64 : index
    %1096 = vector.load %arg8[%1095, %c64_260] : memref<64x128xf32, #tpu.memory_space<vmem>>, vector<8x64xf32>
    tpu.vector_store %arg8[%1095, %c64_260], %1092 {strides = array<i32>} : memref<64x128xf32, #tpu.memory_space<vmem>>, vector<8x64xf32>,
    %c7_i32_261 = arith.constant 7 : i32
    %c7_i32_262 = arith.constant 7 : i32
    %1097 = arith.subi %c7_i32_262, %c7_i32_261 : i32
    %c8_i32_263 = arith.constant 8 : i32
    %1098 = arith.muli %c7_i32_261, %c8_i32_263 : i32
    %1099 = tpu.assume_multiple %1098, 8 : i32
    %c8_i32_264 = arith.constant 8 : i32
    %1100 = arith.muli %1097, %c8_i32_264 : i32
    %1101 = tpu.assume_multiple %1100, 8 : i32
    %1102 = tpu.concatenate %1067, %1092 in 1 : vector<8x64xf32>, vector<8x64xf32> -> vector<8x128xf32>
    %1103 = arith.truncf %1102 : vector<8x128xf32> to vector<8x128xbf16>
    %c0_265 = arith.constant 0 : index
    %c0_266 = arith.constant 0 : index
    %1104 = vector.load %arg6[%c0_265, %c0_266] : memref<128x512xbf16, #tpu.memory_space<vmem>>, vector<128x512xbf16>
    %cst_267 = arith.constant dense<0.000000e+00> : vector<8x512xf32>
    %1105 = tpu.matmul %1103, %1104, %cst_267 {dimension_numbers = #tpu.dot_dimension_numbers<[1], [0], [0], [1], [0, 0, 1, 1], [], []>} : vector<8x128xbf16>, vector<128x512xbf16>, vector<8x512xf32> -> vector<8x512xf32>
    %1106 = arith.index_cast %1099 : i32 to index
    %c0_268 = arith.constant 0 : index
    %1107 = vector.load %arg13[%1106, %c0_268] : memref<64x512xf32, #tpu.memory_space<vmem>>, vector<8x256xf32>
    %1108 = vector.extract_strided_slice %1105 {offsets = [0, 0], sizes = [8, 256], strides = [1, 1]} : vector<8x512xf32> to vector<8x256xf32>
    %1109 = arith.addf %1107, %1108 : vector<8x256xf32>
    %1110 = arith.index_cast %1101 : i32 to index
    %c256_269 = arith.constant 256 : index
    %1111 = vector.load %arg13[%1110, %c256_269] : memref<64x512xf32, #tpu.memory_space<vmem>>, vector<8x256xf32>
    %1112 = vector.extract_strided_slice %1105 {offsets = [0, 256], sizes = [8, 256], strides = [1, 1]} : vector<8x512xf32> to vector<8x256xf32>
    %1113 = arith.addf %1111, %1112 : vector<8x256xf32>
    %1114 = vector.extract_strided_slice %1109 {offsets = [0, 0], sizes = [8, 64], strides = [1, 1]} : vector<8x256xf32> to vector<8x64xf32>
    %1115 = arith.negf %1114 : vector<8x64xf32>
    %1116 = math.exp %1115 : vector<8x64xf32>
    %cst_270 = arith.constant 1.000000e+00 : f32
    %1117 = vector.broadcast %cst_270 : f32 to vector<8x64xf32>
    %1118 = arith.addf %1117, %1116 : vector<8x64xf32>
    %1119 = arith.divf %1117, %1118 : vector<8x64xf32>
    %1120 = vector.extract_strided_slice %1109 {offsets = [0, 64], sizes = [8, 64], strides = [1, 1]} : vector<8x256xf32> to vector<8x64xf32>
    %1121 = arith.negf %1120 : vector<8x64xf32>
    %1122 = math.exp %1121 : vector<8x64xf32>
    %cst_271 = arith.constant 1.000000e+00 : f32
    %1123 = vector.broadcast %cst_271 : f32 to vector<8x64xf32>
    %1124 = arith.addf %1123, %1122 : vector<8x64xf32>
    %1125 = arith.divf %1123, %1124 : vector<8x64xf32>
    %1126 = vector.extract_strided_slice %1109 {offsets = [0, 128], sizes = [8, 64], strides = [1, 1]} : vector<8x256xf32> to vector<8x64xf32>
    %1127 = math.tanh %1126 : vector<8x64xf32>
    %1128 = vector.extract_strided_slice %1109 {offsets = [0, 192], sizes = [8, 64], strides = [1, 1]} : vector<8x256xf32> to vector<8x64xf32>
    %1129 = arith.negf %1128 : vector<8x64xf32>
    %1130 = math.exp %1129 : vector<8x64xf32>
    %cst_272 = arith.constant 1.000000e+00 : f32
    %1131 = vector.broadcast %cst_272 : f32 to vector<8x64xf32>
    %1132 = arith.addf %1131, %1130 : vector<8x64xf32>
    %1133 = arith.divf %1131, %1132 : vector<8x64xf32>
    %1134 = arith.mulf %1125, %1065 : vector<8x64xf32>
    %1135 = arith.mulf %1119, %1127 : vector<8x64xf32>
    %1136 = arith.addf %1134, %1135 : vector<8x64xf32>
    %1137 = math.tanh %1136 : vector<8x64xf32>
    %1138 = arith.mulf %1133, %1137 : vector<8x64xf32>
    %1139 = vector.extract_strided_slice %1113 {offsets = [0, 0], sizes = [8, 64], strides = [1, 1]} : vector<8x256xf32> to vector<8x64xf32>
    %1140 = arith.negf %1139 : vector<8x64xf32>
    %1141 = math.exp %1140 : vector<8x64xf32>
    %cst_273 = arith.constant 1.000000e+00 : f32
    %1142 = vector.broadcast %cst_273 : f32 to vector<8x64xf32>
    %1143 = arith.addf %1142, %1141 : vector<8x64xf32>
    %1144 = arith.divf %1142, %1143 : vector<8x64xf32>
    %1145 = vector.extract_strided_slice %1113 {offsets = [0, 64], sizes = [8, 64], strides = [1, 1]} : vector<8x256xf32> to vector<8x64xf32>
    %1146 = arith.negf %1145 : vector<8x64xf32>
    %1147 = math.exp %1146 : vector<8x64xf32>
    %cst_274 = arith.constant 1.000000e+00 : f32
    %1148 = vector.broadcast %cst_274 : f32 to vector<8x64xf32>
    %1149 = arith.addf %1148, %1147 : vector<8x64xf32>
    %1150 = arith.divf %1148, %1149 : vector<8x64xf32>
    %1151 = vector.extract_strided_slice %1113 {offsets = [0, 128], sizes = [8, 64], strides = [1, 1]} : vector<8x256xf32> to vector<8x64xf32>
    %1152 = math.tanh %1151 : vector<8x64xf32>
    %1153 = vector.extract_strided_slice %1113 {offsets = [0, 192], sizes = [8, 64], strides = [1, 1]} : vector<8x256xf32> to vector<8x64xf32>
    %1154 = arith.negf %1153 : vector<8x64xf32>
    %1155 = math.exp %1154 : vector<8x64xf32>
    %cst_275 = arith.constant 1.000000e+00 : f32
    %1156 = vector.broadcast %cst_275 : f32 to vector<8x64xf32>
    %1157 = arith.addf %1156, %1155 : vector<8x64xf32>
    %1158 = arith.divf %1156, %1157 : vector<8x64xf32>
    %1159 = arith.mulf %1150, %1090 : vector<8x64xf32>
    %1160 = arith.mulf %1144, %1152 : vector<8x64xf32>
    %1161 = arith.addf %1159, %1160 : vector<8x64xf32>
    %1162 = math.tanh %1161 : vector<8x64xf32>
    %1163 = arith.mulf %1158, %1162 : vector<8x64xf32>
    %1164 = arith.index_cast %1099 : i32 to index
    %c0_276 = arith.constant 0 : index
    %1165 = vector.load %arg8[%1164, %c0_276] : memref<64x128xf32, #tpu.memory_space<vmem>>, vector<8x64xf32>
    tpu.vector_store %arg8[%1164, %c0_276], %1138 {strides = array<i32>} : memref<64x128xf32, #tpu.memory_space<vmem>>, vector<8x64xf32>,
    %1166 = arith.index_cast %1101 : i32 to index
    %c64_277 = arith.constant 64 : index
    %1167 = vector.load %arg8[%1166, %c64_277] : memref<64x128xf32, #tpu.memory_space<vmem>>, vector<8x64xf32>
    tpu.vector_store %arg8[%1166, %c64_277], %1163 {strides = array<i32>} : memref<64x128xf32, #tpu.memory_space<vmem>>, vector<8x64xf32>,
    %c8_i32_278 = arith.constant 8 : i32
    %c0_279 = arith.constant 0 : index
    %c0_280 = arith.constant 0 : index
    %1168 = vector.load %arg9[%c0_279, %c0_280] : memref<16x64xf32, #tpu.memory_space<vmem>>, vector<8x64xf32>
    tpu.vector_store %arg9[%c0_279, %c0_280], %1138 {strides = array<i32>} : memref<16x64xf32, #tpu.memory_space<vmem>>, vector<8x64xf32>,
    %c8 = arith.constant 8 : index
    %c0_281 = arith.constant 0 : index
    %1169 = vector.load %arg9[%c8, %c0_281] : memref<16x64xf32, #tpu.memory_space<vmem>>, vector<8x64xf32>
    tpu.vector_store %arg9[%c8, %c0_281], %1163 {strides = array<i32>} : memref<16x64xf32, #tpu.memory_space<vmem>>, vector<8x64xf32>,
    %c0_282 = arith.constant 0 : index
    %c0_283 = arith.constant 0 : index
    %1170 = vector.load %arg10[%c0_282, %c0_283] : memref<16x64xf32, #tpu.memory_space<vmem>>, vector<8x64xf32>
    tpu.vector_store %arg10[%c0_282, %c0_283], %1136 {strides = array<i32>} : memref<16x64xf32, #tpu.memory_space<vmem>>, vector<8x64xf32>,
    %c8_284 = arith.constant 8 : index
    %c0_285 = arith.constant 0 : index
    %1171 = vector.load %arg10[%c8_284, %c0_285] : memref<16x64xf32, #tpu.memory_space<vmem>>, vector<8x64xf32>
    tpu.vector_store %arg10[%c8_284, %c0_285], %1161 {strides = array<i32>} : memref<16x64xf32, #tpu.memory_space<vmem>>, vector<8x64xf32>,
    return
  }
  func.func @transform_0(%arg0: i32) -> (i32, i32) {
    %c0_i32 = arith.constant 0 : i32
    %c0_i32_0 = arith.constant 0 : i32
    %c0_i32_1 = arith.constant 0 : i32
    return %c0_i32, %c0_i32_0 : i32, i32
  }
  func.func @transform_1(%arg0: i32) -> (i32, i32) {
    %c0_i32 = arith.constant 0 : i32
    %c0_i32_0 = arith.constant 0 : i32
    %c0_i32_1 = arith.constant 0 : i32
    return %c0_i32, %c0_i32_0 : i32, i32
  }
  func.func @transform_2(%arg0: i32) -> (i32, i32) {
    %c0_i32 = arith.constant 0 : i32
    %c0_i32_0 = arith.constant 0 : i32
    %c0_i32_1 = arith.constant 0 : i32
    return %c0_i32, %c0_i32_0 : i32, i32
  }
  func.func @transform_3(%arg0: i32) -> (i32, i32) {
    %c0_i32 = arith.constant 0 : i32
    %c0_i32_0 = arith.constant 0 : i32
    %c0_i32_1 = arith.constant 0 : i32
    return %c0_i32, %c0_i32_0 : i32, i32
  }
  func.func @transform_4(%arg0: i32) -> (i32, i32) {
    %c0_i32 = arith.constant 0 : i32
    %c0_i32_0 = arith.constant 0 : i32
    %c0_i32_1 = arith.constant 0 : i32
    return %c0_i32, %c0_i32_0 : i32, i32
  }
  func.func @transform_5(%arg0: i32) -> (i32, i32) {
    %c0_i32 = arith.constant 0 : i32
    %c0_i32_0 = arith.constant 0 : i32
    %c0_i32_1 = arith.constant 0 : i32
    return %c0_i32, %c0_i32_0 : i32, i32
  }
  func.func @transform_6(%arg0: i32) -> (i32, i32) {
    %c0_i32 = arith.constant 0 : i32
    %c0_i32_0 = arith.constant 0 : i32
    %c0_i32_1 = arith.constant 0 : i32
    return %c0_i32, %c0_i32_0 : i32, i32
  }
  func.func @transform_7(%arg0: i32) -> (i32, i32) {
    %c0_i32 = arith.constant 0 : i32
    %c0_i32_0 = arith.constant 0 : i32
    %c0_i32_1 = arith.constant 0 : i32
    return %c0_i32, %c0_i32_0 : i32, i32
  }
  func.func @transform_8(%arg0: i32) -> (i32, i32) {
    %c0_i32 = arith.constant 0 : i32
    %c0_i32_0 = arith.constant 0 : i32
    %c0_i32_1 = arith.constant 0 : i32
    return %c0_i32, %c0_i32_0 : i32, i32
  }
  func.func @transform_9(%arg0: i32) -> (i32, i32) {
    %c0_i32 = arith.constant 0 : i32
    %c0_i32_0 = arith.constant 0 : i32
    %c0_i32_1 = arith.constant 0 : i32
    return %c0_i32, %c0_i32_0 : i32, i32
  }
}

</mosaic_0001>

<bundles_post_ra>
// kernel: encoder_forward.1
= control target key start
LH: loop header
LB: loop body
LE: loop exit
PB: predicated region body
PF: predicated region fallthrough
CT: control target
= control target key end

     0   :  { %v19340_v3 = vmov 0   ;;  %vm148_vm0 = vcmask 130048   ;;  %vm9537_vm1 = vcmask 1048064   ;;  %vm9534_vm2 = vcmask 523264   ;;  %s19324_s1 = inlined_call_operand.vmem [shape: bf16[16,1024], index: 1, kind: input, shape index: {}]   ;;  %s19325_s0 = inlined_call_operand.vmem [shape: bf16[64,16], index: 0, kind: input, shape index: {}]   ;;  %s19326_s2 = inlined_call_operand.vmem [shape: bf16[256,1024], index: 2, kind: input, shape index: {}]   ;;  %s19327_s3 = inlined_call_operand.vmem [shape: f32[1,1024], index: 3, kind: input, shape index: {}]   ;;  %s19328_s4 = inlined_call_operand.vmem [shape: bf16[256,512], index: 4, kind: input, shape index: {}]   ;;  %s19329_s5 = inlined_call_operand.vmem [shape: bf16[128,512], index: 5, kind: input, shape index: {}]   ;;  %s19330_s6 = inlined_call_operand.vmem [shape: f32[1,512], index: 6, kind: input, shape index: {}]   ;;  %s19331_s7 = inlined_call_operand.vmem [shape: f32[64,128], index: 7, kind: output, shape index: {0}]   ;;  %s19332_s8 = inlined_call_operand.vmem [shape: f32[16,64], index: 8, kind: output, shape index: {1}]   ;;  %s19333_s9 = inlined_call_operand.vmem [shape: f32[16,64], index: 9, kind: output, shape index: {2}]  }
   0x1   :  { %v38_v0 = vld [vmem:[%s19324_s1] sm:$0xff]  ;;  %v39_v2 = vld [vmem:[%s19324_s1 + $0x8] sm:$0xff]  ;;  %193 = vmatprep.mubr.bf16.mxu0 %v19340_v3  ;;  %266 = vmatprep.mubr.bf16.mxu1 %v19340_v3  ;;  %v40_v9 = vld [vmem:[%s19324_s1 + $0x10] sm:$0xff] }
   0x2   :  { %v42_v1 = vld [vmem:[%s19324_s1 + $0x20] sm:$0xff]  ;;  %v43_v5 = vld [vmem:[%s19324_s1 + $0x28] sm:$0xff]  ;;  %v44_v10 = vld [vmem:[%s19324_s1 + $0x30] sm:$0xff] }
   0x3   :  { %v11955_v4 = vcombine.high %v38_v0, %v42_v1  ;;  %v11954_v6 = vcombine.low %v38_v0, %v42_v1  ;;  %v11957_v7 = vcombine.high %v39_v2, %v43_v5  ;;  %v11956_v8 = vcombine.low %v39_v2, %v43_v5  ;;  %v13427_v11 = vld [vmem:[%s19325_s0] sm:$0xff]   ;;  %v41_v14 = vld [vmem:[%s19324_s1 + $0x18] sm:$0xff]  ;;  %v575_v20 = vld [vmem:[%s19326_s2 + $0x1c8] sm:$0xff] }
   0x4   :  { %v11959_v12 = vcombine.high %v40_v9, %v44_v10  ;;  %v11958_v13 = vcombine.low %v40_v9, %v44_v10  ;;  %v45_v15 = vld [vmem:[%s19324_s1 + $0x38] sm:$0xff]  ;;  %v574_v17 = vld [vmem:[%s19326_s2 + $0x1c0] sm:$0xff]  ;;  %v579_v21 = vld [vmem:[%s19326_s2 + $0x1e8] sm:$0xff] }
   0x5   :  { %175 = vmatprep.subr.bf16.mxu0 %v11955_v4  ;;  %248 = vmatprep.subr.bf16.mxu1 %v11957_v7  ;;  %v11961_v16 = vcombine.high %v41_v14, %v45_v15  ;;  %v11960_v18 = vcombine.low %v41_v14, %v45_v15  ;;  %v578_v19 = vld [vmem:[%s19326_s2 + $0x1e0] sm:$0xff]  ;;  %v12037_v23 = vcombine.high %v575_v20, %v579_v21  ;;  %v13428_v24 = vld [vmem:[%s19325_s0 + $0x8] sm:$0xff]   ;;  %v14239_v25 = vld [vmem:[%s19325_s0 + $0x10] sm:$0xff]  }
   0x6   :  { %176 = vmatpush1.bf16.msra.mxu0 %v11954_v6  ;;  %249 = vmatpush1.bf16.msra.mxu1 %v11956_v8  ;;  %v12035_v22 = vcombine.high %v574_v17, %v578_v19  ;;  %v14250_v26 = vld [vmem:[%s19325_s0 + $0x18] sm:$0xff]   ;;  %v566_v27 = vld [vmem:[%s19326_s2 + $0x180] sm:$0xff]  ;;  %v567_v29 = vld [vmem:[%s19326_s2 + $0x188] sm:$0xff]  ;;  %v12034_v31 = vcombine.low %v574_v17, %v578_v19  ;;  %v12036_v32 = vcombine.low %v575_v20, %v579_v21 }
   0x7   :  { %321 = vmatprep.subr.bf16.mxu0 %v11959_v12  ;;  %394 = vmatprep.subr.bf16.mxu1 %v11961_v16  ;;  %v570_v28 = vld [vmem:[%s19326_s2 + $0x1a0] sm:$0xff]  ;;  %v571_v30 = vld [vmem:[%s19326_s2 + $0x1a8] sm:$0xff] }
   0x8   :  { %v12027_v33 = vcombine.high %v566_v27, %v570_v28  ;;  %v12029_v34 = vcombine.high %v567_v29, %v571_v30  ;;  %v558_v35 = vld [vmem:[%s19326_s2 + $0x140] sm:$0xff]  ;;  %v559_v37 = vld [vmem:[%s19326_s2 + $0x148] sm:$0xff]  ;;  %v12026_v39 = vcombine.low %v566_v27, %v570_v28  ;;  %v12028_v40 = vcombine.low %v567_v29, %v571_v30 }
   0x9   :  { %11962 = vmatmul.mubr.msk.bf16.vlgmr.msra.gmra.mxu0 %vm148_vm0, %v13427_v11  ;;  %11966 = vmatmul.mubr.msk.bf16.vlgmr.msra.gmra.mxu1 %vm148_vm0, %v13427_v11  ;;  %v562_v36 = vld [vmem:[%s19326_s2 + $0x160] sm:$0xff]  ;;  %v563_v38 = vld [vmem:[%s19326_s2 + $0x168] sm:$0xff] }
   0xa   :  { %322 = vmatpush1.bf16.msra.mxu0 %v11958_v13  ;;  %203 = vmatprep.mubr.bf16.mxu0 %v19340_v3  ;;  %v12019_v41 = vcombine.high %v558_v35, %v562_v36  ;;  %v12021_v42 = vcombine.high %v559_v37, %v563_v38  ;;  %v550_v43 = vld [vmem:[%s19326_s2 + $0x100] sm:$0xff]  ;;  %v551_v45 = vld [vmem:[%s19326_s2 + $0x108] sm:$0xff]  ;;  %v12018_v47 = vcombine.low %v558_v35, %v562_v36 }
   0xb   :  { %276 = vmatprep.mubr.bf16.mxu1 %v19340_v3  ;;  %1286 = vmatprep.subr.bf16.mxu0 %v12035_v22  ;;  %v554_v44 = vld [vmem:[%s19326_s2 + $0x120] sm:$0xff]  ;;  %v555_v46 = vld [vmem:[%s19326_s2 + $0x128] sm:$0xff]  ;;  %v12020_v48 = vcombine.low %v559_v37, %v563_v38 }
   0xc   :  { %395 = vmatpush1.bf16.msra.mxu1 %v11960_v18  ;;  %v12011_v49 = vcombine.high %v550_v43, %v554_v44  ;;  %v12013_v50 = vcombine.high %v551_v45, %v555_v46  ;;  %v542_v51 = vld [vmem:[%s19326_s2 + $0xc0] sm:$0xff]  ;;  %v543_v53 = vld [vmem:[%s19326_s2 + $0xc8] sm:$0xff]  ;;  %v12010_v55 = vcombine.low %v550_v43, %v554_v44  ;;  %v12012_v56 = vcombine.low %v551_v45, %v555_v46 }
   0xd   :  { %1327 = vmatprep.subr.bf16.mxu1 %v12037_v23  ;;  %v546_v52 = vld [vmem:[%s19326_s2 + $0xe0] sm:$0xff]  ;;  %v547_v54 = vld [vmem:[%s19326_s2 + $0xe8] sm:$0xff] }
   0xe   :  { %v12003_v57 = vcombine.high %v542_v51, %v546_v52  ;;  %v12005_v58 = vcombine.high %v543_v53, %v547_v54  ;;  %v534_v59 = vld [vmem:[%s19326_s2 + $0x80] sm:$0xff]  ;;  %v535_v61 = vld [vmem:[%s19326_s2 + $0x88] sm:$0xff]  ;;  %v12002_v63 = vcombine.low %v542_v51, %v546_v52  ;;  %v12004_v0 = vcombine.low %v543_v53, %v547_v54 }
   0xf   :  { %v538_v60 = vld [vmem:[%s19326_s2 + $0xa0] sm:$0xff]  ;;  %v539_v62 = vld [vmem:[%s19326_s2 + $0xa8] sm:$0xff] }
  0x10   :  { %v11995_v1 = vcombine.high %v534_v59, %v538_v60  ;;  %v11997_v2 = vcombine.high %v535_v61, %v539_v62  ;;  %v526_v4 = vld [vmem:[%s19326_s2 + $0x40] sm:$0xff]  ;;  %v527_v6 = vld [vmem:[%s19326_s2 + $0x48] sm:$0xff]  ;;  %v11994_v8 = vcombine.low %v534_v59, %v538_v60  ;;  %v11996_v9 = vcombine.low %v535_v61, %v539_v62 }
  0x11   :  { %11963 = vmatmul.mubr.msk.bf16.gmra.mxu0 %vm148_vm0, %v13428_v24  ;;  %11967 = vmatmul.mubr.msk.bf16.gmra.mxu1 %vm148_vm0, %v13428_v24  ;;  %v530_v5 = vld [vmem:[%s19326_s2 + $0x60] sm:$0xff]  ;;  %v531_v7 = vld [vmem:[%s19326_s2 + $0x68] sm:$0xff] }
  0x12   :  { %213 = vmatprep.mubr.bf16.mxu0 %v19340_v3  ;;  %286 = vmatprep.mubr.bf16.mxu1 %v19340_v3  ;;  %v11987_v10 = vcombine.high %v526_v4, %v530_v5  ;;  %v518_v12 = vld [vmem:[%s19326_s2] sm:$0xff]  ;;  %v519_v14 = vld [vmem:[%s19326_s2 + $0x8] sm:$0xff]  ;;  %v11986_v16 = vcombine.low %v526_v4, %v530_v5  ;;  %v11988_v17 = vcombine.low %v527_v6, %v531_v7 }
  0x13   :  { %v522_v13 = vld [vmem:[%s19326_s2 + $0x20] sm:$0xff]  ;;  %v523_v15 = vld [vmem:[%s19326_s2 + $0x28] sm:$0xff] }
  0x14   :  { %v11979_v18 = vcombine.high %v518_v12, %v522_v13  ;;  %v11981_v19 = vcombine.high %v519_v14, %v523_v15  ;;  %v638_v20 = vld [vmem:[%s19326_s2 + $0x3c0] sm:$0xff]  ;;  %v639_v22 = vld [vmem:[%s19326_s2 + $0x3c8] sm:$0xff] }
  0x15   :  { %v642_v21 = vld [vmem:[%s19326_s2 + $0x3e0] sm:$0xff]  ;;  %v643_v23 = vld [vmem:[%s19326_s2 + $0x3e8] sm:$0xff] }
  0x16   :  { %v12099_v27 = vcombine.high %v638_v20, %v642_v21  ;;  %v12101_v28 = vcombine.high %v639_v22, %v643_v23  ;;  %v630_v29 = vld [vmem:[%s19326_s2 + $0x380] sm:$0xff] }
  0x17   :  { %v634_v30 = vld [vmem:[%s19326_s2 + $0x3a0] sm:$0xff] }
  0x18   :  { %v12091_v35 = vcombine.high %v630_v29, %v634_v30  ;;  %v622_v37 = vld [vmem:[%s19326_s2 + $0x340] sm:$0xff] }
  0x19   :  { %11964 = vmatmul.mubr.msk.bf16.gmra.mxu0 %vm148_vm0, %v14239_v25  ;;  %11968 = vmatmul.mubr.msk.bf16.gmra.mxu1 %vm148_vm0, %v14239_v25  ;;  %v626_v38 = vld [vmem:[%s19326_s2 + $0x360] sm:$0xff] }
  0x1a   :  { %223 = vmatprep.mubr.bf16.mxu0 %v19340_v3  ;;  %296 = vmatprep.mubr.bf16.mxu1 %v19340_v3  ;;  %v12083_v43 = vcombine.high %v622_v37, %v626_v38  ;;  %v614_v45 = vld [vmem:[%s19326_s2 + $0x300] sm:$0xff] }
  0x1b   :  { %v618_v46 = vld [vmem:[%s19326_s2 + $0x320] sm:$0xff] }
  0x1c   :  { %v12075_v51 = vcombine.high %v614_v45, %v618_v46  ;;  %v606_v53 = vld [vmem:[%s19326_s2 + $0x2c0] sm:$0xff] }
  0x1d   :  { %v610_v54 = vld [vmem:[%s19326_s2 + $0x2e0] sm:$0xff] }
  0x1e   :  { %v12067_v59 = vcombine.high %v606_v53, %v610_v54  ;;  %v598_v61 = vld [vmem:[%s19326_s2 + $0x280] sm:$0xff] }
  0x1f   :  { %v602_v62 = vld [vmem:[%s19326_s2 + $0x2a0] sm:$0xff] }
  0x20   :  { %v12059_v4 = vcombine.high %v598_v61, %v602_v62 }
  0x21   :  { %11965 = vmatmul.mubr.msk.bf16.gmra.mxu0 %vm148_vm0, %v14250_v26  ;;  %11969 = vmatmul.mubr.msk.bf16.gmra.mxu1 %vm148_vm0, %v14250_v26 }
  0x22   :  { %339 = vmatprep.mubr.bf16.mxu0 %v19340_v3  ;;  %412 = vmatprep.mubr.bf16.mxu1 %v19340_v3 }
  0x29   :  { %11970 = vmatmul.mubr.msk.bf16.vlgmr.msra.gmra.mxu0 %vm148_vm0, %v13427_v11  ;;  %11974 = vmatmul.mubr.msk.bf16.vlgmr.msra.gmra.mxu1 %vm148_vm0, %v13427_v11  ;;  %v11989_v11 = vcombine.high %v527_v6, %v531_v7  ;;  %v590_v6 = vld [vmem:[%s19326_s2 + $0x240] sm:$0xff] }
  0x2a   :  { %1287 = vmatpush1.bf16.msra.mxu0 %v12034_v31  ;;  %1328 = vmatpush1.bf16.msra.mxu1 %v12036_v32  ;;  %v19338_v31 = vmov 0.0|0.0   ;;  %v635_v32 = vld [vmem:[%s19326_s2 + $0x3a8] sm:$0xff]  ;;  %v594_v7 = vld [vmem:[%s19326_s2 + $0x260] sm:$0xff] }
  0x2b   :  { %1288 = vmatprep.subr.bf16.mxu0 %v12027_v33  ;;  %1329 = vmatprep.subr.bf16.mxu1 %v12029_v34  ;;  %v12098_v33 = vcombine.low %v638_v20, %v642_v21  ;;  %v12100_v34 = vcombine.low %v639_v22, %v643_v23  ;;  %v576_v22 = vld [vmem:[%s19326_s2 + $0x1d0] sm:$0xff] }
  0x2c   :  { %349 = vmatprep.mubr.bf16.mxu0 %v19340_v3  ;;  %422 = vmatprep.mubr.bf16.mxu1 %v19340_v3  ;;  %v580_v23 = vld [vmem:[%s19326_s2 + $0x1f0] sm:$0xff] }
  0x2e   :  { %1289 = vmatpush1.bf16.msra.mxu0 %v12026_v39  ;;  %1330 = vmatpush1.bf16.msra.mxu1 %v12028_v40  ;;  %v623_v39 = vld [vmem:[%s19326_s2 + $0x348] sm:$0xff] }
  0x2f   :  { %1290 = vmatprep.subr.bf16.mxu0 %v12019_v41  ;;  %1331 = vmatprep.subr.bf16.mxu1 %v12021_v42  ;;  %v627_v40 = vld [vmem:[%s19326_s2 + $0x368] sm:$0xff]  ;;  %v12090_v41 = vcombine.low %v630_v29, %v634_v30  ;;  %v12039_v29 = vcombine.high %v576_v22, %v580_v23 }
  0x30   :  { %v12085_v44 = vcombine.high %v623_v39, %v627_v40 }
  0x31   :  { %11971 = vmatmul.mubr.msk.bf16.gmra.mxu0 %vm148_vm0, %v13428_v24  ;;  %11975 = vmatmul.mubr.msk.bf16.gmra.mxu1 %vm148_vm0, %v13428_v24  ;;  %v11978_v24 = vcombine.low %v518_v12, %v522_v13  ;;  %v12051_v12 = vcombine.high %v590_v6, %v594_v7 }
  0x32   :  { %1291 = vmatpush1.bf16.msra.mxu0 %v12018_v47  ;;  %1332 = vmatpush1.bf16.msra.mxu1 %v12020_v48  ;;  %v615_v47 = vld [vmem:[%s19326_s2 + $0x308] sm:$0xff] }
  0x33   :  { %1292 = vmatprep.subr.bf16.mxu0 %v12011_v49  ;;  %1333 = vmatprep.subr.bf16.mxu1 %v12013_v50  ;;  %v619_v48 = vld [vmem:[%s19326_s2 + $0x328] sm:$0xff]  ;;  %v12082_v49 = vcombine.low %v622_v37, %v626_v38  ;;  %v12084_v50 = vcombine.low %v623_v39, %v627_v40  ;;  %v560_v39 = vld [vmem:[%s19326_s2 + $0x150] sm:$0xff] }
  0x34   :  { %359 = vmatprep.mubr.bf16.mxu0 %v19340_v3  ;;  %432 = vmatprep.mubr.bf16.mxu1 %v19340_v3  ;;  %v12077_v52 = vcombine.high %v615_v47, %v619_v48  ;;  %v564_v40 = vld [vmem:[%s19326_s2 + $0x170] sm:$0xff] }
  0x36   :  { %1293 = vmatpush1.bf16.msra.mxu0 %v12010_v55  ;;  %1334 = vmatpush1.bf16.msra.mxu1 %v12012_v56  ;;  %v607_v55 = vld [vmem:[%s19326_s2 + $0x2c8] sm:$0xff] }
  0x37   :  { %1294 = vmatprep.subr.bf16.mxu0 %v12003_v57  ;;  %1335 = vmatprep.subr.bf16.mxu1 %v12005_v58  ;;  %v611_v56 = vld [vmem:[%s19326_s2 + $0x2e8] sm:$0xff]  ;;  %v12074_v57 = vcombine.low %v614_v45, %v618_v46  ;;  %v12076_v58 = vcombine.low %v615_v47, %v619_v48  ;;  %v12023_v45 = vcombine.high %v560_v39, %v564_v40  ;;  %v552_v47 = vld [vmem:[%s19326_s2 + $0x110] sm:$0xff] }
  0x38   :  { %v12069_v60 = vcombine.high %v607_v55, %v611_v56  ;;  %v556_v48 = vld [vmem:[%s19326_s2 + $0x130] sm:$0xff] }
  0x39   :  { %11972 = vmatmul.mubr.msk.bf16.gmra.mxu0 %vm148_vm0, %v14239_v25  ;;  %11976 = vmatmul.mubr.msk.bf16.gmra.mxu1 %vm148_vm0, %v14239_v25  ;;  %v11980_v25 = vcombine.low %v519_v14, %v523_v15  ;;  %v582_v14 = vld [vmem:[%s19326_s2 + $0x200] sm:$0xff] }
  0x3a   :  { %1295 = vmatpush1.bf16.msra.mxu0 %v12002_v63  ;;  %1336 = vmatpush1.bf16.msra.mxu1 %v12004_v0  ;;  %v599_v63 = vld [vmem:[%s19326_s2 + $0x288] sm:$0xff]  ;;  %v586_v15 = vld [vmem:[%s19326_s2 + $0x220] sm:$0xff] }
  0x3b   :  { %1296 = vmatprep.subr.bf16.mxu0 %v11995_v1  ;;  %1337 = vmatprep.subr.bf16.mxu1 %v11997_v2  ;;  %v603_v0 = vld [vmem:[%s19326_s2 + $0x2a8] sm:$0xff]  ;;  %v12066_v1 = vcombine.low %v606_v53, %v610_v54  ;;  %v12068_v2 = vcombine.low %v607_v55, %v611_v56  ;;  %v12043_v20 = vcombine.high %v582_v14, %v586_v15  ;;  %v544_v55 = vld [vmem:[%s19326_s2 + $0xd0] sm:$0xff] }
  0x3c   :  { %369 = vmatprep.mubr.bf16.mxu0 %v19340_v3  ;;  %442 = vmatprep.mubr.bf16.mxu1 %v19340_v3  ;;  %v12061_v5 = vcombine.high %v599_v63, %v603_v0  ;;  %v12015_v53 = vcombine.high %v552_v47, %v556_v48  ;;  %v548_v56 = vld [vmem:[%s19326_s2 + $0xf0] sm:$0xff] }
  0x3e   :  { %1297 = vmatpush1.bf16.msra.mxu0 %v11994_v8  ;;  %1338 = vmatpush1.bf16.msra.mxu1 %v11996_v9  ;;  %v591_v8 = vld [vmem:[%s19326_s2 + $0x248] sm:$0xff] }
  0x3f   :  { %1298 = vmatprep.subr.bf16.mxu0 %v11987_v10  ;;  %1339 = vmatprep.subr.bf16.mxu1 %v11989_v11  ;;  %v595_v9 = vld [vmem:[%s19326_s2 + $0x268] sm:$0xff]  ;;  %v12058_v10 = vcombine.low %v598_v61, %v602_v62  ;;  %v12060_v11 = vcombine.low %v599_v63, %v603_v0  ;;  %v12007_v61 = vcombine.high %v544_v55, %v548_v56  ;;  %v536_v63 = vld [vmem:[%s19326_s2 + $0x90] sm:$0xff] }
  0x40   :  { %v12053_v13 = vcombine.high %v591_v8, %v595_v9  ;;  %v540_v0 = vld [vmem:[%s19326_s2 + $0xb0] sm:$0xff] }
  0x41   :  { %11973 = vmatmul.mubr.msk.bf16.gmra.mxu0 %vm148_vm0, %v14250_v26  ;;  %11977 = vmatmul.mubr.msk.bf16.gmra.mxu1 %vm148_vm0, %v14250_v26  ;;  %v631_v26 = vld [vmem:[%s19326_s2 + $0x388] sm:$0xff] }
  0x42   :  { %1299 = vmatpush1.bf16.msra.mxu0 %v11986_v16  ;;  %1340 = vmatpush1.bf16.msra.mxu1 %v11988_v17  ;;  %v12093_v36 = vcombine.high %v631_v26, %v635_v32  ;;  %v12092_v42 = vcombine.low %v631_v26, %v635_v32  ;;  %v583_v16 = vld [vmem:[%s19326_s2 + $0x208] sm:$0xff]  ;;  %v568_v26 = vld [vmem:[%s19326_s2 + $0x190] sm:$0xff] }
  0x43   :  { %1300 = vmatprep.subr.bf16.mxu0 %v11979_v18  ;;  %1341 = vmatprep.subr.bf16.mxu1 %v11981_v19  ;;  %v587_v17 = vld [vmem:[%s19326_s2 + $0x228] sm:$0xff]  ;;  %v12050_v18 = vcombine.low %v590_v6, %v594_v7  ;;  %v12052_v19 = vcombine.low %v591_v8, %v595_v9  ;;  %v572_v32 = vld [vmem:[%s19326_s2 + $0x1b0] sm:$0xff]  ;;  %v11999_v6 = vcombine.high %v536_v63, %v540_v0 }
  0x44   :  { %1318 = vmatprep.mubr.bf16.mxu0 %v19338_v31  ;;  %1359 = vmatprep.mubr.bf16.mxu1 %v19338_v31  ;;  %v12045_v21 = vcombine.high %v583_v16, %v587_v17  ;;  %v12031_v37 = vcombine.high %v568_v26, %v572_v32  ;;  %v528_v8 = vld [vmem:[%s19326_s2 + $0x50] sm:$0xff] }
  0x45   :  { %v532_v9 = vld [vmem:[%s19326_s2 + $0x70] sm:$0xff] }
  0x46   :  { %1301 = vmatpush1.bf16.msra.mxu0 %v11978_v24  ;;  %1342 = vmatpush1.bf16.msra.mxu1 %v11980_v25  ;;  %v577_v24 = vld [vmem:[%s19326_s2 + $0x1d8] sm:$0xff] }
  0x47   :  { %1302 = vmatprep.subr.bf16.mxu0 %v12099_v27  ;;  %1343 = vmatprep.subr.bf16.mxu1 %v12101_v28  ;;  %v581_v25 = vld [vmem:[%s19326_s2 + $0x1f8] sm:$0xff]  ;;  %v12042_v27 = vcombine.low %v582_v14, %v586_v15  ;;  %v12044_v28 = vcombine.low %v583_v16, %v587_v17  ;;  %v11991_v14 = vcombine.high %v528_v8, %v532_v9  ;;  %v520_v16 = vld [vmem:[%s19326_s2 + $0x10] sm:$0xff] }
  0x48   :  { %v12041_v30 = vcombine.high %v577_v24, %v581_v25  ;;  %v524_v17 = vld [vmem:[%s19326_s2 + $0x30] sm:$0xff] }
  0x4a   :  { %1303 = vmatpush2.bf16.msra.mxu0 %v12098_v33  ;;  %1344 = vmatpush2.bf16.msra.mxu1 %v12100_v34  ;;  %v569_v33 = vld [vmem:[%s19326_s2 + $0x198] sm:$0xff] }
  0x4b   :  { %1304 = vmatprep.subr.bf16.mxu0 %v12091_v35  ;;  %1345 = vmatprep.subr.bf16.mxu1 %v12093_v36  ;;  %v573_v34 = vld [vmem:[%s19326_s2 + $0x1b8] sm:$0xff]  ;;  %v12038_v35 = vcombine.low %v576_v22, %v580_v23  ;;  %v12040_v36 = vcombine.low %v577_v24, %v581_v25  ;;  %v11983_v22 = vcombine.high %v520_v16, %v524_v17  ;;  %v640_v24 = vld [vmem:[%s19326_s2 + $0x3d0] sm:$0xff] }
  0x4c   :  { %v12033_v38 = vcombine.high %v569_v33, %v573_v34  ;;  %v644_v25 = vld [vmem:[%s19326_s2 + $0x3f0] sm:$0xff] }
  0x4e   :  { %1305 = vmatpush2.bf16.msra.mxu0 %v12090_v41  ;;  %1346 = vmatpush2.bf16.msra.mxu1 %v12092_v42  ;;  %v561_v41 = vld [vmem:[%s19326_s2 + $0x158] sm:$0xff] }
  0x4f   :  { %1306 = vmatprep.subr.bf16.mxu0 %v12083_v43  ;;  %1347 = vmatprep.subr.bf16.mxu1 %v12085_v44  ;;  %v565_v42 = vld [vmem:[%s19326_s2 + $0x178] sm:$0xff]  ;;  %v12030_v43 = vcombine.low %v568_v26, %v572_v32  ;;  %v12032_v44 = vcombine.low %v569_v33, %v573_v34  ;;  %v12103_v26 = vcombine.high %v640_v24, %v644_v25  ;;  %v632_v33 = vld [vmem:[%s19326_s2 + $0x390] sm:$0xff] }
  0x50   :  { %v12025_v46 = vcombine.high %v561_v41, %v565_v42  ;;  %v636_v34 = vld [vmem:[%s19326_s2 + $0x3b0] sm:$0xff] }
  0x52   :  { %1307 = vmatpush2.bf16.msra.mxu0 %v12082_v49  ;;  %1348 = vmatpush2.bf16.msra.mxu1 %v12084_v50  ;;  %v553_v49 = vld [vmem:[%s19326_s2 + $0x118] sm:$0xff] }
  0x53   :  { %1308 = vmatprep.subr.bf16.mxu0 %v12075_v51  ;;  %1349 = vmatprep.subr.bf16.mxu1 %v12077_v52  ;;  %v557_v50 = vld [vmem:[%s19326_s2 + $0x138] sm:$0xff]  ;;  %v12022_v51 = vcombine.low %v560_v39, %v564_v40  ;;  %v12024_v52 = vcombine.low %v561_v41, %v565_v42  ;;  %v12095_v39 = vcombine.high %v632_v33, %v636_v34  ;;  %v624_v41 = vld [vmem:[%s19326_s2 + $0x350] sm:$0xff] }
  0x54   :  { %v12017_v54 = vcombine.high %v553_v49, %v557_v50  ;;  %v628_v42 = vld [vmem:[%s19326_s2 + $0x370] sm:$0xff] }
  0x56   :  { %1309 = vmatpush2.bf16.msra.mxu0 %v12074_v57  ;;  %1350 = vmatpush2.bf16.msra.mxu1 %v12076_v58  ;;  %v545_v57 = vld [vmem:[%s19326_s2 + $0xd8] sm:$0xff] }
  0x57   :  { %1310 = vmatprep.subr.bf16.mxu0 %v12067_v59  ;;  %1351 = vmatprep.subr.bf16.mxu1 %v12069_v60  ;;  %v549_v58 = vld [vmem:[%s19326_s2 + $0xf8] sm:$0xff]  ;;  %v12014_v59 = vcombine.low %v552_v47, %v556_v48  ;;  %v12016_v60 = vcombine.low %v553_v49, %v557_v50  ;;  %v12087_v47 = vcombine.high %v624_v41, %v628_v42  ;;  %v616_v49 = vld [vmem:[%s19326_s2 + $0x310] sm:$0xff] }
  0x58   :  { %v12009_v62 = vcombine.high %v545_v57, %v549_v58  ;;  %v620_v50 = vld [vmem:[%s19326_s2 + $0x330] sm:$0xff] }
  0x5a   :  { %1311 = vmatpush2.bf16.msra.mxu0 %v12066_v1  ;;  %1352 = vmatpush2.bf16.msra.mxu1 %v12068_v2  ;;  %v537_v1 = vld [vmem:[%s19326_s2 + $0x98] sm:$0xff] }
  0x5b   :  { %1312 = vmatprep.subr.bf16.mxu0 %v12059_v4  ;;  %1353 = vmatprep.subr.bf16.mxu1 %v12061_v5  ;;  %v541_v2 = vld [vmem:[%s19326_s2 + $0xb8] sm:$0xff]  ;;  %v12006_v4 = vcombine.low %v544_v55, %v548_v56  ;;  %v12008_v5 = vcombine.low %v545_v57, %v549_v58  ;;  %v12079_v55 = vcombine.high %v616_v49, %v620_v50  ;;  %v608_v57 = vld [vmem:[%s19326_s2 + $0x2d0] sm:$0xff] }
  0x5c   :  { %v12001_v7 = vcombine.high %v537_v1, %v541_v2  ;;  %v612_v58 = vld [vmem:[%s19326_s2 + $0x2f0] sm:$0xff] }
  0x5e   :  { %1313 = vmatpush2.bf16.msra.mxu0 %v12058_v10  ;;  %1354 = vmatpush2.bf16.msra.mxu1 %v12060_v11  ;;  %v529_v10 = vld [vmem:[%s19326_s2 + $0x58] sm:$0xff] }
  0x5f   :  { %1314 = vmatprep.subr.bf16.mxu0 %v12051_v12  ;;  %1355 = vmatprep.subr.bf16.mxu1 %v12053_v13  ;;  %v533_v11 = vld [vmem:[%s19326_s2 + $0x78] sm:$0xff]  ;;  %v11998_v12 = vcombine.low %v536_v63, %v540_v0  ;;  %v12000_v13 = vcombine.low %v537_v1, %v541_v2  ;;  %v12071_v63 = vcombine.high %v608_v57, %v612_v58  ;;  %v600_v1 = vld [vmem:[%s19326_s2 + $0x290] sm:$0xff] }
  0x60   :  { %v11993_v15 = vcombine.high %v529_v10, %v533_v11  ;;  %v604_v2 = vld [vmem:[%s19326_s2 + $0x2b0] sm:$0xff] }
  0x62   :  { %1315 = vmatpush2.bf16.msra.mxu0 %v12050_v18  ;;  %1356 = vmatpush2.bf16.msra.mxu1 %v12052_v19  ;;  %v521_v18 = vld [vmem:[%s19326_s2 + $0x18] sm:$0xff] }
  0x63   :  { %1316 = vmatprep.subr.bf16.mxu0 %v12043_v20  ;;  %1357 = vmatprep.subr.bf16.mxu1 %v12045_v21  ;;  %v525_v19 = vld [vmem:[%s19326_s2 + $0x38] sm:$0xff]  ;;  %v11990_v20 = vcombine.low %v528_v8, %v532_v9  ;;  %v11992_v21 = vcombine.low %v529_v10, %v533_v11  ;;  %v12063_v8 = vcombine.high %v600_v1, %v604_v2  ;;  %v592_v10 = vld [vmem:[%s19326_s2 + $0x250] sm:$0xff] }
  0x64   :  { %v11985_v23 = vcombine.high %v521_v18, %v525_v19  ;;  %v596_v11 = vld [vmem:[%s19326_s2 + $0x270] sm:$0xff] }
  0x66   :  { %1317 = vmatpush2.bf16.msra.mxu0 %v12042_v27  ;;  %1358 = vmatpush2.bf16.msra.mxu1 %v12044_v28  ;;  %v641_v27 = vld [vmem:[%s19326_s2 + $0x3d8] sm:$0xff] }
  0x67   :  { %1368 = vmatprep.subr.bf16.mxu0 %v12039_v29  ;;  %1409 = vmatprep.subr.bf16.mxu1 %v12041_v30  ;;  %v645_v28 = vld [vmem:[%s19326_s2 + $0x3f8] sm:$0xff]  ;;  %v11982_v29 = vcombine.low %v520_v16, %v524_v17  ;;  %v11984_v30 = vcombine.low %v521_v18, %v525_v19  ;;  %v12055_v16 = vcombine.high %v592_v10, %v596_v11  ;;  %v584_v18 = vld [vmem:[%s19326_s2 + $0x210] sm:$0xff] }
  0x68   :  { %v12105_v32 = vcombine.high %v641_v27, %v645_v28  ;;  %v588_v19 = vld [vmem:[%s19326_s2 + $0x230] sm:$0xff] }
  0x69   :  { %1319 = vmatmul.mubr.bf16.vlgmr.msra.gmra.mxu0 %v19338_v31  ;;  %1360 = vmatmul.mubr.bf16.vlgmr.msra.gmra.mxu1 %v19338_v31 }
  0x6a   :  { %1369 = vmatpush1.bf16.msra.mxu0 %v12038_v35  ;;  %1410 = vmatpush1.bf16.msra.mxu1 %v12040_v36  ;;  %v633_v35 = vld [vmem:[%s19326_s2 + $0x398] sm:$0xff] }
  0x6b   :  { %1370 = vmatprep.subr.bf16.mxu0 %v12031_v37  ;;  %1411 = vmatprep.subr.bf16.mxu1 %v12033_v38  ;;  %v637_v36 = vld [vmem:[%s19326_s2 + $0x3b8] sm:$0xff]  ;;  %v12102_v37 = vcombine.low %v640_v24, %v644_v25  ;;  %v12104_v38 = vcombine.low %v641_v27, %v645_v28  ;;  %v12047_v24 = vcombine.high %v584_v18, %v588_v19 }
  0x6c   :  { %1400 = vmatprep.mubr.bf16.mxu0 %v19338_v31  ;;  %1441 = vmatprep.mubr.bf16.mxu1 %v19338_v31  ;;  %v12097_v40 = vcombine.high %v633_v35, %v637_v36  ;;  %v12046_v27 = vcombine.low %v584_v18, %v588_v19 }
  0x6e   :  { %1371 = vmatpush1.bf16.msra.mxu0 %v12030_v43  ;;  %1412 = vmatpush1.bf16.msra.mxu1 %v12032_v44  ;;  %v625_v43 = vld [vmem:[%s19326_s2 + $0x358] sm:$0xff] }
  0x6f   :  { %1372 = vmatprep.subr.bf16.mxu0 %v12023_v45  ;;  %1413 = vmatprep.subr.bf16.mxu1 %v12025_v46  ;;  %v629_v44 = vld [vmem:[%s19326_s2 + $0x378] sm:$0xff]  ;;  %v12094_v45 = vcombine.low %v632_v33, %v636_v34  ;;  %v12096_v46 = vcombine.low %v633_v35, %v637_v36  ;;  %v14663_v33 = vld [vmem:[%s19327_s3] sm:$0xff] }
  0x70   :  { %v12089_v48 = vcombine.high %v625_v43, %v629_v44 }
  0x72   :  { %1373 = vmatpush1.bf16.msra.mxu0 %v12022_v51  ;;  %1414 = vmatpush1.bf16.msra.mxu1 %v12024_v52  ;;  %v617_v51 = vld [vmem:[%s19326_s2 + $0x318] sm:$0xff] }
  0x73   :  { %1374 = vmatprep.subr.bf16.mxu0 %v12015_v53  ;;  %1415 = vmatprep.subr.bf16.mxu1 %v12017_v54  ;;  %v621_v52 = vld [vmem:[%s19326_s2 + $0x338] sm:$0xff]  ;;  %v12086_v53 = vcombine.low %v624_v41, %v628_v42  ;;  %v12088_v54 = vcombine.low %v625_v43, %v629_v44 }
  0x74   :  { %v12081_v56 = vcombine.high %v617_v51, %v621_v52 }
  0x76   :  { %1375 = vmatpush1.bf16.msra.mxu0 %v12014_v59  ;;  %1416 = vmatpush1.bf16.msra.mxu1 %v12016_v60  ;;  %v609_v59 = vld [vmem:[%s19326_s2 + $0x2d8] sm:$0xff] }
  0x77   :  { %1376 = vmatprep.subr.bf16.mxu0 %v12007_v61  ;;  %1417 = vmatprep.subr.bf16.mxu1 %v12009_v62  ;;  %v613_v60 = vld [vmem:[%s19326_s2 + $0x2f8] sm:$0xff]  ;;  %v12078_v61 = vcombine.low %v616_v49, %v620_v50  ;;  %v12080_v62 = vcombine.low %v617_v51, %v621_v52  ;;  %v1586_v52 = vld [vmem:[%s19326_s2 + $0x1c0] sm:$0xff] }
  0x78   :  { %v12073_v0 = vcombine.high %v609_v59, %v613_v60 }
  0x7a   :  { %1377 = vmatpush1.bf16.msra.mxu0 %v12006_v4  ;;  %1418 = vmatpush1.bf16.msra.mxu1 %v12008_v5  ;;  %v601_v4 = vld [vmem:[%s19326_s2 + $0x298] sm:$0xff] }
  0x7b   :  { %1378 = vmatprep.subr.bf16.mxu0 %v11999_v6  ;;  %1419 = vmatprep.subr.bf16.mxu1 %v12001_v7  ;;  %v605_v5 = vld [vmem:[%s19326_s2 + $0x2b8] sm:$0xff]  ;;  %v12070_v6 = vcombine.low %v608_v57, %v612_v58  ;;  %v12072_v7 = vcombine.low %v609_v59, %v613_v60  ;;  %v1591_v60 = vld [vmem:[%s19326_s2 + $0x1e8] sm:$0xff] }
  0x7c   :  { %v12065_v9 = vcombine.high %v601_v4, %v605_v5 }
  0x7e   :  { %1379 = vmatpush1.bf16.msra.mxu0 %v11998_v12  ;;  %1420 = vmatpush1.bf16.msra.mxu1 %v12000_v13  ;;  %v593_v12 = vld [vmem:[%s19326_s2 + $0x258] sm:$0xff] }
  0x7f   :  { %1380 = vmatprep.subr.bf16.mxu0 %v11991_v14  ;;  %1421 = vmatprep.subr.bf16.mxu1 %v11993_v15  ;;  %v597_v13 = vld [vmem:[%s19326_s2 + $0x278] sm:$0xff]  ;;  %v12062_v14 = vcombine.low %v600_v1, %v604_v2  ;;  %v12064_v15 = vcombine.low %v601_v4, %v605_v5  ;;  %v1579_v4 = vld [vmem:[%s19326_s2 + $0x188] sm:$0xff] }
  0x80   :  { %v12057_v17 = vcombine.high %v593_v12, %v597_v13  ;;  %v1583_v5 = vld [vmem:[%s19326_s2 + $0x1a8] sm:$0xff] }
  0x82   :  { %1381 = vmatpush1.bf16.msra.mxu0 %v11990_v20  ;;  %1422 = vmatpush1.bf16.msra.mxu1 %v11992_v21  ;;  %v585_v20 = vld [vmem:[%s19326_s2 + $0x218] sm:$0xff] }
  0x83   :  { %1382 = vmatprep.subr.bf16.mxu0 %v11983_v22  ;;  %1423 = vmatprep.subr.bf16.mxu1 %v11985_v23  ;;  %v589_v21 = vld [vmem:[%s19326_s2 + $0x238] sm:$0xff]  ;;  %v12054_v22 = vcombine.low %v592_v10, %v596_v11  ;;  %v12056_v23 = vcombine.low %v593_v12, %v597_v13 }
  0x84   :  { %v12049_v25 = vcombine.high %v585_v20, %v589_v21  ;;  %v12048_v28 = vcombine.low %v585_v20, %v589_v21 }
  0x86   :  { %1383 = vmatpush1.bf16.msra.mxu0 %v11982_v29  ;;  %1424 = vmatpush1.bf16.msra.mxu1 %v11984_v30  ;;  %v48_v29 = vlaneseq }
  0x87   :  { %1384 = vmatprep.subr.bf16.mxu0 %v12103_v26  ;;  %1425 = vmatprep.subr.bf16.mxu1 %v12105_v32 }
  0x88   :  { %v14656_v30 = vshrl.u32 %v48_v29, 7 }
  0x8a   :  { %1385 = vmatpush2.bf16.msra.mxu0 %v12102_v37  ;;  %1426 = vmatpush2.bf16.msra.mxu1 %v12104_v38  ;;  %19578 = vst [vmem:[#allocation5_spill] sm:$0xff] %v14656_v30  ;;  %v19337_v26 = vsub.s32 2, %v14656_v30  ;;  %v19335_v32 = vsub.s32 0, %v14656_v30  ;;  %v19334_v41 = vsub.s32 1, %v14656_v30 }
  0x8b   :  { %1386 = vmatprep.subr.bf16.mxu0 %v12095_v39  ;;  %1427 = vmatprep.subr.bf16.mxu1 %v12097_v40 }
  0x8c   :  { %v14674_v37 = vrot.slane %v14663_v33, %v19337_v26  ;;  %v14679_v38 = vrot.slane %v14663_v33, %v19335_v32  ;;  %v14698_v49 = vrot.slane %v14663_v33, %v19334_v41 }
  0x8e   :  { %1387 = vmatpush2.bf16.msra.mxu0 %v12094_v45  ;;  %1428 = vmatpush2.bf16.msra.mxu1 %v12096_v46  ;;  %v19336_v45 = vsub.s32 3, %v14656_v30  ;;  %19583 = vst [vmem:[#allocation10_spill] sm:$0xff] %v14698_v49 }
  0x8f   :  { %1388 = vmatprep.subr.bf16.mxu0 %v12087_v47  ;;  %1429 = vmatprep.subr.bf16.mxu1 %v12089_v48 }
  0x92   :  { %1389 = vmatpush2.bf16.msra.mxu0 %v12086_v53  ;;  %1430 = vmatpush2.bf16.msra.mxu1 %v12088_v54  ;;  %v1590_v53 = vld [vmem:[%s19326_s2 + $0x1e0] sm:$0xff]  ;;  %v1587_v54 = vld [vmem:[%s19326_s2 + $0x1c8] sm:$0xff] }
  0x93   :  { %1390 = vmatprep.subr.bf16.mxu0 %v12079_v55  ;;  %1431 = vmatprep.subr.bf16.mxu1 %v12081_v56  ;;  %v14715_v56 = vrot.slane %v14663_v33, %v19336_v45  ;;  %v14720_v58 = vcombine.low %v1586_v52, %v1590_v53  ;;  %v14722_v59 = vcombine.high %v1586_v52, %v1590_v53  ;;  %v66_v52 = vsub.s32 4, %v14656_v30 }
  0x94   :  { %v14736_v1 = vcombine.low %v1587_v54, %v1591_v60  ;;  %v14738_v2 = vcombine.high %v1587_v54, %v1591_v60  ;;  %v74_v60 = vsub.s32 6, %v14656_v30 }
  0x95   :  { %19585 = vst [vmem:[#allocation12_spill] sm:$0xff] %v14715_v56 }
  0x96   :  { %1391 = vmatpush2.bf16.msra.mxu0 %v12078_v61  ;;  %1432 = vmatpush2.bf16.msra.mxu1 %v12080_v62  ;;  %v1578_v61 = vld [vmem:[%s19326_s2 + $0x180] sm:$0xff] }
  0x97   :  { %1392 = vmatprep.subr.bf16.mxu0 %v12071_v63  ;;  %1433 = vmatprep.subr.bf16.mxu1 %v12073_v0  ;;  %v1582_v62 = vld [vmem:[%s19326_s2 + $0x1a0] sm:$0xff] }
  0x98   :  { %v14759_v12 = vcombine.low %v1578_v61, %v1582_v62 }
  0x9a   :  { %1393 = vmatpush2.bf16.msra.mxu0 %v12070_v6  ;;  %1434 = vmatpush2.bf16.msra.mxu1 %v12072_v7 }
  0x9b   :  { %1394 = vmatprep.subr.bf16.mxu0 %v12063_v8  ;;  %1435 = vmatprep.subr.bf16.mxu1 %v12065_v9  ;;  %v14750_v8 = vcombine.high %v1578_v61, %v1582_v62  ;;  %v14752_v9 = vcombine.high %v1579_v4, %v1583_v5  ;;  %v70_v62 = vsub.s32 5, %v14656_v30 }
  0x9e   :  { %1395 = vmatpush2.bf16.msra.mxu0 %v12062_v14  ;;  %1436 = vmatpush2.bf16.msra.mxu1 %v12064_v15  ;;  %v14768_v15 = vcombine.low %v1579_v4, %v1583_v5 }
  0x9f   :  { %1396 = vmatprep.subr.bf16.mxu0 %v12055_v16  ;;  %1437 = vmatprep.subr.bf16.mxu1 %v12057_v17 }
  0xa2   :  { %1397 = vmatpush2.bf16.msra.mxu0 %v12054_v22  ;;  %1438 = vmatpush2.bf16.msra.mxu1 %v12056_v23 }
  0xa3   :  { %1398 = vmatprep.subr.bf16.mxu0 %v12047_v24  ;;  %1439 = vmatprep.subr.bf16.mxu1 %v12049_v25 }
  0xa6   :  { %1399 = vmatpush2.bf16.msra.mxu0 %v12046_v27  ;;  %1440 = vmatpush2.bf16.msra.mxu1 %v12048_v28 }
  0xa7   :  { %2298 = vmatprep.subr.bf16.mxu0 %v14722_v59  ;;  %2339 = vmatprep.subr.bf16.mxu1 %v14738_v2 }
  0xa9   :  { %1401 = vmatmul.mubr.bf16.vlgmr.msra.gmra.mxu0 %v19338_v31  ;;  %1442 = vmatmul.mubr.bf16.vlgmr.msra.gmra.mxu1 %v19338_v31 }
  0xaa   :  { %2299 = vmatpush1.bf16.msra.mxu0 %v14720_v58  ;;  %2340 = vmatpush1.bf16.msra.mxu1 %v14736_v1 }
  0xab   :  { %2300 = vmatprep.subr.bf16.mxu0 %v14750_v8  ;;  %2341 = vmatprep.subr.bf16.mxu1 %v14752_v9 }
  0xae   :  { %2301 = vmatpush1.bf16.msra.mxu0 %v14759_v12  ;;  %2342 = vmatpush1.bf16.msra.mxu1 %v14768_v15 }
  0xc9   :  { %v14665_v34 = vpop.f32.mrf.mxu0  ;;  %v14667_v35 = vpop.f32.mrf.mxu1 }
  0xcb   :  { %v14669_v36 = vpop.f32.mrf.mxu0  ;;  %v14681_v39 = vpop.f32.mrf.mxu1 }
  0xcd   :  { %v199_v40 = vpop.f32.mrf.mxu0  ;;  %v272_v43 = vpop.f32.mrf.mxu1 }
  0xce   :  { %v14685_v42 = vadd.f32 %v199_v40, %v14679_v38  ;;  %v14691_v46 = vadd.f32 %v272_v43, %v14674_v37 }
  0xcf   :  { %v14687_v44 = vpop.f32.mrf.mxu0  ;;  %v14693_v47 = vpop.f32.mrf.mxu1 }
  0xd0   :  { %19579 = vst [vmem:[#allocation6_spill] sm:$0xff] %v14685_v42  ;;  %19580 = vst [vmem:[#allocation7_spill] sm:$0xff] %v14687_v44 }
  0xd1   :  { %19581 = vst [vmem:[#allocation8_spill] sm:$0xff] %v14691_v46  ;;  %19582 = vst [vmem:[#allocation9_spill] sm:$0xff] %v14693_v47  ;;  %v205_v48 = vpop.f32.mrf.mxu0  ;;  %v278_v51 = vpop.f32.mrf.mxu1  ;;  %v1626_v46 = vld [vmem:[%s19326_s2 + $0x300] sm:$0xff] }
  0xd2   :  { %v14701_v50 = vadd.f32 %v205_v48, %v14679_v38  ;;  %v14718_v57 = vadd.f32 %v278_v51, %v14674_v37  ;;  %v1630_v47 = vld [vmem:[%s19326_s2 + $0x320] sm:$0xff] }
  0xd3   :  { %v207_v55 = vpop.f32.mrf.mxu0  ;;  %v280_v0 = vpop.f32.mrf.mxu1 }
  0xd4   :  { %19584 = vst [vmem:[#allocation11_spill] sm:$0xff] %v14701_v50  ;;  %19586 = vst [vmem:[#allocation13_spill] sm:$0xff] %v14718_v57  ;;  %v14734_v63 = vadd.f32 %v207_v55, %v14698_v49  ;;  %v14747_v7 = vadd.f32 %v280_v0, %v14715_v56 }
  0xd5   :  { %v209_v6 = vpop.f32.mrf.mxu0  ;;  %v282_v11 = vpop.f32.mrf.mxu1 }
  0xd6   :  { %19587 = vst [vmem:[#allocation14_spill] sm:$0xff] %v14734_v63  ;;  %19588 = vst [vmem:[#allocation15_spill] sm:$0xff] %v14747_v7  ;;  %v14755_v10 = vadd.f32 %v209_v6, %v14679_v38  ;;  %v14764_v14 = vadd.f32 %v282_v11, %v14674_v37  ;;  %v78_v6 = vsub.s32 7, %v14656_v30 }
  0xd7   :  { %v14761_v13 = vpop.f32.mrf.mxu0  ;;  %v14770_v16 = vpop.f32.mrf.mxu1 }
  0xd8   :  { %19589 = vst [vmem:[#allocation16_spill] sm:$0xff] %v14755_v10  ;;  %19590 = vst [vmem:[#allocation17_spill] sm:$0xff] %v14761_v13 }
  0xd9   :  { %19591 = vst [vmem:[#allocation18_spill] sm:$0xff] %v14764_v14  ;;  %19592 = vst [vmem:[#allocation19_spill] sm:$0xff] %v14770_v16  ;;  %v215_v17 = vpop.f32.mrf.mxu0  ;;  %v288_v19 = vpop.f32.mrf.mxu1 }
  0xda   :  { %v14774_v18 = vadd.f32 %v215_v17, %v14679_v38  ;;  %v14778_v21 = vadd.f32 %v288_v19, %v14674_v37  ;;  %v14817_v17 = vrot.slane %v14663_v33, %v66_v52 }
  0xdb   :  { %v217_v20 = vpop.f32.mrf.mxu0  ;;  %v290_v23 = vpop.f32.mrf.mxu1 }
  0xdc   :  { %19593 = vst [vmem:[#allocation20_spill] sm:$0xff] %v14774_v18  ;;  %19594 = vst [vmem:[#allocation21_spill] sm:$0xff] %v14778_v21  ;;  %v14782_v22 = vadd.f32 %v217_v20, %v14698_v49  ;;  %v14785_v25 = vadd.f32 %v290_v23, %v14715_v56 }
  0xdd   :  { %v219_v24 = vpop.f32.mrf.mxu0  ;;  %v292_v28 = vpop.f32.mrf.mxu1 }
  0xde   :  { %19595 = vst [vmem:[#allocation22_spill] sm:$0xff] %v14782_v22  ;;  %19596 = vst [vmem:[#allocation23_spill] sm:$0xff] %v14785_v25  ;;  %v14788_v27 = vadd.f32 %v219_v24, %v14679_v38  ;;  %v14793_v40 = vadd.f32 %v292_v28, %v14674_v37  ;;  %v14825_v24 = vrot.slane %v14663_v33, %v74_v60  ;;  %v1574_v60 = vld [vmem:[%s19326_s2 + $0x160] sm:$0xff] }
  0xdf   :  { %v14790_v29 = vpop.f32.mrf.mxu0  ;;  %v14795_v43 = vpop.f32.mrf.mxu1  ;;  %v14828_v28 = vrot.slane %v14663_v33, %v70_v62  ;;  %v1571_v62 = vld [vmem:[%s19326_s2 + $0x148] sm:$0xff] }
  0xe0   :  { %19597 = vst [vmem:[#allocation24_spill] sm:$0xff] %v14788_v27  ;;  %19598 = vst [vmem:[#allocation25_spill] sm:$0xff] %v14790_v29 }
  0xe1   :  { %19599 = vst [vmem:[#allocation26_spill] sm:$0xff] %v14793_v40  ;;  %19600 = vst [vmem:[#allocation27_spill] sm:$0xff] %v14795_v43  ;;  %v225_v48 = vpop.f32.mrf.mxu0  ;;  %v298_v53 = vpop.f32.mrf.mxu1 }
  0xe2   :  { %v14798_v51 = vadd.f32 %v225_v48, %v14679_v38  ;;  %v14802_v55 = vadd.f32 %v298_v53, %v14674_v37  ;;  %19608 = vst [vmem:[#allocation35_spill] sm:$0xff] %v14828_v28 }
  0xe3   :  { %v227_v54 = vpop.f32.mrf.mxu0  ;;  %v300_v0 = vpop.f32.mrf.mxu1 }
  0xe4   :  { %19601 = vst [vmem:[#allocation28_spill] sm:$0xff] %v14798_v51  ;;  %19602 = vst [vmem:[#allocation29_spill] sm:$0xff] %v14802_v55  ;;  %v14806_v61 = vadd.f32 %v227_v54, %v14698_v49  ;;  %v14810_v5 = vadd.f32 %v300_v0, %v14715_v56  ;;  %v14833_v54 = vrot.slane %v14663_v33, %v78_v6 }
  0xe5   :  { %v229_v4 = vpop.f32.mrf.mxu0  ;;  %v302_v19 = vpop.f32.mrf.mxu1 }
  0xe6   :  { %19603 = vst [vmem:[#allocation30_spill] sm:$0xff] %v14806_v61  ;;  %19604 = vst [vmem:[#allocation31_spill] sm:$0xff] %v14810_v5  ;;  %v14814_v11 = vadd.f32 %v229_v4, %v14679_v38  ;;  %v14822_v23 = vadd.f32 %v302_v19, %v14674_v37  ;;  %v1570_v4 = vld [vmem:[%s19326_s2 + $0x140] sm:$0xff] }
  0xe7   :  { %v14819_v20 = vpop.f32.mrf.mxu0  ;;  %v14830_v48 = vpop.f32.mrf.mxu1  ;;  %19610 = vst [vmem:[#allocation37_spill] sm:$0xff] %v14833_v54  ;;  %v14850_v6 = vcombine.high %v1570_v4, %v1574_v60  ;;  %v14858_v45 = vcombine.low %v1570_v4, %v1574_v60  ;;  %v1562_v4 = vld [vmem:[%s19326_s2 + $0x100] sm:$0xff] }
  0xe8   :  { %19605 = vst [vmem:[#allocation32_spill] sm:$0xff] %v14814_v11  ;;  %19606 = vst [vmem:[#allocation33_spill] sm:$0xff] %v14819_v20  ;;  %v1566_v60 = vld [vmem:[%s19326_s2 + $0x120] sm:$0xff] }
  0xe9   :  { %19607 = vst [vmem:[#allocation34_spill] sm:$0xff] %v14822_v23  ;;  %19609 = vst [vmem:[#allocation36_spill] sm:$0xff] %v14830_v48  ;;  %v341_v53 = vpop.f32.mrf.mxu0  ;;  %v414_v0 = vpop.f32.mrf.mxu1  ;;  %2302 = vmatprep.subr.bf16.mxu0 %v14850_v6 }
  0xea   :  { %v14836_v52 = vadd.f32 %v341_v53, %v14817_v17  ;;  %v14848_v33 = vadd.f32 %v414_v0, %v14825_v24  ;;  %v1575_v53 = vld [vmem:[%s19326_s2 + $0x168] sm:$0xff]  ;;  %2303 = vmatpush1.bf16.msra.mxu0 %v14858_v45 }
  0xeb   :  { %v343_v19 = vpop.f32.mrf.mxu0  ;;  %v416_v32 = vpop.f32.mrf.mxu1  ;;  %v14860_v26 = vcombine.low %v1571_v62, %v1575_v53  ;;  %v14862_v31 = vcombine.high %v1571_v62, %v1575_v53  ;;  %v1567_v53 = vld [vmem:[%s19326_s2 + $0x128] sm:$0xff] }
  0xec   :  { %19611 = vst [vmem:[#allocation38_spill] sm:$0xff] %v14836_v52  ;;  %19612 = vst [vmem:[#allocation39_spill] sm:$0xff] %v14848_v33  ;;  %v14856_v41 = vadd.f32 %v343_v19, %v14828_v28  ;;  %v14865_v0 = vadd.f32 %v416_v32, %v14833_v54  ;;  %v1563_v32 = vld [vmem:[%s19326_s2 + $0x108] sm:$0xff]  ;;  %v14888_v19 = vcombine.high %v1562_v4, %v1566_v60 }
  0xed   :  { %v345_v3 = vpop.f32.mrf.mxu0  ;;  %v418_v33 = vpop.f32.mrf.mxu1  ;;  %2343 = vmatprep.subr.bf16.mxu1 %v14862_v31  ;;  %v14897_v52 = vcombine.low %v1563_v32, %v1567_v53  ;;  %v14899_v23 = vcombine.high %v1563_v32, %v1567_v53  ;;  %v1555_v32 = vld [vmem:[%s19326_s2 + $0xc8] sm:$0xff] }
  0xee   :  { %19613 = vst [vmem:[#allocation40_spill] sm:$0xff] %v14856_v41  ;;  %19614 = vst [vmem:[#allocation41_spill] sm:$0xff] %v14865_v0  ;;  %v14869_v30 = vadd.f32 %v345_v3, %v14817_v17  ;;  %v14885_v3 = vadd.f32 %v418_v33, %v14825_v24  ;;  %2344 = vmatpush1.bf16.msra.mxu1 %v14860_v26  ;;  %v14895_v41 = vcombine.low %v1562_v4, %v1566_v60  ;;  %v1554_v4 = vld [vmem:[%s19326_s2 + $0xc0] sm:$0xff] }
  0xef   :  { %v14882_v62 = vpop.f32.mrf.mxu0  ;;  %v14893_v0 = vpop.f32.mrf.mxu1  ;;  %2304 = vmatprep.subr.bf16.mxu0 %v14888_v19  ;;  %2345 = vmatprep.subr.bf16.mxu1 %v14899_v23  ;;  %v1558_v60 = vld [vmem:[%s19326_s2 + $0xe0] sm:$0xff] }
  0xf0   :  { %19615 = vst [vmem:[#allocation42_spill] sm:$0xff] %v14869_v30  ;;  %19616 = vst [vmem:[#allocation43_spill] sm:$0xff] %v14882_v62  ;;  %2305 = vmatpush1.bf16.msra.mxu0 %v14895_v41  ;;  %v14920_v20 = vcombine.high %v1554_v4, %v1558_v60  ;;  %v14928_v62 = vcombine.low %v1554_v4, %v1558_v60  ;;  %v1546_v4 = vld [vmem:[%s19326_s2 + $0x80] sm:$0xff] }
  0xf1   :  { %19617 = vst [vmem:[#allocation44_spill] sm:$0xff] %v14885_v3  ;;  %19618 = vst [vmem:[#allocation45_spill] sm:$0xff] %v14893_v0  ;;  %v351_v48 = vpop.f32.mrf.mxu0  ;;  %v424_v11 = vpop.f32.mrf.mxu1  ;;  %v1559_v3 = vld [vmem:[%s19326_s2 + $0xe8] sm:$0xff] }
  0xf2   :  { %v14903_v33 = vadd.f32 %v351_v48, %v14817_v17  ;;  %v14917_v48 = vadd.f32 %v424_v11, %v14825_v24  ;;  %2346 = vmatpush1.bf16.msra.mxu1 %v14897_v52  ;;  %v14930_v55 = vcombine.low %v1555_v32, %v1559_v3  ;;  %v14932_v5 = vcombine.high %v1555_v32, %v1559_v3  ;;  %v1550_v3 = vld [vmem:[%s19326_s2 + $0xa0] sm:$0xff] }
  0xf3   :  { %v353_v53 = vpop.f32.mrf.mxu0  ;;  %v426_v30 = vpop.f32.mrf.mxu1  ;;  %2306 = vmatprep.subr.bf16.mxu0 %v14920_v20 }
  0xf4   :  { %19619 = vst [vmem:[#allocation46_spill] sm:$0xff] %v14903_v33  ;;  %19620 = vst [vmem:[#allocation47_spill] sm:$0xff] %v14917_v48  ;;  %v14926_v0 = vadd.f32 %v353_v53, %v14828_v28  ;;  %v14935_v61 = vadd.f32 %v426_v30, %v14833_v54  ;;  %2347 = vmatprep.subr.bf16.mxu1 %v14932_v5  ;;  %2307 = vmatpush1.bf16.msra.mxu0 %v14928_v62  ;;  %v1547_v30 = vld [vmem:[%s19326_s2 + $0x88] sm:$0xff] }
  0xf5   :  { %v355_v11 = vpop.f32.mrf.mxu0  ;;  %v428_v48 = vpop.f32.mrf.mxu1  ;;  %v14958_v53 = vcombine.high %v1546_v4, %v1550_v3 }
  0xf6   :  { %19621 = vst [vmem:[#allocation48_spill] sm:$0xff] %v14926_v0  ;;  %19622 = vst [vmem:[#allocation49_spill] sm:$0xff] %v14935_v61  ;;  %v14939_v51 = vadd.f32 %v355_v11, %v14817_v17  ;;  %v14955_v32 = vadd.f32 %v428_v48, %v14825_v24  ;;  %2348 = vmatpush1.bf16.msra.mxu1 %v14930_v55  ;;  %v1551_v11 = vld [vmem:[%s19326_s2 + $0xa8] sm:$0xff]  ;;  %v14965_v0 = vcombine.low %v1546_v4, %v1550_v3  ;;  %v1538_v4 = vld [vmem:[%s19326_s2 + $0x40] sm:$0xff] }
  0xf7   :  { %v14952_v60 = vpop.f32.mrf.mxu0  ;;  %v14963_v61 = vpop.f32.mrf.mxu1  ;;  %v14967_v33 = vcombine.low %v1547_v30, %v1551_v11  ;;  %v14969_v40 = vcombine.high %v1547_v30, %v1551_v11  ;;  %2308 = vmatprep.subr.bf16.mxu0 %v14958_v53  ;;  %v1542_v3 = vld [vmem:[%s19326_s2 + $0x60] sm:$0xff]  ;;  %v1539_v30 = vld [vmem:[%s19326_s2 + $0x48] sm:$0xff] }
  0xf8   :  { %19623 = vst [vmem:[#allocation50_spill] sm:$0xff] %v14939_v51  ;;  %19624 = vst [vmem:[#allocation51_spill] sm:$0xff] %v14952_v60  ;;  %2309 = vmatpush1.bf16.msra.mxu0 %v14965_v0  ;;  %v14990_v29 = vcombine.high %v1538_v4, %v1542_v3  ;;  %v14998_v60 = vcombine.low %v1538_v4, %v1542_v3  ;;  %v1530_v4 = vld [vmem:[%s19326_s2] sm:$0xff] }
  0xf9   :  { %19625 = vst [vmem:[#allocation52_spill] sm:$0xff] %v14955_v32  ;;  %19626 = vst [vmem:[#allocation53_spill] sm:$0xff] %v14963_v61  ;;  %v361_v43 = vpop.f32.mrf.mxu0  ;;  %v434_v27 = vpop.f32.mrf.mxu1  ;;  %2349 = vmatprep.subr.bf16.mxu1 %v14969_v40  ;;  %v1543_v32 = vld [vmem:[%s19326_s2 + $0x68] sm:$0xff] }
  0xfa   :  { %v14973_v48 = vadd.f32 %v361_v43, %v14817_v17  ;;  %v14987_v43 = vadd.f32 %v434_v27, %v14825_v24  ;;  %2350 = vmatpush1.bf16.msra.mxu1 %v14967_v33  ;;  %v15000_v21 = vcombine.low %v1539_v30, %v1543_v32  ;;  %v15002_v25 = vcombine.high %v1539_v30, %v1543_v32  ;;  %v1534_v32 = vld [vmem:[%s19326_s2 + $0x20] sm:$0xff] }
  0xfb   :  { %v363_v11 = vpop.f32.mrf.mxu0  ;;  %v436_v51 = vpop.f32.mrf.mxu1  ;;  %2310 = vmatprep.subr.bf16.mxu0 %v14990_v29 }
  0xfc   :  { %19627 = vst [vmem:[#allocation54_spill] sm:$0xff] %v14973_v48  ;;  %19628 = vst [vmem:[#allocation55_spill] sm:$0xff] %v14987_v43  ;;  %v14996_v61 = vadd.f32 %v363_v11, %v14828_v28  ;;  %v15005_v22 = vadd.f32 %v436_v51, %v14833_v54  ;;  %2351 = vmatprep.subr.bf16.mxu1 %v15002_v25  ;;  %2311 = vmatpush1.bf16.msra.mxu0 %v14998_v60  ;;  %v1531_v51 = vld [vmem:[%s19326_s2 + $0x8] sm:$0xff] }
  0xfd   :  { %v365_v27 = vpop.f32.mrf.mxu0  ;;  %v438_v43 = vpop.f32.mrf.mxu1  ;;  %v15028_v11 = vcombine.high %v1530_v4, %v1534_v32 }
  0xfe   :  { %19629 = vst [vmem:[#allocation56_spill] sm:$0xff] %v14996_v61  ;;  %19630 = vst [vmem:[#allocation57_spill] sm:$0xff] %v15005_v22  ;;  %v15009_v18 = vadd.f32 %v365_v27, %v14817_v17  ;;  %v15025_v30 = vadd.f32 %v438_v43, %v14825_v24  ;;  %2352 = vmatpush1.bf16.msra.mxu1 %v15000_v21  ;;  %v1535_v27 = vld [vmem:[%s19326_s2 + $0x28] sm:$0xff]  ;;  %v15035_v61 = vcombine.low %v1530_v4, %v1534_v32  ;;  %v1650_v4 = vld [vmem:[%s19326_s2 + $0x3c0] sm:$0xff] }
  0xff   :  { %v15022_v3 = vpop.f32.mrf.mxu0  ;;  %v15033_v22 = vpop.f32.mrf.mxu1  ;;  %v15037_v48 = vcombine.low %v1531_v51, %v1535_v27  ;;  %v15039_v14 = vcombine.high %v1531_v51, %v1535_v27  ;;  %2312 = vmatprep.subr.bf16.mxu0 %v15028_v11  ;;  %v1654_v32 = vld [vmem:[%s19326_s2 + $0x3e0] sm:$0xff]  ;;  %v1651_v51 = vld [vmem:[%s19326_s2 + $0x3c8] sm:$0xff] }
 0x100   :  { %19631 = vst [vmem:[#allocation58_spill] sm:$0xff] %v15009_v18  ;;  %19632 = vst [vmem:[#allocation59_spill] sm:$0xff] %v15022_v3  ;;  %2313 = vmatpush1.bf16.msra.mxu0 %v15035_v61  ;;  %v15060_v13 = vcombine.high %v1650_v4, %v1654_v32  ;;  %v15068_v3 = vcombine.low %v1650_v4, %v1654_v32  ;;  %v1642_v4 = vld [vmem:[%s19326_s2 + $0x380] sm:$0xff] }
 0x101   :  { %19633 = vst [vmem:[#allocation60_spill] sm:$0xff] %v15025_v30  ;;  %19634 = vst [vmem:[#allocation61_spill] sm:$0xff] %v15033_v22  ;;  %v371_v16 = vpop.f32.mrf.mxu0  ;;  %v444_v10 = vpop.f32.mrf.mxu1  ;;  %2353 = vmatprep.subr.bf16.mxu1 %v15039_v14  ;;  %v1655_v30 = vld [vmem:[%s19326_s2 + $0x3e8] sm:$0xff] }
 0x102   :  { %v15043_v43 = vadd.f32 %v371_v16, %v14817_v17  ;;  %v15057_v16 = vadd.f32 %v444_v10, %v14825_v24  ;;  %2354 = vmatpush1.bf16.msra.mxu1 %v15037_v48  ;;  %19638 = vst [vmem:[#allocation65_spill] sm:$0xff] %v15068_v3  ;;  %v15070_v57 = vcombine.low %v1651_v51, %v1655_v30 }
 0x103   :  { %v373_v27 = vpop.f32.mrf.mxu0  ;;  %v446_v18 = vpop.f32.mrf.mxu1  ;;  %v15072_v7 = vcombine.high %v1651_v51, %v1655_v30  ;;  %2314 = vmatprep.subr.bf16.mxu0 %v15060_v13  ;;  %v1646_v30 = vld [vmem:[%s19326_s2 + $0x3a0] sm:$0xff]  ;;  %v1647_v51 = vld [vmem:[%s19326_s2 + $0x3a8] sm:$0xff] }
 0x104   :  { %19635 = vst [vmem:[#allocation62_spill] sm:$0xff] %v15043_v43  ;;  %19636 = vst [vmem:[#allocation63_spill] sm:$0xff] %v15057_v16  ;;  %v15066_v22 = vadd.f32 %v373_v27, %v14828_v28  ;;  %v15075_v63 = vadd.f32 %v446_v18, %v14833_v54  ;;  %2315 = vmatpush2.bf16.msra.mxu0 %v15068_v3  ;;  %v1643_v18 = vld [vmem:[%s19326_s2 + $0x388] sm:$0xff]  ;;  %v15096_v32 = vcombine.high %v1642_v4, %v1646_v30 }
 0x105   :  { %19639 = vst [vmem:[#allocation66_spill] sm:$0xff] %v15070_v57  ;;  %v375_v10 = vpop.f32.mrf.mxu0  ;;  %v448_v16 = vpop.f32.mrf.mxu1  ;;  %2355 = vmatprep.subr.bf16.mxu1 %v15072_v7  ;;  %v15101_v27 = vcombine.low %v1642_v4, %v1646_v30  ;;  %v1635_v4 = vld [vmem:[%s19326_s2 + $0x348] sm:$0xff] }
 0x106   :  { %19637 = vst [vmem:[#allocation64_spill] sm:$0xff] %v15066_v22  ;;  %19640 = vst [vmem:[#allocation67_spill] sm:$0xff] %v15075_v63  ;;  %v15079_v50 = vadd.f32 %v375_v10, %v14817_v17  ;;  %v15093_v17 = vadd.f32 %v448_v16, %v14825_v24  ;;  %2356 = vmatpush2.bf16.msra.mxu1 %v15070_v57  ;;  %v15103_v10 = vcombine.low %v1643_v18, %v1647_v51  ;;  %v1634_v24 = vld [vmem:[%s19326_s2 + $0x340] sm:$0xff] }
 0x107   :  { %19641 = vst [vmem:[#allocation68_spill] sm:$0xff] %v15096_v32  ;;  %19642 = vst [vmem:[#allocation69_spill] sm:$0xff] %v15101_v27  ;;  %v15105_v63 = vcombine.high %v1643_v18, %v1647_v51  ;;  %2316 = vmatprep.subr.bf16.mxu0 %v15096_v32  ;;  %v1638_v16 = vld [vmem:[%s19326_s2 + $0x360] sm:$0xff]  ;;  %v1639_v18 = vld [vmem:[%s19326_s2 + $0x368] sm:$0xff] }
 0x108   :  { %19643 = vst [vmem:[#allocation70_spill] sm:$0xff] %v15103_v10  ;;  %2317 = vmatpush2.bf16.msra.mxu0 %v15101_v27  ;;  %v15120_v30 = vcombine.high %v1634_v24, %v1638_v16  ;;  %v15125_v51 = vcombine.low %v1634_v24, %v1638_v16  ;;  %v15127_v22 = vcombine.low %v1635_v4, %v1639_v18  ;;  %v1627_v24 = vld [vmem:[%s19326_s2 + $0x308] sm:$0xff] }
 0x109   :  { %19644 = vst [vmem:[#allocation71_spill] sm:$0xff] %v15105_v63  ;;  %2357 = vmatprep.subr.bf16.mxu1 %v15105_v63  ;;  %v15129_v43 = vcombine.high %v1635_v4, %v1639_v18  ;;  %v15144_v16 = vcombine.high %v1626_v46, %v1630_v47  ;;  %v1631_v4 = vld [vmem:[%s19326_s2 + $0x328] sm:$0xff]  ;;  %v15149_v18 = vcombine.low %v1626_v46, %v1630_v47 }
 0x10a   :  { %2358 = vmatpush2.bf16.msra.mxu1 %v15103_v10  ;;  %19645 = vst [vmem:[#allocation72_spill] sm:$0xff] %v15120_v30  ;;  %19646 = vst [vmem:[#allocation73_spill] sm:$0xff] %v15125_v51  ;;  %2318 = vmatprep.subr.bf16.mxu0 %v15120_v30  ;;  %v15151_v42 = vcombine.low %v1627_v24, %v1631_v4  ;;  %v15153_v44 = vcombine.high %v1627_v24, %v1631_v4  ;;  %v1619_v46 = vld [vmem:[%s19326_s2 + $0x2c8] sm:$0xff]  ;;  %v1602_v30 = vld [vmem:[%s19326_s2 + $0x240] sm:$0xff] }
 0x10b   :  { %19647 = vst [vmem:[#allocation74_spill] sm:$0xff] %v15127_v22  ;;  %19648 = vst [vmem:[#allocation75_spill] sm:$0xff] %v15129_v43  ;;  %2359 = vmatprep.subr.bf16.mxu1 %v15129_v43  ;;  %v1623_v4 = vld [vmem:[%s19326_s2 + $0x2e8] sm:$0xff] }
 0x10c   :  { %2319 = vmatpush2.bf16.msra.mxu0 %v15125_v51  ;;  %19649 = vst [vmem:[#allocation76_spill] sm:$0xff] %v15144_v16  ;;  %19650 = vst [vmem:[#allocation77_spill] sm:$0xff] %v15149_v18  ;;  %v1622_v51 = vld [vmem:[%s19326_s2 + $0x2e0] sm:$0xff]  ;;  %v15183_v43 = vcombine.high %v1619_v46, %v1623_v4  ;;  %v1607_v27 = vld [vmem:[%s19326_s2 + $0x268] sm:$0xff] }
 0x10d   :  { %19651 = vst [vmem:[#allocation78_spill] sm:$0xff] %v15151_v42  ;;  %19652 = vst [vmem:[#allocation79_spill] sm:$0xff] %v15153_v44  ;;  %2320 = vmatprep.subr.bf16.mxu0 %v15144_v16  ;;  %v15181_v16 = vcombine.low %v1619_v46, %v1623_v4  ;;  %v1606_v46 = vld [vmem:[%s19326_s2 + $0x260] sm:$0xff]  ;;  %v1603_v4 = vld [vmem:[%s19326_s2 + $0x248] sm:$0xff] }
 0x10e   :  { %2360 = vmatpush2.bf16.msra.mxu1 %v15127_v22  ;;  %v1618_v22 = vld [vmem:[%s19326_s2 + $0x2c0] sm:$0xff]  ;;  %19656 = vst [vmem:[#allocation83_spill] sm:$0xff] %v15183_v43  ;;  %v15216_v32 = vcombine.high %v1602_v30, %v1606_v46  ;;  %v15219_v57 = vcombine.high %v1603_v4, %v1607_v27 }
 0x10f   :  { %2361 = vmatprep.subr.bf16.mxu1 %v15153_v44  ;;  %v15168_v47 = vcombine.low %v1618_v22, %v1622_v51  ;;  %v15170_v24 = vcombine.high %v1618_v22, %v1622_v51  ;;  %v1614_v44 = vld [vmem:[%s19326_s2 + $0x2a0] sm:$0xff]  ;;  %19655 = vst [vmem:[#allocation82_spill] sm:$0xff] %v15181_v16  ;;  %v1611_v22 = vld [vmem:[%s19326_s2 + $0x288] sm:$0xff] }
 0x110   :  { %2321 = vmatpush2.bf16.msra.mxu0 %v15149_v18  ;;  %v1610_v18 = vld [vmem:[%s19326_s2 + $0x280] sm:$0xff]  ;;  %v1615_v51 = vld [vmem:[%s19326_s2 + $0x2a8] sm:$0xff]  ;;  %19661 = vst [vmem:[#allocation88_spill] sm:$0xff] %v15216_v32  ;;  %19662 = vst [vmem:[#allocation89_spill] sm:$0xff] %v15219_v57 }
 0x111   :  { %19653 = vst [vmem:[#allocation80_spill] sm:$0xff] %v15168_v47  ;;  %19654 = vst [vmem:[#allocation81_spill] sm:$0xff] %v15170_v24  ;;  %2322 = vmatprep.subr.bf16.mxu0 %v15170_v24  ;;  %v15197_v10 = vcombine.high %v1611_v22, %v1615_v51  ;;  %v15210_v63 = vcombine.low %v1610_v18, %v1614_v44  ;;  %v15214_v24 = vcombine.low %v1611_v22, %v1615_v51  ;;  %v1599_v22 = vld [vmem:[%s19326_s2 + $0x228] sm:$0xff] }
 0x112   :  { %2362 = vmatpush2.bf16.msra.mxu1 %v15151_v42  ;;  %v15185_v42 = vcombine.high %v1610_v18, %v1614_v44  ;;  %v1598_v44 = vld [vmem:[%s19326_s2 + $0x220] sm:$0xff]  ;;  %v1595_v18 = vld [vmem:[%s19326_s2 + $0x208] sm:$0xff]  ;;  %v15234_v51 = vcombine.low %v1602_v30, %v1606_v46  ;;  %v1592_v46 = vld [vmem:[%s19326_s2 + $0x1f0] sm:$0xff] }
 0x113   :  { %19658 = vst [vmem:[#allocation85_spill] sm:$0xff] %v15197_v10  ;;  %2363 = vmatprep.subr.bf16.mxu1 %v15183_v43  ;;  %19659 = vst [vmem:[#allocation86_spill] sm:$0xff] %v15210_v63  ;;  %v1594_v43 = vld [vmem:[%s19326_s2 + $0x200] sm:$0xff]  ;;  %v15250_v30 = vcombine.low %v1595_v18, %v1599_v22 }
 0x114   :  { %19657 = vst [vmem:[#allocation84_spill] sm:$0xff] %v15185_v42  ;;  %2323 = vmatpush2.bf16.msra.mxu0 %v15168_v47  ;;  %19660 = vst [vmem:[#allocation87_spill] sm:$0xff] %v15214_v24  ;;  %v15246_v47 = vcombine.low %v1594_v43, %v1598_v44 }
 0x115   :  { %2324 = vmatprep.subr.bf16.mxu0 %v15185_v42  ;;  %19663 = vst [vmem:[#allocation90_spill] sm:$0xff] %v15234_v51  ;;  %v15240_v42 = vcombine.high %v1594_v43, %v1598_v44  ;;  %19668 = vst [vmem:[#allocation95_spill] sm:$0xff] %v15250_v30  ;;  %v1589_v43 = vld [vmem:[%s19326_s2 + $0x1d8] sm:$0xff] }
 0x116   :  { %2364 = vmatpush2.bf16.msra.mxu1 %v15181_v16  ;;  %v15243_v16 = vcombine.high %v1595_v18, %v1599_v22  ;;  %19667 = vst [vmem:[#allocation94_spill] sm:$0xff] %v15246_v47  ;;  %v1593_v44 = vld [vmem:[%s19326_s2 + $0x1f8] sm:$0xff] }
 0x117   :  { %2365 = vmatprep.subr.bf16.mxu1 %v15197_v10  ;;  %v15238_v10 = vcombine.low %v1603_v4, %v1607_v27  ;;  %19665 = vst [vmem:[#allocation92_spill] sm:$0xff] %v15240_v42  ;;  %v1588_v27 = vld [vmem:[%s19326_s2 + $0x1d0] sm:$0xff]  ;;  %v15271_v22 = vcombine.low %v1589_v43, %v1593_v44 }
 0x118   :  { %2325 = vmatpush2.bf16.msra.mxu0 %v15210_v63  ;;  %19666 = vst [vmem:[#allocation93_spill] sm:$0xff] %v15243_v16  ;;  %v15264_v4 = vcombine.high %v1588_v27, %v1592_v46  ;;  %v15269_v18 = vcombine.low %v1588_v27, %v1592_v46 }
 0x119   :  { %2326 = vmatprep.subr.bf16.mxu0 %v15216_v32  ;;  %19664 = vst [vmem:[#allocation91_spill] sm:$0xff] %v15238_v10 }
 0x11a   :  { %2366 = vmatpush2.bf16.msra.mxu1 %v15214_v24  ;;  %19669 = vst [vmem:[#allocation96_spill] sm:$0xff] %v15264_v4 }
 0x11b   :  { %2367 = vmatprep.subr.bf16.mxu1 %v15219_v57 }
 0x11c   :  { %2327 = vmatpush2.bf16.msra.mxu0 %v15234_v51  ;;  %v198_v51 = vadd.f32 %v14669_v36, %v14698_v49  ;;  %v269_v36 = vadd.f32 %v14667_v35, %v14674_v37 }
 0x11d   :  { %2328 = vmatprep.subr.bf16.mxu0 %v15240_v42  ;;  %v377_v42 = vpop.f32.mrf.mxu0 }
 0x11e   :  { %2368 = vmatpush2.bf16.msra.mxu1 %v15238_v10 }
 0x11f   :  { %2369 = vmatprep.subr.bf16.mxu1 %v15243_v16  ;;  %v450_v16 = vpop.f32.mrf.mxu1 }
 0x120   :  { %2329 = vmatpush2.bf16.msra.mxu0 %v15246_v47  ;;  %v15273_v47 = vcombine.high %v1589_v43, %v1593_v44 }
 0x121   :  { %2380 = vmatprep.subr.bf16.mxu0 %v15264_v4 }
 0x122   :  { %2370 = vmatpush2.bf16.msra.mxu1 %v15250_v30  ;;  %19670 = vst [vmem:[#allocation97_spill] sm:$0xff] %v15273_v47  ;;  %v196_v30 = vadd.f32 %v14665_v34, %v14679_v38  ;;  %v271_v34 = vadd.f32 %v14681_v39, %v14715_v56 }
 0x123   :  { %2421 = vmatprep.subr.bf16.mxu1 %v15273_v47 }
 0x129   :  { %v1320_v10 = vpop.f32.mrf.mxu0  ;;  %v1361_v27 = vpop.f32.mrf.mxu1 }
 0x12a   :  { %v1457_v57 = vadd.f32 %v1320_v10, %v196_v30  ;;  %v1459_v10 = vadd.f32 %v1361_v27, %v269_v36 }
 0x12b   :  { %v1322_v46 = vpop.f32.mrf.mxu0  ;;  %v1363_v43 = vpop.f32.mrf.mxu1 }
 0x12c   :  { %v12106_v32 = vmul.f32 -1.442695, %v1457_v57  ;;  %v1458_v24 = vadd.f32 %v1322_v46, %v198_v51  ;;  %v1460_v38 = vadd.f32 %v1363_v43, %v271_v34  ;;  %v378_v34 = vadd.f32 %v377_v42, %v14828_v28  ;;  %v1552_v28 = vld [vmem:[%s19326_s2 + $0xb0] sm:$0xff] }
 0x12d   :  { %v1324_v44 = vpop.f32.mrf.mxu0  ;;  %v1365_v63 = vpop.f32.mrf.mxu1 }
 0x12e   :  { %13683 = vpow2.f32 %v12106_v32  ;;  %v12107_v4 = vmul.f32 -1.442695, %v1458_v24  ;;  %v12108_v30 = vmul.f32 -1.442695, %v1460_v38 }
 0x12f   :  { %v1325_v3 = vpop.f32.mrf.mxu0  ;;  %v1366_v47 = vpop.f32.mrf.mxu1 }
 0x130   :  { %13685 = vpow2.f32 %v12107_v4 }
 0x131   :  { %13687 = vtanh.f32 %v1459_v10 }
 0x132   :  { %13689 = vpow2.f32 %v12108_v30 }
 0x13b   :  { %v13684_v49 = vpop.eup %13683 }
 0x13c   :  { %v1475_v57 = vadd.f32 1.0, %v13684_v49 }
 0x13d   :  { %v13686_v51 = vpop.eup %13685 }
 0x13e   :  { %13691 = vrcp.f32 %v1475_v57  ;;  %v1481_v32 = vadd.f32 1.0, %v13686_v51  ;;  %v13688_v63 = vpop.eup %13687 }
 0x13f   :  { %v13690_v3 = vpop.eup %13689 }
 0x140   :  { %13693 = vrcp.f32 %v1481_v32  ;;  %v1488_v39 = vadd.f32 1.0, %v13690_v3 }
 0x142   :  { %13695 = vrcp.f32 %v1488_v39 }
 0x14b   :  { %v13692_v47 = vpop.eup %13691 }
 0x14c   :  { %v1492_v24 = vmul.f32 %v13692_v47, %v13688_v63 }
 0x14d   :  { %v13694_v4 = vpop.eup %13693 }
 0x14e   :  { %v1491_v46 = vmul.f32 0.0, %v13694_v4  ;;  %v451_v4 = vadd.f32 %v450_v16, %v14833_v54  ;;  %v1548_v54 = vld [vmem:[%s19326_s2 + $0x90] sm:$0xff] }
 0x14f   :  { %v13696_v35 = vpop.eup %13695 }
 0x150   :  { %v15285_v43 = vadd.f32 %v1492_v24, %v1491_v46 }
 0x152   :  { %13697 = vtanh.f32 %v15285_v43 }
 0x15f   :  { %v13698_v37 = vpop.eup %13697 }
 0x160   :  { %v1495_v49 = vmul.f32 %v13698_v37, %v13696_v35 }
 0x162   :  { %v15288_v27 = vpack.c.bf16 %v1495_v49, %v1495_v49 }
 0x164   :  { %1524 = vst [vmem:[#allocation3] sm:$0xf] %v15288_v27 }
 0x169   :  { %v1402_v44 = vpop.f32.mrf.mxu0  ;;  %v1443_v36 = vpop.f32.mrf.mxu1 }
 0x16a   :  { %v1468_v38 = vadd.f32 %v1402_v44, %v15079_v50  ;;  %v1470_v46 = vadd.f32 %v1443_v36, %v15093_v17 }
 0x16b   :  { %v1404_v10 = vpop.f32.mrf.mxu0  ;;  %v1445_v51 = vpop.f32.mrf.mxu1 }
 0x16c   :  { %v12109_v30 = vmul.f32 -1.442695, %v1468_v38  ;;  %v1469_v57 = vadd.f32 %v1404_v10, %v378_v34  ;;  %v1471_v39 = vadd.f32 %v1445_v51, %v451_v4 }
 0x16d   :  { %v1406_v32 = vpop.f32.mrf.mxu0  ;;  %v1447_v3 = vpop.f32.mrf.mxu1 }
 0x16e   :  { %13699 = vpow2.f32 %v12109_v30  ;;  %v12110_v63 = vmul.f32 -1.442695, %v1469_v57  ;;  %v12111_v42 = vmul.f32 -1.442695, %v1471_v39  ;;  %v1584_v3 = vld [vmem:[%s19326_s2 + $0x1b0] sm:$0xff] }
 0x16f   :  { %v1407_v47 = vpop.f32.mrf.mxu0  ;;  %v1448_v24 = vpop.f32.mrf.mxu1  ;;  %v1572_v39 = vld [vmem:[%s19326_s2 + $0x150] sm:$0xff] }
 0x170   :  { %13701 = vpow2.f32 %v12110_v63  ;;  %v1580_v63 = vld [vmem:[%s19326_s2 + $0x190] sm:$0xff]  ;;  %v1581_v47 = vld [vmem:[%s19326_s2 + $0x198] sm:$0xff] }
 0x171   :  { %13703 = vtanh.f32 %v1470_v46  ;;  %v1585_v24 = vld [vmem:[%s19326_s2 + $0x1b8] sm:$0xff]  ;;  %v15313_v46 = vcombine.high %v1580_v63, %v1584_v3 }
 0x172   :  { %13705 = vpow2.f32 %v12111_v42  ;;  %v15315_v42 = vcombine.high %v1581_v47, %v1585_v24 }
 0x17b   :  { %v13700_v35 = vpop.eup %13699 }
 0x17c   :  { %v1499_v50 = vadd.f32 1.0, %v13700_v35  ;;  %v1576_v35 = vld [vmem:[%s19326_s2 + $0x170] sm:$0xff] }
 0x17d   :  { %v13702_v37 = vpop.eup %13701 }
 0x17e   :  { %13707 = vrcp.f32 %v1499_v50  ;;  %v1505_v49 = vadd.f32 1.0, %v13702_v37  ;;  %v13704_v44 = vpop.eup %13703  ;;  %v1573_v50 = vld [vmem:[%s19326_s2 + $0x158] sm:$0xff] }
 0x17f   :  { %v13706_v34 = vpop.eup %13705  ;;  %v1577_v37 = vld [vmem:[%s19326_s2 + $0x178] sm:$0xff] }
 0x180   :  { %13709 = vrcp.f32 %v1505_v49  ;;  %v1512_v57 = vadd.f32 1.0, %v13706_v34  ;;  %v15330_v49 = vcombine.low %v1580_v63, %v1584_v3  ;;  %v15334_v34 = vcombine.high %v1572_v39, %v1576_v35  ;;  %v1556_v3 = vld [vmem:[%s19326_s2 + $0xd0] sm:$0xff] }
 0x182   :  { %13711 = vrcp.f32 %v1512_v57  ;;  %v1565_v57 = vld [vmem:[%s19326_s2 + $0x118] sm:$0xff] }
 0x18b   :  { %v13708_v38 = vpop.eup %13707 }
 0x18c   :  { %v1516_v10 = vmul.f32 %v13708_v38, %v13704_v44  ;;  %v15332_v44 = vcombine.low %v1581_v47, %v1585_v24  ;;  %v15336_v38 = vcombine.high %v1573_v50, %v1577_v37  ;;  %v1560_v47 = vld [vmem:[%s19326_s2 + $0xf0] sm:$0xff]  ;;  %v1557_v24 = vld [vmem:[%s19326_s2 + $0xd8] sm:$0xff] }
 0x18d   :  { %v13710_v30 = vpop.eup %13709 }
 0x18e   :  { %v1515_v32 = vmul.f32 0.0, %v13710_v30  ;;  %v1568_v30 = vld [vmem:[%s19326_s2 + $0x130] sm:$0xff] }
 0x18f   :  { %v13712_v17 = vpop.eup %13711 }
 0x190   :  { %v15295_v16 = vadd.f32 %v1516_v10, %v1515_v32  ;;  %v1564_v10 = vld [vmem:[%s19326_s2 + $0x110] sm:$0xff]  ;;  %v1569_v32 = vld [vmem:[%s19326_s2 + $0x138] sm:$0xff] }
 0x191   :  { %v15362_v63 = vcombine.high %v1565_v57, %v1569_v32 }
 0x192   :  { %13713 = vtanh.f32 %v15295_v16 }
 0x193   :  { %19673 = vst [vmem:[#allocation100_spill] sm:$0xff] %v15362_v63 }
 0x19f   :  { %v13714_v36 = vpop.eup %13713 }
 0x1a0   :  { %v1519_v51 = vmul.f32 %v13714_v36, %v13712_v17  ;;  %v15354_v17 = vcombine.low %v1572_v39, %v1576_v35  ;;  %v15356_v36 = vcombine.low %v1573_v50, %v1577_v37  ;;  %v15378_v39 = vcombine.low %v1564_v10, %v1568_v30 }
 0x1a1   :  { %v15380_v35 = vcombine.low %v1565_v57, %v1569_v32  ;;  %v15384_v50 = vcombine.high %v1556_v3, %v1560_v47  ;;  %v15402_v57 = vcombine.low %v1556_v3, %v1560_v47  ;;  %v1541_v3 = vld [vmem:[%s19326_s2 + $0x58] sm:$0xff] }
 0x1a2   :  { %v1525_v4 = vpack.c.bf16 %v1519_v51, %v1519_v51  ;;  %19671 = vst [vmem:[#allocation98_spill] sm:$0xff] %v15356_v36  ;;  %v15360_v51 = vcombine.high %v1564_v10, %v1568_v30  ;;  %19674 = vst [vmem:[#allocation101_spill] sm:$0xff] %v15378_v39  ;;  %v1549_v10 = vld [vmem:[%s19326_s2 + $0x98] sm:$0xff] }
 0x1a3   :  { %19675 = vst [vmem:[#allocation102_spill] sm:$0xff] %v15380_v35  ;;  %19676 = vst [vmem:[#allocation103_spill] sm:$0xff] %v15384_v50  ;;  %v1553_v30 = vld [vmem:[%s19326_s2 + $0xb8] sm:$0xff] }
 0x1a4   :  { %1529 = vst [vmem:[#allocation3 + $0x3c] sm:$0xf] %v1525_v4  ;;  %2330 = vmatprep.mubr.bf16.mxu0 %v1525_v4  ;;  %2371 = vmatprep.mubr.bf16.mxu1 %v1525_v4  ;;  %19672 = vst [vmem:[#allocation99_spill] sm:$0xff] %v15360_v51  ;;  %v1545_v47 = vld [vmem:[%s19326_s2 + $0x78] sm:$0xff] }
 0x1a5   :  { %2331 = vmatmul.mubr.bf16.vlgmr.msra.gmra.mxu0 %v15288_v27  ;;  %2372 = vmatmul.mubr.bf16.vlgmr.msra.gmra.mxu1 %v15288_v27  ;;  %19678 = vst [vmem:[#allocation105_spill] sm:$0xff] %v15402_v57 }
 0x1a6   :  { %2381 = vmatpush1.bf16.msra.mxu0 %v15269_v18  ;;  %2422 = vmatpush1.bf16.msra.mxu1 %v15271_v22 }
 0x1a7   :  { %2412 = vmatprep.mubr.bf16.mxu0 %v1525_v4  ;;  %2453 = vmatprep.mubr.bf16.mxu1 %v1525_v4  ;;  %v1561_v4 = vld [vmem:[%s19326_s2 + $0xf8] sm:$0xff] }
 0x1a8   :  { %2382 = vmatprep.subr.bf16.mxu0 %v15313_v46  ;;  %2423 = vmatprep.subr.bf16.mxu1 %v15315_v42  ;;  %v15386_v37 = vcombine.high %v1557_v24, %v1561_v4  ;;  %v15404_v32 = vcombine.low %v1557_v24, %v1561_v4  ;;  %v15426_v24 = vcombine.low %v1548_v54, %v1552_v28 }
 0x1a9   :  { %v15428_v4 = vcombine.low %v1549_v10, %v1553_v30 }
 0x1aa   :  { %2383 = vmatpush1.bf16.msra.mxu0 %v15330_v49  ;;  %2424 = vmatpush1.bf16.msra.mxu1 %v15332_v44  ;;  %19677 = vst [vmem:[#allocation104_spill] sm:$0xff] %v15386_v37  ;;  %19679 = vst [vmem:[#allocation106_spill] sm:$0xff] %v15404_v32 }
 0x1ab   :  { %2384 = vmatprep.subr.bf16.mxu0 %v15334_v34  ;;  %2425 = vmatprep.subr.bf16.mxu1 %v15336_v38  ;;  %19682 = vst [vmem:[#allocation109_spill] sm:$0xff] %v15426_v24  ;;  %19683 = vst [vmem:[#allocation110_spill] sm:$0xff] %v15428_v4 }
 0x1ae   :  { %2385 = vmatpush1.bf16.msra.mxu0 %v15354_v17  ;;  %2426 = vmatpush1.bf16.msra.mxu1 %v15356_v36  ;;  %v1540_v36 = vld [vmem:[%s19326_s2 + $0x50] sm:$0xff] }
 0x1af   :  { %2386 = vmatprep.subr.bf16.mxu0 %v15360_v51  ;;  %2427 = vmatprep.subr.bf16.mxu1 %v15362_v63  ;;  %v15408_v63 = vcombine.high %v1548_v54, %v1552_v28  ;;  %v15410_v51 = vcombine.high %v1549_v10, %v1553_v30  ;;  %v1533_v28 = vld [vmem:[%s19326_s2 + $0x18] sm:$0xff]  ;;  %v15452_v30 = vcombine.low %v1541_v3, %v1545_v47 }
 0x1b0   :  { %v1537_v54 = vld [vmem:[%s19326_s2 + $0x38] sm:$0xff] }
 0x1b1   :  { %19680 = vst [vmem:[#allocation107_spill] sm:$0xff] %v15408_v63  ;;  %19681 = vst [vmem:[#allocation108_spill] sm:$0xff] %v15410_v51 }
 0x1b2   :  { %2387 = vmatpush1.bf16.msra.mxu0 %v15378_v39  ;;  %2428 = vmatpush1.bf16.msra.mxu1 %v15380_v35  ;;  %v1544_v35 = vld [vmem:[%s19326_s2 + $0x70] sm:$0xff]  ;;  %19687 = vst [vmem:[#allocation114_spill] sm:$0xff] %v15452_v30 }
 0x1b3   :  { %2388 = vmatprep.subr.bf16.mxu0 %v15384_v50  ;;  %2429 = vmatprep.subr.bf16.mxu1 %v15386_v37  ;;  %v15432_v37 = vcombine.high %v1540_v36, %v1544_v35  ;;  %v15434_v50 = vcombine.high %v1541_v3, %v1545_v47  ;;  %v1532_v39 = vld [vmem:[%s19326_s2 + $0x10] sm:$0xff]  ;;  %v15450_v10 = vcombine.low %v1540_v36, %v1544_v35  ;;  %v1653_v36 = vld [vmem:[%s19326_s2 + $0x3d8] sm:$0xff] }
 0x1b4   :  { %v1657_v35 = vld [vmem:[%s19326_s2 + $0x3f8] sm:$0xff]  ;;  %v15476_v47 = vcombine.low %v1533_v28, %v1537_v54 }
 0x1b5   :  { %19684 = vst [vmem:[#allocation111_spill] sm:$0xff] %v15432_v37  ;;  %19685 = vst [vmem:[#allocation112_spill] sm:$0xff] %v15434_v50 }
 0x1b6   :  { %2389 = vmatpush1.bf16.msra.mxu0 %v15402_v57  ;;  %2430 = vmatpush1.bf16.msra.mxu1 %v15404_v32  ;;  %v1536_v32 = vld [vmem:[%s19326_s2 + $0x30] sm:$0xff]  ;;  %19686 = vst [vmem:[#allocation113_spill] sm:$0xff] %v15450_v10  ;;  %19691 = vst [vmem:[#allocation118_spill] sm:$0xff] %v15476_v47 }
 0x1b7   :  { %2390 = vmatprep.subr.bf16.mxu0 %v15408_v63  ;;  %2431 = vmatprep.subr.bf16.mxu1 %v15410_v51  ;;  %v15456_v51 = vcombine.high %v1532_v39, %v1536_v32  ;;  %v15458_v63 = vcombine.high %v1533_v28, %v1537_v54  ;;  %v1652_v57 = vld [vmem:[%s19326_s2 + $0x3d0] sm:$0xff]  ;;  %v15474_v3 = vcombine.low %v1532_v39, %v1536_v32  ;;  %v1645_v39 = vld [vmem:[%s19326_s2 + $0x398] sm:$0xff] }
 0x1b8   :  { %v1649_v32 = vld [vmem:[%s19326_s2 + $0x3b8] sm:$0xff]  ;;  %v15500_v54 = vcombine.low %v1653_v36, %v1657_v35 }
 0x1b9   :  { %19688 = vst [vmem:[#allocation115_spill] sm:$0xff] %v15456_v51  ;;  %19689 = vst [vmem:[#allocation116_spill] sm:$0xff] %v15458_v63 }
 0x1ba   :  { %2391 = vmatpush1.bf16.msra.mxu0 %v15426_v24  ;;  %2432 = vmatpush1.bf16.msra.mxu1 %v15428_v4  ;;  %v1656_v4 = vld [vmem:[%s19326_s2 + $0x3f0] sm:$0xff]  ;;  %19690 = vst [vmem:[#allocation117_spill] sm:$0xff] %v15474_v3  ;;  %19695 = vst [vmem:[#allocation122_spill] sm:$0xff] %v15500_v54 }
 0x1bb   :  { %2392 = vmatprep.subr.bf16.mxu0 %v15432_v37  ;;  %2433 = vmatprep.subr.bf16.mxu1 %v15434_v50  ;;  %v15480_v50 = vcombine.high %v1652_v57, %v1656_v4  ;;  %v15482_v37 = vcombine.high %v1653_v36, %v1657_v35  ;;  %v1644_v24 = vld [vmem:[%s19326_s2 + $0x390] sm:$0xff]  ;;  %v15498_v28 = vcombine.low %v1652_v57, %v1656_v4  ;;  %v1637_v57 = vld [vmem:[%s19326_s2 + $0x358] sm:$0xff] }
 0x1bc   :  { %v1641_v4 = vld [vmem:[%s19326_s2 + $0x378] sm:$0xff]  ;;  %v15524_v35 = vcombine.low %v1645_v39, %v1649_v32 }
 0x1bd   :  { %19692 = vst [vmem:[#allocation119_spill] sm:$0xff] %v15480_v50  ;;  %19693 = vst [vmem:[#allocation120_spill] sm:$0xff] %v15482_v37 }
 0x1be   :  { %2393 = vmatpush1.bf16.msra.mxu0 %v15450_v10  ;;  %2434 = vmatpush1.bf16.msra.mxu1 %v15452_v30  ;;  %v1648_v30 = vld [vmem:[%s19326_s2 + $0x3b0] sm:$0xff]  ;;  %19694 = vst [vmem:[#allocation121_spill] sm:$0xff] %v15498_v28  ;;  %19699 = vst [vmem:[#allocation126_spill] sm:$0xff] %v15524_v35 }
 0x1bf   :  { %2394 = vmatprep.subr.bf16.mxu0 %v15456_v51  ;;  %2435 = vmatprep.subr.bf16.mxu1 %v15458_v63  ;;  %v15504_v63 = vcombine.high %v1644_v24, %v1648_v30  ;;  %v15506_v51 = vcombine.high %v1645_v39, %v1649_v32  ;;  %v1636_v10 = vld [vmem:[%s19326_s2 + $0x350] sm:$0xff]  ;;  %v15522_v36 = vcombine.low %v1644_v24, %v1648_v30  ;;  %v1629_v24 = vld [vmem:[%s19326_s2 + $0x318] sm:$0xff] }
 0x1c0   :  { %v1633_v30 = vld [vmem:[%s19326_s2 + $0x338] sm:$0xff]  ;;  %v15548_v32 = vcombine.low %v1637_v57, %v1641_v4 }
 0x1c1   :  { %19696 = vst [vmem:[#allocation123_spill] sm:$0xff] %v15504_v63  ;;  %19697 = vst [vmem:[#allocation124_spill] sm:$0xff] %v15506_v51 }
 0x1c2   :  { %2395 = vmatpush1.bf16.msra.mxu0 %v15474_v3  ;;  %2436 = vmatpush1.bf16.msra.mxu1 %v15476_v47  ;;  %v1640_v47 = vld [vmem:[%s19326_s2 + $0x370] sm:$0xff]  ;;  %19698 = vst [vmem:[#allocation125_spill] sm:$0xff] %v15522_v36  ;;  %19703 = vst [vmem:[#allocation130_spill] sm:$0xff] %v15548_v32 }
 0x1c3   :  { %2396 = vmatprep.subr.bf16.mxu0 %v15480_v50  ;;  %2437 = vmatprep.subr.bf16.mxu1 %v15482_v37  ;;  %v15528_v37 = vcombine.high %v1636_v10, %v1640_v47  ;;  %v15530_v50 = vcombine.high %v1637_v57, %v1641_v4  ;;  %v1628_v3 = vld [vmem:[%s19326_s2 + $0x310] sm:$0xff]  ;;  %v15546_v39 = vcombine.low %v1636_v10, %v1640_v47  ;;  %v1621_v10 = vld [vmem:[%s19326_s2 + $0x2d8] sm:$0xff] }
 0x1c4   :  { %v1625_v47 = vld [vmem:[%s19326_s2 + $0x2f8] sm:$0xff]  ;;  %v15572_v4 = vcombine.low %v1629_v24, %v1633_v30 }
 0x1c5   :  { %19700 = vst [vmem:[#allocation127_spill] sm:$0xff] %v15528_v37  ;;  %19701 = vst [vmem:[#allocation128_spill] sm:$0xff] %v15530_v50 }
 0x1c6   :  { %2397 = vmatpush2.bf16.msra.mxu0 %v15498_v28  ;;  %2438 = vmatpush2.bf16.msra.mxu1 %v15500_v54  ;;  %v1632_v54 = vld [vmem:[%s19326_s2 + $0x330] sm:$0xff]  ;;  %19702 = vst [vmem:[#allocation129_spill] sm:$0xff] %v15546_v39  ;;  %19707 = vst [vmem:[#allocation134_spill] sm:$0xff] %v15572_v4 }
 0x1c7   :  { %2398 = vmatprep.subr.bf16.mxu0 %v15504_v63  ;;  %2439 = vmatprep.subr.bf16.mxu1 %v15506_v51  ;;  %v15552_v51 = vcombine.high %v1628_v3, %v1632_v54  ;;  %v15554_v63 = vcombine.high %v1629_v24, %v1633_v30  ;;  %v1620_v28 = vld [vmem:[%s19326_s2 + $0x2d0] sm:$0xff]  ;;  %v15570_v57 = vcombine.low %v1628_v3, %v1632_v54  ;;  %v1613_v3 = vld [vmem:[%s19326_s2 + $0x298] sm:$0xff] }
 0x1c8   :  { %v1617_v54 = vld [vmem:[%s19326_s2 + $0x2b8] sm:$0xff]  ;;  %v15596_v30 = vcombine.low %v1621_v10, %v1625_v47 }
 0x1c9   :  { %19704 = vst [vmem:[#allocation131_spill] sm:$0xff] %v15552_v51  ;;  %19705 = vst [vmem:[#allocation132_spill] sm:$0xff] %v15554_v63 }
 0x1ca   :  { %2399 = vmatpush2.bf16.msra.mxu0 %v15522_v36  ;;  %2440 = vmatpush2.bf16.msra.mxu1 %v15524_v35  ;;  %v1624_v35 = vld [vmem:[%s19326_s2 + $0x2f0] sm:$0xff]  ;;  %19706 = vst [vmem:[#allocation133_spill] sm:$0xff] %v15570_v57  ;;  %19711 = vst [vmem:[#allocation138_spill] sm:$0xff] %v15596_v30 }
 0x1cb   :  { %2400 = vmatprep.subr.bf16.mxu0 %v15528_v37  ;;  %2441 = vmatprep.subr.bf16.mxu1 %v15530_v50  ;;  %v15576_v50 = vcombine.high %v1620_v28, %v1624_v35  ;;  %v15578_v37 = vcombine.high %v1621_v10, %v1625_v47  ;;  %v1612_v36 = vld [vmem:[%s19326_s2 + $0x290] sm:$0xff]  ;;  %v15594_v24 = vcombine.low %v1620_v28, %v1624_v35  ;;  %v1605_v28 = vld [vmem:[%s19326_s2 + $0x258] sm:$0xff] }
 0x1cc   :  { %v1609_v35 = vld [vmem:[%s19326_s2 + $0x278] sm:$0xff]  ;;  %v15620_v47 = vcombine.low %v1613_v3, %v1617_v54 }
 0x1cd   :  { %19708 = vst [vmem:[#allocation135_spill] sm:$0xff] %v15576_v50  ;;  %19709 = vst [vmem:[#allocation136_spill] sm:$0xff] %v15578_v37 }
 0x1ce   :  { %2401 = vmatpush2.bf16.msra.mxu0 %v15546_v39  ;;  %2442 = vmatpush2.bf16.msra.mxu1 %v15548_v32  ;;  %v1616_v32 = vld [vmem:[%s19326_s2 + $0x2b0] sm:$0xff]  ;;  %19710 = vst [vmem:[#allocation137_spill] sm:$0xff] %v15594_v24 }
 0x1cf   :  { %2402 = vmatprep.subr.bf16.mxu0 %v15552_v51  ;;  %2443 = vmatprep.subr.bf16.mxu1 %v15554_v63  ;;  %v15600_v63 = vcombine.high %v1612_v36, %v1616_v32  ;;  %v15602_v51 = vcombine.high %v1613_v3, %v1617_v54  ;;  %v1604_v39 = vld [vmem:[%s19326_s2 + $0x250] sm:$0xff]  ;;  %v15618_v10 = vcombine.low %v1612_v36, %v1616_v32  ;;  %v1597_v36 = vld [vmem:[%s19326_s2 + $0x218] sm:$0xff] }
 0x1d0   :  { %v1601_v32 = vld [vmem:[%s19326_s2 + $0x238] sm:$0xff]  ;;  %v15644_v54 = vcombine.low %v1605_v28, %v1609_v35 }
 0x1d1   :  { %19712 = vst [vmem:[#allocation139_spill] sm:$0xff] %v15600_v63  ;;  %19713 = vst [vmem:[#allocation140_spill] sm:$0xff] %v15602_v51 }
 0x1d2   :  { %2403 = vmatpush2.bf16.msra.mxu0 %v15570_v57  ;;  %2444 = vmatpush2.bf16.msra.mxu1 %v15572_v4  ;;  %v1608_v4 = vld [vmem:[%s19326_s2 + $0x270] sm:$0xff]  ;;  %19714 = vst [vmem:[#allocation141_spill] sm:$0xff] %v15618_v10 }
 0x1d3   :  { %2404 = vmatprep.subr.bf16.mxu0 %v15576_v50  ;;  %2445 = vmatprep.subr.bf16.mxu1 %v15578_v37  ;;  %v15624_v37 = vcombine.high %v1604_v39, %v1608_v4  ;;  %v15626_v50 = vcombine.high %v1605_v28, %v1609_v35  ;;  %v1596_v57 = vld [vmem:[%s19326_s2 + $0x210] sm:$0xff]  ;;  %v15642_v3 = vcombine.low %v1604_v39, %v1608_v4  ;;  %v19749_v4 = vld [vmem:[#allocation6_spill] sm:$0xff] }
 0x1d4   :  { %v19748_v39 = vld [vmem:[#allocation7_spill] sm:$0xff] }
 0x1d6   :  { %2405 = vmatpush2.bf16.msra.mxu0 %v15594_v24  ;;  %2446 = vmatpush2.bf16.msra.mxu1 %v15596_v30  ;;  %v1600_v30 = vld [vmem:[%s19326_s2 + $0x230] sm:$0xff] }
 0x1d7   :  { %2406 = vmatprep.subr.bf16.mxu0 %v15600_v63  ;;  %2447 = vmatprep.subr.bf16.mxu1 %v15602_v51  ;;  %v15648_v51 = vcombine.high %v1596_v57, %v1600_v30  ;;  %v15650_v63 = vcombine.high %v1597_v36, %v1601_v32  ;;  %v15654_v24 = vcombine.low %v1596_v57, %v1600_v30 }
 0x1da   :  { %2407 = vmatpush2.bf16.msra.mxu0 %v15618_v10  ;;  %2448 = vmatpush2.bf16.msra.mxu1 %v15620_v47  ;;  %v15656_v10 = vcombine.low %v1597_v36, %v1601_v32 }
 0x1db   :  { %2408 = vmatprep.subr.bf16.mxu0 %v15624_v37  ;;  %2449 = vmatprep.subr.bf16.mxu1 %v15626_v50 }
 0x1de   :  { %2409 = vmatpush2.bf16.msra.mxu0 %v15642_v3  ;;  %2450 = vmatpush2.bf16.msra.mxu1 %v15644_v54 }
 0x1df   :  { %2410 = vmatprep.subr.bf16.mxu0 %v15648_v51  ;;  %2451 = vmatprep.subr.bf16.mxu1 %v15650_v63 }
 0x1e2   :  { %2411 = vmatpush2.bf16.msra.mxu0 %v15654_v24  ;;  %2452 = vmatpush2.bf16.msra.mxu1 %v15656_v10 }
 0x1e3   :  { %3310 = vmatprep.subr.bf16.mxu0 %v14722_v59  ;;  %3351 = vmatprep.subr.bf16.mxu1 %v14738_v2  ;;  %v19720_v59 = vld [vmem:[#allocation70_spill] sm:$0xff]  ;;  %v19722_v2 = vld [vmem:[#allocation75_spill] sm:$0xff] }
 0x1e5   :  { %2413 = vmatmul.mubr.bf16.vlgmr.msra.gmra.mxu0 %v15288_v27  ;;  %2454 = vmatmul.mubr.bf16.vlgmr.msra.gmra.mxu1 %v15288_v27  ;;  %v19747_v27 = vld [vmem:[#allocation10_spill] sm:$0xff] }
 0x1e6   :  { %3311 = vmatpush1.bf16.msra.mxu0 %v14720_v58  ;;  %3352 = vmatpush1.bf16.msra.mxu1 %v14736_v1  ;;  %v19719_v58 = vld [vmem:[#allocation69_spill] sm:$0xff]  ;;  %v19721_v1 = vld [vmem:[#allocation72_spill] sm:$0xff]  ;;  %v202_v57 = vadd.f32 %v19748_v39, %v19747_v27  ;;  %v3631_v27 = vld [vmem:[%s19326_s2 + $0x268] sm:$0xff] }
 0x1e7   :  { %3312 = vmatprep.subr.bf16.mxu0 %v14750_v8  ;;  %3353 = vmatprep.subr.bf16.mxu1 %v14752_v9  ;;  %v19723_v8 = vld [vmem:[#allocation73_spill] sm:$0xff]  ;;  %v19724_v9 = vld [vmem:[#allocation74_spill] sm:$0xff] }
 0x1ea   :  { %3313 = vmatpush1.bf16.msra.mxu0 %v14759_v12  ;;  %3354 = vmatpush1.bf16.msra.mxu1 %v14768_v15  ;;  %v19726_v12 = vld [vmem:[#allocation79_spill] sm:$0xff]  ;;  %v19729_v15 = vld [vmem:[#allocation81_spill] sm:$0xff] }
 0x1eb   :  { %3314 = vmatprep.subr.bf16.mxu0 %v14850_v6  ;;  %3355 = vmatprep.subr.bf16.mxu1 %v14862_v31  ;;  %v19715_v31 = vld [vmem:[#allocation65_spill] sm:$0xff]  ;;  %v19740_v6 = vld [vmem:[#allocation91_spill] sm:$0xff] }
 0x1ee   :  { %3315 = vmatpush1.bf16.msra.mxu0 %v14858_v45  ;;  %3356 = vmatpush1.bf16.msra.mxu1 %v14860_v26  ;;  %v19716_v26 = vld [vmem:[#allocation66_spill] sm:$0xff]  ;;  %v19718_v45 = vld [vmem:[#allocation71_spill] sm:$0xff] }
 0x1ef   :  { %3316 = vmatprep.subr.bf16.mxu0 %v14888_v19  ;;  %3357 = vmatprep.subr.bf16.mxu1 %v14899_v23  ;;  %v19738_v23 = vld [vmem:[#allocation89_spill] sm:$0xff]  ;;  %v19743_v19 = vld [vmem:[#allocation94_spill] sm:$0xff] }
 0x1f2   :  { %3317 = vmatpush1.bf16.msra.mxu0 %v14895_v41  ;;  %3358 = vmatpush1.bf16.msra.mxu1 %v14897_v52  ;;  %v19717_v41 = vld [vmem:[#allocation68_spill] sm:$0xff]  ;;  %v19739_v52 = vld [vmem:[#allocation90_spill] sm:$0xff] }
 0x1f3   :  { %3318 = vmatprep.subr.bf16.mxu0 %v14920_v20  ;;  %3359 = vmatprep.subr.bf16.mxu1 %v14932_v5  ;;  %v19736_v5 = vld [vmem:[#allocation87_spill] sm:$0xff]  ;;  %v19737_v20 = vld [vmem:[#allocation88_spill] sm:$0xff] }
 0x1f6   :  { %3319 = vmatpush1.bf16.msra.mxu0 %v14928_v62  ;;  %3360 = vmatpush1.bf16.msra.mxu1 %v14930_v55  ;;  %v19734_v55 = vld [vmem:[#allocation85_spill] sm:$0xff] }
 0x1f7   :  { %3320 = vmatprep.subr.bf16.mxu0 %v14958_v53  ;;  %3361 = vmatprep.subr.bf16.mxu1 %v14969_v40  ;;  %v19733_v40 = vld [vmem:[#allocation84_spill] sm:$0xff]  ;;  %v19742_v62 = vld [vmem:[#allocation93_spill] sm:$0xff] }
 0x1f8   :  { %v19746_v53 = vld [vmem:[#allocation97_spill] sm:$0xff] }
 0x1fa   :  { %3321 = vmatpush1.bf16.msra.mxu0 %v14965_v0  ;;  %3362 = vmatpush1.bf16.msra.mxu1 %v14967_v33  ;;  %v19741_v0 = vld [vmem:[#allocation92_spill] sm:$0xff]  ;;  %v19744_v33 = vld [vmem:[#allocation95_spill] sm:$0xff] }
 0x1fb   :  { %3322 = vmatprep.subr.bf16.mxu0 %v14990_v29  ;;  %3363 = vmatprep.subr.bf16.mxu1 %v15002_v25  ;;  %v19731_v25 = vld [vmem:[#allocation80_spill] sm:$0xff]  ;;  %v19732_v29 = vld [vmem:[#allocation82_spill] sm:$0xff] }
 0x1fe   :  { %3323 = vmatpush1.bf16.msra.mxu0 %v14998_v60  ;;  %3364 = vmatpush1.bf16.msra.mxu1 %v15000_v21  ;;  %v19730_v21 = vld [vmem:[#allocation83_spill] sm:$0xff]  ;;  %v19745_v60 = vld [vmem:[#allocation96_spill] sm:$0xff] }
 0x1ff   :  { %3324 = vmatprep.subr.bf16.mxu0 %v15028_v11  ;;  %3365 = vmatprep.subr.bf16.mxu1 %v15039_v14  ;;  %v19728_v14 = vld [vmem:[#allocation78_spill] sm:$0xff] }
 0x202   :  { %3325 = vmatpush1.bf16.msra.mxu0 %v15035_v61  ;;  %3366 = vmatpush1.bf16.msra.mxu1 %v15037_v48  ;;  %v19735_v61 = vld [vmem:[#allocation86_spill] sm:$0xff] }
 0x203   :  { %3326 = vmatprep.subr.bf16.mxu0 %v15060_v13  ;;  %3367 = vmatprep.subr.bf16.mxu1 %v15072_v7  ;;  %v19725_v7 = vld [vmem:[#allocation76_spill] sm:$0xff]  ;;  %v19727_v13 = vld [vmem:[#allocation77_spill] sm:$0xff] }
 0x206   :  { %3327 = vmatpush2.bf16.msra.mxu0 %v19715_v31  ;;  %3368 = vmatpush2.bf16.msra.mxu1 %v19716_v26 }
 0x207   :  { %3328 = vmatprep.subr.bf16.mxu0 %v19717_v41  ;;  %3369 = vmatprep.subr.bf16.mxu1 %v19718_v45 }
 0x20a   :  { %3329 = vmatpush2.bf16.msra.mxu0 %v19719_v58  ;;  %3370 = vmatpush2.bf16.msra.mxu1 %v19720_v59  ;;  %v19750_v59 = vld [vmem:[#allocation9_spill] sm:$0xff] }
 0x20b   :  { %3330 = vmatprep.subr.bf16.mxu0 %v19721_v1  ;;  %3371 = vmatprep.subr.bf16.mxu1 %v19722_v2  ;;  %v275_v1 = vadd.f32 %v19750_v59, %v14715_v56 }
 0x20e   :  { %3331 = vmatpush2.bf16.msra.mxu0 %v19723_v8  ;;  %3372 = vmatpush2.bf16.msra.mxu1 %v19724_v9  ;;  %v19751_v8 = vld [vmem:[#allocation8_spill] sm:$0xff] }
 0x20f   :  { %3332 = vmatprep.subr.bf16.mxu0 %v19725_v7  ;;  %3373 = vmatprep.subr.bf16.mxu1 %v19726_v12 }
 0x212   :  { %3333 = vmatpush2.bf16.msra.mxu0 %v19727_v13  ;;  %3374 = vmatpush2.bf16.msra.mxu1 %v19728_v14 }
 0x213   :  { %3334 = vmatprep.subr.bf16.mxu0 %v19729_v15  ;;  %3375 = vmatprep.subr.bf16.mxu1 %v19730_v21 }
 0x216   :  { %3335 = vmatpush2.bf16.msra.mxu0 %v19731_v25  ;;  %3376 = vmatpush2.bf16.msra.mxu1 %v19732_v29 }
 0x217   :  { %3336 = vmatprep.subr.bf16.mxu0 %v19733_v40  ;;  %3377 = vmatprep.subr.bf16.mxu1 %v19734_v55 }
 0x21a   :  { %3337 = vmatpush2.bf16.msra.mxu0 %v19735_v61  ;;  %3378 = vmatpush2.bf16.msra.mxu1 %v19736_v5 }
 0x21b   :  { %3338 = vmatprep.subr.bf16.mxu0 %v19737_v20  ;;  %3379 = vmatprep.subr.bf16.mxu1 %v19738_v23 }
 0x21e   :  { %3339 = vmatpush2.bf16.msra.mxu0 %v19739_v52  ;;  %3380 = vmatpush2.bf16.msra.mxu1 %v19740_v6 }
 0x21f   :  { %3340 = vmatprep.subr.bf16.mxu0 %v19741_v0  ;;  %3381 = vmatprep.subr.bf16.mxu1 %v19742_v62 }
 0x222   :  { %3341 = vmatpush2.bf16.msra.mxu0 %v19743_v19  ;;  %3382 = vmatpush2.bf16.msra.mxu1 %v19744_v33  ;;  %v19752_v33 = vld [vmem:[#allocation62_spill] sm:$0xff] }
 0x223   :  { %3392 = vmatprep.subr.bf16.mxu0 %v19745_v60  ;;  %3433 = vmatprep.subr.bf16.mxu1 %v19746_v53 }
 0x265   :  { %v2332_v48 = vpop.f32.mrf.mxu0  ;;  %v2373_v11 = vpop.f32.mrf.mxu1 }
 0x266   :  { %v2469_v30 = vadd.f32 %v2332_v48, %v19749_v4  ;;  %v2471_v9 = vadd.f32 %v2373_v11, %v19751_v8 }
 0x267   :  { %v2334_v28 = vpop.f32.mrf.mxu0  ;;  %v2375_v35 = vpop.f32.mrf.mxu1 }
 0x268   :  { %v12240_v36 = vmul.f32 -1.442695, %v2469_v30  ;;  %v2470_v32 = vadd.f32 %v2334_v28, %v202_v57  ;;  %v2472_v2 = vadd.f32 %v2375_v35, %v275_v1 }
 0x269   :  { %v2336_v31 = vpop.f32.mrf.mxu0  ;;  %v2377_v26 = vpop.f32.mrf.mxu1 }
 0x26a   :  { %13715 = vpow2.f32 %v12240_v36  ;;  %v12241_v41 = vmul.f32 -1.442695, %v2470_v32  ;;  %v12242_v7 = vmul.f32 -1.442695, %v2472_v2  ;;  %v19754_v36 = vld [vmem:[#allocation67_spill] sm:$0xff] }
 0x26b   :  { %v2337_v45 = vpop.f32.mrf.mxu0  ;;  %v2378_v58 = vpop.f32.mrf.mxu1  ;;  %v19755_v31 = vld [vmem:[#allocation63_spill] sm:$0xff] }
 0x26c   :  { %13717 = vpow2.f32 %v12241_v41 }
 0x26d   :  { %13719 = vtanh.f32 %v2471_v9 }
 0x26e   :  { %13721 = vpow2.f32 %v12242_v7 }
 0x277   :  { %v13716_v12 = vpop.eup %13715 }
 0x278   :  { %v2487_v13 = vadd.f32 1.0, %v13716_v12 }
 0x279   :  { %v13718_v14 = vpop.eup %13717 }
 0x27a   :  { %13723 = vrcp.f32 %v2487_v13  ;;  %v2493_v15 = vadd.f32 1.0, %v13718_v14  ;;  %v13720_v21 = vpop.eup %13719 }
 0x27b   :  { %v13722_v25 = vpop.eup %13721 }
 0x27c   :  { %13725 = vrcp.f32 %v2493_v15  ;;  %v2500_v61 = vadd.f32 1.0, %v13722_v25 }
 0x27e   :  { %13727 = vrcp.f32 %v2500_v61  ;;  %v19767_v61 = vld [vmem:[#allocation109_spill] sm:$0xff] }
 0x287   :  { %v13724_v29 = vpop.eup %13723 }
 0x288   :  { %v2504_v40 = vmul.f32 %v13724_v29, %v13720_v21 }
 0x289   :  { %v13726_v55 = vpop.eup %13725 }
 0x28a   :  { %v2503_v5 = vmul.f32 %v13726_v55, %v15285_v43  ;;  %v19753_v43 = vld [vmem:[#allocation64_spill] sm:$0xff]  ;;  %v19759_v55 = vld [vmem:[#allocation101_spill] sm:$0xff] }
 0x28b   :  { %v13728_v23 = vpop.eup %13727 }
 0x28c   :  { %v15737_v20 = vadd.f32 %v2504_v40, %v2503_v5  ;;  %v19768_v5 = vld [vmem:[#allocation110_spill] sm:$0xff] }
 0x28e   :  { %13729 = vtanh.f32 %v15737_v20 }
 0x29b   :  { %v13730_v52 = vpop.eup %13729 }
 0x29c   :  { %v2507_v6 = vmul.f32 %v13730_v52, %v13728_v23  ;;  %v19769_v23 = vld [vmem:[#allocation111_spill] sm:$0xff]  ;;  %v19770_v52 = vld [vmem:[#allocation112_spill] sm:$0xff] }
 0x29e   :  { %v15740_v0 = vpack.c.bf16 %v2507_v6, %v2507_v6  ;;  %v19771_v6 = vld [vmem:[#allocation113_spill] sm:$0xff] }
 0x2a0   :  { %2536 = vst [vmem:[#allocation3 + $0x8] sm:$0xf] %v15740_v0 }
 0x2a5   :  { %v2414_v62 = vpop.f32.mrf.mxu0  ;;  %v2455_v19 = vpop.f32.mrf.mxu1 }
 0x2a6   :  { %v2480_v60 = vadd.f32 %v2414_v62, %v19752_v33  ;;  %v2482_v26 = vadd.f32 %v2455_v19, %v19755_v31  ;;  %v19772_v62 = vld [vmem:[#allocation114_spill] sm:$0xff]  ;;  %v19773_v19 = vld [vmem:[#allocation115_spill] sm:$0xff]  ;;  %v19774_v33 = vld [vmem:[#allocation116_spill] sm:$0xff] }
 0x2a7   :  { %v2416_v53 = vpop.f32.mrf.mxu0  ;;  %v2457_v48 = vpop.f32.mrf.mxu1  ;;  %v19788_v31 = vld [vmem:[#allocation130_spill] sm:$0xff] }
 0x2a8   :  { %v12243_v11 = vmul.f32 -1.442695, %v2480_v60  ;;  %v2481_v39 = vadd.f32 %v2416_v53, %v19753_v43  ;;  %v2483_v32 = vadd.f32 %v2457_v48, %v19754_v36  ;;  %v19775_v60 = vld [vmem:[#allocation117_spill] sm:$0xff]  ;;  %v19776_v53 = vld [vmem:[#allocation118_spill] sm:$0xff]  ;;  %v19777_v48 = vld [vmem:[#allocation119_spill] sm:$0xff] }
 0x2a9   :  { %v2418_v57 = vpop.f32.mrf.mxu0  ;;  %v2459_v4 = vpop.f32.mrf.mxu1  ;;  %v19779_v43 = vld [vmem:[#allocation121_spill] sm:$0xff]  ;;  %v19786_v36 = vld [vmem:[#allocation128_spill] sm:$0xff] }
 0x2aa   :  { %13731 = vpow2.f32 %v12243_v11  ;;  %v12244_v30 = vmul.f32 -1.442695, %v2481_v39  ;;  %v12245_v41 = vmul.f32 -1.442695, %v2483_v32  ;;  %v19778_v11 = vld [vmem:[#allocation120_spill] sm:$0xff]  ;;  %v19780_v39 = vld [vmem:[#allocation122_spill] sm:$0xff] }
 0x2ab   :  { %v2419_v28 = vpop.f32.mrf.mxu0  ;;  %v2460_v35 = vpop.f32.mrf.mxu1  ;;  %v19781_v57 = vld [vmem:[#allocation123_spill] sm:$0xff]  ;;  %v19782_v4 = vld [vmem:[#allocation124_spill] sm:$0xff]  ;;  %v19787_v32 = vld [vmem:[#allocation129_spill] sm:$0xff] }
 0x2ac   :  { %13733 = vpow2.f32 %v12244_v30  ;;  %v19783_v30 = vld [vmem:[#allocation125_spill] sm:$0xff]  ;;  %v19784_v28 = vld [vmem:[#allocation126_spill] sm:$0xff]  ;;  %v19785_v35 = vld [vmem:[#allocation127_spill] sm:$0xff] }
 0x2ad   :  { %13735 = vtanh.f32 %v2482_v26  ;;  %v19789_v26 = vld [vmem:[#allocation131_spill] sm:$0xff] }
 0x2ae   :  { %13737 = vpow2.f32 %v12245_v41  ;;  %v19790_v41 = vld [vmem:[#allocation132_spill] sm:$0xff] }
 0x2b7   :  { %v13732_v45 = vpop.eup %13731 }
 0x2b8   :  { %v2511_v58 = vadd.f32 1.0, %v13732_v45  ;;  %v19791_v45 = vld [vmem:[#allocation133_spill] sm:$0xff] }
 0x2b9   :  { %v13734_v59 = vpop.eup %13733 }
 0x2ba   :  { %13739 = vrcp.f32 %v2511_v58  ;;  %v2517_v1 = vadd.f32 1.0, %v13734_v59  ;;  %v13736_v2 = vpop.eup %13735  ;;  %v19792_v58 = vld [vmem:[#allocation134_spill] sm:$0xff]  ;;  %v19793_v59 = vld [vmem:[#allocation135_spill] sm:$0xff] }
 0x2bb   :  { %v13738_v8 = vpop.eup %13737 }
 0x2bc   :  { %13741 = vrcp.f32 %v2517_v1  ;;  %v2524_v13 = vadd.f32 1.0, %v13738_v8  ;;  %v19794_v1 = vld [vmem:[#allocation136_spill] sm:$0xff]  ;;  %v19796_v8 = vld [vmem:[#allocation138_spill] sm:$0xff] }
 0x2be   :  { %13743 = vrcp.f32 %v2524_v13 }
 0x2c7   :  { %v13740_v9 = vpop.eup %13739 }
 0x2c8   :  { %v2528_v7 = vmul.f32 %v13740_v9, %v13736_v2  ;;  %v19795_v2 = vld [vmem:[#allocation137_spill] sm:$0xff]  ;;  %v19797_v9 = vld [vmem:[#allocation139_spill] sm:$0xff] }
 0x2c9   :  { %v13742_v12 = vpop.eup %13741 }
 0x2ca   :  { %v2527_v14 = vmul.f32 %v13742_v12, %v15295_v16  ;;  %v19756_v16 = vld [vmem:[#allocation98_spill] sm:$0xff]  ;;  %v19799_v12 = vld [vmem:[#allocation141_spill] sm:$0xff] }
 0x2cb   :  { %v13744_v21 = vpop.eup %13743 }
 0x2cc   :  { %v15748_v15 = vadd.f32 %v2528_v7, %v2527_v14  ;;  %v19798_v7 = vld [vmem:[#allocation140_spill] sm:$0xff]  ;;  %v3603_v14 = vld [vmem:[%s19326_s2 + $0x188] sm:$0xff] }
 0x2ce   :  { %13745 = vtanh.f32 %v15748_v15 }
 0x2db   :  { %v13746_v25 = vpop.eup %13745 }
 0x2dc   :  { %v2531_v29 = vmul.f32 %v13746_v25, %v13744_v21  ;;  %v3607_v21 = vld [vmem:[%s19326_s2 + $0x1a8] sm:$0xff] }
 0x2dd   :  { %v15852_v25 = vcombine.high %v3603_v14, %v3607_v21 }
 0x2de   :  { %v2537_v40 = vpack.c.bf16 %v2531_v29, %v2531_v29 }
 0x2e0   :  { %2541 = vst [vmem:[#allocation3 + $0x34] sm:$0xf] %v2537_v40  ;;  %3342 = vmatprep.mubr.bf16.mxu0 %v2537_v40  ;;  %3383 = vmatprep.mubr.bf16.mxu1 %v2537_v40 }
 0x2e1   :  { %3343 = vmatmul.mubr.bf16.vlgmr.msra.gmra.mxu0 %v15740_v0  ;;  %3384 = vmatmul.mubr.bf16.vlgmr.msra.gmra.mxu1 %v15740_v0 }
 0x2e2   :  { %3393 = vmatpush1.bf16.msra.mxu0 %v15269_v18  ;;  %3434 = vmatpush1.bf16.msra.mxu1 %v15271_v22  ;;  %v19757_v18 = vld [vmem:[#allocation99_spill] sm:$0xff]  ;;  %v19758_v22 = vld [vmem:[#allocation100_spill] sm:$0xff] }
 0x2e3   :  { %3424 = vmatprep.mubr.bf16.mxu0 %v2537_v40  ;;  %3465 = vmatprep.mubr.bf16.mxu1 %v2537_v40  ;;  %v15860_v40 = vcombine.low %v3603_v14, %v3607_v21  ;;  %v3675_v14 = vld [vmem:[%s19326_s2 + $0x3c8] sm:$0xff] }
 0x2e4   :  { %3394 = vmatprep.subr.bf16.mxu0 %v15313_v46  ;;  %3435 = vmatprep.subr.bf16.mxu1 %v15315_v42  ;;  %v19760_v46 = vld [vmem:[#allocation102_spill] sm:$0xff]  ;;  %v19761_v42 = vld [vmem:[#allocation103_spill] sm:$0xff] }
 0x2e6   :  { %3395 = vmatpush1.bf16.msra.mxu0 %v15330_v49  ;;  %3436 = vmatpush1.bf16.msra.mxu1 %v15332_v44  ;;  %v19762_v49 = vld [vmem:[#allocation104_spill] sm:$0xff]  ;;  %v19763_v44 = vld [vmem:[#allocation105_spill] sm:$0xff] }
 0x2e7   :  { %3396 = vmatprep.subr.bf16.mxu0 %v15334_v34  ;;  %3437 = vmatprep.subr.bf16.mxu1 %v15336_v38  ;;  %v19764_v34 = vld [vmem:[#allocation106_spill] sm:$0xff]  ;;  %v19765_v38 = vld [vmem:[#allocation107_spill] sm:$0xff] }
 0x2ea   :  { %3397 = vmatpush1.bf16.msra.mxu0 %v15354_v17  ;;  %3438 = vmatpush1.bf16.msra.mxu1 %v19756_v16  ;;  %v19766_v17 = vld [vmem:[#allocation108_spill] sm:$0xff]  ;;  %v3594_v16 = vld [vmem:[%s19326_s2 + $0x140] sm:$0xff] }
 0x2eb   :  { %3398 = vmatprep.subr.bf16.mxu0 %v19757_v18  ;;  %3439 = vmatprep.subr.bf16.mxu1 %v19758_v22  ;;  %v3598_v18 = vld [vmem:[%s19326_s2 + $0x160] sm:$0xff]  ;;  %v3595_v22 = vld [vmem:[%s19326_s2 + $0x148] sm:$0xff] }
 0x2ee   :  { %3399 = vmatpush1.bf16.msra.mxu0 %v19759_v55  ;;  %3440 = vmatpush1.bf16.msra.mxu1 %v19760_v46  ;;  %v15874_v55 = vcombine.high %v3594_v16, %v3598_v18  ;;  %v3599_v46 = vld [vmem:[%s19326_s2 + $0x168] sm:$0xff] }
 0x2ef   :  { %3400 = vmatprep.subr.bf16.mxu0 %v19761_v42  ;;  %3441 = vmatprep.subr.bf16.mxu1 %v19762_v49  ;;  %v15879_v42 = vcombine.low %v3594_v16, %v3598_v18  ;;  %v15881_v49 = vcombine.low %v3595_v22, %v3599_v46  ;;  %v3679_v16 = vld [vmem:[%s19326_s2 + $0x3e8] sm:$0xff] }
 0x2f2   :  { %3401 = vmatpush1.bf16.msra.mxu0 %v19763_v44  ;;  %3442 = vmatpush1.bf16.msra.mxu1 %v19764_v34  ;;  %v15883_v44 = vcombine.high %v3595_v22, %v3599_v46  ;;  %v3586_v34 = vld [vmem:[%s19326_s2 + $0x100] sm:$0xff]  ;;  %v16025_v22 = vcombine.low %v3675_v14, %v3679_v16  ;;  %v16027_v46 = vcombine.high %v3675_v14, %v3679_v16 }
 0x2f3   :  { %3402 = vmatprep.subr.bf16.mxu0 %v19765_v38  ;;  %3443 = vmatprep.subr.bf16.mxu1 %v19766_v17  ;;  %v3590_v38 = vld [vmem:[%s19326_s2 + $0x120] sm:$0xff]  ;;  %v3587_v17 = vld [vmem:[%s19326_s2 + $0x108] sm:$0xff] }
 0x2f6   :  { %3403 = vmatpush1.bf16.msra.mxu0 %v19767_v61  ;;  %3444 = vmatpush1.bf16.msra.mxu1 %v19768_v5  ;;  %v15898_v61 = vcombine.high %v3586_v34, %v3590_v38  ;;  %v3591_v5 = vld [vmem:[%s19326_s2 + $0x128] sm:$0xff] }
 0x2f7   :  { %3404 = vmatprep.subr.bf16.mxu0 %v19769_v23  ;;  %3445 = vmatprep.subr.bf16.mxu1 %v19770_v52  ;;  %v15903_v23 = vcombine.low %v3586_v34, %v3590_v38  ;;  %v15905_v52 = vcombine.low %v3587_v17, %v3591_v5  ;;  %v3666_v34 = vld [vmem:[%s19326_s2 + $0x380] sm:$0xff] }
 0x2f8   :  { %v3670_v38 = vld [vmem:[%s19326_s2 + $0x3a0] sm:$0xff] }
 0x2fa   :  { %3405 = vmatpush1.bf16.msra.mxu0 %v19771_v6  ;;  %3446 = vmatpush1.bf16.msra.mxu1 %v19772_v62  ;;  %v15907_v6 = vcombine.high %v3587_v17, %v3591_v5  ;;  %v3578_v62 = vld [vmem:[%s19326_s2 + $0xc0] sm:$0xff]  ;;  %v3667_v17 = vld [vmem:[%s19326_s2 + $0x388] sm:$0xff]  ;;  %v16042_v5 = vcombine.high %v3666_v34, %v3670_v38 }
 0x2fb   :  { %3406 = vmatprep.subr.bf16.mxu0 %v19773_v19  ;;  %3447 = vmatprep.subr.bf16.mxu1 %v19774_v33  ;;  %v3582_v19 = vld [vmem:[%s19326_s2 + $0xe0] sm:$0xff]  ;;  %v3579_v33 = vld [vmem:[%s19326_s2 + $0xc8] sm:$0xff] }
 0x2fe   :  { %3407 = vmatpush1.bf16.msra.mxu0 %v19775_v60  ;;  %3448 = vmatpush1.bf16.msra.mxu1 %v19776_v53  ;;  %v15922_v60 = vcombine.high %v3578_v62, %v3582_v19  ;;  %v3583_v53 = vld [vmem:[%s19326_s2 + $0xe8] sm:$0xff] }
 0x2ff   :  { %3408 = vmatprep.subr.bf16.mxu0 %v19777_v48  ;;  %3449 = vmatprep.subr.bf16.mxu1 %v19778_v11  ;;  %v15927_v48 = vcombine.low %v3578_v62, %v3582_v19  ;;  %v15929_v11 = vcombine.low %v3579_v33, %v3583_v53  ;;  %v3671_v62 = vld [vmem:[%s19326_s2 + $0x3a8] sm:$0xff]  ;;  %v16047_v19 = vcombine.low %v3666_v34, %v3670_v38  ;;  %v3642_v34 = vld [vmem:[%s19326_s2 + $0x2c0] sm:$0xff] }
 0x300   :  { %v3646_v38 = vld [vmem:[%s19326_s2 + $0x2e0] sm:$0xff] }
 0x301   :  { %19800 = vst [vmem:[#allocation65_spill] sm:$0xff] %v16047_v19 }
 0x302   :  { %3409 = vmatpush2.bf16.msra.mxu0 %v19779_v43  ;;  %3450 = vmatpush2.bf16.msra.mxu1 %v19780_v39  ;;  %v15931_v43 = vcombine.high %v3579_v33, %v3583_v53  ;;  %v3570_v39 = vld [vmem:[%s19326_s2 + $0x80] sm:$0xff]  ;;  %v16049_v33 = vcombine.low %v3667_v17, %v3671_v62  ;;  %v16051_v53 = vcombine.high %v3667_v17, %v3671_v62  ;;  %v3643_v17 = vld [vmem:[%s19326_s2 + $0x2c8] sm:$0xff] }
 0x303   :  { %3410 = vmatprep.subr.bf16.mxu0 %v19781_v57  ;;  %3451 = vmatprep.subr.bf16.mxu1 %v19782_v4  ;;  %v3574_v57 = vld [vmem:[%s19326_s2 + $0xa0] sm:$0xff]  ;;  %v3571_v4 = vld [vmem:[%s19326_s2 + $0x88] sm:$0xff]  ;;  %v16114_v62 = vcombine.low %v3642_v34, %v3646_v38 }
 0x304   :  { %19801 = vst [vmem:[#allocation66_spill] sm:$0xff] %v16049_v33 }
 0x305   :  { %19810 = vst [vmem:[#allocation76_spill] sm:$0xff] %v16114_v62 }
 0x306   :  { %3411 = vmatpush2.bf16.msra.mxu0 %v19783_v30  ;;  %3452 = vmatpush2.bf16.msra.mxu1 %v19784_v28  ;;  %v15946_v30 = vcombine.high %v3570_v39, %v3574_v57  ;;  %v3575_v28 = vld [vmem:[%s19326_s2 + $0xa8] sm:$0xff] }
 0x307   :  { %3412 = vmatprep.subr.bf16.mxu0 %v19785_v35  ;;  %3453 = vmatprep.subr.bf16.mxu1 %v19786_v36  ;;  %v15951_v35 = vcombine.low %v3570_v39, %v3574_v57  ;;  %v15953_v36 = vcombine.low %v3571_v4, %v3575_v28  ;;  %v3658_v39 = vld [vmem:[%s19326_s2 + $0x340] sm:$0xff] }
 0x308   :  { %v3662_v57 = vld [vmem:[%s19326_s2 + $0x360] sm:$0xff] }
 0x30a   :  { %3413 = vmatpush2.bf16.msra.mxu0 %v19787_v32  ;;  %3454 = vmatpush2.bf16.msra.mxu1 %v19788_v31  ;;  %v15955_v32 = vcombine.high %v3571_v4, %v3575_v28  ;;  %v3562_v31 = vld [vmem:[%s19326_s2 + $0x40] sm:$0xff]  ;;  %v3659_v4 = vld [vmem:[%s19326_s2 + $0x348] sm:$0xff]  ;;  %v16066_v28 = vcombine.high %v3658_v39, %v3662_v57 }
 0x30b   :  { %3414 = vmatprep.subr.bf16.mxu0 %v19789_v26  ;;  %3455 = vmatprep.subr.bf16.mxu1 %v19790_v41  ;;  %v3566_v26 = vld [vmem:[%s19326_s2 + $0x60] sm:$0xff]  ;;  %v3563_v41 = vld [vmem:[%s19326_s2 + $0x48] sm:$0xff] }
 0x30c   :  { %19802 = vst [vmem:[#allocation68_spill] sm:$0xff] %v16066_v28 }
 0x30e   :  { %3415 = vmatpush2.bf16.msra.mxu0 %v19791_v45  ;;  %3456 = vmatpush2.bf16.msra.mxu1 %v19792_v58  ;;  %v15970_v45 = vcombine.high %v3562_v31, %v3566_v26  ;;  %v3567_v58 = vld [vmem:[%s19326_s2 + $0x68] sm:$0xff] }
 0x30f   :  { %3416 = vmatprep.subr.bf16.mxu0 %v19793_v59  ;;  %3457 = vmatprep.subr.bf16.mxu1 %v19794_v1  ;;  %v15975_v59 = vcombine.low %v3562_v31, %v3566_v26  ;;  %v15977_v1 = vcombine.low %v3563_v41, %v3567_v58  ;;  %v3663_v31 = vld [vmem:[%s19326_s2 + $0x368] sm:$0xff]  ;;  %v16071_v26 = vcombine.low %v3658_v39, %v3662_v57 }
 0x310   :  { %v16116_v39 = vcombine.high %v3642_v34, %v3646_v38  ;;  %v3647_v57 = vld [vmem:[%s19326_s2 + $0x2e8] sm:$0xff]  ;;  %v3626_v38 = vld [vmem:[%s19326_s2 + $0x240] sm:$0xff] }
 0x311   :  { %19803 = vst [vmem:[#allocation71_spill] sm:$0xff] %v16071_v26  ;;  %v3639_v34 = vld [vmem:[%s19326_s2 + $0x2a8] sm:$0xff] }
 0x312   :  { %3417 = vmatpush2.bf16.msra.mxu0 %v19795_v2  ;;  %3458 = vmatpush2.bf16.msra.mxu1 %v19796_v8  ;;  %v15979_v2 = vcombine.high %v3563_v41, %v3567_v58  ;;  %v3554_v8 = vld [vmem:[%s19326_s2] sm:$0xff]  ;;  %v16073_v41 = vcombine.low %v3659_v4, %v3663_v31  ;;  %v16075_v58 = vcombine.high %v3659_v4, %v3663_v31 }
 0x313   :  { %3418 = vmatprep.subr.bf16.mxu0 %v19797_v9  ;;  %3459 = vmatprep.subr.bf16.mxu1 %v19798_v7  ;;  %v3558_v9 = vld [vmem:[%s19326_s2 + $0x20] sm:$0xff]  ;;  %v3555_v7 = vld [vmem:[%s19326_s2 + $0x8] sm:$0xff]  ;;  %19811 = vst [vmem:[#allocation79_spill] sm:$0xff] %v16116_v39 }
 0x314   :  { %19804 = vst [vmem:[#allocation69_spill] sm:$0xff] %v16073_v41  ;;  %19805 = vst [vmem:[#allocation70_spill] sm:$0xff] %v16075_v58  ;;  %v3634_v4 = vld [vmem:[%s19326_s2 + $0x280] sm:$0xff] }
 0x315   :  { %v3638_v31 = vld [vmem:[%s19326_s2 + $0x2a0] sm:$0xff] }
 0x316   :  { %3419 = vmatpush2.bf16.msra.mxu0 %v19799_v12  ;;  %3460 = vmatpush2.bf16.msra.mxu1 %v15620_v47  ;;  %v3602_v47 = vld [vmem:[%s19326_s2 + $0x180] sm:$0xff]  ;;  %v15994_v12 = vcombine.high %v3554_v8, %v3558_v9 }
 0x317   :  { %3420 = vmatprep.subr.bf16.mxu0 %v15624_v37  ;;  %3461 = vmatprep.subr.bf16.mxu1 %v15626_v50  ;;  %v3610_v50 = vld [vmem:[%s19326_s2 + $0x1c0] sm:$0xff] }
 0x318   :  { %v3614_v37 = vld [vmem:[%s19326_s2 + $0x1e0] sm:$0xff] }
 0x31a   :  { %3421 = vmatpush2.bf16.msra.mxu0 %v15642_v3  ;;  %3462 = vmatpush2.bf16.msra.mxu1 %v15644_v54  ;;  %v3606_v3 = vld [vmem:[%s19326_s2 + $0x1a0] sm:$0xff] }
 0x31b   :  { %3422 = vmatprep.subr.bf16.mxu0 %v15648_v51  ;;  %3463 = vmatprep.subr.bf16.mxu1 %v15650_v63  ;;  %v3611_v51 = vld [vmem:[%s19326_s2 + $0x1c8] sm:$0xff]  ;;  %v15826_v63 = vcombine.low %v3610_v50, %v3614_v37  ;;  %v15843_v13 = vcombine.high %v3602_v47, %v3606_v3  ;;  %v15856_v29 = vcombine.low %v3602_v47, %v3606_v3  ;;  %v3674_v47 = vld [vmem:[%s19326_s2 + $0x3c0] sm:$0xff] }
 0x31c   :  { %v3678_v3 = vld [vmem:[%s19326_s2 + $0x3e0] sm:$0xff] }
 0x31d   :  { %v16018_v21 = vcombine.high %v3674_v47, %v3678_v3  ;;  %v16023_v18 = vcombine.low %v3674_v47, %v3678_v3  ;;  %v3655_v47 = vld [vmem:[%s19326_s2 + $0x328] sm:$0xff] }
 0x31e   :  { %3423 = vmatpush2.bf16.msra.mxu0 %v15654_v24  ;;  %3464 = vmatpush2.bf16.msra.mxu1 %v15656_v10  ;;  %v15828_v24 = vcombine.high %v3610_v50, %v3614_v37  ;;  %v3615_v10 = vld [vmem:[%s19326_s2 + $0x1e8] sm:$0xff]  ;;  %v15999_v37 = vcombine.low %v3554_v8, %v3558_v9  ;;  %v3650_v8 = vld [vmem:[%s19326_s2 + $0x300] sm:$0xff] }
 0x31f   :  { %v15839_v54 = vcombine.low %v3611_v51, %v3615_v10  ;;  %v3559_v50 = vld [vmem:[%s19326_s2 + $0x28] sm:$0xff]  ;;  %v3654_v9 = vld [vmem:[%s19326_s2 + $0x320] sm:$0xff] }
 0x320   :  { %4322 = vmatprep.subr.bf16.mxu0 %v15828_v24  ;;  %v16095_v3 = vcombine.low %v3650_v8, %v3654_v9 }
 0x321   :  { %3425 = vmatmul.mubr.bf16.vlgmr.msra.gmra.mxu0 %v15740_v0  ;;  %3466 = vmatmul.mubr.bf16.vlgmr.msra.gmra.mxu1 %v15740_v0  ;;  %v15841_v0 = vcombine.high %v3611_v51, %v3615_v10  ;;  %v16001_v51 = vcombine.low %v3555_v7, %v3559_v50  ;;  %v16003_v10 = vcombine.high %v3555_v7, %v3559_v50  ;;  %v3651_v7 = vld [vmem:[%s19326_s2 + $0x308] sm:$0xff] }
 0x322   :  { %4323 = vmatpush1.bf16.msra.mxu0 %v15826_v63  ;;  %v16090_v50 = vcombine.high %v3650_v8, %v3654_v9  ;;  %19807 = vst [vmem:[#allocation75_spill] sm:$0xff] %v16095_v3  ;;  %v16097_v14 = vcombine.low %v3651_v7, %v3655_v47  ;;  %v16099_v16 = vcombine.high %v3651_v7, %v3655_v47  ;;  %v3635_v47 = vld [vmem:[%s19326_s2 + $0x288] sm:$0xff] }
 0x323   :  { %4363 = vmatprep.subr.bf16.mxu1 %v15841_v0  ;;  %4324 = vmatprep.subr.bf16.mxu0 %v15843_v13  ;;  %v16127_v8 = vcombine.low %v3643_v17, %v3647_v57  ;;  %v16129_v9 = vcombine.high %v3643_v17, %v3647_v57  ;;  %v16131_v7 = vcombine.high %v3634_v4, %v3638_v31  ;;  %v3630_v17 = vld [vmem:[%s19326_s2 + $0x260] sm:$0xff]  ;;  %v3627_v57 = vld [vmem:[%s19326_s2 + $0x248] sm:$0xff] }
 0x324   :  { %4364 = vmatpush1.bf16.msra.mxu1 %v15839_v54  ;;  %19806 = vst [vmem:[#allocation72_spill] sm:$0xff] %v16090_v50  ;;  %19808 = vst [vmem:[#allocation73_spill] sm:$0xff] %v16097_v14  ;;  %v16143_v56 = vcombine.high %v3635_v47, %v3639_v34 }
 0x325   :  { %4365 = vmatprep.subr.bf16.mxu1 %v15852_v25  ;;  %19809 = vst [vmem:[#allocation74_spill] sm:$0xff] %v16099_v16  ;;  %19812 = vst [vmem:[#allocation77_spill] sm:$0xff] %v16127_v8 }
 0x326   :  { %4325 = vmatpush1.bf16.msra.mxu0 %v15856_v29  ;;  %19813 = vst [vmem:[#allocation78_spill] sm:$0xff] %v16129_v9  ;;  %19814 = vst [vmem:[#allocation81_spill] sm:$0xff] %v16131_v7 }
 0x327   :  { %4326 = vmatprep.subr.bf16.mxu0 %v15874_v55  ;;  %19815 = vst [vmem:[#allocation83_spill] sm:$0xff] %v16143_v56 }
 0x328   :  { %4366 = vmatpush1.bf16.msra.mxu1 %v15860_v40 }
 0x329   :  { %4367 = vmatprep.subr.bf16.mxu1 %v15883_v44 }
 0x32a   :  { %4327 = vmatpush1.bf16.msra.mxu0 %v15879_v42 }
 0x32b   :  { %4328 = vmatprep.subr.bf16.mxu0 %v15898_v61 }
 0x32c   :  { %4368 = vmatpush1.bf16.msra.mxu1 %v15881_v49 }
 0x32d   :  { %4369 = vmatprep.subr.bf16.mxu1 %v15907_v6 }
 0x32e   :  { %4329 = vmatpush1.bf16.msra.mxu0 %v15903_v23 }
 0x32f   :  { %4330 = vmatprep.subr.bf16.mxu0 %v15922_v60 }
 0x330   :  { %4370 = vmatpush1.bf16.msra.mxu1 %v15905_v52 }
 0x331   :  { %4371 = vmatprep.subr.bf16.mxu1 %v15931_v43 }
 0x332   :  { %4331 = vmatpush1.bf16.msra.mxu0 %v15927_v48 }
 0x333   :  { %4332 = vmatprep.subr.bf16.mxu0 %v15946_v30 }
 0x334   :  { %4372 = vmatpush1.bf16.msra.mxu1 %v15929_v11 }
 0x335   :  { %4373 = vmatprep.subr.bf16.mxu1 %v15955_v32 }
 0x336   :  { %4333 = vmatpush1.bf16.msra.mxu0 %v15951_v35 }
 0x337   :  { %4334 = vmatprep.subr.bf16.mxu0 %v15970_v45 }
 0x338   :  { %4374 = vmatpush1.bf16.msra.mxu1 %v15953_v36 }
 0x339   :  { %4375 = vmatprep.subr.bf16.mxu1 %v15979_v2 }
 0x33a   :  { %4335 = vmatpush1.bf16.msra.mxu0 %v15975_v59 }
 0x33b   :  { %4336 = vmatprep.subr.bf16.mxu0 %v15994_v12 }
 0x33c   :  { %4376 = vmatpush1.bf16.msra.mxu1 %v15977_v1 }
 0x33d   :  { %4377 = vmatprep.subr.bf16.mxu1 %v16003_v10 }
 0x33e   :  { %4337 = vmatpush1.bf16.msra.mxu0 %v15999_v37 }
 0x33f   :  { %4338 = vmatprep.subr.bf16.mxu0 %v16018_v21 }
 0x340   :  { %4378 = vmatpush1.bf16.msra.mxu1 %v16001_v51 }
 0x341   :  { %4379 = vmatprep.subr.bf16.mxu1 %v16027_v46 }
 0x342   :  { %4339 = vmatpush2.bf16.msra.mxu0 %v16023_v18 }
 0x343   :  { %4340 = vmatprep.subr.bf16.mxu0 %v16042_v5 }
 0x344   :  { %4380 = vmatpush2.bf16.msra.mxu1 %v16025_v22 }
 0x345   :  { %4381 = vmatprep.subr.bf16.mxu1 %v16051_v53 }
 0x346   :  { %4341 = vmatpush2.bf16.msra.mxu0 %v16047_v19 }
 0x347   :  { %4342 = vmatprep.subr.bf16.mxu0 %v16066_v28 }
 0x348   :  { %4382 = vmatpush2.bf16.msra.mxu1 %v16049_v33 }
 0x349   :  { %4383 = vmatprep.subr.bf16.mxu1 %v16075_v58 }
 0x34a   :  { %4343 = vmatpush2.bf16.msra.mxu0 %v16071_v26  ;;  %v19831_v26 = vld [vmem:[#allocation13_spill] sm:$0xff] }
 0x34b   :  { %4344 = vmatprep.subr.bf16.mxu0 %v16090_v50 }
 0x34c   :  { %4384 = vmatpush2.bf16.msra.mxu1 %v16073_v41 }
 0x34d   :  { %4385 = vmatprep.subr.bf16.mxu1 %v16099_v16  ;;  %v16165_v16 = vcombine.high %v3627_v57, %v3631_v27 }
 0x34e   :  { %4345 = vmatpush2.bf16.msra.mxu0 %v16095_v3  ;;  %v16162_v3 = vcombine.high %v3626_v38, %v3630_v17 }
 0x34f   :  { %4346 = vmatprep.subr.bf16.mxu0 %v16116_v39  ;;  %v16160_v39 = vcombine.low %v3635_v47, %v3639_v34  ;;  %19819 = vst [vmem:[#allocation85_spill] sm:$0xff] %v16165_v16  ;;  %v3623_v47 = vld [vmem:[%s19326_s2 + $0x228] sm:$0xff]  ;;  %v16180_v34 = vcombine.low %v3626_v38, %v3630_v17  ;;  %v3616_v17 = vld [vmem:[%s19326_s2 + $0x1f0] sm:$0xff] }
 0x350   :  { %4386 = vmatpush2.bf16.msra.mxu1 %v16097_v14  ;;  %v16156_v14 = vcombine.low %v3634_v4, %v3638_v31  ;;  %19818 = vst [vmem:[#allocation84_spill] sm:$0xff] %v16162_v3  ;;  %v3622_v4 = vld [vmem:[%s19326_s2 + $0x220] sm:$0xff]  ;;  %v3619_v31 = vld [vmem:[%s19326_s2 + $0x208] sm:$0xff] }
 0x351   :  { %4387 = vmatprep.subr.bf16.mxu1 %v16129_v9  ;;  %19817 = vst [vmem:[#allocation82_spill] sm:$0xff] %v16160_v39  ;;  %v3618_v9 = vld [vmem:[%s19326_s2 + $0x200] sm:$0xff]  ;;  %19820 = vst [vmem:[#allocation86_spill] sm:$0xff] %v16180_v34  ;;  %v16196_v38 = vcombine.low %v3619_v31, %v3623_v47 }
 0x352   :  { %4347 = vmatpush2.bf16.msra.mxu0 %v16114_v62  ;;  %19816 = vst [vmem:[#allocation80_spill] sm:$0xff] %v16156_v14  ;;  %v16192_v62 = vcombine.low %v3618_v9, %v3622_v4 }
 0x353   :  { %4348 = vmatprep.subr.bf16.mxu0 %v16131_v7  ;;  %v16186_v7 = vcombine.high %v3618_v9, %v3622_v4  ;;  %19825 = vst [vmem:[#allocation91_spill] sm:$0xff] %v16196_v38  ;;  %v3613_v9 = vld [vmem:[%s19326_s2 + $0x1d8] sm:$0xff] }
 0x354   :  { %4388 = vmatpush2.bf16.msra.mxu1 %v16127_v8  ;;  %v16189_v8 = vcombine.high %v3619_v31, %v3623_v47  ;;  %19824 = vst [vmem:[#allocation90_spill] sm:$0xff] %v16192_v62  ;;  %v3617_v4 = vld [vmem:[%s19326_s2 + $0x1f8] sm:$0xff] }
 0x355   :  { %4389 = vmatprep.subr.bf16.mxu1 %v16143_v56  ;;  %v16184_v56 = vcombine.low %v3627_v57, %v3631_v27  ;;  %19822 = vst [vmem:[#allocation88_spill] sm:$0xff] %v16186_v7  ;;  %v3612_v27 = vld [vmem:[%s19326_s2 + $0x1d0] sm:$0xff]  ;;  %v16217_v47 = vcombine.low %v3613_v9, %v3617_v4 }
 0x356   :  { %4349 = vmatpush2.bf16.msra.mxu0 %v16156_v14  ;;  %19823 = vst [vmem:[#allocation89_spill] sm:$0xff] %v16189_v8  ;;  %v16210_v57 = vcombine.high %v3612_v27, %v3616_v17  ;;  %v16215_v31 = vcombine.low %v3612_v27, %v3616_v17 }
 0x357   :  { %4350 = vmatprep.subr.bf16.mxu0 %v16162_v3  ;;  %19821 = vst [vmem:[#allocation87_spill] sm:$0xff] %v16184_v56 }
 0x358   :  { %4390 = vmatpush2.bf16.msra.mxu1 %v16160_v39  ;;  %19826 = vst [vmem:[#allocation92_spill] sm:$0xff] %v16210_v57  ;;  %v19829_v39 = vld [vmem:[#allocation14_spill] sm:$0xff] }
 0x359   :  { %4391 = vmatprep.subr.bf16.mxu1 %v16165_v16 }
 0x35a   :  { %4351 = vmatpush2.bf16.msra.mxu0 %v16180_v34 }
 0x35b   :  { %4352 = vmatprep.subr.bf16.mxu0 %v16186_v7 }
 0x35c   :  { %4392 = vmatpush2.bf16.msra.mxu1 %v16184_v56  ;;  %v19828_v56 = vld [vmem:[#allocation11_spill] sm:$0xff] }
 0x35d   :  { %4393 = vmatprep.subr.bf16.mxu1 %v16189_v8 }
 0x35e   :  { %4353 = vmatpush2.bf16.msra.mxu0 %v16192_v62  ;;  %v16219_v62 = vcombine.high %v3613_v9, %v3617_v4  ;;  %v19830_v4 = vld [vmem:[#allocation15_spill] sm:$0xff] }
 0x35f   :  { %4404 = vmatprep.subr.bf16.mxu0 %v16210_v57 }
 0x360   :  { %4394 = vmatpush2.bf16.msra.mxu1 %v16196_v38  ;;  %19827 = vst [vmem:[#allocation93_spill] sm:$0xff] %v16219_v62 }
 0x361   :  { %4445 = vmatprep.subr.bf16.mxu1 %v16219_v62 }
 0x3a1   :  { %v3344_v8 = vpop.f32.mrf.mxu0  ;;  %v3385_v7 = vpop.f32.mrf.mxu1 }
 0x3a2   :  { %v3481_v38 = vadd.f32 %v3344_v8, %v19828_v56  ;;  %v3483_v62 = vadd.f32 %v3385_v7, %v19831_v26 }
 0x3a3   :  { %v3346_v34 = vpop.f32.mrf.mxu0  ;;  %v3387_v16 = vpop.f32.mrf.mxu1 }
 0x3a4   :  { %v12374_v3 = vmul.f32 -1.442695, %v3481_v38  ;;  %v3482_v14 = vadd.f32 %v3346_v34, %v19829_v39  ;;  %v3484_v57 = vadd.f32 %v3387_v16, %v19830_v4 }
 0x3a5   :  { %v3348_v50 = vpop.f32.mrf.mxu0  ;;  %v3389_v27 = vpop.f32.mrf.mxu1 }
 0x3a6   :  { %13747 = vpow2.f32 %v12374_v3  ;;  %v12375_v17 = vmul.f32 -1.442695, %v3482_v14  ;;  %v12376_v58 = vmul.f32 -1.442695, %v3484_v57  ;;  %v19833_v57 = vld [vmem:[#allocation35_spill] sm:$0xff] }
 0x3a7   :  { %v3349_v41 = vpop.f32.mrf.mxu0  ;;  %v3390_v9 = vpop.f32.mrf.mxu1  ;;  %v19834_v27 = vld [vmem:[#allocation59_spill] sm:$0xff] }
 0x3a8   :  { %13749 = vpow2.f32 %v12375_v17  ;;  %v368_v17 = vadd.f32 %v19834_v27, %v19833_v57  ;;  %v19835_v9 = vld [vmem:[#allocation58_spill] sm:$0xff] }
 0x3a9   :  { %13751 = vtanh.f32 %v3483_v62 }
 0x3aa   :  { %13753 = vpow2.f32 %v12376_v58 }
 0x3b3   :  { %v13748_v28 = vpop.eup %13747 }
 0x3b4   :  { %v3499_v33 = vadd.f32 1.0, %v13748_v28 }
 0x3b5   :  { %v13750_v56 = vpop.eup %13749 }
 0x3b6   :  { %13755 = vrcp.f32 %v3499_v33  ;;  %v3505_v8 = vadd.f32 1.0, %v13750_v56  ;;  %v13752_v50 = vpop.eup %13751 }
 0x3b7   :  { %v13754_v39 = vpop.eup %13753 }
 0x3b8   :  { %13757 = vrcp.f32 %v3505_v8  ;;  %v3512_v34 = vadd.f32 1.0, %v13754_v39 }
 0x3ba   :  { %13759 = vrcp.f32 %v3512_v34 }
 0x3c3   :  { %v13756_v3 = vpop.eup %13755 }
 0x3c4   :  { %v3516_v14 = vmul.f32 %v13756_v3, %v13752_v50 }
 0x3c5   :  { %v13758_v41 = vpop.eup %13757 }
 0x3c6   :  { %v3515_v38 = vmul.f32 %v13758_v41, %v15737_v20 }
 0x3c7   :  { %v13760_v28 = vpop.eup %13759 }
 0x3c8   :  { %v16228_v16 = vadd.f32 %v3516_v14, %v3515_v38  ;;  %v19836_v38 = vld [vmem:[#allocation37_spill] sm:$0xff] }
 0x3ca   :  { %19832 = vst [vmem:[#allocation94_spill] sm:$0xff] %v16228_v16  ;;  %13761 = vtanh.f32 %v16228_v16  ;;  %v19838_v16 = vld [vmem:[#allocation60_spill] sm:$0xff] }
 0x3d7   :  { %v13762_v26 = vpop.eup %13761 }
 0x3d8   :  { %v3519_v62 = vmul.f32 %v13762_v26, %v13760_v28  ;;  %v19837_v28 = vld [vmem:[#allocation61_spill] sm:$0xff] }
 0x3d9   :  { %v441_v26 = vadd.f32 %v19837_v28, %v19836_v38 }
 0x3da   :  { %v16231_v58 = vpack.c.bf16 %v3519_v62, %v3519_v62 }
 0x3dc   :  { %3548 = vst [vmem:[#allocation3 + $0x10] sm:$0xf] %v16231_v58 }
 0x3e1   :  { %v3426_v33 = vpop.f32.mrf.mxu0  ;;  %v3467_v7 = vpop.f32.mrf.mxu1 }
 0x3e2   :  { %v3492_v4 = vadd.f32 %v3426_v33, %v19835_v9  ;;  %v3494_v19 = vadd.f32 %v3467_v7, %v19838_v16 }
 0x3e3   :  { %v3428_v20 = vpop.f32.mrf.mxu0  ;;  %v3469_v56 = vpop.f32.mrf.mxu1 }
 0x3e4   :  { %v12377_v8 = vmul.f32 -1.442695, %v3492_v4  ;;  %v3493_v50 = vadd.f32 %v3428_v20, %v368_v17  ;;  %v3495_v62 = vadd.f32 %v3469_v56, %v441_v26  ;;  %v3596_v26 = vld [vmem:[%s19326_s2 + $0x150] sm:$0xff] }
 0x3e5   :  { %v3430_v39 = vpop.f32.mrf.mxu0  ;;  %v3471_v3 = vpop.f32.mrf.mxu1 }
 0x3e6   :  { %13763 = vpow2.f32 %v12377_v8  ;;  %v12378_v14 = vmul.f32 -1.442695, %v3493_v50  ;;  %v12379_v27 = vmul.f32 -1.442695, %v3495_v62 }
 0x3e7   :  { %v3431_v41 = vpop.f32.mrf.mxu0  ;;  %v3472_v34 = vpop.f32.mrf.mxu1 }
 0x3e8   :  { %13765 = vpow2.f32 %v12378_v14  ;;  %v3608_v41 = vld [vmem:[%s19326_s2 + $0x1b0] sm:$0xff]  ;;  %v3609_v34 = vld [vmem:[%s19326_s2 + $0x1b8] sm:$0xff] }
 0x3e9   :  { %13767 = vtanh.f32 %v3494_v19 }
 0x3ea   :  { %13769 = vpow2.f32 %v12379_v27 }
 0x3f3   :  { %v13764_v57 = vpop.eup %13763 }
 0x3f4   :  { %v3523_v33 = vadd.f32 1.0, %v13764_v57  ;;  %v3604_v57 = vld [vmem:[%s19326_s2 + $0x190] sm:$0xff] }
 0x3f5   :  { %v13766_v9 = vpop.eup %13765  ;;  %v16259_v62 = vcombine.high %v3604_v57, %v3608_v41 }
 0x3f6   :  { %13771 = vrcp.f32 %v3523_v33  ;;  %v3529_v17 = vadd.f32 1.0, %v13766_v9  ;;  %v13768_v4 = vpop.eup %13767  ;;  %v3600_v33 = vld [vmem:[%s19326_s2 + $0x170] sm:$0xff]  ;;  %v3597_v9 = vld [vmem:[%s19326_s2 + $0x158] sm:$0xff] }
 0x3f7   :  { %v13770_v20 = vpop.eup %13769 }
 0x3f8   :  { %13773 = vrcp.f32 %v3529_v17  ;;  %v3536_v3 = vadd.f32 1.0, %v13770_v20  ;;  %v3601_v17 = vld [vmem:[%s19326_s2 + $0x178] sm:$0xff] }
 0x3fa   :  { %13775 = vrcp.f32 %v3536_v3  ;;  %v3592_v3 = vld [vmem:[%s19326_s2 + $0x130] sm:$0xff] }
 0x403   :  { %v13772_v8 = vpop.eup %13771 }
 0x404   :  { %v3540_v50 = vmul.f32 %v13772_v8, %v13768_v4  ;;  %v16276_v4 = vcombine.low %v3604_v57, %v3608_v41  ;;  %v16280_v8 = vcombine.high %v3596_v26, %v3600_v33 }
 0x405   :  { %v13774_v39 = vpop.eup %13773 }
 0x406   :  { %v3539_v14 = vmul.f32 %v13774_v39, %v15748_v15  ;;  %v3605_v15 = vld [vmem:[%s19326_s2 + $0x198] sm:$0xff]  ;;  %v3588_v39 = vld [vmem:[%s19326_s2 + $0x110] sm:$0xff] }
 0x407   :  { %v13776_v16 = vpop.eup %13775  ;;  %v16261_v27 = vcombine.high %v3605_v15, %v3609_v34  ;;  %v16278_v20 = vcombine.low %v3605_v15, %v3609_v34  ;;  %v16306_v57 = vcombine.high %v3588_v39, %v3592_v3  ;;  %v3580_v15 = vld [vmem:[%s19326_s2 + $0xd0] sm:$0xff] }
 0x408   :  { %v16241_v56 = vadd.f32 %v3540_v50, %v3539_v14  ;;  %v16282_v50 = vcombine.high %v3597_v9, %v3601_v17  ;;  %v3589_v14 = vld [vmem:[%s19326_s2 + $0x118] sm:$0xff]  ;;  %v3584_v34 = vld [vmem:[%s19326_s2 + $0xf0] sm:$0xff] }
 0x409   :  { %19842 = vst [vmem:[#allocation7_spill] sm:$0xff] %v16306_v57 }
 0x40a   :  { %13777 = vtanh.f32 %v16241_v56  ;;  %19839 = vst [vmem:[#allocation95_spill] sm:$0xff] %v16282_v50 }
 0x417   :  { %v13778_v19 = vpop.eup %13777 }
 0x418   :  { %v3543_v7 = vmul.f32 %v13778_v19, %v13776_v16  ;;  %v3593_v16 = vld [vmem:[%s19326_s2 + $0x138] sm:$0xff]  ;;  %v16300_v19 = vcombine.low %v3596_v26, %v3600_v33  ;;  %v16324_v33 = vcombine.low %v3588_v39, %v3592_v3 }
 0x419   :  { %v16308_v41 = vcombine.high %v3589_v14, %v3593_v16  ;;  %v3585_v26 = vld [vmem:[%s19326_s2 + $0xf8] sm:$0xff] }
 0x41a   :  { %v3549_v28 = vpack.c.bf16 %v3543_v7, %v3543_v7  ;;  %19840 = vst [vmem:[#allocation96_spill] sm:$0xff] %v16300_v19  ;;  %v16302_v7 = vcombine.low %v3597_v9, %v3601_v17  ;;  %19844 = vst [vmem:[#allocation9_spill] sm:$0xff] %v16324_v33  ;;  %v16326_v9 = vcombine.low %v3589_v14, %v3593_v16  ;;  %v3573_v39 = vld [vmem:[%s19326_s2 + $0x98] sm:$0xff] }
 0x41b   :  { %19843 = vst [vmem:[#allocation6_spill] sm:$0xff] %v16308_v41  ;;  %v16330_v17 = vcombine.high %v3580_v15, %v3584_v34  ;;  %v3577_v3 = vld [vmem:[%s19326_s2 + $0xb8] sm:$0xff]  ;;  %v16348_v14 = vcombine.low %v3580_v15, %v3584_v34 }
 0x41c   :  { %3553 = vst [vmem:[#allocation3 + $0x2c] sm:$0xf] %v3549_v28  ;;  %4354 = vmatprep.mubr.bf16.mxu0 %v3549_v28  ;;  %4395 = vmatprep.mubr.bf16.mxu1 %v3549_v28  ;;  %19841 = vst [vmem:[#allocation97_spill] sm:$0xff] %v16302_v7  ;;  %v3565_v15 = vld [vmem:[%s19326_s2 + $0x58] sm:$0xff] }
 0x41d   :  { %4355 = vmatmul.mubr.bf16.vlgmr.msra.gmra.mxu0 %v16231_v58  ;;  %4396 = vmatmul.mubr.bf16.vlgmr.msra.gmra.mxu1 %v16231_v58  ;;  %19845 = vst [vmem:[#allocation8_spill] sm:$0xff] %v16326_v9  ;;  %19846 = vst [vmem:[#allocation62_spill] sm:$0xff] %v16330_v17  ;;  %v3569_v34 = vld [vmem:[%s19326_s2 + $0x78] sm:$0xff] }
 0x41e   :  { %4405 = vmatpush1.bf16.msra.mxu0 %v16215_v31  ;;  %4446 = vmatpush1.bf16.msra.mxu1 %v16217_v47  ;;  %19848 = vst [vmem:[#allocation67_spill] sm:$0xff] %v16348_v14 }
 0x41f   :  { %4436 = vmatprep.mubr.bf16.mxu0 %v3549_v28  ;;  %4477 = vmatprep.mubr.bf16.mxu1 %v3549_v28  ;;  %v3581_v28 = vld [vmem:[%s19326_s2 + $0xd8] sm:$0xff] }
 0x420   :  { %4406 = vmatprep.subr.bf16.mxu0 %v16259_v62  ;;  %4447 = vmatprep.subr.bf16.mxu1 %v16261_v27  ;;  %v16332_v38 = vcombine.high %v3581_v28, %v3585_v26  ;;  %v16350_v16 = vcombine.low %v3581_v28, %v3585_v26  ;;  %v16374_v26 = vcombine.low %v3573_v39, %v3577_v3 }
 0x422   :  { %4407 = vmatpush1.bf16.msra.mxu0 %v16276_v4  ;;  %4448 = vmatpush1.bf16.msra.mxu1 %v16278_v20  ;;  %19847 = vst [vmem:[#allocation64_spill] sm:$0xff] %v16332_v38  ;;  %19849 = vst [vmem:[#allocation63_spill] sm:$0xff] %v16350_v16 }
 0x423   :  { %4408 = vmatprep.subr.bf16.mxu0 %v16280_v8  ;;  %4449 = vmatprep.subr.bf16.mxu1 %v16282_v50  ;;  %v3572_v50 = vld [vmem:[%s19326_s2 + $0x90] sm:$0xff]  ;;  %19853 = vst [vmem:[#allocation101_spill] sm:$0xff] %v16374_v26 }
 0x426   :  { %4409 = vmatpush1.bf16.msra.mxu0 %v16300_v19  ;;  %4450 = vmatpush1.bf16.msra.mxu1 %v16302_v7  ;;  %v3576_v7 = vld [vmem:[%s19326_s2 + $0xb0] sm:$0xff] }
 0x427   :  { %4410 = vmatprep.subr.bf16.mxu0 %v16306_v57  ;;  %4451 = vmatprep.subr.bf16.mxu1 %v16308_v41  ;;  %v16354_v41 = vcombine.high %v3572_v50, %v3576_v7  ;;  %v16356_v57 = vcombine.high %v3573_v39, %v3577_v3  ;;  %v3564_v19 = vld [vmem:[%s19326_s2 + $0x50] sm:$0xff]  ;;  %v16372_v28 = vcombine.low %v3572_v50, %v3576_v7  ;;  %v3557_v50 = vld [vmem:[%s19326_s2 + $0x18] sm:$0xff] }
 0x428   :  { %v3561_v7 = vld [vmem:[%s19326_s2 + $0x38] sm:$0xff]  ;;  %v16398_v3 = vcombine.low %v3565_v15, %v3569_v34 }
 0x429   :  { %19850 = vst [vmem:[#allocation98_spill] sm:$0xff] %v16354_v41  ;;  %19851 = vst [vmem:[#allocation99_spill] sm:$0xff] %v16356_v57 }
 0x42a   :  { %4411 = vmatpush1.bf16.msra.mxu0 %v16324_v33  ;;  %4452 = vmatpush1.bf16.msra.mxu1 %v16326_v9  ;;  %v3568_v9 = vld [vmem:[%s19326_s2 + $0x70] sm:$0xff]  ;;  %19852 = vst [vmem:[#allocation100_spill] sm:$0xff] %v16372_v28  ;;  %19857 = vst [vmem:[#allocation105_spill] sm:$0xff] %v16398_v3 }
 0x42b   :  { %4412 = vmatprep.subr.bf16.mxu0 %v16330_v17  ;;  %4453 = vmatprep.subr.bf16.mxu1 %v16332_v38  ;;  %v16378_v38 = vcombine.high %v3564_v19, %v3568_v9  ;;  %v16380_v17 = vcombine.high %v3565_v15, %v3569_v34  ;;  %v3556_v33 = vld [vmem:[%s19326_s2 + $0x10] sm:$0xff]  ;;  %v16396_v39 = vcombine.low %v3564_v19, %v3568_v9  ;;  %v3677_v19 = vld [vmem:[%s19326_s2 + $0x3d8] sm:$0xff] }
 0x42c   :  { %v3681_v9 = vld [vmem:[%s19326_s2 + $0x3f8] sm:$0xff]  ;;  %v16422_v34 = vcombine.low %v3557_v50, %v3561_v7 }
 0x42d   :  { %19854 = vst [vmem:[#allocation102_spill] sm:$0xff] %v16378_v38  ;;  %19855 = vst [vmem:[#allocation103_spill] sm:$0xff] %v16380_v17 }
 0x42e   :  { %4413 = vmatpush1.bf16.msra.mxu0 %v16348_v14  ;;  %4454 = vmatpush1.bf16.msra.mxu1 %v16350_v16  ;;  %v3560_v16 = vld [vmem:[%s19326_s2 + $0x30] sm:$0xff]  ;;  %19856 = vst [vmem:[#allocation104_spill] sm:$0xff] %v16396_v39  ;;  %19861 = vst [vmem:[#allocation109_spill] sm:$0xff] %v16422_v34 }
 0x42f   :  { %4414 = vmatprep.subr.bf16.mxu0 %v16354_v41  ;;  %4455 = vmatprep.subr.bf16.mxu1 %v16356_v57  ;;  %v16402_v57 = vcombine.high %v3556_v33, %v3560_v16  ;;  %v16404_v41 = vcombine.high %v3557_v50, %v3561_v7  ;;  %v3676_v14 = vld [vmem:[%s19326_s2 + $0x3d0] sm:$0xff]  ;;  %v16420_v15 = vcombine.low %v3556_v33, %v3560_v16  ;;  %v3669_v33 = vld [vmem:[%s19326_s2 + $0x398] sm:$0xff] }
 0x430   :  { %v3673_v16 = vld [vmem:[%s19326_s2 + $0x3b8] sm:$0xff]  ;;  %v16446_v7 = vcombine.low %v3677_v19, %v3681_v9 }
 0x431   :  { %19858 = vst [vmem:[#allocation106_spill] sm:$0xff] %v16402_v57  ;;  %19859 = vst [vmem:[#allocation107_spill] sm:$0xff] %v16404_v41 }
 0x432   :  { %4415 = vmatpush1.bf16.msra.mxu0 %v16372_v28  ;;  %4456 = vmatpush1.bf16.msra.mxu1 %v16374_v26  ;;  %v3680_v26 = vld [vmem:[%s19326_s2 + $0x3f0] sm:$0xff]  ;;  %19860 = vst [vmem:[#allocation108_spill] sm:$0xff] %v16420_v15  ;;  %19865 = vst [vmem:[#allocation113_spill] sm:$0xff] %v16446_v7 }
 0x433   :  { %4416 = vmatprep.subr.bf16.mxu0 %v16378_v38  ;;  %4457 = vmatprep.subr.bf16.mxu1 %v16380_v17  ;;  %v16426_v17 = vcombine.high %v3676_v14, %v3680_v26  ;;  %v16428_v38 = vcombine.high %v3677_v19, %v3681_v9  ;;  %v3668_v28 = vld [vmem:[%s19326_s2 + $0x390] sm:$0xff]  ;;  %v16444_v50 = vcombine.low %v3676_v14, %v3680_v26  ;;  %v3661_v14 = vld [vmem:[%s19326_s2 + $0x358] sm:$0xff] }
 0x434   :  { %v3665_v26 = vld [vmem:[%s19326_s2 + $0x378] sm:$0xff]  ;;  %v16470_v9 = vcombine.low %v3669_v33, %v3673_v16 }
 0x435   :  { %19862 = vst [vmem:[#allocation110_spill] sm:$0xff] %v16426_v17  ;;  %19863 = vst [vmem:[#allocation111_spill] sm:$0xff] %v16428_v38 }
 0x436   :  { %4417 = vmatpush1.bf16.msra.mxu0 %v16396_v39  ;;  %4458 = vmatpush1.bf16.msra.mxu1 %v16398_v3  ;;  %v3672_v3 = vld [vmem:[%s19326_s2 + $0x3b0] sm:$0xff]  ;;  %19864 = vst [vmem:[#allocation112_spill] sm:$0xff] %v16444_v50  ;;  %19869 = vst [vmem:[#allocation117_spill] sm:$0xff] %v16470_v9 }
 0x437   :  { %4418 = vmatprep.subr.bf16.mxu0 %v16402_v57  ;;  %4459 = vmatprep.subr.bf16.mxu1 %v16404_v41  ;;  %v16450_v41 = vcombine.high %v3668_v28, %v3672_v3  ;;  %v16452_v57 = vcombine.high %v3669_v33, %v3673_v16  ;;  %v3660_v39 = vld [vmem:[%s19326_s2 + $0x350] sm:$0xff]  ;;  %v16468_v19 = vcombine.low %v3668_v28, %v3672_v3  ;;  %v3653_v28 = vld [vmem:[%s19326_s2 + $0x318] sm:$0xff] }
 0x438   :  { %v3657_v3 = vld [vmem:[%s19326_s2 + $0x338] sm:$0xff]  ;;  %v16494_v16 = vcombine.low %v3661_v14, %v3665_v26 }
 0x439   :  { %19866 = vst [vmem:[#allocation114_spill] sm:$0xff] %v16450_v41  ;;  %19867 = vst [vmem:[#allocation115_spill] sm:$0xff] %v16452_v57 }
 0x43a   :  { %4419 = vmatpush1.bf16.msra.mxu0 %v16420_v15  ;;  %4460 = vmatpush1.bf16.msra.mxu1 %v16422_v34  ;;  %v3664_v34 = vld [vmem:[%s19326_s2 + $0x370] sm:$0xff]  ;;  %19868 = vst [vmem:[#allocation116_spill] sm:$0xff] %v16468_v19  ;;  %19873 = vst [vmem:[#allocation121_spill] sm:$0xff] %v16494_v16 }
 0x43b   :  { %4420 = vmatprep.subr.bf16.mxu0 %v16426_v17  ;;  %4461 = vmatprep.subr.bf16.mxu1 %v16428_v38  ;;  %v16474_v38 = vcombine.high %v3660_v39, %v3664_v34  ;;  %v16476_v17 = vcombine.high %v3661_v14, %v3665_v26  ;;  %v3652_v15 = vld [vmem:[%s19326_s2 + $0x310] sm:$0xff]  ;;  %v16492_v33 = vcombine.low %v3660_v39, %v3664_v34  ;;  %v3645_v39 = vld [vmem:[%s19326_s2 + $0x2d8] sm:$0xff] }
 0x43c   :  { %v3649_v34 = vld [vmem:[%s19326_s2 + $0x2f8] sm:$0xff]  ;;  %v16518_v26 = vcombine.low %v3653_v28, %v3657_v3 }
 0x43d   :  { %19870 = vst [vmem:[#allocation118_spill] sm:$0xff] %v16474_v38  ;;  %19871 = vst [vmem:[#allocation119_spill] sm:$0xff] %v16476_v17 }
 0x43e   :  { %4421 = vmatpush2.bf16.msra.mxu0 %v16444_v50  ;;  %4462 = vmatpush2.bf16.msra.mxu1 %v16446_v7  ;;  %v3656_v7 = vld [vmem:[%s19326_s2 + $0x330] sm:$0xff]  ;;  %19872 = vst [vmem:[#allocation120_spill] sm:$0xff] %v16492_v33  ;;  %19877 = vst [vmem:[#allocation125_spill] sm:$0xff] %v16518_v26 }
 0x43f   :  { %4422 = vmatprep.subr.bf16.mxu0 %v16450_v41  ;;  %4463 = vmatprep.subr.bf16.mxu1 %v16452_v57  ;;  %v16498_v57 = vcombine.high %v3652_v15, %v3656_v7  ;;  %v16500_v41 = vcombine.high %v3653_v28, %v3657_v3  ;;  %v3644_v50 = vld [vmem:[%s19326_s2 + $0x2d0] sm:$0xff]  ;;  %v16516_v14 = vcombine.low %v3652_v15, %v3656_v7  ;;  %v3637_v15 = vld [vmem:[%s19326_s2 + $0x298] sm:$0xff] }
 0x440   :  { %v3641_v7 = vld [vmem:[%s19326_s2 + $0x2b8] sm:$0xff]  ;;  %v16542_v3 = vcombine.low %v3645_v39, %v3649_v34 }
 0x441   :  { %19874 = vst [vmem:[#allocation122_spill] sm:$0xff] %v16498_v57  ;;  %19875 = vst [vmem:[#allocation123_spill] sm:$0xff] %v16500_v41 }
 0x442   :  { %4423 = vmatpush2.bf16.msra.mxu0 %v16468_v19  ;;  %4464 = vmatpush2.bf16.msra.mxu1 %v16470_v9  ;;  %v3648_v9 = vld [vmem:[%s19326_s2 + $0x2f0] sm:$0xff]  ;;  %19876 = vst [vmem:[#allocation124_spill] sm:$0xff] %v16516_v14  ;;  %19881 = vst [vmem:[#allocation129_spill] sm:$0xff] %v16542_v3 }
 0x443   :  { %4424 = vmatprep.subr.bf16.mxu0 %v16474_v38  ;;  %4465 = vmatprep.subr.bf16.mxu1 %v16476_v17  ;;  %v16522_v17 = vcombine.high %v3644_v50, %v3648_v9  ;;  %v16524_v38 = vcombine.high %v3645_v39, %v3649_v34  ;;  %v3636_v19 = vld [vmem:[%s19326_s2 + $0x290] sm:$0xff]  ;;  %v16540_v28 = vcombine.low %v3644_v50, %v3648_v9  ;;  %v3629_v50 = vld [vmem:[%s19326_s2 + $0x258] sm:$0xff] }
 0x444   :  { %v3633_v9 = vld [vmem:[%s19326_s2 + $0x278] sm:$0xff]  ;;  %v16566_v34 = vcombine.low %v3637_v15, %v3641_v7 }
 0x445   :  { %19878 = vst [vmem:[#allocation126_spill] sm:$0xff] %v16522_v17  ;;  %19879 = vst [vmem:[#allocation127_spill] sm:$0xff] %v16524_v38 }
 0x446   :  { %4425 = vmatpush2.bf16.msra.mxu0 %v16492_v33  ;;  %4466 = vmatpush2.bf16.msra.mxu1 %v16494_v16  ;;  %v3640_v16 = vld [vmem:[%s19326_s2 + $0x2b0] sm:$0xff]  ;;  %19880 = vst [vmem:[#allocation128_spill] sm:$0xff] %v16540_v28 }
 0x447   :  { %4426 = vmatprep.subr.bf16.mxu0 %v16498_v57  ;;  %4467 = vmatprep.subr.bf16.mxu1 %v16500_v41  ;;  %v16546_v41 = vcombine.high %v3636_v19, %v3640_v16  ;;  %v16548_v57 = vcombine.high %v3637_v15, %v3641_v7  ;;  %v3628_v33 = vld [vmem:[%s19326_s2 + $0x250] sm:$0xff]  ;;  %v16564_v39 = vcombine.low %v3636_v19, %v3640_v16  ;;  %v3621_v19 = vld [vmem:[%s19326_s2 + $0x218] sm:$0xff] }
 0x448   :  { %v3625_v16 = vld [vmem:[%s19326_s2 + $0x238] sm:$0xff]  ;;  %v16590_v7 = vcombine.low %v3629_v50, %v3633_v9 }
 0x449   :  { %19882 = vst [vmem:[#allocation130_spill] sm:$0xff] %v16546_v41  ;;  %19883 = vst [vmem:[#allocation131_spill] sm:$0xff] %v16548_v57 }
 0x44a   :  { %4427 = vmatpush2.bf16.msra.mxu0 %v16516_v14  ;;  %4468 = vmatpush2.bf16.msra.mxu1 %v16518_v26  ;;  %v3632_v26 = vld [vmem:[%s19326_s2 + $0x270] sm:$0xff]  ;;  %19884 = vst [vmem:[#allocation132_spill] sm:$0xff] %v16564_v39 }
 0x44b   :  { %4428 = vmatprep.subr.bf16.mxu0 %v16522_v17  ;;  %4469 = vmatprep.subr.bf16.mxu1 %v16524_v38  ;;  %v16570_v38 = vcombine.high %v3628_v33, %v3632_v26  ;;  %v16572_v17 = vcombine.high %v3629_v50, %v3633_v9  ;;  %v3620_v14 = vld [vmem:[%s19326_s2 + $0x210] sm:$0xff]  ;;  %v16588_v15 = vcombine.low %v3628_v33, %v3632_v26  ;;  %v19916_v9 = vld [vmem:[#allocation12_spill] sm:$0xff] }
 0x44e   :  { %4429 = vmatpush2.bf16.msra.mxu0 %v16540_v28  ;;  %4470 = vmatpush2.bf16.msra.mxu1 %v16542_v3  ;;  %v3624_v3 = vld [vmem:[%s19326_s2 + $0x230] sm:$0xff] }
 0x44f   :  { %4430 = vmatprep.subr.bf16.mxu0 %v16546_v41  ;;  %4471 = vmatprep.subr.bf16.mxu1 %v16548_v57  ;;  %v16594_v57 = vcombine.high %v3620_v14, %v3624_v3  ;;  %v16596_v41 = vcombine.high %v3621_v19, %v3625_v16  ;;  %v16600_v28 = vcombine.low %v3620_v14, %v3624_v3 }
 0x452   :  { %4431 = vmatpush2.bf16.msra.mxu0 %v16564_v39  ;;  %4472 = vmatpush2.bf16.msra.mxu1 %v16566_v34  ;;  %v16602_v39 = vcombine.low %v3621_v19, %v3625_v16  ;;  %v19917_v19 = vld [vmem:[#allocation19_spill] sm:$0xff] }
 0x453   :  { %4432 = vmatprep.subr.bf16.mxu0 %v16570_v38  ;;  %4473 = vmatprep.subr.bf16.mxu1 %v16572_v17  ;;  %v285_v16 = vadd.f32 %v19917_v19, %v19916_v9 }
 0x456   :  { %4433 = vmatpush2.bf16.msra.mxu0 %v16588_v15  ;;  %4474 = vmatpush2.bf16.msra.mxu1 %v16590_v7 }
 0x457   :  { %4434 = vmatprep.subr.bf16.mxu0 %v16594_v57  ;;  %4475 = vmatprep.subr.bf16.mxu1 %v16596_v41 }
 0x45a   :  { %4435 = vmatpush2.bf16.msra.mxu0 %v16600_v28  ;;  %4476 = vmatpush2.bf16.msra.mxu1 %v16602_v39 }
 0x45b   :  { %5334 = vmatprep.subr.bf16.mxu0 %v15828_v24  ;;  %5375 = vmatprep.subr.bf16.mxu1 %v15841_v0  ;;  %v19886_v24 = vld [vmem:[#allocation66_spill] sm:$0xff] }
 0x45c   :  { %v19888_v0 = vld [vmem:[#allocation70_spill] sm:$0xff] }
 0x45d   :  { %4437 = vmatmul.mubr.bf16.vlgmr.msra.gmra.mxu0 %v16231_v58  ;;  %4478 = vmatmul.mubr.bf16.vlgmr.msra.gmra.mxu1 %v16231_v58 }
 0x45e   :  { %5335 = vmatpush1.bf16.msra.mxu0 %v15826_v63  ;;  %5376 = vmatpush1.bf16.msra.mxu1 %v15839_v54  ;;  %v19885_v63 = vld [vmem:[#allocation65_spill] sm:$0xff]  ;;  %v19887_v54 = vld [vmem:[#allocation68_spill] sm:$0xff] }
 0x45f   :  { %5336 = vmatprep.subr.bf16.mxu0 %v15843_v13  ;;  %5377 = vmatprep.subr.bf16.mxu1 %v15852_v25  ;;  %v19889_v13 = vld [vmem:[#allocation71_spill] sm:$0xff]  ;;  %v19890_v25 = vld [vmem:[#allocation69_spill] sm:$0xff] }
 0x462   :  { %5337 = vmatpush1.bf16.msra.mxu0 %v15856_v29  ;;  %5378 = vmatpush1.bf16.msra.mxu1 %v15860_v40  ;;  %v19891_v29 = vld [vmem:[#allocation72_spill] sm:$0xff]  ;;  %v19892_v40 = vld [vmem:[#allocation74_spill] sm:$0xff] }
 0x463   :  { %5338 = vmatprep.subr.bf16.mxu0 %v15874_v55  ;;  %5379 = vmatprep.subr.bf16.mxu1 %v15883_v44  ;;  %v19893_v55 = vld [vmem:[#allocation75_spill] sm:$0xff]  ;;  %v19896_v44 = vld [vmem:[#allocation78_spill] sm:$0xff] }
 0x466   :  { %5339 = vmatpush1.bf16.msra.mxu0 %v15879_v42  ;;  %5380 = vmatpush1.bf16.msra.mxu1 %v15881_v49  ;;  %v19894_v42 = vld [vmem:[#allocation73_spill] sm:$0xff]  ;;  %v19895_v49 = vld [vmem:[#allocation79_spill] sm:$0xff] }
 0x467   :  { %5340 = vmatprep.subr.bf16.mxu0 %v15898_v61  ;;  %5381 = vmatprep.subr.bf16.mxu1 %v15907_v6  ;;  %v19897_v61 = vld [vmem:[#allocation76_spill] sm:$0xff]  ;;  %v19900_v6 = vld [vmem:[#allocation83_spill] sm:$0xff] }
 0x46a   :  { %5341 = vmatpush1.bf16.msra.mxu0 %v15903_v23  ;;  %5382 = vmatpush1.bf16.msra.mxu1 %v15905_v52  ;;  %v19898_v23 = vld [vmem:[#allocation77_spill] sm:$0xff] }
 0x46b   :  { %5342 = vmatprep.subr.bf16.mxu0 %v15922_v60  ;;  %5383 = vmatprep.subr.bf16.mxu1 %v15931_v43  ;;  %v19899_v52 = vld [vmem:[#allocation81_spill] sm:$0xff]  ;;  %v19901_v60 = vld [vmem:[#allocation80_spill] sm:$0xff] }
 0x46c   :  { %v19904_v43 = vld [vmem:[#allocation85_spill] sm:$0xff] }
 0x46e   :  { %5343 = vmatpush1.bf16.msra.mxu0 %v15927_v48  ;;  %5384 = vmatpush1.bf16.msra.mxu1 %v15929_v11  ;;  %v19902_v48 = vld [vmem:[#allocation82_spill] sm:$0xff]  ;;  %v19903_v11 = vld [vmem:[#allocation84_spill] sm:$0xff] }
 0x46f   :  { %5344 = vmatprep.subr.bf16.mxu0 %v15946_v30  ;;  %5385 = vmatprep.subr.bf16.mxu1 %v15955_v32  ;;  %v19905_v30 = vld [vmem:[#allocation86_spill] sm:$0xff]  ;;  %v19908_v32 = vld [vmem:[#allocation89_spill] sm:$0xff] }
 0x472   :  { %5345 = vmatpush1.bf16.msra.mxu0 %v15951_v35  ;;  %5386 = vmatpush1.bf16.msra.mxu1 %v15953_v36  ;;  %v19906_v35 = vld [vmem:[#allocation87_spill] sm:$0xff]  ;;  %v19907_v36 = vld [vmem:[#allocation88_spill] sm:$0xff] }
 0x473   :  { %5346 = vmatprep.subr.bf16.mxu0 %v15970_v45  ;;  %5387 = vmatprep.subr.bf16.mxu1 %v15979_v2  ;;  %v19909_v45 = vld [vmem:[#allocation90_spill] sm:$0xff]  ;;  %v19912_v2 = vld [vmem:[#allocation93_spill] sm:$0xff] }
 0x476   :  { %5347 = vmatpush1.bf16.msra.mxu0 %v15975_v59  ;;  %5388 = vmatpush1.bf16.msra.mxu1 %v15977_v1  ;;  %v19910_v59 = vld [vmem:[#allocation91_spill] sm:$0xff]  ;;  %v19911_v1 = vld [vmem:[#allocation92_spill] sm:$0xff] }
 0x477   :  { %5348 = vmatprep.subr.bf16.mxu0 %v15994_v12  ;;  %5389 = vmatprep.subr.bf16.mxu1 %v16003_v10  ;;  %v19914_v10 = vld [vmem:[#allocation17_spill] sm:$0xff] }
 0x47a   :  { %5349 = vmatpush1.bf16.msra.mxu0 %v15999_v37  ;;  %5390 = vmatpush1.bf16.msra.mxu1 %v16001_v51  ;;  %v19913_v51 = vld [vmem:[#allocation10_spill] sm:$0xff] }
 0x47b   :  { %5350 = vmatprep.subr.bf16.mxu0 %v16018_v21  ;;  %5391 = vmatprep.subr.bf16.mxu1 %v16027_v46  ;;  %v212_v21 = vadd.f32 %v19914_v10, %v19913_v51  ;;  %v5643_v51 = vld [vmem:[%s19326_s2 + $0x268] sm:$0xff] }
 0x47e   :  { %5351 = vmatpush2.bf16.msra.mxu0 %v16023_v18  ;;  %5392 = vmatpush2.bf16.msra.mxu1 %v16025_v22  ;;  %v19915_v18 = vld [vmem:[#allocation16_spill] sm:$0xff] }
 0x47f   :  { %5352 = vmatprep.subr.bf16.mxu0 %v16042_v5  ;;  %5393 = vmatprep.subr.bf16.mxu1 %v16051_v53 }
 0x482   :  { %5353 = vmatpush2.bf16.msra.mxu0 %v19885_v63  ;;  %5394 = vmatpush2.bf16.msra.mxu1 %v19886_v24  ;;  %v19918_v24 = vld [vmem:[#allocation18_spill] sm:$0xff] }
 0x483   :  { %5354 = vmatprep.subr.bf16.mxu0 %v19887_v54  ;;  %5395 = vmatprep.subr.bf16.mxu1 %v19888_v0 }
 0x486   :  { %5355 = vmatpush2.bf16.msra.mxu0 %v19889_v13  ;;  %5396 = vmatpush2.bf16.msra.mxu1 %v19890_v25 }
 0x487   :  { %5356 = vmatprep.subr.bf16.mxu0 %v19891_v29  ;;  %5397 = vmatprep.subr.bf16.mxu1 %v19892_v40 }
 0x48a   :  { %5357 = vmatpush2.bf16.msra.mxu0 %v19893_v55  ;;  %5398 = vmatpush2.bf16.msra.mxu1 %v19894_v42 }
 0x48b   :  { %5358 = vmatprep.subr.bf16.mxu0 %v19895_v49  ;;  %5399 = vmatprep.subr.bf16.mxu1 %v19896_v44 }
 0x48e   :  { %5359 = vmatpush2.bf16.msra.mxu0 %v19897_v61  ;;  %5400 = vmatpush2.bf16.msra.mxu1 %v19898_v23 }
 0x48f   :  { %5360 = vmatprep.subr.bf16.mxu0 %v19899_v52  ;;  %5401 = vmatprep.subr.bf16.mxu1 %v19900_v6  ;;  %v19919_v52 = vld [vmem:[#allocation94_spill] sm:$0xff] }
 0x492   :  { %5361 = vmatpush2.bf16.msra.mxu0 %v19901_v60  ;;  %5402 = vmatpush2.bf16.msra.mxu1 %v19902_v48 }
 0x493   :  { %5362 = vmatprep.subr.bf16.mxu0 %v19903_v11  ;;  %5403 = vmatprep.subr.bf16.mxu1 %v19904_v43 }
 0x496   :  { %5363 = vmatpush2.bf16.msra.mxu0 %v19905_v30  ;;  %5404 = vmatpush2.bf16.msra.mxu1 %v19906_v35 }
 0x497   :  { %5364 = vmatprep.subr.bf16.mxu0 %v19907_v36  ;;  %5405 = vmatprep.subr.bf16.mxu1 %v19908_v32  ;;  %v19920_v32 = vld [vmem:[#allocation54_spill] sm:$0xff] }
 0x49a   :  { %5365 = vmatpush2.bf16.msra.mxu0 %v19909_v45  ;;  %5406 = vmatpush2.bf16.msra.mxu1 %v19910_v59 }
 0x49b   :  { %5416 = vmatprep.subr.bf16.mxu0 %v19911_v1  ;;  %5457 = vmatprep.subr.bf16.mxu1 %v19912_v2 }
 0x4dd   :  { %v4356_v12 = vpop.f32.mrf.mxu0  ;;  %v4397_v37 = vpop.f32.mrf.mxu1 }
 0x4de   :  { %v4493_v22 = vadd.f32 %v4356_v12, %v19915_v18  ;;  %v4495_v54 = vadd.f32 %v4397_v37, %v19918_v24  ;;  %v19921_v12 = vld [vmem:[#allocation56_spill] sm:$0xff] }
 0x4df   :  { %v4358_v46 = vpop.f32.mrf.mxu0  ;;  %v4399_v5 = vpop.f32.mrf.mxu1 }
 0x4e0   :  { %v12508_v53 = vmul.f32 -1.442695, %v4493_v22  ;;  %v4494_v58 = vadd.f32 %v4358_v46, %v212_v21  ;;  %v4496_v63 = vadd.f32 %v4399_v5, %v285_v16  ;;  %v19922_v5 = vld [vmem:[#allocation57_spill] sm:$0xff] }
 0x4e1   :  { %v4360_v33 = vpop.f32.mrf.mxu0  ;;  %v4401_v14 = vpop.f32.mrf.mxu1 }
 0x4e2   :  { %13779 = vpow2.f32 %v12508_v53  ;;  %v12509_v26 = vmul.f32 -1.442695, %v4494_v58  ;;  %v12510_v0 = vmul.f32 -1.442695, %v4496_v63  ;;  %v19923_v58 = vld [vmem:[#allocation55_spill] sm:$0xff] }
 0x4e3   :  { %v4361_v3 = vpop.f32.mrf.mxu0  ;;  %v4402_v50 = vpop.f32.mrf.mxu1 }
 0x4e4   :  { %13781 = vpow2.f32 %v12509_v26 }
 0x4e5   :  { %13783 = vtanh.f32 %v4495_v54 }
 0x4e6   :  { %13785 = vpow2.f32 %v12510_v0 }
 0x4ef   :  { %v13780_v13 = vpop.eup %13779 }
 0x4f0   :  { %v4511_v25 = vadd.f32 1.0, %v13780_v13 }
 0x4f1   :  { %v13782_v29 = vpop.eup %13781 }
 0x4f2   :  { %13787 = vrcp.f32 %v4511_v25  ;;  %v4517_v40 = vadd.f32 1.0, %v13782_v29  ;;  %v13784_v55 = vpop.eup %13783 }
 0x4f3   :  { %v13786_v42 = vpop.eup %13785 }
 0x4f4   :  { %13789 = vrcp.f32 %v4517_v40  ;;  %v4524_v23 = vadd.f32 1.0, %v13786_v42 }
 0x4f6   :  { %13791 = vrcp.f32 %v4524_v23  ;;  %v19929_v23 = vld [vmem:[#allocation9_spill] sm:$0xff] }
 0x4ff   :  { %v13788_v49 = vpop.eup %13787 }
 0x500   :  { %v4528_v44 = vmul.f32 %v13788_v49, %v13784_v55 }
 0x501   :  { %v13790_v61 = vpop.eup %13789 }
 0x502   :  { %v4527_v6 = vmul.f32 %v13790_v61, %v19919_v52  ;;  %v19926_v61 = vld [vmem:[#allocation97_spill] sm:$0xff]  ;;  %v19935_v52 = vld [vmem:[#allocation98_spill] sm:$0xff] }
 0x503   :  { %v13792_v48 = vpop.eup %13791 }
 0x504   :  { %v16683_v60 = vadd.f32 %v4528_v44, %v4527_v6  ;;  %v19925_v44 = vld [vmem:[#allocation96_spill] sm:$0xff]  ;;  %v19936_v6 = vld [vmem:[#allocation99_spill] sm:$0xff] }
 0x506   :  { %13793 = vtanh.f32 %v16683_v60 }
 0x513   :  { %v13794_v11 = vpop.eup %13793 }
 0x514   :  { %v4531_v43 = vmul.f32 %v13794_v11, %v13792_v48  ;;  %v19937_v48 = vld [vmem:[#allocation100_spill] sm:$0xff]  ;;  %v19938_v11 = vld [vmem:[#allocation101_spill] sm:$0xff] }
 0x516   :  { %v16686_v30 = vpack.c.bf16 %v4531_v43, %v4531_v43  ;;  %v19939_v43 = vld [vmem:[#allocation102_spill] sm:$0xff] }
 0x518   :  { %4560 = vst [vmem:[#allocation3 + $0x18] sm:$0xf] %v16686_v30 }
 0x51d   :  { %v4438_v35 = vpop.f32.mrf.mxu0  ;;  %v4479_v36 = vpop.f32.mrf.mxu1 }
 0x51e   :  { %v4504_v45 = vadd.f32 %v4438_v35, %v19920_v32  ;;  %v4506_v33 = vadd.f32 %v4479_v36, %v19923_v58  ;;  %v19940_v35 = vld [vmem:[#allocation103_spill] sm:$0xff]  ;;  %v19941_v36 = vld [vmem:[#allocation104_spill] sm:$0xff]  ;;  %v19942_v32 = vld [vmem:[#allocation105_spill] sm:$0xff] }
 0x51f   :  { %v4440_v59 = vpop.f32.mrf.mxu0  ;;  %v4481_v1 = vpop.f32.mrf.mxu1  ;;  %v19956_v58 = vld [vmem:[#allocation119_spill] sm:$0xff] }
 0x520   :  { %v12511_v2 = vmul.f32 -1.442695, %v4504_v45  ;;  %v4505_v37 = vadd.f32 %v4440_v59, %v19921_v12  ;;  %v4507_v53 = vadd.f32 %v4481_v1, %v19922_v5  ;;  %v19943_v45 = vld [vmem:[#allocation106_spill] sm:$0xff]  ;;  %v19944_v59 = vld [vmem:[#allocation107_spill] sm:$0xff]  ;;  %v19945_v1 = vld [vmem:[#allocation108_spill] sm:$0xff] }
 0x521   :  { %v4442_v10 = vpop.f32.mrf.mxu0  ;;  %v4483_v21 = vpop.f32.mrf.mxu1  ;;  %v19947_v12 = vld [vmem:[#allocation110_spill] sm:$0xff]  ;;  %v19954_v5 = vld [vmem:[#allocation117_spill] sm:$0xff] }
 0x522   :  { %13795 = vpow2.f32 %v12511_v2  ;;  %v12512_v18 = vmul.f32 -1.442695, %v4505_v37  ;;  %v12513_v14 = vmul.f32 -1.442695, %v4507_v53  ;;  %v19946_v2 = vld [vmem:[#allocation109_spill] sm:$0xff]  ;;  %v19948_v37 = vld [vmem:[#allocation111_spill] sm:$0xff] }
 0x523   :  { %v4443_v22 = vpop.f32.mrf.mxu0  ;;  %v4484_v46 = vpop.f32.mrf.mxu1  ;;  %v19949_v10 = vld [vmem:[#allocation112_spill] sm:$0xff]  ;;  %v19950_v21 = vld [vmem:[#allocation113_spill] sm:$0xff]  ;;  %v19955_v53 = vld [vmem:[#allocation118_spill] sm:$0xff] }
 0x524   :  { %13797 = vpow2.f32 %v12512_v18  ;;  %v19951_v18 = vld [vmem:[#allocation114_spill] sm:$0xff]  ;;  %v19952_v22 = vld [vmem:[#allocation115_spill] sm:$0xff]  ;;  %v19953_v46 = vld [vmem:[#allocation116_spill] sm:$0xff] }
 0x525   :  { %13799 = vtanh.f32 %v4506_v33  ;;  %v19957_v33 = vld [vmem:[#allocation120_spill] sm:$0xff] }
 0x526   :  { %13801 = vpow2.f32 %v12513_v14  ;;  %v19958_v14 = vld [vmem:[#allocation121_spill] sm:$0xff] }
 0x52f   :  { %v13796_v26 = vpop.eup %13795 }
 0x530   :  { %v4535_v3 = vadd.f32 1.0, %v13796_v26  ;;  %v19959_v26 = vld [vmem:[#allocation122_spill] sm:$0xff] }
 0x531   :  { %v13798_v50 = vpop.eup %13797 }
 0x532   :  { %13803 = vrcp.f32 %v4535_v3  ;;  %v4541_v19 = vadd.f32 1.0, %v13798_v50  ;;  %v13800_v16 = vpop.eup %13799  ;;  %v19960_v3 = vld [vmem:[#allocation123_spill] sm:$0xff]  ;;  %v19961_v50 = vld [vmem:[#allocation124_spill] sm:$0xff] }
 0x533   :  { %v13802_v63 = vpop.eup %13801 }
 0x534   :  { %13805 = vrcp.f32 %v4541_v19  ;;  %v4548_v13 = vadd.f32 1.0, %v13802_v63  ;;  %v19962_v19 = vld [vmem:[#allocation125_spill] sm:$0xff]  ;;  %v19964_v63 = vld [vmem:[#allocation127_spill] sm:$0xff] }
 0x536   :  { %13807 = vrcp.f32 %v4548_v13  ;;  %v19968_v13 = vld [vmem:[#allocation131_spill] sm:$0xff] }
 0x53f   :  { %v13804_v24 = vpop.eup %13803 }
 0x540   :  { %v4552_v54 = vmul.f32 %v13804_v24, %v13800_v16  ;;  %v19963_v16 = vld [vmem:[#allocation126_spill] sm:$0xff]  ;;  %v19965_v24 = vld [vmem:[#allocation128_spill] sm:$0xff] }
 0x541   :  { %v13806_v0 = vpop.eup %13805 }
 0x542   :  { %v4551_v25 = vmul.f32 %v13806_v0, %v16241_v56  ;;  %v19924_v56 = vld [vmem:[#allocation95_spill] sm:$0xff]  ;;  %v19967_v0 = vld [vmem:[#allocation130_spill] sm:$0xff] }
 0x543   :  { %v13808_v40 = vpop.eup %13807 }
 0x544   :  { %v16694_v29 = vadd.f32 %v4552_v54, %v4551_v25  ;;  %v19966_v54 = vld [vmem:[#allocation129_spill] sm:$0xff]  ;;  %v19969_v25 = vld [vmem:[#allocation132_spill] sm:$0xff] }
 0x546   :  { %13809 = vtanh.f32 %v16694_v29 }
 0x553   :  { %v13810_v55 = vpop.eup %13809 }
 0x554   :  { %v4555_v42 = vmul.f32 %v13810_v55, %v13808_v40  ;;  %v5615_v55 = vld [vmem:[%s19326_s2 + $0x188] sm:$0xff] }
 0x556   :  { %v4561_v49 = vpack.c.bf16 %v4555_v42, %v4555_v42  ;;  %v5619_v42 = vld [vmem:[%s19326_s2 + $0x1a8] sm:$0xff] }
 0x558   :  { %4565 = vst [vmem:[#allocation3 + $0x24] sm:$0xf] %v4561_v49  ;;  %5366 = vmatprep.mubr.bf16.mxu0 %v4561_v49  ;;  %5407 = vmatprep.mubr.bf16.mxu1 %v4561_v49 }
 0x559   :  { %5367 = vmatmul.mubr.bf16.vlgmr.msra.gmra.mxu0 %v16686_v30  ;;  %5408 = vmatmul.mubr.bf16.vlgmr.msra.gmra.mxu1 %v16686_v30 }
 0x55a   :  { %5417 = vmatpush1.bf16.msra.mxu0 %v16215_v31  ;;  %5458 = vmatpush1.bf16.msra.mxu1 %v16217_v47  ;;  %v19927_v31 = vld [vmem:[#allocation7_spill] sm:$0xff]  ;;  %v19928_v47 = vld [vmem:[#allocation6_spill] sm:$0xff] }
 0x55b   :  { %5448 = vmatprep.mubr.bf16.mxu0 %v4561_v49  ;;  %5489 = vmatprep.mubr.bf16.mxu1 %v4561_v49  ;;  %v16798_v49 = vcombine.high %v5615_v55, %v5619_v42 }
 0x55c   :  { %5418 = vmatprep.subr.bf16.mxu0 %v16259_v62  ;;  %5459 = vmatprep.subr.bf16.mxu1 %v16261_v27  ;;  %v19930_v62 = vld [vmem:[#allocation8_spill] sm:$0xff]  ;;  %v19931_v27 = vld [vmem:[#allocation62_spill] sm:$0xff] }
 0x55e   :  { %5419 = vmatpush1.bf16.msra.mxu0 %v16276_v4  ;;  %5460 = vmatpush1.bf16.msra.mxu1 %v16278_v20  ;;  %v19932_v4 = vld [vmem:[#allocation64_spill] sm:$0xff]  ;;  %v19933_v20 = vld [vmem:[#allocation67_spill] sm:$0xff] }
 0x55f   :  { %5420 = vmatprep.subr.bf16.mxu0 %v16280_v8  ;;  %5461 = vmatprep.subr.bf16.mxu1 %v19924_v56  ;;  %v19934_v8 = vld [vmem:[#allocation63_spill] sm:$0xff] }
 0x562   :  { %5421 = vmatpush1.bf16.msra.mxu0 %v19925_v44  ;;  %5462 = vmatpush1.bf16.msra.mxu1 %v19926_v61  ;;  %v16806_v44 = vcombine.low %v5615_v55, %v5619_v42  ;;  %v5606_v61 = vld [vmem:[%s19326_s2 + $0x140] sm:$0xff]  ;;  %v5687_v55 = vld [vmem:[%s19326_s2 + $0x3c8] sm:$0xff] }
 0x563   :  { %5422 = vmatprep.subr.bf16.mxu0 %v19927_v31  ;;  %5463 = vmatprep.subr.bf16.mxu1 %v19928_v47  ;;  %v5610_v31 = vld [vmem:[%s19326_s2 + $0x160] sm:$0xff]  ;;  %v5607_v47 = vld [vmem:[%s19326_s2 + $0x148] sm:$0xff] }
 0x566   :  { %5423 = vmatpush1.bf16.msra.mxu0 %v19929_v23  ;;  %5464 = vmatpush1.bf16.msra.mxu1 %v19930_v62  ;;  %v16820_v23 = vcombine.high %v5606_v61, %v5610_v31  ;;  %v5611_v62 = vld [vmem:[%s19326_s2 + $0x168] sm:$0xff] }
 0x567   :  { %5424 = vmatprep.subr.bf16.mxu0 %v19931_v27  ;;  %5465 = vmatprep.subr.bf16.mxu1 %v19932_v4  ;;  %v16825_v27 = vcombine.low %v5606_v61, %v5610_v31  ;;  %v16827_v4 = vcombine.low %v5607_v47, %v5611_v62  ;;  %v5691_v61 = vld [vmem:[%s19326_s2 + $0x3e8] sm:$0xff] }
 0x56a   :  { %5425 = vmatpush1.bf16.msra.mxu0 %v19933_v20  ;;  %5466 = vmatpush1.bf16.msra.mxu1 %v19934_v8  ;;  %v16829_v20 = vcombine.high %v5607_v47, %v5611_v62  ;;  %v5598_v8 = vld [vmem:[%s19326_s2 + $0x100] sm:$0xff]  ;;  %v16971_v47 = vcombine.low %v5687_v55, %v5691_v61  ;;  %v16973_v62 = vcombine.high %v5687_v55, %v5691_v61 }
 0x56b   :  { %5426 = vmatprep.subr.bf16.mxu0 %v19935_v52  ;;  %5467 = vmatprep.subr.bf16.mxu1 %v19936_v6  ;;  %v5602_v52 = vld [vmem:[%s19326_s2 + $0x120] sm:$0xff]  ;;  %v5599_v6 = vld [vmem:[%s19326_s2 + $0x108] sm:$0xff] }
 0x56e   :  { %5427 = vmatpush1.bf16.msra.mxu0 %v19937_v48  ;;  %5468 = vmatpush1.bf16.msra.mxu1 %v19938_v11  ;;  %v16844_v48 = vcombine.high %v5598_v8, %v5602_v52  ;;  %v5603_v11 = vld [vmem:[%s19326_s2 + $0x128] sm:$0xff] }
 0x56f   :  { %5428 = vmatprep.subr.bf16.mxu0 %v19939_v43  ;;  %5469 = vmatprep.subr.bf16.mxu1 %v19940_v35  ;;  %v16849_v43 = vcombine.low %v5598_v8, %v5602_v52  ;;  %v16851_v35 = vcombine.low %v5599_v6, %v5603_v11  ;;  %v5678_v8 = vld [vmem:[%s19326_s2 + $0x380] sm:$0xff] }
 0x570   :  { %v5682_v52 = vld [vmem:[%s19326_s2 + $0x3a0] sm:$0xff] }
 0x572   :  { %5429 = vmatpush1.bf16.msra.mxu0 %v19941_v36  ;;  %5470 = vmatpush1.bf16.msra.mxu1 %v19942_v32  ;;  %v16853_v36 = vcombine.high %v5599_v6, %v5603_v11  ;;  %v5590_v32 = vld [vmem:[%s19326_s2 + $0xc0] sm:$0xff]  ;;  %v5679_v6 = vld [vmem:[%s19326_s2 + $0x388] sm:$0xff]  ;;  %v16988_v11 = vcombine.high %v5678_v8, %v5682_v52 }
 0x573   :  { %5430 = vmatprep.subr.bf16.mxu0 %v19943_v45  ;;  %5471 = vmatprep.subr.bf16.mxu1 %v19944_v59  ;;  %v5594_v45 = vld [vmem:[%s19326_s2 + $0xe0] sm:$0xff]  ;;  %v5591_v59 = vld [vmem:[%s19326_s2 + $0xc8] sm:$0xff] }
 0x576   :  { %5431 = vmatpush1.bf16.msra.mxu0 %v19945_v1  ;;  %5472 = vmatpush1.bf16.msra.mxu1 %v19946_v2  ;;  %v16868_v1 = vcombine.high %v5590_v32, %v5594_v45  ;;  %v5595_v2 = vld [vmem:[%s19326_s2 + $0xe8] sm:$0xff] }
 0x577   :  { %5432 = vmatprep.subr.bf16.mxu0 %v19947_v12  ;;  %5473 = vmatprep.subr.bf16.mxu1 %v19948_v37  ;;  %v16873_v12 = vcombine.low %v5590_v32, %v5594_v45  ;;  %v16875_v37 = vcombine.low %v5591_v59, %v5595_v2  ;;  %v5683_v32 = vld [vmem:[%s19326_s2 + $0x3a8] sm:$0xff]  ;;  %v16993_v45 = vcombine.low %v5678_v8, %v5682_v52  ;;  %v5654_v8 = vld [vmem:[%s19326_s2 + $0x2c0] sm:$0xff] }
 0x578   :  { %v5658_v52 = vld [vmem:[%s19326_s2 + $0x2e0] sm:$0xff] }
 0x579   :  { %19970 = vst [vmem:[#allocation133_spill] sm:$0xff] %v16993_v45 }
 0x57a   :  { %5433 = vmatpush2.bf16.msra.mxu0 %v19949_v10  ;;  %5474 = vmatpush2.bf16.msra.mxu1 %v19950_v21  ;;  %v16877_v10 = vcombine.high %v5591_v59, %v5595_v2  ;;  %v5582_v21 = vld [vmem:[%s19326_s2 + $0x80] sm:$0xff]  ;;  %v16995_v59 = vcombine.low %v5679_v6, %v5683_v32  ;;  %v16997_v2 = vcombine.high %v5679_v6, %v5683_v32  ;;  %v5655_v6 = vld [vmem:[%s19326_s2 + $0x2c8] sm:$0xff] }
 0x57b   :  { %5434 = vmatprep.subr.bf16.mxu0 %v19951_v18  ;;  %5475 = vmatprep.subr.bf16.mxu1 %v19952_v22  ;;  %v5586_v18 = vld [vmem:[%s19326_s2 + $0xa0] sm:$0xff]  ;;  %v5583_v22 = vld [vmem:[%s19326_s2 + $0x88] sm:$0xff]  ;;  %v17060_v32 = vcombine.low %v5654_v8, %v5658_v52 }
 0x57c   :  { %19971 = vst [vmem:[#allocation134_spill] sm:$0xff] %v16995_v59 }
 0x57d   :  { %19980 = vst [vmem:[#allocation14_spill] sm:$0xff] %v17060_v32 }
 0x57e   :  { %5435 = vmatpush2.bf16.msra.mxu0 %v19953_v46  ;;  %5476 = vmatpush2.bf16.msra.mxu1 %v19954_v5  ;;  %v16892_v46 = vcombine.high %v5582_v21, %v5586_v18  ;;  %v5587_v5 = vld [vmem:[%s19326_s2 + $0xa8] sm:$0xff] }
 0x57f   :  { %5436 = vmatprep.subr.bf16.mxu0 %v19955_v53  ;;  %5477 = vmatprep.subr.bf16.mxu1 %v19956_v58  ;;  %v16897_v53 = vcombine.low %v5582_v21, %v5586_v18  ;;  %v16899_v58 = vcombine.low %v5583_v22, %v5587_v5  ;;  %v5670_v21 = vld [vmem:[%s19326_s2 + $0x340] sm:$0xff] }
 0x580   :  { %v5674_v18 = vld [vmem:[%s19326_s2 + $0x360] sm:$0xff] }
 0x582   :  { %5437 = vmatpush2.bf16.msra.mxu0 %v19957_v33  ;;  %5478 = vmatpush2.bf16.msra.mxu1 %v19958_v14  ;;  %v16901_v33 = vcombine.high %v5583_v22, %v5587_v5  ;;  %v5574_v14 = vld [vmem:[%s19326_s2 + $0x40] sm:$0xff]  ;;  %v5671_v22 = vld [vmem:[%s19326_s2 + $0x348] sm:$0xff]  ;;  %v17012_v5 = vcombine.high %v5670_v21, %v5674_v18 }
 0x583   :  { %5438 = vmatprep.subr.bf16.mxu0 %v19959_v26  ;;  %5479 = vmatprep.subr.bf16.mxu1 %v19960_v3  ;;  %v5578_v26 = vld [vmem:[%s19326_s2 + $0x60] sm:$0xff]  ;;  %v5575_v3 = vld [vmem:[%s19326_s2 + $0x48] sm:$0xff] }
 0x584   :  { %19972 = vst [vmem:[#allocation135_spill] sm:$0xff] %v17012_v5 }
 0x586   :  { %5439 = vmatpush2.bf16.msra.mxu0 %v19961_v50  ;;  %5480 = vmatpush2.bf16.msra.mxu1 %v19962_v19  ;;  %v16916_v50 = vcombine.high %v5574_v14, %v5578_v26  ;;  %v5579_v19 = vld [vmem:[%s19326_s2 + $0x68] sm:$0xff] }
 0x587   :  { %5440 = vmatprep.subr.bf16.mxu0 %v19963_v16  ;;  %5481 = vmatprep.subr.bf16.mxu1 %v19964_v63  ;;  %v16921_v16 = vcombine.low %v5574_v14, %v5578_v26  ;;  %v16923_v63 = vcombine.low %v5575_v3, %v5579_v19  ;;  %v5675_v14 = vld [vmem:[%s19326_s2 + $0x368] sm:$0xff]  ;;  %v17017_v26 = vcombine.low %v5670_v21, %v5674_v18 }
 0x588   :  { %v17062_v21 = vcombine.high %v5654_v8, %v5658_v52  ;;  %v5659_v18 = vld [vmem:[%s19326_s2 + $0x2e8] sm:$0xff]  ;;  %v5638_v52 = vld [vmem:[%s19326_s2 + $0x240] sm:$0xff] }
 0x589   :  { %19973 = vst [vmem:[#allocation136_spill] sm:$0xff] %v17017_v26  ;;  %v5651_v8 = vld [vmem:[%s19326_s2 + $0x2a8] sm:$0xff] }
 0x58a   :  { %5441 = vmatpush2.bf16.msra.mxu0 %v19965_v24  ;;  %5482 = vmatpush2.bf16.msra.mxu1 %v19966_v54  ;;  %v16925_v24 = vcombine.high %v5575_v3, %v5579_v19  ;;  %v5566_v54 = vld [vmem:[%s19326_s2] sm:$0xff]  ;;  %v17019_v3 = vcombine.low %v5671_v22, %v5675_v14  ;;  %v17021_v19 = vcombine.high %v5671_v22, %v5675_v14 }
 0x58b   :  { %5442 = vmatprep.subr.bf16.mxu0 %v19967_v0  ;;  %5483 = vmatprep.subr.bf16.mxu1 %v19968_v13  ;;  %v5570_v0 = vld [vmem:[%s19326_s2 + $0x20] sm:$0xff]  ;;  %v5567_v13 = vld [vmem:[%s19326_s2 + $0x8] sm:$0xff]  ;;  %19981 = vst [vmem:[#allocation15_spill] sm:$0xff] %v17062_v21 }
 0x58c   :  { %19974 = vst [vmem:[#allocation137_spill] sm:$0xff] %v17019_v3  ;;  %19975 = vst [vmem:[#allocation138_spill] sm:$0xff] %v17021_v19  ;;  %v5646_v22 = vld [vmem:[%s19326_s2 + $0x280] sm:$0xff] }
 0x58d   :  { %v5650_v14 = vld [vmem:[%s19326_s2 + $0x2a0] sm:$0xff] }
 0x58e   :  { %5443 = vmatpush2.bf16.msra.mxu0 %v19969_v25  ;;  %5484 = vmatpush2.bf16.msra.mxu1 %v16566_v34  ;;  %v5614_v34 = vld [vmem:[%s19326_s2 + $0x180] sm:$0xff]  ;;  %v16940_v25 = vcombine.high %v5566_v54, %v5570_v0 }
 0x58f   :  { %5444 = vmatprep.subr.bf16.mxu0 %v16570_v38  ;;  %5485 = vmatprep.subr.bf16.mxu1 %v16572_v17  ;;  %v5622_v38 = vld [vmem:[%s19326_s2 + $0x1c0] sm:$0xff] }
 0x590   :  { %v5626_v17 = vld [vmem:[%s19326_s2 + $0x1e0] sm:$0xff] }
 0x592   :  { %5445 = vmatpush2.bf16.msra.mxu0 %v16588_v15  ;;  %5486 = vmatpush2.bf16.msra.mxu1 %v16590_v7  ;;  %v5618_v15 = vld [vmem:[%s19326_s2 + $0x1a0] sm:$0xff] }
 0x593   :  { %5446 = vmatprep.subr.bf16.mxu0 %v16594_v57  ;;  %5487 = vmatprep.subr.bf16.mxu1 %v16596_v41  ;;  %v5623_v57 = vld [vmem:[%s19326_s2 + $0x1c8] sm:$0xff]  ;;  %v16772_v41 = vcombine.low %v5622_v38, %v5626_v17  ;;  %v16789_v40 = vcombine.high %v5614_v34, %v5618_v15  ;;  %v16802_v56 = vcombine.low %v5614_v34, %v5618_v15  ;;  %v5686_v34 = vld [vmem:[%s19326_s2 + $0x3c0] sm:$0xff] }
 0x594   :  { %v5690_v15 = vld [vmem:[%s19326_s2 + $0x3e0] sm:$0xff] }
 0x595   :  { %v16964_v42 = vcombine.high %v5686_v34, %v5690_v15  ;;  %v16969_v31 = vcombine.low %v5686_v34, %v5690_v15  ;;  %v5667_v34 = vld [vmem:[%s19326_s2 + $0x328] sm:$0xff] }
 0x596   :  { %5447 = vmatpush2.bf16.msra.mxu0 %v16600_v28  ;;  %5488 = vmatpush2.bf16.msra.mxu1 %v16602_v39  ;;  %v16774_v28 = vcombine.high %v5622_v38, %v5626_v17  ;;  %v5627_v39 = vld [vmem:[%s19326_s2 + $0x1e8] sm:$0xff]  ;;  %v16945_v17 = vcombine.low %v5566_v54, %v5570_v0  ;;  %v5662_v54 = vld [vmem:[%s19326_s2 + $0x300] sm:$0xff] }
 0x597   :  { %v16785_v7 = vcombine.low %v5623_v57, %v5627_v39  ;;  %v5571_v38 = vld [vmem:[%s19326_s2 + $0x28] sm:$0xff]  ;;  %v5666_v0 = vld [vmem:[%s19326_s2 + $0x320] sm:$0xff] }
 0x598   :  { %6334 = vmatprep.subr.bf16.mxu0 %v16774_v28  ;;  %v17041_v15 = vcombine.low %v5662_v54, %v5666_v0 }
 0x599   :  { %5449 = vmatmul.mubr.bf16.vlgmr.msra.gmra.mxu0 %v16686_v30  ;;  %5490 = vmatmul.mubr.bf16.vlgmr.msra.gmra.mxu1 %v16686_v30  ;;  %v16787_v30 = vcombine.high %v5623_v57, %v5627_v39  ;;  %v16947_v57 = vcombine.low %v5567_v13, %v5571_v38  ;;  %v16949_v39 = vcombine.high %v5567_v13, %v5571_v38  ;;  %v5663_v13 = vld [vmem:[%s19326_s2 + $0x308] sm:$0xff] }
 0x59a   :  { %6335 = vmatpush1.bf16.msra.mxu0 %v16772_v41  ;;  %v17036_v38 = vcombine.high %v5662_v54, %v5666_v0  ;;  %19977 = vst [vmem:[#allocation140_spill] sm:$0xff] %v17041_v15  ;;  %v17043_v55 = vcombine.low %v5663_v13, %v5667_v34  ;;  %v17045_v61 = vcombine.high %v5663_v13, %v5667_v34  ;;  %v5647_v34 = vld [vmem:[%s19326_s2 + $0x288] sm:$0xff] }
 0x59b   :  { %6375 = vmatprep.subr.bf16.mxu1 %v16787_v30  ;;  %6336 = vmatprep.subr.bf16.mxu0 %v16789_v40  ;;  %v17073_v54 = vcombine.low %v5655_v6, %v5659_v18  ;;  %v17075_v0 = vcombine.high %v5655_v6, %v5659_v18  ;;  %v17077_v13 = vcombine.high %v5646_v22, %v5650_v14  ;;  %v5642_v6 = vld [vmem:[%s19326_s2 + $0x260] sm:$0xff]  ;;  %v5639_v18 = vld [vmem:[%s19326_s2 + $0x248] sm:$0xff] }
 0x59c   :  { %6376 = vmatpush1.bf16.msra.mxu1 %v16785_v7  ;;  %19976 = vst [vmem:[#allocation139_spill] sm:$0xff] %v17036_v38  ;;  %19978 = vst [vmem:[#allocation141_spill] sm:$0xff] %v17043_v55  ;;  %v17089_v9 = vcombine.high %v5647_v34, %v5651_v8 }
 0x59d   :  { %6377 = vmatprep.subr.bf16.mxu1 %v16798_v49  ;;  %19979 = vst [vmem:[#allocation11_spill] sm:$0xff] %v17045_v61  ;;  %19982 = vst [vmem:[#allocation13_spill] sm:$0xff] %v17073_v54 }
 0x59e   :  { %6337 = vmatpush1.bf16.msra.mxu0 %v16802_v56  ;;  %19983 = vst [vmem:[#allocation59_spill] sm:$0xff] %v17075_v0  ;;  %19984 = vst [vmem:[#allocation58_spill] sm:$0xff] %v17077_v13 }
 0x59f   :  { %6338 = vmatprep.subr.bf16.mxu0 %v16820_v23  ;;  %19985 = vst [vmem:[#allocation61_spill] sm:$0xff] %v17089_v9 }
 0x5a0   :  { %6378 = vmatpush1.bf16.msra.mxu1 %v16806_v44 }
 0x5a1   :  { %6379 = vmatprep.subr.bf16.mxu1 %v16829_v20 }
 0x5a2   :  { %6339 = vmatpush1.bf16.msra.mxu0 %v16825_v27 }
 0x5a3   :  { %6340 = vmatprep.subr.bf16.mxu0 %v16844_v48 }
 0x5a4   :  { %6380 = vmatpush1.bf16.msra.mxu1 %v16827_v4 }
 0x5a5   :  { %6381 = vmatprep.subr.bf16.mxu1 %v16853_v36 }
 0x5a6   :  { %6341 = vmatpush1.bf16.msra.mxu0 %v16849_v43 }
 0x5a7   :  { %6342 = vmatprep.subr.bf16.mxu0 %v16868_v1 }
 0x5a8   :  { %6382 = vmatpush1.bf16.msra.mxu1 %v16851_v35 }
 0x5a9   :  { %6383 = vmatprep.subr.bf16.mxu1 %v16877_v10 }
 0x5aa   :  { %6343 = vmatpush1.bf16.msra.mxu0 %v16873_v12 }
 0x5ab   :  { %6344 = vmatprep.subr.bf16.mxu0 %v16892_v46 }
 0x5ac   :  { %6384 = vmatpush1.bf16.msra.mxu1 %v16875_v37 }
 0x5ad   :  { %6385 = vmatprep.subr.bf16.mxu1 %v16901_v33 }
 0x5ae   :  { %6345 = vmatpush1.bf16.msra.mxu0 %v16897_v53 }
 0x5af   :  { %6346 = vmatprep.subr.bf16.mxu0 %v16916_v50 }
 0x5b0   :  { %6386 = vmatpush1.bf16.msra.mxu1 %v16899_v58 }
 0x5b1   :  { %6387 = vmatprep.subr.bf16.mxu1 %v16925_v24 }
 0x5b2   :  { %6347 = vmatpush1.bf16.msra.mxu0 %v16921_v16 }
 0x5b3   :  { %6348 = vmatprep.subr.bf16.mxu0 %v16940_v25 }
 0x5b4   :  { %6388 = vmatpush1.bf16.msra.mxu1 %v16923_v63 }
 0x5b5   :  { %6389 = vmatprep.subr.bf16.mxu1 %v16949_v39 }
 0x5b6   :  { %6349 = vmatpush1.bf16.msra.mxu0 %v16945_v17 }
 0x5b7   :  { %6350 = vmatprep.subr.bf16.mxu0 %v16964_v42 }
 0x5b8   :  { %6390 = vmatpush1.bf16.msra.mxu1 %v16947_v57 }
 0x5b9   :  { %6391 = vmatprep.subr.bf16.mxu1 %v16973_v62 }
 0x5ba   :  { %6351 = vmatpush2.bf16.msra.mxu0 %v16969_v31 }
 0x5bb   :  { %6352 = vmatprep.subr.bf16.mxu0 %v16988_v11 }
 0x5bc   :  { %6392 = vmatpush2.bf16.msra.mxu1 %v16971_v47 }
 0x5bd   :  { %6393 = vmatprep.subr.bf16.mxu1 %v16997_v2 }
 0x5be   :  { %6353 = vmatpush2.bf16.msra.mxu0 %v16993_v45 }
 0x5bf   :  { %6354 = vmatprep.subr.bf16.mxu0 %v17012_v5 }
 0x5c0   :  { %6394 = vmatpush2.bf16.msra.mxu1 %v16995_v59 }
 0x5c1   :  { %6395 = vmatprep.subr.bf16.mxu1 %v17021_v19 }
 0x5c2   :  { %6355 = vmatpush2.bf16.msra.mxu0 %v17017_v26  ;;  %v20001_v26 = vld [vmem:[#allocation21_spill] sm:$0xff] }
 0x5c3   :  { %6356 = vmatprep.subr.bf16.mxu0 %v17036_v38 }
 0x5c4   :  { %6396 = vmatpush2.bf16.msra.mxu1 %v17019_v3 }
 0x5c5   :  { %6397 = vmatprep.subr.bf16.mxu1 %v17045_v61  ;;  %v17111_v61 = vcombine.high %v5639_v18, %v5643_v51 }
 0x5c6   :  { %6357 = vmatpush2.bf16.msra.mxu0 %v17041_v15  ;;  %v17108_v15 = vcombine.high %v5638_v52, %v5642_v6 }
 0x5c7   :  { %6358 = vmatprep.subr.bf16.mxu0 %v17062_v21  ;;  %v17106_v21 = vcombine.low %v5647_v34, %v5651_v8  ;;  %19989 = vst [vmem:[#allocation68_spill] sm:$0xff] %v17111_v61  ;;  %v5635_v34 = vld [vmem:[%s19326_s2 + $0x228] sm:$0xff]  ;;  %v17126_v8 = vcombine.low %v5638_v52, %v5642_v6  ;;  %v5628_v6 = vld [vmem:[%s19326_s2 + $0x1f0] sm:$0xff] }
 0x5c8   :  { %6398 = vmatpush2.bf16.msra.mxu1 %v17043_v55  ;;  %v17102_v55 = vcombine.low %v5646_v22, %v5650_v14  ;;  %19988 = vst [vmem:[#allocation66_spill] sm:$0xff] %v17108_v15  ;;  %v5634_v22 = vld [vmem:[%s19326_s2 + $0x220] sm:$0xff]  ;;  %v5631_v14 = vld [vmem:[%s19326_s2 + $0x208] sm:$0xff] }
 0x5c9   :  { %6399 = vmatprep.subr.bf16.mxu1 %v17075_v0  ;;  %19987 = vst [vmem:[#allocation65_spill] sm:$0xff] %v17106_v21  ;;  %v5630_v0 = vld [vmem:[%s19326_s2 + $0x200] sm:$0xff]  ;;  %19990 = vst [vmem:[#allocation70_spill] sm:$0xff] %v17126_v8  ;;  %v17142_v52 = vcombine.low %v5631_v14, %v5635_v34 }
 0x5ca   :  { %6359 = vmatpush2.bf16.msra.mxu0 %v17060_v32  ;;  %19986 = vst [vmem:[#allocation60_spill] sm:$0xff] %v17102_v55  ;;  %v17138_v32 = vcombine.low %v5630_v0, %v5634_v22 }
 0x5cb   :  { %6360 = vmatprep.subr.bf16.mxu0 %v17077_v13  ;;  %v17132_v13 = vcombine.high %v5630_v0, %v5634_v22  ;;  %19995 = vst [vmem:[#allocation75_spill] sm:$0xff] %v17142_v52  ;;  %v5625_v0 = vld [vmem:[%s19326_s2 + $0x1d8] sm:$0xff] }
 0x5cc   :  { %6400 = vmatpush2.bf16.msra.mxu1 %v17073_v54  ;;  %v17135_v54 = vcombine.high %v5631_v14, %v5635_v34  ;;  %19994 = vst [vmem:[#allocation74_spill] sm:$0xff] %v17138_v32  ;;  %v5629_v22 = vld [vmem:[%s19326_s2 + $0x1f8] sm:$0xff] }
 0x5cd   :  { %6401 = vmatprep.subr.bf16.mxu1 %v17089_v9  ;;  %v17130_v9 = vcombine.low %v5639_v18, %v5643_v51  ;;  %19992 = vst [vmem:[#allocation69_spill] sm:$0xff] %v17132_v13  ;;  %v5624_v51 = vld [vmem:[%s19326_s2 + $0x1d0] sm:$0xff]  ;;  %v17163_v34 = vcombine.low %v5625_v0, %v5629_v22 }
 0x5ce   :  { %6361 = vmatpush2.bf16.msra.mxu0 %v17102_v55  ;;  %19993 = vst [vmem:[#allocation72_spill] sm:$0xff] %v17135_v54  ;;  %v17156_v18 = vcombine.high %v5624_v51, %v5628_v6  ;;  %v17161_v14 = vcombine.low %v5624_v51, %v5628_v6 }
 0x5cf   :  { %6362 = vmatprep.subr.bf16.mxu0 %v17108_v15  ;;  %19991 = vst [vmem:[#allocation71_spill] sm:$0xff] %v17130_v9 }
 0x5d0   :  { %6402 = vmatpush2.bf16.msra.mxu1 %v17106_v21  ;;  %19996 = vst [vmem:[#allocation73_spill] sm:$0xff] %v17156_v18  ;;  %v19999_v21 = vld [vmem:[#allocation22_spill] sm:$0xff] }
 0x5d1   :  { %6403 = vmatprep.subr.bf16.mxu1 %v17111_v61 }
 0x5d2   :  { %6363 = vmatpush2.bf16.msra.mxu0 %v17126_v8 }
 0x5d3   :  { %6364 = vmatprep.subr.bf16.mxu0 %v17132_v13 }
 0x5d4   :  { %6404 = vmatpush2.bf16.msra.mxu1 %v17130_v9  ;;  %v19998_v9 = vld [vmem:[#allocation20_spill] sm:$0xff] }
 0x5d5   :  { %6405 = vmatprep.subr.bf16.mxu1 %v17135_v54 }
 0x5d6   :  { %6365 = vmatpush2.bf16.msra.mxu0 %v17138_v32  ;;  %v17165_v32 = vcombine.high %v5625_v0, %v5629_v22  ;;  %v20000_v22 = vld [vmem:[#allocation23_spill] sm:$0xff] }
 0x5d7   :  { %6416 = vmatprep.subr.bf16.mxu0 %v17156_v18 }
 0x5d8   :  { %6406 = vmatpush2.bf16.msra.mxu1 %v17142_v52  ;;  %19997 = vst [vmem:[#allocation79_spill] sm:$0xff] %v17165_v32 }
 0x5d9   :  { %6457 = vmatprep.subr.bf16.mxu1 %v17165_v32 }
 0x619   :  { %v5368_v54 = vpop.f32.mrf.mxu0  ;;  %v5409_v13 = vpop.f32.mrf.mxu1 }
 0x61a   :  { %v5502_v52 = vadd.f32 %v5368_v54, %v19998_v9  ;;  %v5504_v32 = vadd.f32 %v5409_v13, %v20001_v26 }
 0x61b   :  { %v5370_v8 = vpop.f32.mrf.mxu0  ;;  %v5411_v61 = vpop.f32.mrf.mxu1 }
 0x61c   :  { %v12642_v15 = vmul.f32 -1.442695, %v5502_v52  ;;  %v5503_v55 = vadd.f32 %v5370_v8, %v19999_v21  ;;  %v5505_v18 = vadd.f32 %v5411_v61, %v20000_v22 }
 0x61d   :  { %v5372_v38 = vpop.f32.mrf.mxu0  ;;  %v5413_v51 = vpop.f32.mrf.mxu1 }
 0x61e   :  { %13811 = vpow2.f32 %v12642_v15  ;;  %v12643_v6 = vmul.f32 -1.442695, %v5503_v55  ;;  %v12644_v19 = vmul.f32 -1.442695, %v5505_v18  ;;  %v20003_v18 = vld [vmem:[#allocation35_spill] sm:$0xff] }
 0x61f   :  { %v5373_v3 = vpop.f32.mrf.mxu0  ;;  %v5414_v0 = vpop.f32.mrf.mxu1  ;;  %v20004_v51 = vld [vmem:[#allocation51_spill] sm:$0xff] }
 0x620   :  { %13813 = vpow2.f32 %v12643_v6  ;;  %v358_v6 = vadd.f32 %v20004_v51, %v20003_v18  ;;  %v20005_v0 = vld [vmem:[#allocation50_spill] sm:$0xff] }
 0x621   :  { %13815 = vtanh.f32 %v5504_v32 }
 0x622   :  { %13817 = vpow2.f32 %v12644_v19 }
 0x62b   :  { %v13812_v5 = vpop.eup %13811 }
 0x62c   :  { %v5517_v59 = vadd.f32 1.0, %v13812_v5 }
 0x62d   :  { %v13814_v9 = vpop.eup %13813 }
 0x62e   :  { %13819 = vrcp.f32 %v5517_v59  ;;  %v5523_v54 = vadd.f32 1.0, %v13814_v9  ;;  %v13816_v38 = vpop.eup %13815 }
 0x62f   :  { %v13818_v21 = vpop.eup %13817 }
 0x630   :  { %13821 = vrcp.f32 %v5523_v54  ;;  %v5530_v8 = vadd.f32 1.0, %v13818_v21 }
 0x632   :  { %13823 = vrcp.f32 %v5530_v8 }
 0x63b   :  { %v13820_v15 = vpop.eup %13819 }
 0x63c   :  { %v5534_v55 = vmul.f32 %v13820_v15, %v13816_v38 }
 0x63d   :  { %v13822_v3 = vpop.eup %13821 }
 0x63e   :  { %v5533_v52 = vmul.f32 %v13822_v3, %v16683_v60 }
 0x63f   :  { %v13824_v5 = vpop.eup %13823 }
 0x640   :  { %v17174_v61 = vadd.f32 %v5534_v55, %v5533_v52  ;;  %v20006_v52 = vld [vmem:[#allocation37_spill] sm:$0xff] }
 0x642   :  { %20002 = vst [vmem:[#allocation78_spill] sm:$0xff] %v17174_v61  ;;  %13825 = vtanh.f32 %v17174_v61  ;;  %v20008_v61 = vld [vmem:[#allocation52_spill] sm:$0xff] }
 0x64f   :  { %v13826_v26 = vpop.eup %13825 }
 0x650   :  { %v5537_v32 = vmul.f32 %v13826_v26, %v13824_v5  ;;  %v20007_v5 = vld [vmem:[#allocation53_spill] sm:$0xff] }
 0x651   :  { %v431_v26 = vadd.f32 %v20007_v5, %v20006_v52 }
 0x652   :  { %v17177_v19 = vpack.c.bf16 %v5537_v32, %v5537_v32 }
 0x654   :  { %5563 = vst [vmem:[#allocation3 + $0x20] sm:$0xf] %v17177_v19 }
 0x659   :  { %v5450_v59 = vpop.f32.mrf.mxu0  ;;  %v5491_v13 = vpop.f32.mrf.mxu1 }
 0x65a   :  { %v5510_v22 = vadd.f32 %v5450_v59, %v20005_v0  ;;  %v5512_v45 = vadd.f32 %v5491_v13, %v20008_v61 }
 0x65b   :  { %v5452_v60 = vpop.f32.mrf.mxu0  ;;  %v5493_v9 = vpop.f32.mrf.mxu1 }
 0x65c   :  { %v12645_v54 = vmul.f32 -1.442695, %v5510_v22  ;;  %v5511_v38 = vadd.f32 %v5452_v60, %v358_v6  ;;  %v5513_v32 = vadd.f32 %v5493_v9, %v431_v26  ;;  %v5608_v26 = vld [vmem:[%s19326_s2 + $0x150] sm:$0xff] }
 0x65d   :  { %v5454_v21 = vpop.f32.mrf.mxu0  ;;  %v5495_v15 = vpop.f32.mrf.mxu1 }
 0x65e   :  { %13827 = vpow2.f32 %v12645_v54  ;;  %v12646_v55 = vmul.f32 -1.442695, %v5511_v38  ;;  %v12647_v51 = vmul.f32 -1.442695, %v5513_v32 }
 0x65f   :  { %v5455_v3 = vpop.f32.mrf.mxu0  ;;  %v5496_v8 = vpop.f32.mrf.mxu1 }
 0x660   :  { %13829 = vpow2.f32 %v12646_v55  ;;  %v5620_v3 = vld [vmem:[%s19326_s2 + $0x1b0] sm:$0xff]  ;;  %v5621_v8 = vld [vmem:[%s19326_s2 + $0x1b8] sm:$0xff] }
 0x661   :  { %13831 = vtanh.f32 %v5512_v45 }
 0x662   :  { %13833 = vpow2.f32 %v12647_v51 }
 0x66b   :  { %v13828_v18 = vpop.eup %13827 }
 0x66c   :  { %v5541_v59 = vadd.f32 1.0, %v13828_v18  ;;  %v5616_v18 = vld [vmem:[%s19326_s2 + $0x190] sm:$0xff] }
 0x66d   :  { %v13830_v0 = vpop.eup %13829  ;;  %v17205_v32 = vcombine.high %v5616_v18, %v5620_v3 }
 0x66e   :  { %13835 = vrcp.f32 %v5541_v59  ;;  %v5547_v6 = vadd.f32 1.0, %v13830_v0  ;;  %v13832_v22 = vpop.eup %13831  ;;  %v5612_v59 = vld [vmem:[%s19326_s2 + $0x170] sm:$0xff]  ;;  %v5609_v0 = vld [vmem:[%s19326_s2 + $0x158] sm:$0xff] }
 0x66f   :  { %v13834_v60 = vpop.eup %13833 }
 0x670   :  { %13837 = vrcp.f32 %v5547_v6  ;;  %v5554_v15 = vadd.f32 1.0, %v13834_v60  ;;  %v5613_v6 = vld [vmem:[%s19326_s2 + $0x178] sm:$0xff] }
 0x672   :  { %13839 = vrcp.f32 %v5554_v15  ;;  %v5604_v15 = vld [vmem:[%s19326_s2 + $0x130] sm:$0xff] }
 0x67b   :  { %v13836_v54 = vpop.eup %13835 }
 0x67c   :  { %v5558_v38 = vmul.f32 %v13836_v54, %v13832_v22  ;;  %v17222_v22 = vcombine.low %v5616_v18, %v5620_v3  ;;  %v17226_v54 = vcombine.high %v5608_v26, %v5612_v59 }
 0x67d   :  { %v13838_v21 = vpop.eup %13837 }
 0x67e   :  { %v5557_v55 = vmul.f32 %v13838_v21, %v16694_v29  ;;  %v5617_v29 = vld [vmem:[%s19326_s2 + $0x198] sm:$0xff]  ;;  %v5600_v21 = vld [vmem:[%s19326_s2 + $0x110] sm:$0xff] }
 0x67f   :  { %v13840_v61 = vpop.eup %13839  ;;  %v17207_v51 = vcombine.high %v5617_v29, %v5621_v8  ;;  %v17224_v60 = vcombine.low %v5617_v29, %v5621_v8  ;;  %v17252_v18 = vcombine.high %v5600_v21, %v5604_v15  ;;  %v5592_v29 = vld [vmem:[%s19326_s2 + $0xd0] sm:$0xff] }
 0x680   :  { %v17187_v9 = vadd.f32 %v5558_v38, %v5557_v55  ;;  %v17228_v38 = vcombine.high %v5609_v0, %v5613_v6  ;;  %v5601_v55 = vld [vmem:[%s19326_s2 + $0x118] sm:$0xff]  ;;  %v5596_v8 = vld [vmem:[%s19326_s2 + $0xf0] sm:$0xff] }
 0x681   :  { %20012 = vst [vmem:[#allocation83_spill] sm:$0xff] %v17252_v18 }
 0x682   :  { %13841 = vtanh.f32 %v17187_v9  ;;  %20009 = vst [vmem:[#allocation76_spill] sm:$0xff] %v17228_v38 }
 0x68f   :  { %v13842_v45 = vpop.eup %13841 }
 0x690   :  { %v5561_v13 = vmul.f32 %v13842_v45, %v13840_v61  ;;  %v5605_v61 = vld [vmem:[%s19326_s2 + $0x138] sm:$0xff]  ;;  %v17246_v45 = vcombine.low %v5608_v26, %v5612_v59  ;;  %v17270_v59 = vcombine.low %v5600_v21, %v5604_v15 }
 0x691   :  { %v17254_v3 = vcombine.high %v5601_v55, %v5605_v61  ;;  %v5597_v26 = vld [vmem:[%s19326_s2 + $0xf8] sm:$0xff] }
 0x692   :  { %v5564_v5 = vpack.c.bf16 %v5561_v13, %v5561_v13  ;;  %20010 = vst [vmem:[#allocation77_spill] sm:$0xff] %v17246_v45  ;;  %v17248_v13 = vcombine.low %v5609_v0, %v5613_v6  ;;  %20014 = vst [vmem:[#allocation82_spill] sm:$0xff] %v17270_v59  ;;  %v17272_v0 = vcombine.low %v5601_v55, %v5605_v61  ;;  %v5585_v21 = vld [vmem:[%s19326_s2 + $0x98] sm:$0xff] }
 0x693   :  { %20013 = vst [vmem:[#allocation80_spill] sm:$0xff] %v17254_v3  ;;  %v17276_v6 = vcombine.high %v5592_v29, %v5596_v8  ;;  %v5589_v15 = vld [vmem:[%s19326_s2 + $0xb8] sm:$0xff]  ;;  %v17294_v55 = vcombine.low %v5592_v29, %v5596_v8 }
 0x694   :  { %5565 = vst [vmem:[#allocation3 + $0x1c] sm:$0xf] %v5564_v5  ;;  %6366 = vmatprep.mubr.bf16.mxu0 %v5564_v5  ;;  %6407 = vmatprep.mubr.bf16.mxu1 %v5564_v5  ;;  %20011 = vst [vmem:[#allocation81_spill] sm:$0xff] %v17248_v13  ;;  %v5577_v29 = vld [vmem:[%s19326_s2 + $0x58] sm:$0xff] }
 0x695   :  { %6367 = vmatmul.mubr.bf16.vlgmr.msra.gmra.mxu0 %v17177_v19  ;;  %6408 = vmatmul.mubr.bf16.vlgmr.msra.gmra.mxu1 %v17177_v19  ;;  %20015 = vst [vmem:[#allocation84_spill] sm:$0xff] %v17272_v0  ;;  %20016 = vst [vmem:[#allocation85_spill] sm:$0xff] %v17276_v6  ;;  %v5581_v8 = vld [vmem:[%s19326_s2 + $0x78] sm:$0xff] }
 0x696   :  { %6417 = vmatpush1.bf16.msra.mxu0 %v17161_v14  ;;  %6458 = vmatpush1.bf16.msra.mxu1 %v17163_v34  ;;  %20018 = vst [vmem:[#allocation87_spill] sm:$0xff] %v17294_v55 }
 0x697   :  { %6448 = vmatprep.mubr.bf16.mxu0 %v5564_v5  ;;  %6489 = vmatprep.mubr.bf16.mxu1 %v5564_v5  ;;  %v5593_v5 = vld [vmem:[%s19326_s2 + $0xd8] sm:$0xff] }
 0x698   :  { %6418 = vmatprep.subr.bf16.mxu0 %v17205_v32  ;;  %6459 = vmatprep.subr.bf16.mxu1 %v17207_v51  ;;  %v17278_v52 = vcombine.high %v5593_v5, %v5597_v26  ;;  %v17296_v61 = vcombine.low %v5593_v5, %v5597_v26  ;;  %v17320_v26 = vcombine.low %v5585_v21, %v5589_v15 }
 0x69a   :  { %6419 = vmatpush1.bf16.msra.mxu0 %v17222_v22  ;;  %6460 = vmatpush1.bf16.msra.mxu1 %v17224_v60  ;;  %20017 = vst [vmem:[#allocation86_spill] sm:$0xff] %v17278_v52  ;;  %20019 = vst [vmem:[#allocation88_spill] sm:$0xff] %v17296_v61 }
 0x69b   :  { %6420 = vmatprep.subr.bf16.mxu0 %v17226_v54  ;;  %6461 = vmatprep.subr.bf16.mxu1 %v17228_v38  ;;  %v5584_v38 = vld [vmem:[%s19326_s2 + $0x90] sm:$0xff]  ;;  %20023 = vst [vmem:[#allocation92_spill] sm:$0xff] %v17320_v26 }
 0x69e   :  { %6421 = vmatpush1.bf16.msra.mxu0 %v17246_v45  ;;  %6462 = vmatpush1.bf16.msra.mxu1 %v17248_v13  ;;  %v5588_v13 = vld [vmem:[%s19326_s2 + $0xb0] sm:$0xff] }
 0x69f   :  { %6422 = vmatprep.subr.bf16.mxu0 %v17252_v18  ;;  %6463 = vmatprep.subr.bf16.mxu1 %v17254_v3  ;;  %v17300_v3 = vcombine.high %v5584_v38, %v5588_v13  ;;  %v17302_v18 = vcombine.high %v5585_v21, %v5589_v15  ;;  %v5576_v45 = vld [vmem:[%s19326_s2 + $0x50] sm:$0xff]  ;;  %v17318_v5 = vcombine.low %v5584_v38, %v5588_v13  ;;  %v5569_v38 = vld [vmem:[%s19326_s2 + $0x18] sm:$0xff] }
 0x6a0   :  { %v5573_v13 = vld [vmem:[%s19326_s2 + $0x38] sm:$0xff]  ;;  %v17344_v15 = vcombine.low %v5577_v29, %v5581_v8 }
 0x6a1   :  { %20020 = vst [vmem:[#allocation89_spill] sm:$0xff] %v17300_v3  ;;  %20021 = vst [vmem:[#allocation90_spill] sm:$0xff] %v17302_v18 }
 0x6a2   :  { %6423 = vmatpush1.bf16.msra.mxu0 %v17270_v59  ;;  %6464 = vmatpush1.bf16.msra.mxu1 %v17272_v0  ;;  %v5580_v0 = vld [vmem:[%s19326_s2 + $0x70] sm:$0xff]  ;;  %20022 = vst [vmem:[#allocation91_spill] sm:$0xff] %v17318_v5  ;;  %20027 = vst [vmem:[#allocation19_spill] sm:$0xff] %v17344_v15 }
 0x6a3   :  { %6424 = vmatprep.subr.bf16.mxu0 %v17276_v6  ;;  %6465 = vmatprep.subr.bf16.mxu1 %v17278_v52  ;;  %v17324_v52 = vcombine.high %v5576_v45, %v5580_v0  ;;  %v17326_v6 = vcombine.high %v5577_v29, %v5581_v8  ;;  %v5568_v59 = vld [vmem:[%s19326_s2 + $0x10] sm:$0xff]  ;;  %v17342_v21 = vcombine.low %v5576_v45, %v5580_v0  ;;  %v5689_v45 = vld [vmem:[%s19326_s2 + $0x3d8] sm:$0xff] }
 0x6a4   :  { %v5693_v0 = vld [vmem:[%s19326_s2 + $0x3f8] sm:$0xff]  ;;  %v17368_v8 = vcombine.low %v5569_v38, %v5573_v13 }
 0x6a5   :  { %20024 = vst [vmem:[#allocation93_spill] sm:$0xff] %v17324_v52  ;;  %20025 = vst [vmem:[#allocation17_spill] sm:$0xff] %v17326_v6 }
 0x6a6   :  { %6425 = vmatpush1.bf16.msra.mxu0 %v17294_v55  ;;  %6466 = vmatpush1.bf16.msra.mxu1 %v17296_v61  ;;  %v5572_v61 = vld [vmem:[%s19326_s2 + $0x30] sm:$0xff]  ;;  %20026 = vst [vmem:[#allocation16_spill] sm:$0xff] %v17342_v21  ;;  %20031 = vst [vmem:[#allocation56_spill] sm:$0xff] %v17368_v8 }
 0x6a7   :  { %6426 = vmatprep.subr.bf16.mxu0 %v17300_v3  ;;  %6467 = vmatprep.subr.bf16.mxu1 %v17302_v18  ;;  %v17348_v18 = vcombine.high %v5568_v59, %v5572_v61  ;;  %v17350_v3 = vcombine.high %v5569_v38, %v5573_v13  ;;  %v5688_v55 = vld [vmem:[%s19326_s2 + $0x3d0] sm:$0xff]  ;;  %v17366_v29 = vcombine.low %v5568_v59, %v5572_v61  ;;  %v5681_v59 = vld [vmem:[%s19326_s2 + $0x398] sm:$0xff] }
 0x6a8   :  { %v5685_v61 = vld [vmem:[%s19326_s2 + $0x3b8] sm:$0xff]  ;;  %v17392_v13 = vcombine.low %v5689_v45, %v5693_v0 }
 0x6a9   :  { %20028 = vst [vmem:[#allocation18_spill] sm:$0xff] %v17348_v18  ;;  %20029 = vst [vmem:[#allocation94_spill] sm:$0xff] %v17350_v3 }
 0x6aa   :  { %6427 = vmatpush1.bf16.msra.mxu0 %v17318_v5  ;;  %6468 = vmatpush1.bf16.msra.mxu1 %v17320_v26  ;;  %v5692_v26 = vld [vmem:[%s19326_s2 + $0x3f0] sm:$0xff]  ;;  %20030 = vst [vmem:[#allocation54_spill] sm:$0xff] %v17366_v29  ;;  %20035 = vst [vmem:[#allocation96_spill] sm:$0xff] %v17392_v13 }
 0x6ab   :  { %6428 = vmatprep.subr.bf16.mxu0 %v17324_v52  ;;  %6469 = vmatprep.subr.bf16.mxu1 %v17326_v6  ;;  %v17372_v6 = vcombine.high %v5688_v55, %v5692_v26  ;;  %v17374_v52 = vcombine.high %v5689_v45, %v5693_v0  ;;  %v5680_v5 = vld [vmem:[%s19326_s2 + $0x390] sm:$0xff]  ;;  %v17390_v38 = vcombine.low %v5688_v55, %v5692_v26  ;;  %v5673_v55 = vld [vmem:[%s19326_s2 + $0x358] sm:$0xff] }
 0x6ac   :  { %v5677_v26 = vld [vmem:[%s19326_s2 + $0x378] sm:$0xff]  ;;  %v17416_v0 = vcombine.low %v5681_v59, %v5685_v61 }
 0x6ad   :  { %20032 = vst [vmem:[#allocation57_spill] sm:$0xff] %v17372_v6  ;;  %20033 = vst [vmem:[#allocation55_spill] sm:$0xff] %v17374_v52 }
 0x6ae   :  { %6429 = vmatpush1.bf16.msra.mxu0 %v17342_v21  ;;  %6470 = vmatpush1.bf16.msra.mxu1 %v17344_v15  ;;  %v5684_v15 = vld [vmem:[%s19326_s2 + $0x3b0] sm:$0xff]  ;;  %20034 = vst [vmem:[#allocation95_spill] sm:$0xff] %v17390_v38  ;;  %20039 = vst [vmem:[#allocation9_spill] sm:$0xff] %v17416_v0 }
 0x6af   :  { %6430 = vmatprep.subr.bf16.mxu0 %v17348_v18  ;;  %6471 = vmatprep.subr.bf16.mxu1 %v17350_v3  ;;  %v17396_v3 = vcombine.high %v5680_v5, %v5684_v15  ;;  %v17398_v18 = vcombine.high %v5681_v59, %v5685_v61  ;;  %v5672_v21 = vld [vmem:[%s19326_s2 + $0x350] sm:$0xff]  ;;  %v17414_v45 = vcombine.low %v5680_v5, %v5684_v15  ;;  %v5665_v5 = vld [vmem:[%s19326_s2 + $0x318] sm:$0xff] }
 0x6b0   :  { %v5669_v15 = vld [vmem:[%s19326_s2 + $0x338] sm:$0xff]  ;;  %v17440_v61 = vcombine.low %v5673_v55, %v5677_v26 }
 0x6b1   :  { %20036 = vst [vmem:[#allocation97_spill] sm:$0xff] %v17396_v3  ;;  %20037 = vst [vmem:[#allocation7_spill] sm:$0xff] %v17398_v18 }
 0x6b2   :  { %6431 = vmatpush1.bf16.msra.mxu0 %v17366_v29  ;;  %6472 = vmatpush1.bf16.msra.mxu1 %v17368_v8  ;;  %v5676_v8 = vld [vmem:[%s19326_s2 + $0x370] sm:$0xff]  ;;  %20038 = vst [vmem:[#allocation6_spill] sm:$0xff] %v17414_v45  ;;  %20043 = vst [vmem:[#allocation67_spill] sm:$0xff] %v17440_v61 }
 0x6b3   :  { %6432 = vmatprep.subr.bf16.mxu0 %v17372_v6  ;;  %6473 = vmatprep.subr.bf16.mxu1 %v17374_v52  ;;  %v17420_v52 = vcombine.high %v5672_v21, %v5676_v8  ;;  %v17422_v6 = vcombine.high %v5673_v55, %v5677_v26  ;;  %v5664_v29 = vld [vmem:[%s19326_s2 + $0x310] sm:$0xff]  ;;  %v17438_v59 = vcombine.low %v5672_v21, %v5676_v8  ;;  %v5657_v21 = vld [vmem:[%s19326_s2 + $0x2d8] sm:$0xff] }
 0x6b4   :  { %v5661_v8 = vld [vmem:[%s19326_s2 + $0x2f8] sm:$0xff]  ;;  %v17464_v26 = vcombine.low %v5665_v5, %v5669_v15 }
 0x6b5   :  { %20040 = vst [vmem:[#allocation8_spill] sm:$0xff] %v17420_v52  ;;  %20041 = vst [vmem:[#allocation62_spill] sm:$0xff] %v17422_v6 }
 0x6b6   :  { %6433 = vmatpush2.bf16.msra.mxu0 %v17390_v38  ;;  %6474 = vmatpush2.bf16.msra.mxu1 %v17392_v13  ;;  %v5668_v13 = vld [vmem:[%s19326_s2 + $0x330] sm:$0xff]  ;;  %20042 = vst [vmem:[#allocation64_spill] sm:$0xff] %v17438_v59  ;;  %20047 = vst [vmem:[#allocation100_spill] sm:$0xff] %v17464_v26 }
 0x6b7   :  { %6434 = vmatprep.subr.bf16.mxu0 %v17396_v3  ;;  %6475 = vmatprep.subr.bf16.mxu1 %v17398_v18  ;;  %v17444_v18 = vcombine.high %v5664_v29, %v5668_v13  ;;  %v17446_v3 = vcombine.high %v5665_v5, %v5669_v15  ;;  %v5656_v38 = vld [vmem:[%s19326_s2 + $0x2d0] sm:$0xff]  ;;  %v17462_v55 = vcombine.low %v5664_v29, %v5668_v13  ;;  %v5649_v29 = vld [vmem:[%s19326_s2 + $0x298] sm:$0xff] }
 0x6b8   :  { %v5653_v13 = vld [vmem:[%s19326_s2 + $0x2b8] sm:$0xff]  ;;  %v17488_v15 = vcombine.low %v5657_v21, %v5661_v8 }
 0x6b9   :  { %20044 = vst [vmem:[#allocation63_spill] sm:$0xff] %v17444_v18  ;;  %20045 = vst [vmem:[#allocation98_spill] sm:$0xff] %v17446_v3 }
 0x6ba   :  { %6435 = vmatpush2.bf16.msra.mxu0 %v17414_v45  ;;  %6476 = vmatpush2.bf16.msra.mxu1 %v17416_v0  ;;  %v5660_v0 = vld [vmem:[%s19326_s2 + $0x2f0] sm:$0xff]  ;;  %20046 = vst [vmem:[#allocation99_spill] sm:$0xff] %v17462_v55  ;;  %20051 = vst [vmem:[#allocation104_spill] sm:$0xff] %v17488_v15 }
 0x6bb   :  { %6436 = vmatprep.subr.bf16.mxu0 %v17420_v52  ;;  %6477 = vmatprep.subr.bf16.mxu1 %v17422_v6  ;;  %v17468_v6 = vcombine.high %v5656_v38, %v5660_v0  ;;  %v17470_v52 = vcombine.high %v5657_v21, %v5661_v8  ;;  %v5648_v45 = vld [vmem:[%s19326_s2 + $0x290] sm:$0xff]  ;;  %v17486_v5 = vcombine.low %v5656_v38, %v5660_v0  ;;  %v5641_v38 = vld [vmem:[%s19326_s2 + $0x258] sm:$0xff] }
 0x6bc   :  { %v5645_v0 = vld [vmem:[%s19326_s2 + $0x278] sm:$0xff]  ;;  %v17512_v8 = vcombine.low %v5649_v29, %v5653_v13 }
 0x6bd   :  { %20048 = vst [vmem:[#allocation101_spill] sm:$0xff] %v17468_v6  ;;  %20049 = vst [vmem:[#allocation102_spill] sm:$0xff] %v17470_v52 }
 0x6be   :  { %6437 = vmatpush2.bf16.msra.mxu0 %v17438_v59  ;;  %6478 = vmatpush2.bf16.msra.mxu1 %v17440_v61  ;;  %v5652_v61 = vld [vmem:[%s19326_s2 + $0x2b0] sm:$0xff]  ;;  %20050 = vst [vmem:[#allocation103_spill] sm:$0xff] %v17486_v5 }
 0x6bf   :  { %6438 = vmatprep.subr.bf16.mxu0 %v17444_v18  ;;  %6479 = vmatprep.subr.bf16.mxu1 %v17446_v3  ;;  %v17492_v3 = vcombine.high %v5648_v45, %v5652_v61  ;;  %v17494_v18 = vcombine.high %v5649_v29, %v5653_v13  ;;  %v5640_v59 = vld [vmem:[%s19326_s2 + $0x250] sm:$0xff]  ;;  %v17510_v21 = vcombine.low %v5648_v45, %v5652_v61  ;;  %v5633_v45 = vld [vmem:[%s19326_s2 + $0x218] sm:$0xff] }
 0x6c0   :  { %v5637_v61 = vld [vmem:[%s19326_s2 + $0x238] sm:$0xff]  ;;  %v17536_v13 = vcombine.low %v5641_v38, %v5645_v0 }
 0x6c1   :  { %20052 = vst [vmem:[#allocation105_spill] sm:$0xff] %v17492_v3  ;;  %20053 = vst [vmem:[#allocation106_spill] sm:$0xff] %v17494_v18 }
 0x6c2   :  { %6439 = vmatpush2.bf16.msra.mxu0 %v17462_v55  ;;  %6480 = vmatpush2.bf16.msra.mxu1 %v17464_v26  ;;  %v5644_v26 = vld [vmem:[%s19326_s2 + $0x270] sm:$0xff]  ;;  %20054 = vst [vmem:[#allocation107_spill] sm:$0xff] %v17510_v21 }
 0x6c3   :  { %6440 = vmatprep.subr.bf16.mxu0 %v17468_v6  ;;  %6481 = vmatprep.subr.bf16.mxu1 %v17470_v52  ;;  %v17516_v52 = vcombine.high %v5640_v59, %v5644_v26  ;;  %v17518_v6 = vcombine.high %v5641_v38, %v5645_v0  ;;  %v5632_v55 = vld [vmem:[%s19326_s2 + $0x210] sm:$0xff]  ;;  %v17534_v29 = vcombine.low %v5640_v59, %v5644_v26  ;;  %v20086_v0 = vld [vmem:[#allocation12_spill] sm:$0xff] }
 0x6c6   :  { %6441 = vmatpush2.bf16.msra.mxu0 %v17486_v5  ;;  %6482 = vmatpush2.bf16.msra.mxu1 %v17488_v15  ;;  %v5636_v15 = vld [vmem:[%s19326_s2 + $0x230] sm:$0xff] }
 0x6c7   :  { %6442 = vmatprep.subr.bf16.mxu0 %v17492_v3  ;;  %6483 = vmatprep.subr.bf16.mxu1 %v17494_v18  ;;  %v17540_v18 = vcombine.high %v5632_v55, %v5636_v15  ;;  %v17542_v3 = vcombine.high %v5633_v45, %v5637_v61  ;;  %v17546_v5 = vcombine.low %v5632_v55, %v5636_v15 }
 0x6ca   :  { %6443 = vmatpush2.bf16.msra.mxu0 %v17510_v21  ;;  %6484 = vmatpush2.bf16.msra.mxu1 %v17512_v8  ;;  %v17548_v21 = vcombine.low %v5633_v45, %v5637_v61  ;;  %v20087_v45 = vld [vmem:[#allocation27_spill] sm:$0xff] }
 0x6cb   :  { %6444 = vmatprep.subr.bf16.mxu0 %v17516_v52  ;;  %6485 = vmatprep.subr.bf16.mxu1 %v17518_v6  ;;  %v295_v61 = vadd.f32 %v20087_v45, %v20086_v0 }
 0x6ce   :  { %6445 = vmatpush2.bf16.msra.mxu0 %v17534_v29  ;;  %6486 = vmatpush2.bf16.msra.mxu1 %v17536_v13 }
 0x6cf   :  { %6446 = vmatprep.subr.bf16.mxu0 %v17540_v18  ;;  %6487 = vmatprep.subr.bf16.mxu1 %v17542_v3 }
 0x6d2   :  { %6447 = vmatpush2.bf16.msra.mxu0 %v17546_v5  ;;  %6488 = vmatpush2.bf16.msra.mxu1 %v17548_v21 }
 0x6d3   :  { %7334 = vmatprep.subr.bf16.mxu0 %v16774_v28  ;;  %7375 = vmatprep.subr.bf16.mxu1 %v16787_v30  ;;  %v20056_v28 = vld [vmem:[#allocation134_spill] sm:$0xff] }
 0x6d4   :  { %v20058_v30 = vld [vmem:[#allocation138_spill] sm:$0xff] }
 0x6d5   :  { %6449 = vmatmul.mubr.bf16.vlgmr.msra.gmra.mxu0 %v17177_v19  ;;  %6490 = vmatmul.mubr.bf16.vlgmr.msra.gmra.mxu1 %v17177_v19 }
 0x6d6   :  { %7335 = vmatpush1.bf16.msra.mxu0 %v16772_v41  ;;  %7376 = vmatpush1.bf16.msra.mxu1 %v16785_v7  ;;  %v20055_v41 = vld [vmem:[#allocation133_spill] sm:$0xff]  ;;  %v20057_v7 = vld [vmem:[#allocation135_spill] sm:$0xff] }
 0x6d7   :  { %7336 = vmatprep.subr.bf16.mxu0 %v16789_v40  ;;  %7377 = vmatprep.subr.bf16.mxu1 %v16798_v49  ;;  %v20059_v40 = vld [vmem:[#allocation136_spill] sm:$0xff]  ;;  %v20060_v49 = vld [vmem:[#allocation137_spill] sm:$0xff] }
 0x6da   :  { %7337 = vmatpush1.bf16.msra.mxu0 %v16802_v56  ;;  %7378 = vmatpush1.bf16.msra.mxu1 %v16806_v44  ;;  %v20061_v56 = vld [vmem:[#allocation139_spill] sm:$0xff] }
 0x6db   :  { %7338 = vmatprep.subr.bf16.mxu0 %v16820_v23  ;;  %7379 = vmatprep.subr.bf16.mxu1 %v16829_v20  ;;  %v20062_v44 = vld [vmem:[#allocation11_spill] sm:$0xff]  ;;  %v20063_v23 = vld [vmem:[#allocation140_spill] sm:$0xff] }
 0x6dc   :  { %v20066_v20 = vld [vmem:[#allocation59_spill] sm:$0xff] }
 0x6de   :  { %7339 = vmatpush1.bf16.msra.mxu0 %v16825_v27  ;;  %7380 = vmatpush1.bf16.msra.mxu1 %v16827_v4  ;;  %v20064_v27 = vld [vmem:[#allocation141_spill] sm:$0xff]  ;;  %v20065_v4 = vld [vmem:[#allocation15_spill] sm:$0xff] }
 0x6df   :  { %7340 = vmatprep.subr.bf16.mxu0 %v16844_v48  ;;  %7381 = vmatprep.subr.bf16.mxu1 %v16853_v36  ;;  %v20067_v48 = vld [vmem:[#allocation14_spill] sm:$0xff]  ;;  %v20070_v36 = vld [vmem:[#allocation61_spill] sm:$0xff] }
 0x6e2   :  { %7341 = vmatpush1.bf16.msra.mxu0 %v16849_v43  ;;  %7382 = vmatpush1.bf16.msra.mxu1 %v16851_v35  ;;  %v20068_v43 = vld [vmem:[#allocation13_spill] sm:$0xff]  ;;  %v20069_v35 = vld [vmem:[#allocation58_spill] sm:$0xff] }
 0x6e3   :  { %7342 = vmatprep.subr.bf16.mxu0 %v16868_v1  ;;  %7383 = vmatprep.subr.bf16.mxu1 %v16877_v10  ;;  %v20071_v1 = vld [vmem:[#allocation60_spill] sm:$0xff] }
 0x6e4   :  { %v20074_v10 = vld [vmem:[#allocation68_spill] sm:$0xff] }
 0x6e6   :  { %7343 = vmatpush1.bf16.msra.mxu0 %v16873_v12  ;;  %7384 = vmatpush1.bf16.msra.mxu1 %v16875_v37  ;;  %v20072_v12 = vld [vmem:[#allocation65_spill] sm:$0xff]  ;;  %v20073_v37 = vld [vmem:[#allocation66_spill] sm:$0xff] }
 0x6e7   :  { %7344 = vmatprep.subr.bf16.mxu0 %v16892_v46  ;;  %7385 = vmatprep.subr.bf16.mxu1 %v16901_v33  ;;  %v20075_v46 = vld [vmem:[#allocation70_spill] sm:$0xff]  ;;  %v20078_v33 = vld [vmem:[#allocation72_spill] sm:$0xff] }
 0x6ea   :  { %7345 = vmatpush1.bf16.msra.mxu0 %v16897_v53  ;;  %7386 = vmatpush1.bf16.msra.mxu1 %v16899_v58  ;;  %v20076_v53 = vld [vmem:[#allocation71_spill] sm:$0xff]  ;;  %v20077_v58 = vld [vmem:[#allocation69_spill] sm:$0xff] }
 0x6eb   :  { %7346 = vmatprep.subr.bf16.mxu0 %v16916_v50  ;;  %7387 = vmatprep.subr.bf16.mxu1 %v16925_v24  ;;  %v20079_v50 = vld [vmem:[#allocation74_spill] sm:$0xff]  ;;  %v20082_v24 = vld [vmem:[#allocation79_spill] sm:$0xff] }
 0x6ee   :  { %7347 = vmatpush1.bf16.msra.mxu0 %v16921_v16  ;;  %7388 = vmatpush1.bf16.msra.mxu1 %v16923_v63  ;;  %v20080_v16 = vld [vmem:[#allocation75_spill] sm:$0xff]  ;;  %v20081_v63 = vld [vmem:[#allocation73_spill] sm:$0xff] }
 0x6ef   :  { %7348 = vmatprep.subr.bf16.mxu0 %v16940_v25  ;;  %7389 = vmatprep.subr.bf16.mxu1 %v16949_v39  ;;  %v20084_v39 = vld [vmem:[#allocation25_spill] sm:$0xff] }
 0x6f2   :  { %7349 = vmatpush1.bf16.msra.mxu0 %v16945_v17  ;;  %7390 = vmatpush1.bf16.msra.mxu1 %v16947_v57  ;;  %v20083_v57 = vld [vmem:[#allocation10_spill] sm:$0xff] }
 0x6f3   :  { %7350 = vmatprep.subr.bf16.mxu0 %v16964_v42  ;;  %7391 = vmatprep.subr.bf16.mxu1 %v16973_v62  ;;  %v222_v42 = vadd.f32 %v20084_v39, %v20083_v57 }
 0x6f6   :  { %7351 = vmatpush2.bf16.msra.mxu0 %v16969_v31  ;;  %7392 = vmatpush2.bf16.msra.mxu1 %v16971_v47  ;;  %v20085_v31 = vld [vmem:[#allocation24_spill] sm:$0xff] }
 0x6f7   :  { %7352 = vmatprep.subr.bf16.mxu0 %v16988_v11  ;;  %7393 = vmatprep.subr.bf16.mxu1 %v16997_v2 }
 0x6fa   :  { %7353 = vmatpush2.bf16.msra.mxu0 %v20055_v41  ;;  %7394 = vmatpush2.bf16.msra.mxu1 %v20056_v28  ;;  %v20088_v28 = vld [vmem:[#allocation26_spill] sm:$0xff] }
 0x6fb   :  { %7354 = vmatprep.subr.bf16.mxu0 %v20057_v7  ;;  %7395 = vmatprep.subr.bf16.mxu1 %v20058_v30 }
 0x6fe   :  { %7355 = vmatpush2.bf16.msra.mxu0 %v20059_v40  ;;  %7396 = vmatpush2.bf16.msra.mxu1 %v20060_v49 }
 0x6ff   :  { %7356 = vmatprep.subr.bf16.mxu0 %v20061_v56  ;;  %7397 = vmatprep.subr.bf16.mxu1 %v20062_v44 }
 0x702   :  { %7357 = vmatpush2.bf16.msra.mxu0 %v20063_v23  ;;  %7398 = vmatpush2.bf16.msra.mxu1 %v20064_v27 }
 0x703   :  { %7358 = vmatprep.subr.bf16.mxu0 %v20065_v4  ;;  %7399 = vmatprep.subr.bf16.mxu1 %v20066_v20 }
 0x706   :  { %7359 = vmatpush2.bf16.msra.mxu0 %v20067_v48  ;;  %7400 = vmatpush2.bf16.msra.mxu1 %v20068_v43 }
 0x707   :  { %7360 = vmatprep.subr.bf16.mxu0 %v20069_v35  ;;  %7401 = vmatprep.subr.bf16.mxu1 %v20070_v36  ;;  %v20089_v35 = vld [vmem:[#allocation78_spill] sm:$0xff] }
 0x70a   :  { %7361 = vmatpush2.bf16.msra.mxu0 %v20071_v1  ;;  %7402 = vmatpush2.bf16.msra.mxu1 %v20072_v12 }
 0x70b   :  { %7362 = vmatprep.subr.bf16.mxu0 %v20073_v37  ;;  %7403 = vmatprep.subr.bf16.mxu1 %v20074_v10 }
 0x70e   :  { %7363 = vmatpush2.bf16.msra.mxu0 %v20075_v46  ;;  %7404 = vmatpush2.bf16.msra.mxu1 %v20076_v53 }
 0x70f   :  { %7364 = vmatprep.subr.bf16.mxu0 %v20077_v58  ;;  %7405 = vmatprep.subr.bf16.mxu1 %v20078_v33  ;;  %v20090_v33 = vld [vmem:[#allocation46_spill] sm:$0xff] }
 0x712   :  { %7365 = vmatpush2.bf16.msra.mxu0 %v20079_v50  ;;  %7406 = vmatpush2.bf16.msra.mxu1 %v20080_v16 }
 0x713   :  { %7416 = vmatprep.subr.bf16.mxu0 %v20081_v63  ;;  %7457 = vmatprep.subr.bf16.mxu1 %v20082_v24 }
 0x755   :  { %v6368_v25 = vpop.f32.mrf.mxu0  ;;  %v6409_v17 = vpop.f32.mrf.mxu1 }
 0x756   :  { %v6502_v47 = vadd.f32 %v6368_v25, %v20085_v31  ;;  %v6504_v7 = vadd.f32 %v6409_v17, %v20088_v28  ;;  %v20091_v25 = vld [vmem:[#allocation48_spill] sm:$0xff] }
 0x757   :  { %v6370_v62 = vpop.f32.mrf.mxu0  ;;  %v6411_v11 = vpop.f32.mrf.mxu1 }
 0x758   :  { %v12776_v2 = vmul.f32 -1.442695, %v6502_v47  ;;  %v6503_v19 = vadd.f32 %v6370_v62, %v222_v42  ;;  %v6505_v41 = vadd.f32 %v6411_v11, %v295_v61  ;;  %v20092_v11 = vld [vmem:[#allocation49_spill] sm:$0xff] }
 0x759   :  { %v6372_v59 = vpop.f32.mrf.mxu0  ;;  %v6413_v55 = vpop.f32.mrf.mxu1 }
 0x75a   :  { %13843 = vpow2.f32 %v12776_v2  ;;  %v12777_v26 = vmul.f32 -1.442695, %v6503_v19  ;;  %v12778_v30 = vmul.f32 -1.442695, %v6505_v41  ;;  %v20093_v19 = vld [vmem:[#allocation47_spill] sm:$0xff] }
 0x75b   :  { %v6373_v15 = vpop.f32.mrf.mxu0  ;;  %v6414_v38 = vpop.f32.mrf.mxu1 }
 0x75c   :  { %13845 = vpow2.f32 %v12777_v26 }
 0x75d   :  { %13847 = vtanh.f32 %v6504_v7 }
 0x75e   :  { %13849 = vpow2.f32 %v12778_v30 }
 0x767   :  { %v13844_v40 = vpop.eup %13843 }
 0x768   :  { %v6517_v49 = vadd.f32 1.0, %v13844_v40 }
 0x769   :  { %v13846_v56 = vpop.eup %13845 }
 0x76a   :  { %13851 = vrcp.f32 %v6517_v49  ;;  %v6523_v44 = vadd.f32 1.0, %v13846_v56  ;;  %v13848_v23 = vpop.eup %13847 }
 0x76b   :  { %v13850_v27 = vpop.eup %13849 }
 0x76c   :  { %13853 = vrcp.f32 %v6523_v44  ;;  %v6530_v43 = vadd.f32 1.0, %v13850_v27 }
 0x76e   :  { %13855 = vrcp.f32 %v6530_v43  ;;  %v20099_v43 = vld [vmem:[#allocation82_spill] sm:$0xff] }
 0x777   :  { %v13852_v4 = vpop.eup %13851 }
 0x778   :  { %v6534_v20 = vmul.f32 %v13852_v4, %v13848_v23 }
 0x779   :  { %v13854_v48 = vpop.eup %13853 }
 0x77a   :  { %v6533_v36 = vmul.f32 %v13854_v48, %v20089_v35  ;;  %v20096_v48 = vld [vmem:[#allocation81_spill] sm:$0xff] }
 0x77b   :  { %v13856_v12 = vpop.eup %13855  ;;  %v20105_v35 = vld [vmem:[#allocation89_spill] sm:$0xff] }
 0x77c   :  { %v17629_v1 = vadd.f32 %v6534_v20, %v6533_v36  ;;  %v20095_v20 = vld [vmem:[#allocation77_spill] sm:$0xff]  ;;  %v20106_v36 = vld [vmem:[#allocation90_spill] sm:$0xff] }
 0x77e   :  { %13857 = vtanh.f32 %v17629_v1 }
 0x78b   :  { %v13858_v37 = vpop.eup %13857 }
 0x78c   :  { %v6537_v10 = vmul.f32 %v13858_v37, %v13856_v12  ;;  %v20107_v12 = vld [vmem:[#allocation91_spill] sm:$0xff]  ;;  %v20108_v37 = vld [vmem:[#allocation92_spill] sm:$0xff] }
 0x78e   :  { %v17632_v46 = vpack.c.bf16 %v6537_v10, %v6537_v10  ;;  %v20109_v10 = vld [vmem:[#allocation93_spill] sm:$0xff] }
 0x790   :  { %6563 = vst [vmem:[#allocation3 + $0x28] sm:$0xf] %v17632_v46 }
 0x795   :  { %v6450_v53 = vpop.f32.mrf.mxu0  ;;  %v6491_v58 = vpop.f32.mrf.mxu1 }
 0x796   :  { %v6510_v50 = vadd.f32 %v6450_v53, %v20090_v33  ;;  %v6512_v59 = vadd.f32 %v6491_v58, %v20093_v19  ;;  %v20110_v53 = vld [vmem:[#allocation17_spill] sm:$0xff]  ;;  %v20111_v58 = vld [vmem:[#allocation16_spill] sm:$0xff]  ;;  %v20112_v33 = vld [vmem:[#allocation19_spill] sm:$0xff] }
 0x797   :  { %v6452_v16 = vpop.f32.mrf.mxu0  ;;  %v6493_v63 = vpop.f32.mrf.mxu1  ;;  %v20126_v19 = vld [vmem:[#allocation62_spill] sm:$0xff] }
 0x798   :  { %v12779_v24 = vmul.f32 -1.442695, %v6510_v50  ;;  %v6511_v17 = vadd.f32 %v6452_v16, %v20091_v25  ;;  %v6513_v2 = vadd.f32 %v6493_v63, %v20092_v11  ;;  %v20113_v50 = vld [vmem:[#allocation18_spill] sm:$0xff]  ;;  %v20117_v25 = vld [vmem:[#allocation57_spill] sm:$0xff] }
 0x799   :  { %v6454_v39 = vpop.f32.mrf.mxu0  ;;  %v6495_v42 = vpop.f32.mrf.mxu1  ;;  %v20114_v16 = vld [vmem:[#allocation94_spill] sm:$0xff]  ;;  %v20124_v11 = vld [vmem:[#allocation9_spill] sm:$0xff] }
 0x79a   :  { %13859 = vpow2.f32 %v12779_v24  ;;  %v12780_v31 = vmul.f32 -1.442695, %v6511_v17  ;;  %v12781_v55 = vmul.f32 -1.442695, %v6513_v2  ;;  %v20115_v63 = vld [vmem:[#allocation54_spill] sm:$0xff]  ;;  %v20116_v24 = vld [vmem:[#allocation56_spill] sm:$0xff] }
 0x79b   :  { %v6455_v47 = vpop.f32.mrf.mxu0  ;;  %v6496_v62 = vpop.f32.mrf.mxu1  ;;  %v20118_v17 = vld [vmem:[#allocation55_spill] sm:$0xff]  ;;  %v20120_v42 = vld [vmem:[#allocation96_spill] sm:$0xff] }
 0x79c   :  { %13861 = vpow2.f32 %v12780_v31  ;;  %v20119_v39 = vld [vmem:[#allocation95_spill] sm:$0xff]  ;;  %v20121_v31 = vld [vmem:[#allocation97_spill] sm:$0xff]  ;;  %v20123_v62 = vld [vmem:[#allocation6_spill] sm:$0xff] }
 0x79d   :  { %13863 = vtanh.f32 %v6512_v59  ;;  %v20122_v47 = vld [vmem:[#allocation7_spill] sm:$0xff]  ;;  %v20125_v2 = vld [vmem:[#allocation8_spill] sm:$0xff] }
 0x79e   :  { %13865 = vpow2.f32 %v12781_v55  ;;  %v20127_v59 = vld [vmem:[#allocation64_spill] sm:$0xff]  ;;  %v20128_v55 = vld [vmem:[#allocation67_spill] sm:$0xff] }
 0x7a7   :  { %v13860_v26 = vpop.eup %13859 }
 0x7a8   :  { %v6541_v15 = vadd.f32 1.0, %v13860_v26  ;;  %v20129_v26 = vld [vmem:[#allocation63_spill] sm:$0xff] }
 0x7a9   :  { %v13862_v38 = vpop.eup %13861 }
 0x7aa   :  { %13867 = vrcp.f32 %v6541_v15  ;;  %v6547_v45 = vadd.f32 1.0, %v13862_v38  ;;  %v13864_v61 = vpop.eup %13863  ;;  %v20130_v15 = vld [vmem:[#allocation98_spill] sm:$0xff]  ;;  %v20131_v38 = vld [vmem:[#allocation99_spill] sm:$0xff] }
 0x7ab   :  { %v13866_v41 = vpop.eup %13865 }
 0x7ac   :  { %13869 = vrcp.f32 %v6547_v45  ;;  %v6554_v40 = vadd.f32 1.0, %v13866_v41  ;;  %v20132_v45 = vld [vmem:[#allocation100_spill] sm:$0xff]  ;;  %v20134_v41 = vld [vmem:[#allocation102_spill] sm:$0xff] }
 0x7ae   :  { %13871 = vrcp.f32 %v6554_v40  ;;  %v20138_v40 = vld [vmem:[#allocation106_spill] sm:$0xff] }
 0x7b7   :  { %v13868_v28 = vpop.eup %13867 }
 0x7b8   :  { %v6558_v7 = vmul.f32 %v13868_v28, %v13864_v61  ;;  %v20133_v61 = vld [vmem:[#allocation101_spill] sm:$0xff]  ;;  %v20135_v28 = vld [vmem:[#allocation103_spill] sm:$0xff] }
 0x7b9   :  { %v13870_v30 = vpop.eup %13869 }
 0x7ba   :  { %v6557_v49 = vmul.f32 %v13870_v30, %v17187_v9  ;;  %v20094_v9 = vld [vmem:[#allocation76_spill] sm:$0xff]  ;;  %v20137_v30 = vld [vmem:[#allocation105_spill] sm:$0xff] }
 0x7bb   :  { %v13872_v44 = vpop.eup %13871 }
 0x7bc   :  { %v17640_v56 = vadd.f32 %v6558_v7, %v6557_v49  ;;  %v20136_v7 = vld [vmem:[#allocation104_spill] sm:$0xff]  ;;  %v20139_v49 = vld [vmem:[#allocation107_spill] sm:$0xff] }
 0x7be   :  { %13873 = vtanh.f32 %v17640_v56 }
 0x7cb   :  { %v13874_v23 = vpop.eup %13873 }
 0x7cc   :  { %v6561_v27 = vmul.f32 %v13874_v23, %v13872_v44  ;;  %v7615_v23 = vld [vmem:[%s19326_s2 + $0x188] sm:$0xff] }
 0x7ce   :  { %v6564_v4 = vpack.c.bf16 %v6561_v27, %v6561_v27  ;;  %v7619_v27 = vld [vmem:[%s19326_s2 + $0x1a8] sm:$0xff] }
 0x7d0   :  { %6565 = vst [vmem:[#allocation3 + $0x14] sm:$0xf] %v6564_v4  ;;  %7366 = vmatprep.mubr.bf16.mxu0 %v6564_v4  ;;  %7407 = vmatprep.mubr.bf16.mxu1 %v6564_v4 }
 0x7d1   :  { %7367 = vmatmul.mubr.bf16.vlgmr.msra.gmra.mxu0 %v17632_v46  ;;  %7408 = vmatmul.mubr.bf16.vlgmr.msra.gmra.mxu1 %v17632_v46 }
 0x7d2   :  { %7417 = vmatpush1.bf16.msra.mxu0 %v17161_v14  ;;  %7458 = vmatpush1.bf16.msra.mxu1 %v17163_v34  ;;  %v20097_v14 = vld [vmem:[#allocation83_spill] sm:$0xff]  ;;  %v20098_v34 = vld [vmem:[#allocation80_spill] sm:$0xff] }
 0x7d3   :  { %7448 = vmatprep.mubr.bf16.mxu0 %v6564_v4  ;;  %7489 = vmatprep.mubr.bf16.mxu1 %v6564_v4  ;;  %v12967_v4 = vcombine.high %v7615_v23, %v7619_v27 }
 0x7d4   :  { %7418 = vmatprep.subr.bf16.mxu0 %v17205_v32  ;;  %7459 = vmatprep.subr.bf16.mxu1 %v17207_v51  ;;  %v20100_v32 = vld [vmem:[#allocation84_spill] sm:$0xff]  ;;  %v20101_v51 = vld [vmem:[#allocation85_spill] sm:$0xff] }
 0x7d6   :  { %7419 = vmatpush1.bf16.msra.mxu0 %v17222_v22  ;;  %7460 = vmatpush1.bf16.msra.mxu1 %v17224_v60  ;;  %v20102_v22 = vld [vmem:[#allocation86_spill] sm:$0xff]  ;;  %v20103_v60 = vld [vmem:[#allocation87_spill] sm:$0xff] }
 0x7d7   :  { %7420 = vmatprep.subr.bf16.mxu0 %v17226_v54  ;;  %7461 = vmatprep.subr.bf16.mxu1 %v20094_v9  ;;  %v20104_v54 = vld [vmem:[#allocation88_spill] sm:$0xff] }
 0x7da   :  { %7421 = vmatpush1.bf16.msra.mxu0 %v20095_v20  ;;  %7462 = vmatpush1.bf16.msra.mxu1 %v20096_v48  ;;  %v12966_v20 = vcombine.low %v7615_v23, %v7619_v27  ;;  %v7606_v48 = vld [vmem:[%s19326_s2 + $0x140] sm:$0xff] }
 0x7db   :  { %7422 = vmatprep.subr.bf16.mxu0 %v20097_v14  ;;  %7463 = vmatprep.subr.bf16.mxu1 %v20098_v34  ;;  %v7610_v14 = vld [vmem:[%s19326_s2 + $0x160] sm:$0xff]  ;;  %v7607_v34 = vld [vmem:[%s19326_s2 + $0x148] sm:$0xff] }
 0x7dc   :  { %v7678_v27 = vld [vmem:[%s19326_s2 + $0x380] sm:$0xff] }
 0x7de   :  { %7423 = vmatpush1.bf16.msra.mxu0 %v20099_v43  ;;  %7464 = vmatpush1.bf16.msra.mxu1 %v20100_v32  ;;  %v12957_v43 = vcombine.high %v7606_v48, %v7610_v14  ;;  %v7611_v32 = vld [vmem:[%s19326_s2 + $0x168] sm:$0xff] }
 0x7df   :  { %7424 = vmatprep.subr.bf16.mxu0 %v20101_v51  ;;  %7465 = vmatprep.subr.bf16.mxu1 %v20102_v22  ;;  %v12956_v51 = vcombine.low %v7606_v48, %v7610_v14  ;;  %v12958_v22 = vcombine.low %v7607_v34, %v7611_v32  ;;  %v7683_v48 = vld [vmem:[%s19326_s2 + $0x3a8] sm:$0xff] }
 0x7e2   :  { %7425 = vmatpush1.bf16.msra.mxu0 %v20103_v60  ;;  %7466 = vmatpush1.bf16.msra.mxu1 %v20104_v54  ;;  %v12959_v60 = vcombine.high %v7607_v34, %v7611_v32  ;;  %v7598_v54 = vld [vmem:[%s19326_s2 + $0x100] sm:$0xff] }
 0x7e3   :  { %7426 = vmatprep.subr.bf16.mxu0 %v20105_v35  ;;  %7467 = vmatprep.subr.bf16.mxu1 %v20106_v36  ;;  %v7602_v35 = vld [vmem:[%s19326_s2 + $0x120] sm:$0xff]  ;;  %v7599_v36 = vld [vmem:[%s19326_s2 + $0x108] sm:$0xff] }
 0x7e4   :  { %v7670_v32 = vld [vmem:[%s19326_s2 + $0x340] sm:$0xff] }
 0x7e6   :  { %7427 = vmatpush1.bf16.msra.mxu0 %v20107_v12  ;;  %7468 = vmatpush1.bf16.msra.mxu1 %v20108_v37  ;;  %v12949_v12 = vcombine.high %v7598_v54, %v7602_v35  ;;  %v7603_v37 = vld [vmem:[%s19326_s2 + $0x128] sm:$0xff] }
 0x7e7   :  { %7428 = vmatprep.subr.bf16.mxu0 %v20109_v10  ;;  %7469 = vmatprep.subr.bf16.mxu1 %v20110_v53  ;;  %v12948_v10 = vcombine.low %v7598_v54, %v7602_v35  ;;  %v12950_v53 = vcombine.low %v7599_v36, %v7603_v37  ;;  %v7675_v54 = vld [vmem:[%s19326_s2 + $0x368] sm:$0xff] }
 0x7ea   :  { %7429 = vmatpush1.bf16.msra.mxu0 %v20111_v58  ;;  %7470 = vmatpush1.bf16.msra.mxu1 %v20112_v33  ;;  %v12951_v58 = vcombine.high %v7599_v36, %v7603_v37  ;;  %v7590_v33 = vld [vmem:[%s19326_s2 + $0xc0] sm:$0xff] }
 0x7eb   :  { %7430 = vmatprep.subr.bf16.mxu0 %v20113_v50  ;;  %7471 = vmatprep.subr.bf16.mxu1 %v20114_v16  ;;  %v7594_v50 = vld [vmem:[%s19326_s2 + $0xe0] sm:$0xff]  ;;  %v7591_v16 = vld [vmem:[%s19326_s2 + $0xc8] sm:$0xff] }
 0x7ec   :  { %v7662_v37 = vld [vmem:[%s19326_s2 + $0x300] sm:$0xff] }
 0x7ee   :  { %7431 = vmatpush1.bf16.msra.mxu0 %v20115_v63  ;;  %7472 = vmatpush1.bf16.msra.mxu1 %v20116_v24  ;;  %v12941_v63 = vcombine.high %v7590_v33, %v7594_v50  ;;  %v7595_v24 = vld [vmem:[%s19326_s2 + $0xe8] sm:$0xff] }
 0x7ef   :  { %7432 = vmatprep.subr.bf16.mxu0 %v20117_v25  ;;  %7473 = vmatprep.subr.bf16.mxu1 %v20118_v17  ;;  %v12940_v25 = vcombine.low %v7590_v33, %v7594_v50  ;;  %v12942_v17 = vcombine.low %v7591_v16, %v7595_v24  ;;  %v7667_v33 = vld [vmem:[%s19326_s2 + $0x328] sm:$0xff] }
 0x7f2   :  { %7433 = vmatpush2.bf16.msra.mxu0 %v20119_v39  ;;  %7474 = vmatpush2.bf16.msra.mxu1 %v20120_v42  ;;  %v12943_v39 = vcombine.high %v7591_v16, %v7595_v24  ;;  %v7582_v42 = vld [vmem:[%s19326_s2 + $0x80] sm:$0xff] }
 0x7f3   :  { %7434 = vmatprep.subr.bf16.mxu0 %v20121_v31  ;;  %7475 = vmatprep.subr.bf16.mxu1 %v20122_v47  ;;  %v7586_v31 = vld [vmem:[%s19326_s2 + $0xa0] sm:$0xff]  ;;  %v7583_v47 = vld [vmem:[%s19326_s2 + $0x88] sm:$0xff] }
 0x7f4   :  { %v7654_v24 = vld [vmem:[%s19326_s2 + $0x2c0] sm:$0xff] }
 0x7f6   :  { %7435 = vmatpush2.bf16.msra.mxu0 %v20123_v62  ;;  %7476 = vmatpush2.bf16.msra.mxu1 %v20124_v11  ;;  %v12933_v62 = vcombine.high %v7582_v42, %v7586_v31  ;;  %v7587_v11 = vld [vmem:[%s19326_s2 + $0xa8] sm:$0xff] }
 0x7f7   :  { %7436 = vmatprep.subr.bf16.mxu0 %v20125_v2  ;;  %7477 = vmatprep.subr.bf16.mxu1 %v20126_v19  ;;  %v12932_v2 = vcombine.low %v7582_v42, %v7586_v31  ;;  %v12934_v19 = vcombine.low %v7583_v47, %v7587_v11  ;;  %v7659_v31 = vld [vmem:[%s19326_s2 + $0x2e8] sm:$0xff] }
 0x7fa   :  { %7437 = vmatpush2.bf16.msra.mxu0 %v20127_v59  ;;  %7478 = vmatpush2.bf16.msra.mxu1 %v20128_v55  ;;  %v12935_v59 = vcombine.high %v7583_v47, %v7587_v11  ;;  %v7574_v55 = vld [vmem:[%s19326_s2 + $0x40] sm:$0xff] }
 0x7fb   :  { %7438 = vmatprep.subr.bf16.mxu0 %v20129_v26  ;;  %7479 = vmatprep.subr.bf16.mxu1 %v20130_v15  ;;  %v7578_v26 = vld [vmem:[%s19326_s2 + $0x60] sm:$0xff]  ;;  %v7575_v15 = vld [vmem:[%s19326_s2 + $0x48] sm:$0xff] }
 0x7fc   :  { %v7646_v47 = vld [vmem:[%s19326_s2 + $0x280] sm:$0xff] }
 0x7fe   :  { %7439 = vmatpush2.bf16.msra.mxu0 %v20131_v38  ;;  %7480 = vmatpush2.bf16.msra.mxu1 %v20132_v45  ;;  %v12925_v38 = vcombine.high %v7574_v55, %v7578_v26  ;;  %v7579_v45 = vld [vmem:[%s19326_s2 + $0x68] sm:$0xff] }
 0x7ff   :  { %7440 = vmatprep.subr.bf16.mxu0 %v20133_v61  ;;  %7481 = vmatprep.subr.bf16.mxu1 %v20134_v41  ;;  %v12924_v61 = vcombine.low %v7574_v55, %v7578_v26  ;;  %v12926_v41 = vcombine.low %v7575_v15, %v7579_v45  ;;  %v7651_v55 = vld [vmem:[%s19326_s2 + $0x2a8] sm:$0xff]  ;;  %v7638_v26 = vld [vmem:[%s19326_s2 + $0x240] sm:$0xff] }
 0x802   :  { %7441 = vmatpush2.bf16.msra.mxu0 %v20135_v28  ;;  %7482 = vmatpush2.bf16.msra.mxu1 %v20136_v7  ;;  %v12927_v28 = vcombine.high %v7575_v15, %v7579_v45  ;;  %v7566_v7 = vld [vmem:[%s19326_s2] sm:$0xff]  ;;  %v7639_v45 = vld [vmem:[%s19326_s2 + $0x248] sm:$0xff] }
 0x803   :  { %7442 = vmatprep.subr.bf16.mxu0 %v20137_v30  ;;  %7483 = vmatprep.subr.bf16.mxu1 %v20138_v40  ;;  %v7570_v30 = vld [vmem:[%s19326_s2 + $0x20] sm:$0xff]  ;;  %v7567_v40 = vld [vmem:[%s19326_s2 + $0x8] sm:$0xff] }
 0x806   :  { %7443 = vmatpush2.bf16.msra.mxu0 %v20139_v49  ;;  %7484 = vmatpush2.bf16.msra.mxu1 %v17512_v8  ;;  %v7614_v8 = vld [vmem:[%s19326_s2 + $0x180] sm:$0xff]  ;;  %v12917_v49 = vcombine.high %v7566_v7, %v7570_v30 }
 0x807   :  { %7444 = vmatprep.subr.bf16.mxu0 %v17516_v52  ;;  %7485 = vmatprep.subr.bf16.mxu1 %v17518_v6  ;;  %v7622_v52 = vld [vmem:[%s19326_s2 + $0x1c0] sm:$0xff] }
 0x808   :  { %v7626_v6 = vld [vmem:[%s19326_s2 + $0x1e0] sm:$0xff] }
 0x80a   :  { %7445 = vmatpush2.bf16.msra.mxu0 %v17534_v29  ;;  %7486 = vmatpush2.bf16.msra.mxu1 %v17536_v13  ;;  %v7618_v29 = vld [vmem:[%s19326_s2 + $0x1a0] sm:$0xff] }
 0x80b   :  { %7446 = vmatprep.subr.bf16.mxu0 %v17540_v18  ;;  %7487 = vmatprep.subr.bf16.mxu1 %v17542_v3  ;;  %v7623_v18 = vld [vmem:[%s19326_s2 + $0x1c8] sm:$0xff]  ;;  %v12972_v3 = vcombine.low %v7622_v52, %v7626_v6  ;;  %v12965_v44 = vcombine.high %v7614_v8, %v7618_v29  ;;  %v12964_v9 = vcombine.low %v7614_v8, %v7618_v29 }
 0x80c   :  { %v7687_v8 = vld [vmem:[%s19326_s2 + $0x3c8] sm:$0xff] }
 0x80e   :  { %7447 = vmatpush2.bf16.msra.mxu0 %v17546_v5  ;;  %7488 = vmatpush2.bf16.msra.mxu1 %v17548_v21  ;;  %v12973_v5 = vcombine.high %v7622_v52, %v7626_v6  ;;  %v7627_v21 = vld [vmem:[%s19326_s2 + $0x1e8] sm:$0xff]  ;;  %v12916_v6 = vcombine.low %v7566_v7, %v7570_v30 }
 0x80f   :  { %v12974_v13 = vcombine.low %v7623_v18, %v7627_v21  ;;  %v7571_v52 = vld [vmem:[%s19326_s2 + $0x28] sm:$0xff] }
 0x810   :  { %8334 = vmatprep.subr.bf16.mxu0 %v12973_v5  ;;  %v7686_v5 = vld [vmem:[%s19326_s2 + $0x3c0] sm:$0xff] }
 0x811   :  { %7449 = vmatmul.mubr.bf16.vlgmr.msra.gmra.mxu0 %v17632_v46  ;;  %7490 = vmatmul.mubr.bf16.vlgmr.msra.gmra.mxu1 %v17632_v46  ;;  %v12975_v46 = vcombine.high %v7623_v18, %v7627_v21  ;;  %v12918_v18 = vcombine.low %v7567_v40, %v7571_v52  ;;  %v7690_v21 = vld [vmem:[%s19326_s2 + $0x3e0] sm:$0xff] }
 0x812   :  { %8335 = vmatpush1.bf16.msra.mxu0 %v12972_v3  ;;  %v12919_v3 = vcombine.high %v7567_v40, %v7571_v52  ;;  %v13037_v29 = vcombine.high %v7686_v5, %v7690_v21  ;;  %v7630_v40 = vld [vmem:[%s19326_s2 + $0x200] sm:$0xff]  ;;  %v7631_v52 = vld [vmem:[%s19326_s2 + $0x208] sm:$0xff] }
 0x813   :  { %8375 = vmatprep.subr.bf16.mxu1 %v12975_v46  ;;  %8336 = vmatprep.subr.bf16.mxu0 %v12965_v44  ;;  %v13036_v46 = vcombine.low %v7686_v5, %v7690_v21 }
 0x814   :  { %8376 = vmatpush1.bf16.msra.mxu1 %v12974_v13  ;;  %v7691_v13 = vld [vmem:[%s19326_s2 + $0x3e8] sm:$0xff] }
 0x815   :  { %8377 = vmatprep.subr.bf16.mxu1 %v12967_v4  ;;  %v13038_v44 = vcombine.low %v7687_v8, %v7691_v13  ;;  %v13039_v23 = vcombine.high %v7687_v8, %v7691_v13  ;;  %v7682_v4 = vld [vmem:[%s19326_s2 + $0x3a0] sm:$0xff]  ;;  %v17904_v13 = vld [vmem:[%s19326_s2 + $0x1d0] sm:$0xff] }
 0x816   :  { %8337 = vmatpush1.bf16.msra.mxu0 %v12964_v9  ;;  %v7679_v9 = vld [vmem:[%s19326_s2 + $0x388] sm:$0xff]  ;;  %v13028_v14 = vcombine.low %v7678_v27, %v7682_v4 }
 0x817   :  { %8338 = vmatprep.subr.bf16.mxu0 %v12957_v43  ;;  %v13030_v34 = vcombine.low %v7679_v9, %v7683_v48  ;;  %v13031_v43 = vcombine.high %v7679_v9, %v7683_v48 }
 0x818   :  { %8378 = vmatpush1.bf16.msra.mxu1 %v12966_v20  ;;  %v13029_v20 = vcombine.high %v7678_v27, %v7682_v4  ;;  %v17921_v27 = vld [vmem:[%s19326_s2 + $0x1f8] sm:$0xff] }
 0x819   :  { %8379 = vmatprep.subr.bf16.mxu1 %v12959_v60 }
 0x81a   :  { %8339 = vmatpush1.bf16.msra.mxu0 %v12956_v51  ;;  %v7674_v51 = vld [vmem:[%s19326_s2 + $0x360] sm:$0xff] }
 0x81b   :  { %8340 = vmatprep.subr.bf16.mxu0 %v12949_v12  ;;  %v13021_v60 = vcombine.high %v7670_v32, %v7674_v51  ;;  %v13020_v35 = vcombine.low %v7670_v32, %v7674_v51 }
 0x81c   :  { %8380 = vmatpush1.bf16.msra.mxu1 %v12958_v22  ;;  %v7671_v22 = vld [vmem:[%s19326_s2 + $0x348] sm:$0xff] }
 0x81d   :  { %8381 = vmatprep.subr.bf16.mxu1 %v12951_v58  ;;  %v13022_v36 = vcombine.low %v7671_v22, %v7675_v54  ;;  %v13023_v12 = vcombine.high %v7671_v22, %v7675_v54 }
 0x81e   :  { %8341 = vmatpush1.bf16.msra.mxu0 %v12948_v10  ;;  %v7666_v10 = vld [vmem:[%s19326_s2 + $0x320] sm:$0xff] }
 0x81f   :  { %8342 = vmatprep.subr.bf16.mxu0 %v12941_v63  ;;  %v13013_v58 = vcombine.high %v7662_v37, %v7666_v10  ;;  %v13012_v50 = vcombine.low %v7662_v37, %v7666_v10 }
 0x820   :  { %8382 = vmatpush1.bf16.msra.mxu1 %v12950_v53  ;;  %v7663_v53 = vld [vmem:[%s19326_s2 + $0x308] sm:$0xff] }
 0x821   :  { %8383 = vmatprep.subr.bf16.mxu1 %v12943_v39  ;;  %v13014_v16 = vcombine.low %v7663_v53, %v7667_v33  ;;  %v13015_v63 = vcombine.high %v7663_v53, %v7667_v33  ;;  %v20142_v53 = vld [vmem:[#allocation31_spill] sm:$0xff]  ;;  %v20143_v33 = vld [vmem:[#allocation29_spill] sm:$0xff] }
 0x822   :  { %8343 = vmatpush1.bf16.msra.mxu0 %v12940_v25  ;;  %v7658_v25 = vld [vmem:[%s19326_s2 + $0x2e0] sm:$0xff] }
 0x823   :  { %8344 = vmatprep.subr.bf16.mxu0 %v12933_v62  ;;  %v13004_v39 = vcombine.low %v7654_v24, %v7658_v25  ;;  %v13005_v42 = vcombine.high %v7654_v24, %v7658_v25  ;;  %v7650_v62 = vld [vmem:[%s19326_s2 + $0x2a0] sm:$0xff] }
 0x824   :  { %8384 = vmatpush1.bf16.msra.mxu1 %v12942_v17  ;;  %v7655_v17 = vld [vmem:[%s19326_s2 + $0x2c8] sm:$0xff] }
 0x825   :  { %8385 = vmatprep.subr.bf16.mxu1 %v12935_v59  ;;  %v13006_v11 = vcombine.low %v7655_v17, %v7659_v31  ;;  %v7647_v59 = vld [vmem:[%s19326_s2 + $0x288] sm:$0xff] }
 0x826   :  { %8345 = vmatpush1.bf16.msra.mxu0 %v12932_v2  ;;  %v13007_v2 = vcombine.high %v7655_v17, %v7659_v31  ;;  %v12999_v15 = vcombine.high %v7647_v59, %v7651_v55 }
 0x827   :  { %8346 = vmatprep.subr.bf16.mxu0 %v12925_v38  ;;  %v7642_v38 = vld [vmem:[%s19326_s2 + $0x260] sm:$0xff] }
 0x828   :  { %8386 = vmatpush1.bf16.msra.mxu1 %v12934_v19  ;;  %v12997_v19 = vcombine.high %v7646_v47, %v7650_v62  ;;  %v12989_v7 = vcombine.high %v7638_v26, %v7642_v38 }
 0x829   :  { %8387 = vmatprep.subr.bf16.mxu1 %v12927_v28  ;;  %v12998_v28 = vcombine.low %v7647_v59, %v7651_v55 }
 0x82a   :  { %8347 = vmatpush1.bf16.msra.mxu0 %v12924_v61  ;;  %v7643_v61 = vld [vmem:[%s19326_s2 + $0x268] sm:$0xff] }
 0x82b   :  { %8348 = vmatprep.subr.bf16.mxu0 %v12917_v49  ;;  %v12991_v30 = vcombine.high %v7639_v45, %v7643_v61  ;;  %v7634_v49 = vld [vmem:[%s19326_s2 + $0x220] sm:$0xff] }
 0x82c   :  { %8388 = vmatpush1.bf16.msra.mxu1 %v12926_v41  ;;  %v12996_v41 = vcombine.low %v7646_v47, %v7650_v62  ;;  %v12981_v5 = vcombine.high %v7630_v40, %v7634_v49  ;;  %v12980_v8 = vcombine.low %v7630_v40, %v7634_v49 }
 0x82d   :  { %8389 = vmatprep.subr.bf16.mxu1 %v12919_v3  ;;  %v12990_v3 = vcombine.low %v7639_v45, %v7643_v61  ;;  %v20144_v61 = vld [vmem:[#allocation35_spill] sm:$0xff] }
 0x82e   :  { %8349 = vmatpush1.bf16.msra.mxu0 %v12916_v6  ;;  %v7635_v6 = vld [vmem:[%s19326_s2 + $0x228] sm:$0xff] }
 0x82f   :  { %8350 = vmatprep.subr.bf16.mxu0 %v13037_v29  ;;  %v12983_v21 = vcombine.high %v7631_v52, %v7635_v6  ;;  %v12982_v29 = vcombine.low %v7631_v52, %v7635_v6 }
 0x830   :  { %8390 = vmatpush1.bf16.msra.mxu1 %v12918_v18  ;;  %v12988_v18 = vcombine.low %v7638_v26, %v7642_v38 }
 0x831   :  { %8391 = vmatprep.subr.bf16.mxu1 %v13039_v23 }
 0x832   :  { %8351 = vmatpush2.bf16.msra.mxu0 %v13036_v46  ;;  %v17909_v46 = vld [vmem:[%s19326_s2 + $0x1f0] sm:$0xff] }
 0x833   :  { %8352 = vmatprep.subr.bf16.mxu0 %v13029_v20  ;;  %v12977_v23 = vcombine.high %v17904_v13, %v17909_v46  ;;  %v12976_v4 = vcombine.low %v17904_v13, %v17909_v46  ;;  %v7604_v13 = vld [vmem:[%s19326_s2 + $0x130] sm:$0xff]  ;;  %v7601_v46 = vld [vmem:[%s19326_s2 + $0x118] sm:$0xff] }
 0x834   :  { %8392 = vmatpush2.bf16.msra.mxu1 %v13038_v44  ;;  %v17914_v44 = vld [vmem:[%s19326_s2 + $0x1d8] sm:$0xff] }
 0x835   :  { %8393 = vmatprep.subr.bf16.mxu1 %v13031_v43  ;;  %v12978_v9 = vcombine.low %v17914_v44, %v17921_v27  ;;  %v12979_v20 = vcombine.high %v17914_v44, %v17921_v27  ;;  %v7605_v44 = vld [vmem:[%s19326_s2 + $0x138] sm:$0xff] }
 0x836   :  { %8353 = vmatpush2.bf16.msra.mxu0 %v13028_v14 }
 0x837   :  { %8354 = vmatprep.subr.bf16.mxu0 %v13021_v60  ;;  %v20141_v60 = vld [vmem:[#allocation30_spill] sm:$0xff] }
 0x838   :  { %8394 = vmatpush2.bf16.msra.mxu1 %v13030_v34  ;;  %v20140_v34 = vld [vmem:[#allocation28_spill] sm:$0xff] }
 0x839   :  { %8395 = vmatprep.subr.bf16.mxu1 %v13023_v12 }
 0x83a   :  { %8355 = vmatpush2.bf16.msra.mxu0 %v13020_v35 }
 0x83b   :  { %8356 = vmatprep.subr.bf16.mxu0 %v13013_v58 }
 0x83c   :  { %8396 = vmatpush2.bf16.msra.mxu1 %v13022_v36 }
 0x83d   :  { %8397 = vmatprep.subr.bf16.mxu1 %v13015_v63 }
 0x83e   :  { %8357 = vmatpush2.bf16.msra.mxu0 %v13012_v50 }
 0x83f   :  { %8358 = vmatprep.subr.bf16.mxu0 %v13005_v42 }
 0x840   :  { %8398 = vmatpush2.bf16.msra.mxu1 %v13014_v16 }
 0x841   :  { %8399 = vmatprep.subr.bf16.mxu1 %v13007_v2 }
 0x842   :  { %8359 = vmatpush2.bf16.msra.mxu0 %v13004_v39 }
 0x843   :  { %8360 = vmatprep.subr.bf16.mxu0 %v12997_v19 }
 0x844   :  { %8400 = vmatpush2.bf16.msra.mxu1 %v13006_v11 }
 0x845   :  { %8401 = vmatprep.subr.bf16.mxu1 %v12999_v15 }
 0x846   :  { %8361 = vmatpush2.bf16.msra.mxu0 %v12996_v41  ;;  %v20145_v41 = vld [vmem:[#allocation43_spill] sm:$0xff] }
 0x847   :  { %8362 = vmatprep.subr.bf16.mxu0 %v12989_v7  ;;  %v20146_v7 = vld [vmem:[#allocation42_spill] sm:$0xff] }
 0x848   :  { %8402 = vmatpush2.bf16.msra.mxu1 %v12998_v28  ;;  %v348_v28 = vadd.f32 %v20145_v41, %v20144_v61  ;;  %v7596_v61 = vld [vmem:[%s19326_s2 + $0xf0] sm:$0xff]  ;;  %v7593_v41 = vld [vmem:[%s19326_s2 + $0xd8] sm:$0xff] }
 0x849   :  { %8403 = vmatprep.subr.bf16.mxu1 %v12991_v30 }
 0x84a   :  { %8363 = vmatpush2.bf16.msra.mxu0 %v12988_v18 }
 0x84b   :  { %8364 = vmatprep.subr.bf16.mxu0 %v12981_v5 }
 0x84c   :  { %8404 = vmatpush2.bf16.msra.mxu1 %v12990_v3 }
 0x84d   :  { %8405 = vmatprep.subr.bf16.mxu1 %v12983_v21 }
 0x84e   :  { %8365 = vmatpush2.bf16.msra.mxu0 %v12980_v8  ;;  %v20147_v8 = vld [vmem:[#allocation37_spill] sm:$0xff] }
 0x84f   :  { %8416 = vmatprep.subr.bf16.mxu0 %v12977_v23 }
 0x850   :  { %8406 = vmatpush2.bf16.msra.mxu1 %v12982_v29  ;;  %v20148_v29 = vld [vmem:[#allocation45_spill] sm:$0xff] }
 0x851   :  { %8457 = vmatprep.subr.bf16.mxu1 %v12979_v20  ;;  %v421_v23 = vadd.f32 %v20148_v29, %v20147_v8  ;;  %v7576_v29 = vld [vmem:[%s19326_s2 + $0x50] sm:$0xff] }
 0x891   :  { %v7368_v48 = vpop.f32.mrf.mxu0  ;;  %v7409_v14 = vpop.f32.mrf.mxu1 }
 0x892   :  { %v7502_v43 = vadd.f32 %v7368_v48, %v20140_v34  ;;  %v7504_v50 = vadd.f32 %v7409_v14, %v20143_v33  ;;  %v20149_v48 = vld [vmem:[#allocation44_spill] sm:$0xff] }
 0x893   :  { %v7370_v32 = vpop.f32.mrf.mxu0  ;;  %v7411_v51 = vpop.f32.mrf.mxu1 }
 0x894   :  { %v12910_v22 = vmul.f32 -1.442695, %v7502_v43  ;;  %v7503_v54 = vadd.f32 %v7370_v32, %v20141_v60  ;;  %v7505_v58 = vadd.f32 %v7411_v51, %v20142_v53 }
 0x895   :  { %v7372_v35 = vpop.f32.mrf.mxu0  ;;  %v7413_v36 = vpop.f32.mrf.mxu1 }
 0x896   :  { %13875 = vpow2.f32 %v12910_v22  ;;  %v12911_v12 = vmul.f32 -1.442695, %v7503_v54  ;;  %v12912_v16 = vmul.f32 -1.442695, %v7505_v58 }
 0x897   :  { %v7373_v37 = vpop.f32.mrf.mxu0  ;;  %v7414_v10 = vpop.f32.mrf.mxu1 }
 0x898   :  { %13877 = vpow2.f32 %v12911_v12 }
 0x899   :  { %13879 = vtanh.f32 %v7504_v50 }
 0x89a   :  { %13881 = vpow2.f32 %v12912_v16  ;;  %v7616_v16 = vld [vmem:[%s19326_s2 + $0x190] sm:$0xff] }
 0x8a3   :  { %v13876_v63 = vpop.eup %13875 }
 0x8a4   :  { %v7517_v24 = vadd.f32 1.0, %v13876_v63  ;;  %v7620_v63 = vld [vmem:[%s19326_s2 + $0x1b0] sm:$0xff] }
 0x8a5   :  { %v13878_v25 = vpop.eup %13877 }
 0x8a6   :  { %13883 = vrcp.f32 %v7517_v24  ;;  %v7523_v17 = vadd.f32 1.0, %v13878_v25  ;;  %v13880_v39 = vpop.eup %13879  ;;  %v7621_v24 = vld [vmem:[%s19326_s2 + $0x1b8] sm:$0xff] }
 0x8a7   :  { %v13882_v42 = vpop.eup %13881 }
 0x8a8   :  { %13885 = vrcp.f32 %v7523_v17  ;;  %v7530_v11 = vadd.f32 1.0, %v13882_v42  ;;  %v7608_v17 = vld [vmem:[%s19326_s2 + $0x150] sm:$0xff] }
 0x8aa   :  { %13887 = vrcp.f32 %v7530_v11  ;;  %v12968_v11 = vcombine.low %v7616_v16, %v7620_v63 }
 0x8b3   :  { %v13884_v31 = vpop.eup %13883 }
 0x8b4   :  { %v7534_v47 = vmul.f32 %v13884_v31, %v13880_v39  ;;  %v12969_v39 = vcombine.high %v7616_v16, %v7620_v63  ;;  %v7612_v31 = vld [vmem:[%s19326_s2 + $0x170] sm:$0xff] }
 0x8b5   :  { %v13886_v62 = vpop.eup %13885  ;;  %v12960_v27 = vcombine.low %v7608_v17, %v7612_v31 }
 0x8b6   :  { %v7533_v2 = vmul.f32 %v13886_v62, %v17629_v1  ;;  %v7613_v62 = vld [vmem:[%s19326_s2 + $0x178] sm:$0xff] }
 0x8b7   :  { %v13888_v59 = vpop.eup %13887 }
 0x8b8   :  { %v17934_v19 = vadd.f32 %v7534_v47, %v7533_v2  ;;  %v7609_v47 = vld [vmem:[%s19326_s2 + $0x158] sm:$0xff] }
 0x8ba   :  { %13889 = vtanh.f32 %v17934_v19 }
 0x8c7   :  { %v13890_v55 = vpop.eup %13889 }
 0x8c8   :  { %v7537_v26 = vmul.f32 %v13890_v55, %v13888_v59  ;;  %v12961_v59 = vcombine.high %v7608_v17, %v7612_v31  ;;  %v12963_v55 = vcombine.high %v7609_v47, %v7613_v62  ;;  %v7684_v17 = vld [vmem:[%s19326_s2 + $0x3b0] sm:$0xff] }
 0x8ca   :  { %v17937_v15 = vpack.c.bf16 %v7537_v26, %v7537_v26  ;;  %v7600_v26 = vld [vmem:[%s19326_s2 + $0x110] sm:$0xff] }
 0x8cc   :  { %7563 = vst [vmem:[#allocation3 + $0x30] sm:$0xf] %v17937_v15 }
 0x8d1   :  { %v7450_v38 = vpop.f32.mrf.mxu0  ;;  %v7491_v45 = vpop.f32.mrf.mxu1 }
 0x8d2   :  { %v7510_v30 = vadd.f32 %v7450_v38, %v20146_v7  ;;  %v7512_v14 = vadd.f32 %v7491_v45, %v20149_v48  ;;  %v12955_v38 = vcombine.high %v7601_v46, %v7605_v44  ;;  %v7592_v45 = vld [vmem:[%s19326_s2 + $0xd0] sm:$0xff]  ;;  %v12952_v7 = vcombine.low %v7600_v26, %v7604_v13  ;;  %v7581_v48 = vld [vmem:[%s19326_s2 + $0x78] sm:$0xff] }
 0x8d3   :  { %v7452_v1 = vpop.f32.mrf.mxu0  ;;  %v7493_v40 = vpop.f32.mrf.mxu1 }
 0x8d4   :  { %v12913_v49 = vmul.f32 -1.442695, %v7510_v30  ;;  %v7511_v52 = vadd.f32 %v7452_v1, %v348_v28  ;;  %v7513_v20 = vadd.f32 %v7493_v40, %v421_v23  ;;  %v7597_v28 = vld [vmem:[%s19326_s2 + $0xf8] sm:$0xff]  ;;  %v12954_v30 = vcombine.low %v7601_v46, %v7605_v44  ;;  %v7580_v23 = vld [vmem:[%s19326_s2 + $0x70] sm:$0xff] }
 0x8d5   :  { %v7454_v6 = vpop.f32.mrf.mxu0  ;;  %v7495_v18 = vpop.f32.mrf.mxu1  ;;  %v12945_v1 = vcombine.high %v7592_v45, %v7596_v61  ;;  %v12947_v40 = vcombine.high %v7593_v41, %v7597_v28 }
 0x8d6   :  { %13891 = vpow2.f32 %v12913_v49  ;;  %v12914_v3 = vmul.f32 -1.442695, %v7511_v52  ;;  %v12915_v34 = vmul.f32 -1.442695, %v7513_v20  ;;  %v7584_v49 = vld [vmem:[%s19326_s2 + $0x90] sm:$0xff]  ;;  %v7585_v6 = vld [vmem:[%s19326_s2 + $0x98] sm:$0xff] }
 0x8d7   :  { %v7455_v5 = vpop.f32.mrf.mxu0  ;;  %v7496_v21 = vpop.f32.mrf.mxu1  ;;  %v7588_v52 = vld [vmem:[%s19326_s2 + $0xb0] sm:$0xff]  ;;  %v7589_v18 = vld [vmem:[%s19326_s2 + $0xb8] sm:$0xff] }
 0x8d8   :  { %13893 = vpow2.f32 %v12914_v3  ;;  %v12944_v3 = vcombine.low %v7592_v45, %v7596_v61  ;;  %v12946_v5 = vcombine.low %v7593_v41, %v7597_v28  ;;  %v12937_v21 = vcombine.high %v7584_v49, %v7588_v52  ;;  %v7577_v20 = vld [vmem:[%s19326_s2 + $0x58] sm:$0xff] }
 0x8d9   :  { %13895 = vtanh.f32 %v7512_v14  ;;  %v12939_v8 = vcombine.high %v7585_v6, %v7589_v18  ;;  %v12936_v14 = vcombine.low %v7584_v49, %v7588_v52  ;;  %v7669_v45 = vld [vmem:[%s19326_s2 + $0x338] sm:$0xff] }
 0x8da   :  { %13897 = vpow2.f32 %v12915_v34  ;;  %v12938_v34 = vcombine.low %v7585_v6, %v7589_v18  ;;  %v7661_v49 = vld [vmem:[%s19326_s2 + $0x2f8] sm:$0xff] }
 0x8e3   :  { %v13892_v43 = vpop.eup %13891 }
 0x8e4   :  { %v7541_v32 = vadd.f32 1.0, %v13892_v43  ;;  %v12929_v43 = vcombine.high %v7576_v29, %v7580_v23 }
 0x8e5   :  { %v13894_v51 = vpop.eup %13893 }
 0x8e6   :  { %13899 = vrcp.f32 %v7541_v32  ;;  %v7547_v22 = vadd.f32 1.0, %v13894_v51  ;;  %v13896_v60 = vpop.eup %13895  ;;  %v12931_v32 = vcombine.high %v7577_v20, %v7581_v48  ;;  %v7568_v51 = vld [vmem:[%s19326_s2 + $0x10] sm:$0xff] }
 0x8e7   :  { %v13898_v54 = vpop.eup %13897 }
 0x8e8   :  { %13901 = vrcp.f32 %v7547_v22  ;;  %v7554_v37 = vadd.f32 1.0, %v13898_v54  ;;  %v7572_v22 = vld [vmem:[%s19326_s2 + $0x30] sm:$0xff]  ;;  %v7573_v54 = vld [vmem:[%s19326_s2 + $0x38] sm:$0xff] }
 0x8e9   :  { %v12920_v16 = vcombine.low %v7568_v51, %v7572_v22 }
 0x8ea   :  { %13903 = vrcp.f32 %v7554_v37 }
 0x8f3   :  { %v13900_v35 = vpop.eup %13899 }
 0x8f4   :  { %v7558_v36 = vmul.f32 %v13900_v35, %v13896_v60  ;;  %v7569_v60 = vld [vmem:[%s19326_s2 + $0x18] sm:$0xff]  ;;  %v12928_v35 = vcombine.low %v7576_v29, %v7580_v23 }
 0x8f5   :  { %v13902_v12 = vpop.eup %13901  ;;  %v12923_v37 = vcombine.high %v7569_v60, %v7573_v54  ;;  %v12922_v63 = vcombine.low %v7569_v60, %v7573_v54  ;;  %v7653_v29 = vld [vmem:[%s19326_s2 + $0x2b8] sm:$0xff] }
 0x8f6   :  { %v7557_v10 = vmul.f32 %v13902_v12, %v17640_v56  ;;  %v7617_v56 = vld [vmem:[%s19326_s2 + $0x198] sm:$0xff]  ;;  %v12921_v12 = vcombine.high %v7568_v51, %v7572_v22 }
 0x8f7   :  { %v13904_v58 = vpop.eup %13903  ;;  %v12971_v42 = vcombine.high %v7617_v56, %v7621_v24  ;;  %v12970_v2 = vcombine.low %v7617_v56, %v7621_v24  ;;  %v7645_v51 = vld [vmem:[%s19326_s2 + $0x278] sm:$0xff] }
 0x8f8   :  { %v17947_v53 = vadd.f32 %v7558_v36, %v7557_v10  ;;  %v12930_v36 = vcombine.low %v7577_v20, %v7581_v48  ;;  %v7688_v10 = vld [vmem:[%s19326_s2 + $0x3d0] sm:$0xff] }
 0x8fa   :  { %13905 = vtanh.f32 %v17947_v53 }
 0x907   :  { %v13906_v33 = vpop.eup %13905 }
 0x908   :  { %v7561_v50 = vmul.f32 %v13906_v33, %v13904_v58  ;;  %v7692_v58 = vld [vmem:[%s19326_s2 + $0x3f0] sm:$0xff]  ;;  %v7689_v33 = vld [vmem:[%s19326_s2 + $0x3d8] sm:$0xff] }
 0x909   :  { %v13041_v56 = vcombine.high %v7688_v10, %v7692_v58  ;;  %v13040_v31 = vcombine.low %v7688_v10, %v7692_v58  ;;  %v7637_v10 = vld [vmem:[%s19326_s2 + $0x238] sm:$0xff] }
 0x90a   :  { %v7564_v25 = vpack.c.bf16 %v7561_v50, %v7561_v50  ;;  %v7693_v50 = vld [vmem:[%s19326_s2 + $0x3f8] sm:$0xff] }
 0x90b   :  { %v13043_v24 = vcombine.high %v7689_v33, %v7693_v50 }
 0x90c   :  { %7565 = vst [vmem:[#allocation3 + $0xc] sm:$0xf] %v7564_v25  ;;  %8366 = vmatprep.mubr.bf16.mxu0 %v7564_v25  ;;  %8407 = vmatprep.mubr.bf16.mxu1 %v7564_v25 }
 0x90d   :  { %8367 = vmatmul.mubr.bf16.vlgmr.msra.gmra.mxu0 %v17937_v15  ;;  %8408 = vmatmul.mubr.bf16.vlgmr.msra.gmra.mxu1 %v17937_v15 }
 0x90e   :  { %8417 = vmatpush1.bf16.msra.mxu0 %v12976_v4  ;;  %8458 = vmatpush1.bf16.msra.mxu1 %v12978_v9  ;;  %v12962_v4 = vcombine.low %v7609_v47, %v7613_v62  ;;  %v12953_v9 = vcombine.high %v7600_v26, %v7604_v13  ;;  %v13042_v47 = vcombine.low %v7689_v33, %v7693_v50  ;;  %v7677_v26 = vld [vmem:[%s19326_s2 + $0x378] sm:$0xff] }
 0x90f   :  { %8448 = vmatprep.mubr.bf16.mxu0 %v7564_v25  ;;  %8489 = vmatprep.mubr.bf16.mxu1 %v7564_v25  ;;  %v7680_v25 = vld [vmem:[%s19326_s2 + $0x390] sm:$0xff] }
 0x910   :  { %8418 = vmatprep.subr.bf16.mxu0 %v12969_v39  ;;  %8459 = vmatprep.subr.bf16.mxu1 %v12971_v42  ;;  %v7681_v39 = vld [vmem:[%s19326_s2 + $0x398] sm:$0xff]  ;;  %v13033_v62 = vcombine.high %v7680_v25, %v7684_v17  ;;  %v13032_v13 = vcombine.low %v7680_v25, %v7684_v17  ;;  %v13431_v25 = vld [vmem:[%s19328_s4 + $0xe0] ss:$16 sps:$4 sm:$0xff]  }
 0x911   :  { %v7685_v42 = vld [vmem:[%s19326_s2 + $0x3b8] sm:$0xff] }
 0x912   :  { %8419 = vmatpush1.bf16.msra.mxu0 %v12968_v11  ;;  %8460 = vmatpush1.bf16.msra.mxu1 %v12970_v2  ;;  %v13035_v11 = vcombine.high %v7681_v39, %v7685_v42  ;;  %v7672_v2 = vld [vmem:[%s19326_s2 + $0x350] sm:$0xff]  ;;  %v13034_v46 = vcombine.low %v7681_v39, %v7685_v42  ;;  %v13434_v17 = vld [vmem:[%s19328_s4 + $0xe8] ss:$16 sps:$4 sm:$0xff]   ;;  %v13436_v39 = vld [vmem:[%s19328_s4 + $0xec] ss:$16 sps:$4 sm:$0xff]  }
 0x913   :  { %8420 = vmatprep.subr.bf16.mxu0 %v12961_v59  ;;  %8461 = vmatprep.subr.bf16.mxu1 %v12963_v55  ;;  %v7676_v59 = vld [vmem:[%s19326_s2 + $0x370] sm:$0xff]  ;;  %v7673_v55 = vld [vmem:[%s19326_s2 + $0x358] sm:$0xff] }
 0x914   :  { %v13025_v44 = vcombine.high %v7672_v2, %v7676_v59  ;;  %v13024_v61 = vcombine.low %v7672_v2, %v7676_v59  ;;  %v13026_v41 = vcombine.low %v7673_v55, %v7677_v26  ;;  %v13442_v42 = vld [vmem:[%s19328_s4 + $0xcc] ss:$16 sps:$4 sm:$0xff]   ;;  %v13443_v2 = vld [vmem:[%s19328_s4 + $0xa0] ss:$16 sps:$4 sm:$0xff]   ;;  %v13446_v59 = vld [vmem:[%s19328_s4 + $0xa8] ss:$16 sps:$4 sm:$0xff]  }
 0x916   :  { %8421 = vmatpush1.bf16.msra.mxu0 %v12960_v27  ;;  %8462 = vmatpush1.bf16.msra.mxu1 %v12962_v4  ;;  %v13027_v27 = vcombine.high %v7673_v55, %v7677_v26  ;;  %v7664_v4 = vld [vmem:[%s19326_s2 + $0x310] sm:$0xff]  ;;  %v13454_v26 = vld [vmem:[%s19328_s4 + $0x8c] ss:$16 sps:$4 sm:$0xff]  }
 0x917   :  { %8422 = vmatprep.subr.bf16.mxu0 %v12953_v9  ;;  %8463 = vmatprep.subr.bf16.mxu1 %v12955_v38  ;;  %v7668_v9 = vld [vmem:[%s19326_s2 + $0x330] sm:$0xff]  ;;  %v7665_v38 = vld [vmem:[%s19326_s2 + $0x318] sm:$0xff] }
 0x918   :  { %v13017_v28 = vcombine.high %v7664_v4, %v7668_v9  ;;  %v13016_v52 = vcombine.low %v7664_v4, %v7668_v9  ;;  %v13018_v6 = vcombine.low %v7665_v38, %v7669_v45  ;;  %v13451_v55 = vld [vmem:[%s19328_s4 + $0x84] ss:$16 sps:$4 sm:$0xff]   ;;  %v13455_v4 = vld [vmem:[%s19328_s4 + $0x60] ss:$16 sps:$4 sm:$0xff]   ;;  %v13458_v9 = vld [vmem:[%s19328_s4 + $0x68] ss:$16 sps:$4 sm:$0xff]  }
 0x91a   :  { %8423 = vmatpush1.bf16.msra.mxu0 %v12952_v7  ;;  %8464 = vmatpush1.bf16.msra.mxu1 %v12954_v30  ;;  %v13019_v7 = vcombine.high %v7665_v38, %v7669_v45  ;;  %v7656_v30 = vld [vmem:[%s19326_s2 + $0x2d0] sm:$0xff]  ;;  %v13466_v45 = vld [vmem:[%s19328_s4 + $0x4c] ss:$16 sps:$4 sm:$0xff]  }
 0x91b   :  { %8424 = vmatprep.subr.bf16.mxu0 %v12945_v1  ;;  %8465 = vmatprep.subr.bf16.mxu1 %v12947_v40  ;;  %v7660_v1 = vld [vmem:[%s19326_s2 + $0x2f0] sm:$0xff]  ;;  %v7657_v40 = vld [vmem:[%s19326_s2 + $0x2d8] sm:$0xff] }
 0x91c   :  { %v13009_v18 = vcombine.high %v7656_v30, %v7660_v1  ;;  %v13008_v23 = vcombine.low %v7656_v30, %v7660_v1  ;;  %v13010_v20 = vcombine.low %v7657_v40, %v7661_v49  ;;  %v13463_v38 = vld [vmem:[%s19328_s4 + $0x44] ss:$16 sps:$4 sm:$0xff]   ;;  %v13467_v30 = vld [vmem:[%s19328_s4 + $0x20] ss:$16 sps:$4 sm:$0xff]   ;;  %v13470_v1 = vld [vmem:[%s19328_s4 + $0x28] ss:$16 sps:$4 sm:$0xff]  }
 0x91e   :  { %8425 = vmatpush1.bf16.msra.mxu0 %v12944_v3  ;;  %8466 = vmatpush1.bf16.msra.mxu1 %v12946_v5  ;;  %v13011_v3 = vcombine.high %v7657_v40, %v7661_v49  ;;  %v7648_v5 = vld [vmem:[%s19326_s2 + $0x290] sm:$0xff]  ;;  %v13478_v49 = vld [vmem:[%s19328_s4 + $0xc] ss:$16 sps:$4 sm:$0xff]  }
 0x91f   :  { %8426 = vmatprep.subr.bf16.mxu0 %v12937_v21  ;;  %8467 = vmatprep.subr.bf16.mxu1 %v12939_v8  ;;  %v7652_v21 = vld [vmem:[%s19326_s2 + $0x2b0] sm:$0xff]  ;;  %v7649_v8 = vld [vmem:[%s19326_s2 + $0x298] sm:$0xff] }
 0x920   :  { %v13001_v48 = vcombine.high %v7648_v5, %v7652_v21  ;;  %v13000_v22 = vcombine.low %v7648_v5, %v7652_v21  ;;  %v13002_v60 = vcombine.low %v7649_v8, %v7653_v29  ;;  %v13475_v40 = vld [vmem:[%s19328_s4 + $0x4] ss:$16 sps:$4 sm:$0xff]   ;;  %v13479_v5 = vld [vmem:[%s19328_s4 + $0x1e0] ss:$16 sps:$4 sm:$0xff]   ;;  %v13482_v21 = vld [vmem:[%s19328_s4 + $0x1e8] ss:$16 sps:$4 sm:$0xff]  }
 0x922   :  { %8427 = vmatpush1.bf16.msra.mxu0 %v12936_v14  ;;  %8468 = vmatpush1.bf16.msra.mxu1 %v12938_v34  ;;  %v13003_v14 = vcombine.high %v7649_v8, %v7653_v29  ;;  %v7640_v34 = vld [vmem:[%s19326_s2 + $0x250] sm:$0xff]  ;;  %v13490_v29 = vld [vmem:[%s19328_s4 + $0x1cc] ss:$16 sps:$4 sm:$0xff]  }
 0x923   :  { %8428 = vmatprep.subr.bf16.mxu0 %v12929_v43  ;;  %8469 = vmatprep.subr.bf16.mxu1 %v12931_v32  ;;  %v7644_v43 = vld [vmem:[%s19326_s2 + $0x270] sm:$0xff]  ;;  %v7641_v32 = vld [vmem:[%s19326_s2 + $0x258] sm:$0xff] }
 0x924   :  { %v12993_v54 = vcombine.high %v7640_v34, %v7644_v43  ;;  %v12992_v58 = vcombine.low %v7640_v34, %v7644_v43  ;;  %v12994_v33 = vcombine.low %v7641_v32, %v7645_v51  ;;  %v13487_v8 = vld [vmem:[%s19328_s4 + $0x1c4] ss:$16 sps:$4 sm:$0xff]   ;;  %v13491_v34 = vld [vmem:[%s19328_s4 + $0x1a0] ss:$16 sps:$4 sm:$0xff]   ;;  %v13494_v43 = vld [vmem:[%s19328_s4 + $0x1a8] ss:$16 sps:$4 sm:$0xff]  }
 0x926   :  { %8429 = vmatpush1.bf16.msra.mxu0 %v12928_v35  ;;  %8470 = vmatpush1.bf16.msra.mxu1 %v12930_v36  ;;  %v12995_v35 = vcombine.high %v7641_v32, %v7645_v51  ;;  %v7632_v36 = vld [vmem:[%s19326_s2 + $0x210] sm:$0xff]  ;;  %v13502_v51 = vld [vmem:[%s19328_s4 + $0x18c] ss:$16 sps:$4 sm:$0xff]  }
 0x927   :  { %8430 = vmatprep.subr.bf16.mxu0 %v12921_v12  ;;  %8471 = vmatprep.subr.bf16.mxu1 %v12923_v37  ;;  %v7636_v12 = vld [vmem:[%s19326_s2 + $0x230] sm:$0xff]  ;;  %v7633_v37 = vld [vmem:[%s19326_s2 + $0x218] sm:$0xff] }
 0x928   :  { %v12985_v50 = vcombine.high %v7632_v36, %v7636_v12  ;;  %v13499_v32 = vld [vmem:[%s19328_s4 + $0x184] ss:$16 sps:$4 sm:$0xff]  }
 0x92a   :  { %8431 = vmatpush1.bf16.msra.mxu0 %v12920_v16  ;;  %8472 = vmatpush1.bf16.msra.mxu1 %v12922_v63  ;;  %v12987_v16 = vcombine.high %v7633_v37, %v7637_v10  ;;  %v12984_v63 = vcombine.low %v7632_v36, %v7636_v12  ;;  %v13503_v36 = vld [vmem:[%s19328_s4 + $0x160] ss:$16 sps:$4 sm:$0xff]   ;;  %v13506_v12 = vld [vmem:[%s19328_s4 + $0x168] ss:$16 sps:$4 sm:$0xff]  }
 0x92b   :  { %8432 = vmatprep.subr.bf16.mxu0 %v13041_v56  ;;  %8473 = vmatprep.subr.bf16.mxu1 %v13043_v24  ;;  %v12986_v56 = vcombine.low %v7633_v37, %v7637_v10  ;;  %v13433_v24 = vld [vmem:[%s19328_s4 + $0xe4] ss:$16 sps:$4 sm:$0xff]   ;;  %v13514_v10 = vld [vmem:[%s19328_s4 + $0x14c] ss:$16 sps:$4 sm:$0xff]  }
 0x92c   :  { %v13511_v37 = vld [vmem:[%s19328_s4 + $0x144] ss:$16 sps:$4 sm:$0xff]  }
 0x92e   :  { %8433 = vmatpush2.bf16.msra.mxu0 %v13040_v31  ;;  %8474 = vmatpush2.bf16.msra.mxu1 %v13042_v47  ;;  %v13437_v31 = vld [vmem:[%s19328_s4 + $0xc0] ss:$16 sps:$4 sm:$0xff]   ;;  %v13440_v47 = vld [vmem:[%s19328_s4 + $0xc8] ss:$16 sps:$4 sm:$0xff]  }
 0x92f   :  { %8434 = vmatprep.subr.bf16.mxu0 %v13033_v62  ;;  %8475 = vmatprep.subr.bf16.mxu1 %v13035_v11  ;;  %v13445_v62 = vld [vmem:[%s19328_s4 + $0xa4] ss:$16 sps:$4 sm:$0xff]   ;;  %v13448_v11 = vld [vmem:[%s19328_s4 + $0xac] ss:$16 sps:$4 sm:$0xff]  }
 0x932   :  { %8435 = vmatpush2.bf16.msra.mxu0 %v13032_v13  ;;  %8476 = vmatpush2.bf16.msra.mxu1 %v13034_v46  ;;  %v13449_v13 = vld [vmem:[%s19328_s4 + $0x80] ss:$16 sps:$4 sm:$0xff]   ;;  %v13452_v46 = vld [vmem:[%s19328_s4 + $0x88] ss:$16 sps:$4 sm:$0xff]  }
 0x933   :  { %8436 = vmatprep.subr.bf16.mxu0 %v13025_v44  ;;  %8477 = vmatprep.subr.bf16.mxu1 %v13027_v27  ;;  %v13457_v44 = vld [vmem:[%s19328_s4 + $0x64] ss:$16 sps:$4 sm:$0xff]   ;;  %v13460_v27 = vld [vmem:[%s19328_s4 + $0x6c] ss:$16 sps:$4 sm:$0xff]  }
 0x936   :  { %8437 = vmatpush2.bf16.msra.mxu0 %v13024_v61  ;;  %8478 = vmatpush2.bf16.msra.mxu1 %v13026_v41  ;;  %v13461_v61 = vld [vmem:[%s19328_s4 + $0x40] ss:$16 sps:$4 sm:$0xff]   ;;  %v13464_v41 = vld [vmem:[%s19328_s4 + $0x48] ss:$16 sps:$4 sm:$0xff]  }
 0x937   :  { %8438 = vmatprep.subr.bf16.mxu0 %v13017_v28  ;;  %8479 = vmatprep.subr.bf16.mxu1 %v13019_v7  ;;  %v13469_v28 = vld [vmem:[%s19328_s4 + $0x24] ss:$16 sps:$4 sm:$0xff]   ;;  %v13472_v7 = vld [vmem:[%s19328_s4 + $0x2c] ss:$16 sps:$4 sm:$0xff]  }
 0x93a   :  { %8439 = vmatpush2.bf16.msra.mxu0 %v13016_v52  ;;  %8480 = vmatpush2.bf16.msra.mxu1 %v13018_v6  ;;  %v13473_v52 = vld [vmem:[%s19328_s4] ss:$16 sps:$4 sm:$0xff]   ;;  %v13476_v6 = vld [vmem:[%s19328_s4 + $0x8] ss:$16 sps:$4 sm:$0xff]  }
 0x93b   :  { %8440 = vmatprep.subr.bf16.mxu0 %v13009_v18  ;;  %8481 = vmatprep.subr.bf16.mxu1 %v13011_v3  ;;  %v13481_v18 = vld [vmem:[%s19328_s4 + $0x1e4] ss:$16 sps:$4 sm:$0xff]   ;;  %v13484_v3 = vld [vmem:[%s19328_s4 + $0x1ec] ss:$16 sps:$4 sm:$0xff]  }
 0x93e   :  { %8441 = vmatpush2.bf16.msra.mxu0 %v13008_v23  ;;  %8482 = vmatpush2.bf16.msra.mxu1 %v13010_v20  ;;  %v13485_v23 = vld [vmem:[%s19328_s4 + $0x1c0] ss:$16 sps:$4 sm:$0xff]   ;;  %v13488_v20 = vld [vmem:[%s19328_s4 + $0x1c8] ss:$16 sps:$4 sm:$0xff]  }
 0x93f   :  { %8442 = vmatprep.subr.bf16.mxu0 %v13001_v48  ;;  %8483 = vmatprep.subr.bf16.mxu1 %v13003_v14  ;;  %v13493_v48 = vld [vmem:[%s19328_s4 + $0x1a4] ss:$16 sps:$4 sm:$0xff]   ;;  %v13496_v14 = vld [vmem:[%s19328_s4 + $0x1ac] ss:$16 sps:$4 sm:$0xff]  }
 0x942   :  { %8443 = vmatpush2.bf16.msra.mxu0 %v13000_v22  ;;  %8484 = vmatpush2.bf16.msra.mxu1 %v13002_v60  ;;  %v13497_v22 = vld [vmem:[%s19328_s4 + $0x180] ss:$16 sps:$4 sm:$0xff]   ;;  %v13500_v60 = vld [vmem:[%s19328_s4 + $0x188] ss:$16 sps:$4 sm:$0xff]  }
 0x943   :  { %8444 = vmatprep.subr.bf16.mxu0 %v12993_v54  ;;  %8485 = vmatprep.subr.bf16.mxu1 %v12995_v35  ;;  %v13505_v54 = vld [vmem:[%s19328_s4 + $0x164] ss:$16 sps:$4 sm:$0xff]   ;;  %v13508_v35 = vld [vmem:[%s19328_s4 + $0x16c] ss:$16 sps:$4 sm:$0xff]  }
 0x946   :  { %8445 = vmatpush2.bf16.msra.mxu0 %v12992_v58  ;;  %8486 = vmatpush2.bf16.msra.mxu1 %v12994_v33  ;;  %v13509_v58 = vld [vmem:[%s19328_s4 + $0x140] ss:$16 sps:$4 sm:$0xff]   ;;  %v13512_v33 = vld [vmem:[%s19328_s4 + $0x148] ss:$16 sps:$4 sm:$0xff]  }
 0x947   :  { %8446 = vmatprep.subr.bf16.mxu0 %v12985_v50  ;;  %8487 = vmatprep.subr.bf16.mxu1 %v12987_v16  ;;  %v13515_v50 = vld [vmem:[%s19328_s4 + $0x120] ss:$16 sps:$4 sm:$0xff]   ;;  %v13517_v16 = vld [vmem:[%s19328_s4 + $0x124] ss:$16 sps:$4 sm:$0xff]  }
 0x94a   :  { %8447 = vmatpush2.bf16.msra.mxu0 %v12984_v63  ;;  %8488 = vmatpush2.bf16.msra.mxu1 %v12986_v56  ;;  %v13520_v63 = vld [vmem:[%s19328_s4 + $0x12c] ss:$16 sps:$4 sm:$0xff]   ;;  %v13523_v56 = vld [vmem:[%s19328_s4 + $0x104] ss:$16 sps:$4 sm:$0xff]  }
 0x94b   :  { %9020 = vmatprep.subr.bf16.mxu0 %v13433_v24  ;;  %9093 = vmatprep.subr.bf16.mxu1 %v13436_v39  ;;  %v13518_v24 = vld [vmem:[%s19328_s4 + $0x128] ss:$16 sps:$4 sm:$0xff]  }
 0x94d   :  { %8449 = vmatmul.mubr.bf16.vlgmr.msra.gmra.mxu0 %v17937_v15  ;;  %8490 = vmatmul.mubr.bf16.vlgmr.msra.gmra.mxu1 %v17937_v15  ;;  %v13439_v15 = vld [vmem:[%s19328_s4 + $0xc4] ss:$16 sps:$4 sm:$0xff]  }
 0x94e   :  { %9021 = vmatpush1.bf16.msra.mxu0 %v13431_v25  ;;  %9094 = vmatpush1.bf16.msra.mxu1 %v13434_v17  ;;  %v13526_v25 = vld [vmem:[%s19328_s4 + $0x10c] ss:$16 sps:$4 sm:$0xff]   ;;  %v13521_v17 = vld [vmem:[%s19328_s4 + $0x100] ss:$16 sps:$4 sm:$0xff]  }
 0x94f   :  { %9022 = vmatprep.subr.bf16.mxu0 %v13439_v15  ;;  %9095 = vmatprep.subr.bf16.mxu1 %v13442_v42  ;;  %v20150_v42 = vld [vmem:[#allocation33_spill] sm:$0xff] }
 0x952   :  { %9023 = vmatpush1.bf16.msra.mxu0 %v13437_v31  ;;  %9096 = vmatpush1.bf16.msra.mxu1 %v13440_v47  ;;  %v232_v31 = vadd.f32 %v20150_v42, %v20083_v57  ;;  %v20151_v47 = vld [vmem:[#allocation32_spill] sm:$0xff] }
 0x953   :  { %9024 = vmatprep.subr.bf16.mxu0 %v13445_v62  ;;  %9097 = vmatprep.subr.bf16.mxu1 %v13448_v11  ;;  %v13524_v11 = vld [vmem:[%s19328_s4 + $0x108] ss:$16 sps:$4 sm:$0xff]  }
 0x956   :  { %9025 = vmatpush1.bf16.msra.mxu0 %v13443_v2  ;;  %9098 = vmatpush1.bf16.msra.mxu1 %v13446_v59 }
 0x957   :  { %9026 = vmatprep.subr.bf16.mxu0 %v13451_v55  ;;  %9099 = vmatprep.subr.bf16.mxu1 %v13454_v26 }
 0x95a   :  { %9027 = vmatpush1.bf16.msra.mxu0 %v13449_v13  ;;  %9100 = vmatpush1.bf16.msra.mxu1 %v13452_v46 }
 0x95b   :  { %9028 = vmatprep.subr.bf16.mxu0 %v13457_v44  ;;  %9101 = vmatprep.subr.bf16.mxu1 %v13460_v27  ;;  %v18338_v44 = vld [vmem:[%s19329_s5 + $0xe4] ss:$16 sps:$4 sm:$0xff]  }
 0x95e   :  { %9029 = vmatpush1.bf16.msra.mxu0 %v13455_v4  ;;  %9102 = vmatpush1.bf16.msra.mxu1 %v13458_v9  ;;  %v18344_v9 = vld [vmem:[%s19329_s5 + $0xec] ss:$16 sps:$4 sm:$0xff]  }
 0x95f   :  { %9030 = vmatprep.subr.bf16.mxu0 %v13463_v38  ;;  %9103 = vmatprep.subr.bf16.mxu1 %v13466_v45  ;;  %v20152_v38 = vld [vmem:[#allocation36_spill] sm:$0xff] }
 0x960   :  { %v305_v45 = vadd.f32 %v20152_v38, %v20086_v0  ;;  %v18369_v38 = vld [vmem:[%s19329_s5 + $0xc4] ss:$16 sps:$4 sm:$0xff]  }
 0x962   :  { %9031 = vmatpush1.bf16.msra.mxu0 %v13461_v61  ;;  %9104 = vmatpush1.bf16.msra.mxu1 %v13464_v41  ;;  %v20153_v41 = vld [vmem:[#allocation34_spill] sm:$0xff] }
 0x963   :  { %9032 = vmatprep.subr.bf16.mxu0 %v13469_v28  ;;  %9105 = vmatprep.subr.bf16.mxu1 %v13472_v7 }
 0x966   :  { %9033 = vmatpush1.bf16.msra.mxu0 %v13467_v30  ;;  %9106 = vmatpush1.bf16.msra.mxu1 %v13470_v1 }
 0x967   :  { %9034 = vmatprep.subr.bf16.mxu0 %v13475_v40  ;;  %9107 = vmatprep.subr.bf16.mxu1 %v13478_v49 }
 0x96a   :  { %9035 = vmatpush1.bf16.msra.mxu0 %v13473_v52  ;;  %9108 = vmatpush1.bf16.msra.mxu1 %v13476_v6 }
 0x96b   :  { %9036 = vmatprep.subr.bf16.mxu0 %v13481_v18  ;;  %9109 = vmatprep.subr.bf16.mxu1 %v13484_v3 }
 0x96e   :  { %9037 = vmatpush2.bf16.msra.mxu0 %v13479_v5  ;;  %9110 = vmatpush2.bf16.msra.mxu1 %v13482_v21 }
 0x96f   :  { %9038 = vmatprep.subr.bf16.mxu0 %v13487_v8  ;;  %9111 = vmatprep.subr.bf16.mxu1 %v13490_v29 }
 0x972   :  { %9039 = vmatpush2.bf16.msra.mxu0 %v13485_v23  ;;  %9112 = vmatpush2.bf16.msra.mxu1 %v13488_v20 }
 0x973   :  { %9040 = vmatprep.subr.bf16.mxu0 %v13493_v48  ;;  %9113 = vmatprep.subr.bf16.mxu1 %v13496_v14 }
 0x976   :  { %9041 = vmatpush2.bf16.msra.mxu0 %v13491_v34  ;;  %9114 = vmatpush2.bf16.msra.mxu1 %v13494_v43  ;;  %v20154_v43 = vld [vmem:[#allocation38_spill] sm:$0xff] }
 0x977   :  { %9042 = vmatprep.subr.bf16.mxu0 %v13499_v32  ;;  %9115 = vmatprep.subr.bf16.mxu1 %v13502_v51 }
 0x97a   :  { %9043 = vmatpush2.bf16.msra.mxu0 %v13497_v22  ;;  %9116 = vmatpush2.bf16.msra.mxu1 %v13500_v60 }
 0x97b   :  { %9044 = vmatprep.subr.bf16.mxu0 %v13505_v54  ;;  %9117 = vmatprep.subr.bf16.mxu1 %v13508_v35  ;;  %v20155_v54 = vld [vmem:[#allocation40_spill] sm:$0xff] }
 0x97e   :  { %9045 = vmatpush2.bf16.msra.mxu0 %v13503_v36  ;;  %9118 = vmatpush2.bf16.msra.mxu1 %v13506_v12 }
 0x97f   :  { %9046 = vmatprep.subr.bf16.mxu0 %v13511_v37  ;;  %9119 = vmatprep.subr.bf16.mxu1 %v13514_v10 }
 0x982   :  { %9047 = vmatpush2.bf16.msra.mxu0 %v13509_v58  ;;  %9120 = vmatpush2.bf16.msra.mxu1 %v13512_v33  ;;  %v20156_v58 = vld [vmem:[#allocation41_spill] sm:$0xff] }
 0x983   :  { %9048 = vmatprep.subr.bf16.mxu0 %v13517_v16  ;;  %9121 = vmatprep.subr.bf16.mxu1 %v13520_v63 }
 0x986   :  { %9049 = vmatpush2.bf16.msra.mxu0 %v13515_v50  ;;  %9122 = vmatpush2.bf16.msra.mxu1 %v13518_v24  ;;  %v20157_v50 = vld [vmem:[#allocation39_spill] sm:$0xff] }
 0x987   :  { %9050 = vmatprep.subr.bf16.mxu0 %v13523_v56  ;;  %9123 = vmatprep.subr.bf16.mxu1 %v13526_v25 }
 0x98a   :  { %9051 = vmatpush2.bf16.msra.mxu0 %v13521_v17  ;;  %9124 = vmatpush2.bf16.msra.mxu1 %v13524_v11 }
 0x98b   :  { %9390 = vmatprep.subr.bf16.mxu0 %v18338_v44  ;;  %9431 = vmatprep.subr.bf16.mxu1 %v18344_v9 }
 0x9cd   :  { %v8368_v39 = vpop.f32.mrf.mxu0  ;;  %v8409_v15 = vpop.f32.mrf.mxu1 }
 0x9ce   :  { %v8502_v62 = vadd.f32 %v8368_v39, %v20151_v47  ;;  %v8504_v28 = vadd.f32 %v8409_v15, %v20153_v41  ;;  %v18386_v41 = vld [vmem:[%s19329_s5 + $0xc8] ss:$16 sps:$4 sm:$0xff]  }
 0x9cf   :  { %v8370_v2 = vpop.f32.mrf.mxu0  ;;  %v8411_v59 = vpop.f32.mrf.mxu1 }
 0x9d0   :  { %v13044_v55 = vmul.f32 -1.442695, %v8502_v62  ;;  %v8503_v26 = vadd.f32 %v8370_v2, %v232_v31  ;;  %v8505_v61 = vadd.f32 %v8411_v59, %v305_v45  ;;  %v18374_v45 = vld [vmem:[%s19329_s5 + $0xcc] ss:$16 sps:$4 sm:$0xff]  }
 0x9d1   :  { %v8372_v13 = vpop.f32.mrf.mxu0  ;;  %v8413_v46 = vpop.f32.mrf.mxu1 }
 0x9d2   :  { %13907 = vpow2.f32 %v13044_v55  ;;  %v13045_v57 = vmul.f32 -1.442695, %v8503_v26  ;;  %v13046_v7 = vmul.f32 -1.442695, %v8505_v61  ;;  %v13527_v46 = vld [vmem:[#allocation3] ss:$8 sps:$4 sm:$0xff]  }
 0x9d3   :  { %v8373_v27 = vpop.f32.mrf.mxu0  ;;  %v8414_v4 = vpop.f32.mrf.mxu1  ;;  %v18381_v61 = vld [vmem:[%s19329_s5 + $0xc0] ss:$16 sps:$4 sm:$0xff]  }
 0x9d4   :  { %13909 = vpow2.f32 %v13045_v57  ;;  %v18359_v27 = vld [vmem:[%s19329_s5 + $0xe0] ss:$16 sps:$4 sm:$0xff]   ;;  %v18364_v4 = vld [vmem:[%s19329_s5 + $0xe8] ss:$16 sps:$4 sm:$0xff]  }
 0x9d5   :  { %13911 = vtanh.f32 %v8504_v28  ;;  %v18393_v28 = vld [vmem:[%s19329_s5 + $0xa4] ss:$16 sps:$4 sm:$0xff]  }
 0x9d6   :  { %13913 = vpow2.f32 %v13046_v7  ;;  %v18398_v7 = vld [vmem:[%s19329_s5 + $0xac] ss:$16 sps:$4 sm:$0xff]  }
 0x9df   :  { %v13908_v30 = vpop.eup %13907 }
 0x9e0   :  { %v8517_v1 = vadd.f32 1.0, %v13908_v30  ;;  %v13544_v30 = vld [vmem:[#allocation3 + $0x10] ss:$8 sps:$4 sm:$0xff]  }
 0x9e1   :  { %v13910_v40 = vpop.eup %13909 }
 0x9e2   :  { %13915 = vrcp.f32 %v8517_v1  ;;  %v8523_v49 = vadd.f32 1.0, %v13910_v40  ;;  %v13912_v52 = vpop.eup %13911  ;;  %v18405_v1 = vld [vmem:[%s19329_s5 + $0xa0] ss:$16 sps:$4 sm:$0xff]   ;;  %v18410_v40 = vld [vmem:[%s19329_s5 + $0xa8] ss:$16 sps:$4 sm:$0xff]  }
 0x9e3   :  { %v13914_v6 = vpop.eup %13913 }
 0x9e4   :  { %13917 = vrcp.f32 %v8523_v49  ;;  %v8530_v21 = vadd.f32 1.0, %v13914_v6  ;;  %v13551_v49 = vld [vmem:[#allocation3 + $0x24] ss:$8 sps:$4 sm:$0xff]  }
 0x9e5   :  { %v18422_v6 = vld [vmem:[%s19329_s5 + $0x8c] ss:$16 sps:$4 sm:$0xff]  }
 0x9e6   :  { %13919 = vrcp.f32 %v8530_v21  ;;  %v18446_v21 = vld [vmem:[%s19329_s5 + $0x6c] ss:$16 sps:$4 sm:$0xff]  }
 0x9ef   :  { %v13916_v18 = vpop.eup %13915 }
 0x9f0   :  { %v8534_v3 = vmul.f32 %v13916_v18, %v13912_v52  ;;  %v18417_v52 = vld [vmem:[%s19329_s5 + $0x84] ss:$16 sps:$4 sm:$0xff]   ;;  %v18429_v18 = vld [vmem:[%s19329_s5 + $0x80] ss:$16 sps:$4 sm:$0xff]  }
 0x9f1   :  { %v13918_v5 = vpop.eup %13917 }
 0x9f2   :  { %v8533_v0 = vmul.f32 %v13918_v5, %v17934_v19  ;;  %v18441_v5 = vld [vmem:[%s19329_s5 + $0x64] ss:$16 sps:$4 sm:$0xff]  }
 0x9f3   :  { %v13920_v29 = vpop.eup %13919 }
 0x9f4   :  { %v8535_v8 = vadd.f32 %v8534_v3, %v8533_v0  ;;  %v18434_v3 = vld [vmem:[%s19329_s5 + $0x88] ss:$16 sps:$4 sm:$0xff]  }
 0x9f5   :  { %v13559_v0 = vld [vmem:[#allocation3 + $0x20] ss:$8 sps:$4 sm:$0xff]  }
 0x9f6   :  { %13921 = vtanh.f32 %v8535_v8  ;;  %v18453_v8 = vld [vmem:[%s19329_s5 + $0x60] ss:$16 sps:$4 sm:$0xff]  }
 0xa03   :  { %v13922_v23 = vpop.eup %13921 }
 0xa04   :  { %v8537_v20 = vmul.f32 %v13922_v23, %v13920_v29  ;;  %v18458_v29 = vld [vmem:[%s19329_s5 + $0x68] ss:$16 sps:$4 sm:$0xff]   ;;  %v13566_v23 = vld [vmem:[#allocation3 + $0x34] ss:$8 sps:$4 sm:$0xff]  }
 0xa06   :  { %v8562_v48 = vpack.c.bf16 %v8537_v20, %v8537_v20  ;;  %v18465_v20 = vld [vmem:[%s19329_s5 + $0x44] ss:$16 sps:$4 sm:$0xff]  }
 0xa08   :  { %8563 = vst [vmem:[#allocation3 + $0x38] sm:$0xf] %v8562_v48  ;;  %v18470_v48 = vld [vmem:[%s19329_s5 + $0x4c] ss:$16 sps:$4 sm:$0xff]  }
 0xa0d   :  { %v8450_v14 = vpop.f32.mrf.mxu0  ;;  %v8491_v34 = vpop.f32.mrf.mxu1 }
 0xa0e   :  { %v8510_v32 = vadd.f32 %v8450_v14, %v20154_v43  ;;  %v8512_v16 = vadd.f32 %v8491_v34, %v20157_v50  ;;  %v18477_v14 = vld [vmem:[%s19329_s5 + $0x40] ss:$16 sps:$4 sm:$0xff]   ;;  %v18482_v34 = vld [vmem:[%s19329_s5 + $0x48] ss:$16 sps:$4 sm:$0xff]   ;;  %v18489_v43 = vld [vmem:[%s19329_s5 + $0x24] ss:$16 sps:$4 sm:$0xff]  }
 0xa0f   :  { %v8452_v51 = vpop.f32.mrf.mxu0  ;;  %v8493_v22 = vpop.f32.mrf.mxu1 }
 0xa10   :  { %v13047_v60 = vmul.f32 -1.442695, %v8510_v32  ;;  %v8511_v35 = vadd.f32 %v8452_v51, %v20155_v54  ;;  %v8513_v33 = vadd.f32 %v8493_v22, %v20156_v58  ;;  %v18494_v32 = vld [vmem:[%s19329_s5 + $0x2c] ss:$16 sps:$4 sm:$0xff]   ;;  %v13574_v51 = vld [vmem:[#allocation3 + $0x30] ss:$8 sps:$4 sm:$0xff]  }
 0xa11   :  { %v8454_v36 = vpop.f32.mrf.mxu0  ;;  %v8495_v12 = vpop.f32.mrf.mxu1  ;;  %v18501_v22 = vld [vmem:[%s19329_s5 + $0x20] ss:$16 sps:$4 sm:$0xff]   ;;  %v18513_v54 = vld [vmem:[%s19329_s5 + $0x4] ss:$16 sps:$4 sm:$0xff]  }
 0xa12   :  { %13923 = vpow2.f32 %v13047_v60  ;;  %v13048_v19 = vmul.f32 -1.442695, %v8511_v35  ;;  %v13049_v63 = vmul.f32 -1.442695, %v8513_v33  ;;  %v18506_v60 = vld [vmem:[%s19329_s5 + $0x28] ss:$16 sps:$4 sm:$0xff]  }
 0xa13   :  { %v8455_v37 = vpop.f32.mrf.mxu0  ;;  %v8496_v10 = vpop.f32.mrf.mxu1  ;;  %v18518_v35 = vld [vmem:[%s19329_s5 + $0xc] ss:$16 sps:$4 sm:$0xff]   ;;  %v20158_v36 = vmov 0   ;;  %v18527_v12 = vld [vmem:[%s19329_s5] ss:$16 sps:$4 sm:$0xff]  }
 0xa14   :  { %13925 = vpow2.f32 %v13048_v19  ;;  %v18532_v19 = vld [vmem:[%s19329_s5 + $0x8] ss:$16 sps:$4 sm:$0xff]   ;;  %v20159_v37 = vmov 0.0|0.0   ;;  %v8638_v10 = vld [vmem:[%s19330_s6] sm:$0xf]  ;;  %s14133_s6 = smov 64  }
 0xa15   :  { %13927 = vtanh.f32 %v8512_v16  ;;  %v20160_v58 = vld [vmem:[#allocation5_spill] sm:$0xff] }
 0xa16   :  { %13929 = vpow2.f32 %v13049_v63  ;;  %v20161_v33 = vsub.s32 2, %v20160_v58  ;;  %v20162_v16 = vsub.s32 3, %v20160_v58 }
 0xa18   :  { %v18581_v50 = vrot.slane %v8638_v10, %v20161_v33  ;;  %v18585_v63 = vrot.slane %v8638_v10, %v20162_v16 }
 0xa1f   :  { %v13924_v56 = vpop.eup %13923 }
 0xa20   :  { %v8541_v24 = vadd.f32 1.0, %v13924_v56 }
 0xa21   :  { %v13926_v25 = vpop.eup %13925 }
 0xa22   :  { %13931 = vrcp.f32 %v8541_v24  ;;  %v8547_v17 = vadd.f32 1.0, %v13926_v25  ;;  %v13928_v39 = vpop.eup %13927 }
 0xa23   :  { %v13930_v15 = vpop.eup %13929 }
 0xa24   :  { %13933 = vrcp.f32 %v8547_v17  ;;  %v8554_v62 = vadd.f32 1.0, %v13930_v15  ;;  %v20164_v17 = vsub.s32 0, %v20160_v58 }
 0xa26   :  { %13935 = vrcp.f32 %v8554_v62 }
 0xa2f   :  { %v13932_v42 = vpop.eup %13931 }
 0xa30   :  { %v8558_v31 = vmul.f32 %v13932_v42, %v13928_v39  ;;  %v8643_v39 = vrot.slane %v8638_v10, %v20164_v17 }
 0xa31   :  { %v13934_v47 = vpop.eup %13933 }
 0xa32   :  { %v8557_v11 = vmul.f32 %v13934_v47, %v17947_v53  ;;  %v13536_v53 = vld [vmem:[#allocation3 + $0x14] ss:$8 sps:$4 sm:$0xff]   ;;  %v20166_v47 = vsub.s32 1, %v20160_v58 }
 0xa33   :  { %v13936_v59 = vpop.eup %13935 }
 0xa34   :  { %v8559_v2 = vadd.f32 %v8558_v31, %v8557_v11  ;;  %v18599_v62 = vrot.slane %v8638_v10, %v20166_v47 }
 0xa36   :  { %13937 = vtanh.f32 %v8559_v2 }
 0xa43   :  { %v13938_v55 = vpop.eup %13937 }
 0xa44   :  { %v8561_v26 = vmul.f32 %v13938_v55, %v13936_v59 }
 0xa46   :  { %v8564_v13 = vpack.c.bf16 %v8561_v26, %v8561_v26 }
 0xa48   :  { %8565 = vst [vmem:[#allocation3 + $0x4] sm:$0xf] %v8564_v13 }
 0xa4f   :  { %v13529_v57 = vld [vmem:[#allocation3 + $0x4] ss:$8 sps:$4 sm:$0xff]  }
 0xa50   :  { %9052 = vmatprep.mubr.bf16.mxu0 %v13529_v57  ;;  %9125 = vmatprep.mubr.bf16.mxu1 %v13529_v57 }
 0xa51   :  { %9053 = vmatmul.mubr.bf16.vlgmr.msra.gmra.mxu0 %v13527_v46  ;;  %9126 = vmatmul.mubr.bf16.vlgmr.msra.gmra.mxu1 %v13527_v46 }
 0xa52   :  { %9062 = vmatprep.mubr.bf16.mxu0 %v13536_v53  ;;  %9135 = vmatprep.mubr.bf16.mxu1 %v13536_v53 }
 0xa53   :  { %9391 = vmatpush1.bf16.msra.mxu0 %v18359_v27  ;;  %9432 = vmatpush1.bf16.msra.mxu1 %v18364_v4 }
 0xa54   :  { %9392 = vmatprep.subr.bf16.mxu0 %v18369_v38  ;;  %9433 = vmatprep.subr.bf16.mxu1 %v18374_v45 }
 0xa57   :  { %9393 = vmatpush1.bf16.msra.mxu0 %v18381_v61  ;;  %9434 = vmatpush1.bf16.msra.mxu1 %v18386_v41 }
 0xa58   :  { %9394 = vmatprep.subr.bf16.mxu0 %v18393_v28  ;;  %9435 = vmatprep.subr.bf16.mxu1 %v18398_v7 }
 0xa59   :  { %9063 = vmatmul.mubr.bf16.gmra.mxu0 %v13544_v30  ;;  %9136 = vmatmul.mubr.bf16.gmra.mxu1 %v13544_v30 }
 0xa5a   :  { %9072 = vmatprep.mubr.bf16.mxu0 %v13551_v49  ;;  %9145 = vmatprep.mubr.bf16.mxu1 %v13551_v49 }
 0xa5b   :  { %9395 = vmatpush1.bf16.msra.mxu0 %v18405_v1  ;;  %9436 = vmatpush1.bf16.msra.mxu1 %v18410_v40 }
 0xa5c   :  { %9396 = vmatprep.subr.bf16.mxu0 %v18417_v52  ;;  %9437 = vmatprep.subr.bf16.mxu1 %v18422_v6 }
 0xa5f   :  { %9397 = vmatpush1.bf16.msra.mxu0 %v18429_v18  ;;  %9438 = vmatpush1.bf16.msra.mxu1 %v18434_v3 }
 0xa60   :  { %9398 = vmatprep.subr.bf16.mxu0 %v18441_v5  ;;  %9439 = vmatprep.subr.bf16.mxu1 %v18446_v21 }
 0xa61   :  { %9073 = vmatmul.mubr.bf16.gmra.mxu0 %v13559_v0  ;;  %9146 = vmatmul.mubr.bf16.gmra.mxu1 %v13559_v0 }
 0xa62   :  { %9082 = vmatprep.mubr.bf16.mxu0 %v13566_v23  ;;  %9155 = vmatprep.mubr.bf16.mxu1 %v13566_v23 }
 0xa63   :  { %9399 = vmatpush1.bf16.msra.mxu0 %v18453_v8  ;;  %9440 = vmatpush1.bf16.msra.mxu1 %v18458_v29 }
 0xa64   :  { %9400 = vmatprep.subr.bf16.mxu0 %v18465_v20  ;;  %9441 = vmatprep.subr.bf16.mxu1 %v18470_v48 }
 0xa67   :  { %9401 = vmatpush1.bf16.msra.mxu0 %v18477_v14  ;;  %9442 = vmatpush1.bf16.msra.mxu1 %v18482_v34 }
 0xa68   :  { %9402 = vmatprep.subr.bf16.mxu0 %v18489_v43  ;;  %9443 = vmatprep.subr.bf16.mxu1 %v18494_v32 }
 0xa69   :  { %9083 = vmatmul.mubr.bf16.gmra.mxu0 %v13574_v51  ;;  %9156 = vmatmul.mubr.bf16.gmra.mxu1 %v13574_v51 }
 0xa6a   :  { %9422 = vmatprep.mubr.bf16.mxu0 %v20158_v36  ;;  %9463 = vmatprep.mubr.bf16.mxu1 %v20158_v36 }
 0xa6b   :  { %9403 = vmatpush1.bf16.msra.mxu0 %v18501_v22  ;;  %9444 = vmatpush1.bf16.msra.mxu1 %v18506_v60 }
 0xa6c   :  { %9404 = vmatprep.subr.bf16.mxu0 %v18513_v54  ;;  %9445 = vmatprep.subr.bf16.mxu1 %v18518_v35 }
 0xa6f   :  { %9405 = vmatpush1.bf16.msra.mxu0 %v18527_v12  ;;  %9446 = vmatpush1.bf16.msra.mxu1 %v18532_v19 }
 0xa70   :  { %9733 = vmatprep.subr.bf16.mxu0 %v18338_v44  ;;  %9774 = vmatprep.subr.bf16.mxu1 %v18344_v9 }
 0xa72   :  { %9423 = vmatmul.mubr.bf16.vlgmr.msra.gmra.mxu0 %v20159_v37  ;;  %9464 = vmatmul.mubr.bf16.vlgmr.msra.gmra.mxu1 %v20159_v37 }
 0xa73   :  { %9734 = vmatpush1.bf16.msra.mxu0 %v18359_v27  ;;  %9775 = vmatpush1.bf16.msra.mxu1 %v18364_v4 }
 0xa74   :  { %9735 = vmatprep.subr.bf16.mxu0 %v18369_v38  ;;  %9776 = vmatprep.subr.bf16.mxu1 %v18374_v45 }
 0xa75   :  { %9765 = vmatprep.mubr.bf16.mxu0 %v20158_v36  ;;  %9806 = vmatprep.mubr.bf16.mxu1 %v20158_v36 }
 0xa77   :  { %9736 = vmatpush1.bf16.msra.mxu0 %v18381_v61  ;;  %9777 = vmatpush1.bf16.msra.mxu1 %v18386_v41 }
 0xa78   :  { %9737 = vmatprep.subr.bf16.mxu0 %v18393_v28  ;;  %9778 = vmatprep.subr.bf16.mxu1 %v18398_v7 }
 0xa7b   :  { %9738 = vmatpush1.bf16.msra.mxu0 %v18405_v1  ;;  %9779 = vmatpush1.bf16.msra.mxu1 %v18410_v40 }
 0xa7c   :  { %9739 = vmatprep.subr.bf16.mxu0 %v18417_v52  ;;  %9780 = vmatprep.subr.bf16.mxu1 %v18422_v6 }
 0xa7f   :  { %9740 = vmatpush1.bf16.msra.mxu0 %v18429_v18  ;;  %9781 = vmatpush1.bf16.msra.mxu1 %v18434_v3 }
 0xa80   :  { %9741 = vmatprep.subr.bf16.mxu0 %v18441_v5  ;;  %9782 = vmatprep.subr.bf16.mxu1 %v18446_v21 }
 0xa83   :  { %9742 = vmatpush1.bf16.msra.mxu0 %v18453_v8  ;;  %9783 = vmatpush1.bf16.msra.mxu1 %v18458_v29 }
 0xa84   :  { %9743 = vmatprep.subr.bf16.mxu0 %v18465_v20  ;;  %9784 = vmatprep.subr.bf16.mxu1 %v18470_v48 }
 0xa87   :  { %9744 = vmatpush1.bf16.msra.mxu0 %v18477_v14  ;;  %9785 = vmatpush1.bf16.msra.mxu1 %v18482_v34 }
 0xa88   :  { %9745 = vmatprep.subr.bf16.mxu0 %v18489_v43  ;;  %9786 = vmatprep.subr.bf16.mxu1 %v18494_v32 }
 0xa8b   :  { %9746 = vmatpush1.bf16.msra.mxu0 %v18501_v22  ;;  %9787 = vmatpush1.bf16.msra.mxu1 %v18506_v60 }
 0xa8c   :  { %9747 = vmatprep.subr.bf16.mxu0 %v18513_v54  ;;  %9788 = vmatprep.subr.bf16.mxu1 %v18518_v35 }
 0xa8f   :  { %9748 = vmatpush1.bf16.msra.mxu0 %v18527_v12  ;;  %9789 = vmatpush1.bf16.msra.mxu1 %v18532_v19 }
 0xa90   :  { %10075 = vmatprep.subr.bf16.mxu0 %v18338_v44  ;;  %10116 = vmatprep.subr.bf16.mxu1 %v18344_v9 }
 0xb11   :  { %v9054_v56 = vpop.f32.mrf.mxu0  ;;  %v9127_v24 = vpop.f32.mrf.mxu1 }
 0xb12   :  { %v18588_v25 = vadd.f32 %v9127_v24, %v18581_v50 }
 0xb13   :  { %v18590_v44 = vpop.f32.mrf.mxu0  ;;  %v9129_v9 = vpop.f32.mrf.mxu1 }
 0xb14   :  { %20163 = vst [vmem:[#allocation108_spill] sm:$0xff] %v18588_v25  ;;  %v18595_v15 = vadd.f32 %v9129_v9, %v18585_v63 }
 0xb15   :  { %v9058_v42 = vpop.f32.mrf.mxu0  ;;  %v9131_v31 = vpop.f32.mrf.mxu1 }
 0xb16   :  { %20165 = vst [vmem:[#allocation109_spill] sm:$0xff] %v18595_v15  ;;  %v18601_v11 = vadd.f32 %v9058_v42, %v8643_v39  ;;  %v18604_v2 = vadd.f32 %v9131_v31, %v18581_v50 }
 0xb17   :  { %v9060_v59 = vpop.f32.mrf.mxu0  ;;  %v9133_v55 = vpop.f32.mrf.mxu1 }
 0xb18   :  { %20167 = vst [vmem:[#allocation110_spill] sm:$0xff] %v18604_v2  ;;  %v18607_v26 = vadd.f32 %v9060_v59, %v18599_v62  ;;  %v18610_v13 = vadd.f32 %v9133_v55, %v18585_v63 }
 0xb19   :  { %v9064_v46 = vpop.f32.mrf.mxu0  ;;  %v9137_v57 = vpop.f32.mrf.mxu1 }
 0xb1a   :  { %20168 = vst [vmem:[#allocation111_spill] sm:$0xff] %v18610_v13  ;;  %v18612_v53 = vadd.f32 %v9064_v46, %v8643_v39  ;;  %v18615_v30 = vadd.f32 %v9137_v57, %v18581_v50 }
 0xb1b   :  { %v9066_v49 = vpop.f32.mrf.mxu0  ;;  %v9139_v0 = vpop.f32.mrf.mxu1 }
 0xb1c   :  { %20169 = vst [vmem:[#allocation112_spill] sm:$0xff] %v18615_v30  ;;  %v18618_v23 = vadd.f32 %v9066_v49, %v18599_v62  ;;  %v18621_v51 = vadd.f32 %v9139_v0, %v18585_v63 }
 0xb1d   :  { %v9068_v37 = vpop.f32.mrf.mxu0  ;;  %v9141_v10 = vpop.f32.mrf.mxu1 }
 0xb1e   :  { %20170 = vst [vmem:[#allocation113_spill] sm:$0xff] %v18621_v51  ;;  %v18623_v58 = vadd.f32 %v9068_v37, %v8643_v39  ;;  %v18626_v33 = vadd.f32 %v9141_v10, %v18581_v50 }
 0xb1f   :  { %v9070_v16 = vpop.f32.mrf.mxu0  ;;  %v9143_v24 = vpop.f32.mrf.mxu1 }
 0xb20   :  { %20171 = vst [vmem:[#allocation114_spill] sm:$0xff] %v18626_v33  ;;  %v18629_v9 = vadd.f32 %v9070_v16, %v18599_v62  ;;  %v18632_v17 = vadd.f32 %v9143_v24, %v18585_v63 }
 0xb21   :  { %v9074_v42 = vpop.f32.mrf.mxu0  ;;  %v9147_v31 = vpop.f32.mrf.mxu1 }
 0xb22   :  { %20172 = vst [vmem:[#allocation115_spill] sm:$0xff] %v18629_v9  ;;  %20173 = vst [vmem:[#allocation116_spill] sm:$0xff] %v18632_v17  ;;  %v18634_v47 = vadd.f32 %v9074_v42, %v8643_v39  ;;  %v18637_v59 = vadd.f32 %v9147_v31, %v18581_v50 }
 0xb23   :  { %v9076_v55 = vpop.f32.mrf.mxu0  ;;  %v9149_v46 = vpop.f32.mrf.mxu1 }
 0xb24   :  { %20174 = vst [vmem:[#allocation117_spill] sm:$0xff] %v18634_v47  ;;  %20175 = vst [vmem:[#allocation118_spill] sm:$0xff] %v18637_v59  ;;  %v18640_v57 = vadd.f32 %v9076_v55, %v18599_v62  ;;  %v18643_v49 = vadd.f32 %v9149_v46, %v18585_v63 }
 0xb25   :  { %v9078_v0 = vpop.f32.mrf.mxu0  ;;  %v9151_v37 = vpop.f32.mrf.mxu1 }
 0xb26   :  { %20176 = vst [vmem:[#allocation119_spill] sm:$0xff] %v18640_v57  ;;  %20177 = vst [vmem:[#allocation120_spill] sm:$0xff] %v18643_v49  ;;  %v18645_v10 = vadd.f32 %v9078_v0, %v8643_v39  ;;  %v18648_v16 = vadd.f32 %v9151_v37, %v18581_v50 }
 0xb27   :  { %v9080_v24 = vpop.f32.mrf.mxu0  ;;  %v9153_v42 = vpop.f32.mrf.mxu1 }
 0xb28   :  { %20178 = vst [vmem:[#allocation121_spill] sm:$0xff] %v18645_v10  ;;  %v18651_v31 = vadd.f32 %v9080_v24, %v18599_v62  ;;  %v18654_v15 = vadd.f32 %v9153_v42, %v18585_v63 }
 0xb29   :  { %v9084_v55 = vpop.f32.mrf.mxu0  ;;  %v9157_v25 = vpop.f32.mrf.mxu1 }
 0xb2a   :  { %20179 = vst [vmem:[#allocation122_spill] sm:$0xff] %v18651_v31  ;;  %v18656_v13 = vadd.f32 %v9084_v55, %v8643_v39  ;;  %v18659_v46 = vadd.f32 %v9157_v25, %v18581_v50 }
 0xb2b   :  { %v9086_v0 = vpop.f32.mrf.mxu0  ;;  %v9159_v2 = vpop.f32.mrf.mxu1 }
 0xb2c   :  { %20180 = vst [vmem:[#allocation123_spill] sm:$0xff] %v18656_v13  ;;  %v18662_v37 = vadd.f32 %v9086_v0, %v18599_v62  ;;  %v18665_v51 = vadd.f32 %v9159_v2, %v18585_v63  ;;  %v9055_v13 = vadd.f32 %v9054_v56, %v8643_v39 }
 0xb2d   :  { %v9088_v24 = vpop.f32.mrf.mxu0  ;;  %v9161_v31 = vpop.f32.mrf.mxu1 }
 0xb2e   :  { %20181 = vst [vmem:[#allocation124_spill] sm:$0xff] %v18662_v37  ;;  %v18667_v30 = vadd.f32 %v9088_v24, %v8643_v39  ;;  %v9162_v25 = vadd.f32 %v9161_v31, %v18581_v50 }
 0xb2f   :  { %v9090_v42 = vpop.f32.mrf.mxu0  ;;  %v9163_v10 = vpop.f32.mrf.mxu1 }
 0xb30   :  { %20182 = vst [vmem:[#allocation125_spill] sm:$0xff] %v18667_v30  ;;  %v18670_v55 = vadd.f32 %v9090_v42, %v18599_v62  ;;  %v9057_v42 = vadd.f32 %v18590_v44, %v18599_v62  ;;  %v9164_v31 = vadd.f32 %v9163_v10, %v18585_v63 }
 0xb32   :  { %v9424_v17 = vpop.f32.mrf.mxu0  ;;  %v9465_v57 = vpop.f32.mrf.mxu1 }
 0xb33   :  { %v9477_v33 = vadd.f32 %v9424_v17, %v9055_v13  ;;  %v9484_v0 = vadd.f32 %v9465_v57, %v9162_v25 }
 0xb34   :  { %v9426_v37 = vpop.f32.mrf.mxu0  ;;  %v9467_v47 = vpop.f32.mrf.mxu1 }
 0xb35   :  { %v13154_v2 = vmul.f32 -1.442695, %v9477_v33  ;;  %v13156_v49 = vmul.f32 -1.442695, %v9484_v0  ;;  %v9478_v56 = vadd.f32 %v9426_v37, %v9057_v42  ;;  %v9485_v33 = vadd.f32 %v9467_v47, %v9164_v31 }
 0xb36   :  { %v9428_v9 = vpop.f32.mrf.mxu0  ;;  %v9469_v59 = vpop.f32.mrf.mxu1 }
 0xb37   :  { %13939 = vpow2.f32 %v13154_v2  ;;  %v13157_v63 = vmul.f32 -1.442695, %v9485_v33 }
 0xb38   :  { %13941 = vpow2.f32 %v13156_v49  ;;  %v9429_v24 = vpop.f32.mrf.mxu0  ;;  %v9470_v30 = vpop.f32.mrf.mxu1 }
 0xb39   :  { %13943 = vtanh.f32 %v9478_v56  ;;  %v13155_v30 = vmul.f32 -1.442695, %v9478_v56 }
 0xb44   :  { %v13940_v39 = vpop.eup %13939 }
 0xb45   :  { %v13942_v50 = vpop.eup %13941  ;;  %v9489_v13 = vadd.f32 1.0, %v13940_v39 }
 0xb46   :  { %v9511_v17 = vadd.f32 1.0, %v13942_v50  ;;  %v13944_v9 = vpop.eup %13943 }
 0xb47   :  { %13945 = vrcp.f32 %v9489_v13 }
 0xb48   :  { %13947 = vrcp.f32 %v9511_v17 }
 0xb49   :  { %13949 = vtanh.f32 %v9485_v33 }
 0xb4a   :  { %13951 = vpow2.f32 %v13155_v30 }
 0xb4b   :  { %13953 = vpow2.f32 %v13157_v63 }
 0xb54   :  { %v13946_v59 = vpop.eup %13945 }
 0xb55   :  { %v9500_v57 = vmul.f32 %v13946_v59, %v13944_v9  ;;  %v13948_v49 = vpop.eup %13947  ;;  %v9499_v25 = vmul.f32 0.0, %v13946_v59 }
 0xb56   :  { %v13950_v44 = vpop.eup %13949  ;;  %v9521_v42 = vmul.f32 0.0, %v13948_v49 }
 0xb57   :  { %9502 = vrot.lane.b32.xlu0 %v9500_v57, %s14133_s6  ;;  %v9522_v62 = vmul.f32 %v13950_v44, %v13948_v49  ;;  %v13952_v10 = vpop.eup %13951 }
 0xb58   :  { %v9496_v37 = vadd.f32 1.0, %v13952_v10  ;;  %v13954_v47 = vpop.eup %13953 }
 0xb59   :  { %v9518_v24 = vadd.f32 1.0, %v13954_v47 }
 0xb5a   :  { %13955 = vrcp.f32 %v9496_v37 }
 0xb5b   :  { %9524 = vrot.lane.b32.xlu0 %v9522_v62, %s14133_s6 }
 0xb67   :  { %v13956_v56 = vpop.eup %13955 }
 0xbc9   :  { %v9503_v0 = vpop.permute.xlu0 %9502 }
 0xbca   :  { %v18678_v2 = vadd.f32 %v9503_v0, %v9499_v25 }
 0xbcc   :  { %13957 = vtanh.f32 %v18678_v2 }
 0xbcd   :  { %v9525_v39 = vpop.permute.xlu0 %9524  ;;  %13959 = vrcp.f32 %v9518_v24 }
 0xbce   :  { %v18681_v50 = vadd.f32 %v9525_v39, %v9521_v42 }
 0xbd0   :  { %13961 = vtanh.f32 %v18681_v50 }
 0xbd9   :  { %v13958_v31 = vpop.eup %13957 }
 0xbda   :  { %v9507_v13 = vmul.f32 %v13958_v31, %v13956_v56  ;;  %v13960_v17 = vpop.eup %13959 }
 0xbdc   :  { %9531 = vrot.lane.b32.xlu1 %v9507_v13, %s14133_s6 }
 0xbdd   :  { %v13962_v33 = vpop.eup %13961 }
 0xbde   :  { %v9529_v9 = vmul.f32 %v13962_v33, %v13960_v17 }
 0xbe0   :  { %13158 = vst.msk [vmem:[%s19331_s7 + $0x38] sm:$0xff] %vm9537_vm1, %v9529_v9 }
 0xc4e   :  { %v9532_v59 = vpop.permute.xlu1 %9531 }
 0xc4f   :  { %9535 = vst.msk [vmem:[%s19331_s7] sm:$0xff] %vm9534_vm2, %v9532_v59  ;;  %v9539_v57 = vsel %vm9534_vm2, %v9532_v59, %v9529_v9 }
 0xc50   :  { %v9540_v49 = vpack.c.bf16 %v9539_v57, %v9539_v57 }
 0xc52   :  { %9766 = vmatmul.mubr.bf16.vlgmr.msra.gmra.mxu0 %v9540_v49  ;;  %9807 = vmatmul.mubr.bf16.vlgmr.msra.gmra.mxu1 %v9540_v49 }
 0xc53   :  { %10076 = vmatpush1.bf16.msra.mxu0 %v18359_v27  ;;  %10117 = vmatpush1.bf16.msra.mxu1 %v18364_v4 }
 0xc54   :  { %10077 = vmatprep.subr.bf16.mxu0 %v18369_v38  ;;  %10118 = vmatprep.subr.bf16.mxu1 %v18374_v45 }
 0xc55   :  { %10107 = vmatprep.mubr.bf16.mxu0 %v20158_v36  ;;  %10148 = vmatprep.mubr.bf16.mxu1 %v20158_v36 }
 0xc57   :  { %10078 = vmatpush1.bf16.msra.mxu0 %v18381_v61  ;;  %10119 = vmatpush1.bf16.msra.mxu1 %v18386_v41 }
 0xc58   :  { %10079 = vmatprep.subr.bf16.mxu0 %v18393_v28  ;;  %10120 = vmatprep.subr.bf16.mxu1 %v18398_v7 }
 0xc5b   :  { %10080 = vmatpush1.bf16.msra.mxu0 %v18405_v1  ;;  %10121 = vmatpush1.bf16.msra.mxu1 %v18410_v40 }
 0xc5c   :  { %10081 = vmatprep.subr.bf16.mxu0 %v18417_v52  ;;  %10122 = vmatprep.subr.bf16.mxu1 %v18422_v6 }
 0xc5f   :  { %10082 = vmatpush1.bf16.msra.mxu0 %v18429_v18  ;;  %10123 = vmatpush1.bf16.msra.mxu1 %v18434_v3 }
 0xc60   :  { %10083 = vmatprep.subr.bf16.mxu0 %v18441_v5  ;;  %10124 = vmatprep.subr.bf16.mxu1 %v18446_v21 }
 0xc63   :  { %10084 = vmatpush1.bf16.msra.mxu0 %v18453_v8  ;;  %10125 = vmatpush1.bf16.msra.mxu1 %v18458_v29 }
 0xc64   :  { %10085 = vmatprep.subr.bf16.mxu0 %v18465_v20  ;;  %10126 = vmatprep.subr.bf16.mxu1 %v18470_v48 }
 0xc67   :  { %10086 = vmatpush1.bf16.msra.mxu0 %v18477_v14  ;;  %10127 = vmatpush1.bf16.msra.mxu1 %v18482_v34 }
 0xc68   :  { %10087 = vmatprep.subr.bf16.mxu0 %v18489_v43  ;;  %10128 = vmatprep.subr.bf16.mxu1 %v18494_v32 }
 0xc6b   :  { %10088 = vmatpush1.bf16.msra.mxu0 %v18501_v22  ;;  %10129 = vmatpush1.bf16.msra.mxu1 %v18506_v60 }
 0xc6c   :  { %10089 = vmatprep.subr.bf16.mxu0 %v18513_v54  ;;  %10130 = vmatprep.subr.bf16.mxu1 %v18518_v35 }
 0xc6f   :  { %10090 = vmatpush1.bf16.msra.mxu0 %v18527_v12  ;;  %10131 = vmatpush1.bf16.msra.mxu1 %v18532_v19 }
 0xd12   :  { %v9767_v27 = vpop.f32.mrf.mxu0  ;;  %v9808_v4 = vpop.f32.mrf.mxu1 }
 0xd13   :  { %v9820_v38 = vadd.f32 %v9767_v27, %v18601_v11  ;;  %v9827_v45 = vadd.f32 %v9808_v4, %v18659_v46 }
 0xd14   :  { %v9769_v61 = vpop.f32.mrf.mxu0  ;;  %v9810_v41 = vpop.f32.mrf.mxu1 }
 0xd15   :  { %v13191_v28 = vmul.f32 -1.442695, %v9820_v38  ;;  %v13193_v7 = vmul.f32 -1.442695, %v9827_v45  ;;  %v9821_v18 = vadd.f32 %v9769_v61, %v18607_v26  ;;  %v9828_v3 = vadd.f32 %v9810_v41, %v18665_v51 }
 0xd16   :  { %v9771_v1 = vpop.f32.mrf.mxu0  ;;  %v9812_v40 = vpop.f32.mrf.mxu1 }
 0xd17   :  { %13963 = vpow2.f32 %v13191_v28  ;;  %v13192_v22 = vmul.f32 -1.442695, %v9821_v18  ;;  %v13194_v60 = vmul.f32 -1.442695, %v9828_v3  ;;  %v18773_v1 = vld [vmem:[%s19329_s5 + $0xe0] ss:$16 sps:$4 sm:$0xff]  }
 0xd18   :  { %13965 = vpow2.f32 %v13193_v7  ;;  %v9772_v52 = vpop.f32.mrf.mxu0  ;;  %v9813_v6 = vpop.f32.mrf.mxu1  ;;  %v18778_v40 = vld [vmem:[%s19329_s5 + $0xe4] ss:$16 sps:$4 sm:$0xff]  }
 0xd19   :  { %13967 = vtanh.f32 %v9821_v18  ;;  %v18783_v52 = vld [vmem:[%s19329_s5 + $0xe8] ss:$16 sps:$4 sm:$0xff]   ;;  %v18788_v6 = vld [vmem:[%s19329_s5 + $0xec] ss:$16 sps:$4 sm:$0xff]   ;;  %v18793_v18 = vld [vmem:[%s19329_s5 + $0xc4] ss:$16 sps:$4 sm:$0xff]   ;;  %10417 = vmatprep.subr.bf16.mxu0 %v18778_v40 }
 0xd1a   :  { %13969 = vtanh.f32 %v9828_v3  ;;  %v18799_v3 = vld [vmem:[%s19329_s5 + $0xcc] ss:$16 sps:$4 sm:$0xff]   ;;  %10458 = vmatprep.subr.bf16.mxu1 %v18788_v6 }
 0xd24   :  { %v13964_v5 = vpop.eup %13963 }
 0xd25   :  { %v13966_v21 = vpop.eup %13965  ;;  %v9832_v8 = vadd.f32 1.0, %v13964_v5  ;;  %v18806_v5 = vld [vmem:[%s19329_s5 + $0xc0] ss:$16 sps:$4 sm:$0xff]  }
 0xd26   :  { %v9854_v29 = vadd.f32 1.0, %v13966_v21  ;;  %v13968_v20 = vpop.eup %13967  ;;  %v18813_v21 = vld [vmem:[%s19329_s5 + $0xc8] ss:$16 sps:$4 sm:$0xff]  }
 0xd27   :  { %13971 = vrcp.f32 %v9832_v8  ;;  %v13970_v48 = vpop.eup %13969  ;;  %v18818_v8 = vld [vmem:[%s19329_s5 + $0xa4] ss:$16 sps:$4 sm:$0xff]  }
 0xd28   :  { %13973 = vrcp.f32 %v9854_v29  ;;  %v18824_v29 = vld [vmem:[%s19329_s5 + $0xac] ss:$16 sps:$4 sm:$0xff]  }
 0xd29   :  { %13975 = vpow2.f32 %v13192_v22  ;;  %v18866_v22 = vld [vmem:[%s19329_s5 + $0x64] ss:$16 sps:$4 sm:$0xff]  }
 0xd2a   :  { %13977 = vpow2.f32 %v13194_v60  ;;  %v18872_v60 = vld [vmem:[%s19329_s5 + $0x6c] ss:$16 sps:$4 sm:$0xff]  }
 0xd34   :  { %v13972_v14 = vpop.eup %13971 }
 0xd35   :  { %v13974_v34 = vpop.eup %13973  ;;  %v9843_v43 = vmul.f32 %v13972_v14, %v13968_v20  ;;  %v9842_v11 = vmul.f32 %v13972_v14, %v18678_v2  ;;  %v18830_v20 = vld [vmem:[%s19329_s5 + $0xa0] ss:$16 sps:$4 sm:$0xff]   ;;  %v18842_v14 = vld [vmem:[%s19329_s5 + $0x84] ss:$16 sps:$4 sm:$0xff]  }
 0xd36   :  { %v9865_v32 = vmul.f32 %v13974_v34, %v13970_v48  ;;  %v13976_v54 = vpop.eup %13975  ;;  %v9864_v26 = vmul.f32 %v13974_v34, %v18681_v50  ;;  %v18837_v48 = vld [vmem:[%s19329_s5 + $0xa8] ss:$16 sps:$4 sm:$0xff]   ;;  %v18848_v34 = vld [vmem:[%s19329_s5 + $0x8c] ss:$16 sps:$4 sm:$0xff]  }
 0xd37   :  { %9845 = vrot.lane.b32.xlu1 %v9843_v43, %s14133_s6  ;;  %v13978_v35 = vpop.eup %13977  ;;  %v9839_v12 = vadd.f32 1.0, %v13976_v54  ;;  %v18854_v43 = vld [vmem:[%s19329_s5 + $0x80] ss:$16 sps:$4 sm:$0xff]  }
 0xd38   :  { %9867 = vrot.lane.b32.xlu0 %v9865_v32, %s14133_s6  ;;  %v9861_v19 = vadd.f32 1.0, %v13978_v35  ;;  %v18861_v32 = vld [vmem:[%s19329_s5 + $0x88] ss:$16 sps:$4 sm:$0xff]   ;;  %v18878_v54 = vld [vmem:[%s19329_s5 + $0x60] ss:$16 sps:$4 sm:$0xff]  }
 0xd39   :  { %13979 = vrcp.f32 %v9839_v12  ;;  %v18885_v35 = vld [vmem:[%s19329_s5 + $0x68] ss:$16 sps:$4 sm:$0xff]   ;;  %v18890_v12 = vld [vmem:[%s19329_s5 + $0x44] ss:$16 sps:$4 sm:$0xff]  }
 0xd3a   :  { %13981 = vrcp.f32 %v9861_v19  ;;  %v18896_v19 = vld [vmem:[%s19329_s5 + $0x4c] ss:$16 sps:$4 sm:$0xff]  }
 0xd46   :  { %v13980_v30 = vpop.eup %13979 }
 0xd47   :  { %v13982_v63 = vpop.eup %13981 }
 0xda9   :  { %v9846_v51 = vpop.permute.xlu1 %9845 }
 0xdaa   :  { %v9868_v46 = vpop.permute.xlu0 %9867  ;;  %v18734_v44 = vadd.f32 %v9846_v51, %v9842_v11  ;;  %v18902_v11 = vld [vmem:[%s19329_s5 + $0x40] ss:$16 sps:$4 sm:$0xff]   ;;  %v18914_v51 = vld [vmem:[%s19329_s5 + $0x24] ss:$16 sps:$4 sm:$0xff]  }
 0xdab   :  { %v18736_v62 = vadd.f32 %v9868_v46, %v9864_v26  ;;  %v18909_v26 = vld [vmem:[%s19329_s5 + $0x48] ss:$16 sps:$4 sm:$0xff]   ;;  %v18920_v46 = vld [vmem:[%s19329_s5 + $0x2c] ss:$16 sps:$4 sm:$0xff]  }
 0xdac   :  { %13983 = vtanh.f32 %v18734_v44 }
 0xdad   :  { %13985 = vtanh.f32 %v18736_v62 }
 0xdb9   :  { %v13984_v10 = vpop.eup %13983 }
 0xdba   :  { %v13986_v37 = vpop.eup %13985  ;;  %v9850_v47 = vmul.f32 %v13984_v10, %v13980_v30  ;;  %v18926_v30 = vld [vmem:[%s19329_s5 + $0x20] ss:$16 sps:$4 sm:$0xff]   ;;  %v18938_v10 = vld [vmem:[%s19329_s5 + $0x4] ss:$16 sps:$4 sm:$0xff]  }
 0xdbb   :  { %v9872_v25 = vmul.f32 %v13986_v37, %v13982_v63  ;;  %v18933_v63 = vld [vmem:[%s19329_s5 + $0x28] ss:$16 sps:$4 sm:$0xff]   ;;  %v18944_v37 = vld [vmem:[%s19329_s5 + $0xc] ss:$16 sps:$4 sm:$0xff]  }
 0xdbc   :  { %9874 = vrot.lane.b32.xlu1 %v9850_v47, %s14133_s6  ;;  %v18950_v47 = vld [vmem:[%s19329_s5] ss:$16 sps:$4 sm:$0xff]  }
 0xdbd   :  { %13196 = vst.msk [vmem:[%s19331_s7 + $0x30] sm:$0xff] %vm9537_vm1, %v9872_v25 }
 0xe2e   :  { %v9875_v0 = vpop.permute.xlu1 %9874 }
 0xe2f   :  { %13195 = vst.msk [vmem:[%s19331_s7 + $0x8] sm:$0xff] %vm9534_vm2, %v9875_v0  ;;  %v9881_v2 = vsel %vm9534_vm2, %v9875_v0, %v9872_v25  ;;  %v18957_v25 = vld [vmem:[%s19329_s5 + $0x8] ss:$16 sps:$4 sm:$0xff]  }
 0xe30   :  { %v9882_v24 = vpack.c.bf16 %v9881_v2, %v9881_v2 }
 0xe32   :  { %10108 = vmatmul.mubr.bf16.vlgmr.msra.gmra.mxu0 %v9882_v24  ;;  %10149 = vmatmul.mubr.bf16.vlgmr.msra.gmra.mxu1 %v9882_v24 }
 0xe33   :  { %10449 = vmatprep.mubr.bf16.mxu0 %v20158_v36  ;;  %10490 = vmatprep.mubr.bf16.mxu1 %v20158_v36 }
 0xe34   :  { %10418 = vmatpush1.bf16.msra.mxu0 %v18773_v1  ;;  %10459 = vmatpush1.bf16.msra.mxu1 %v18783_v52 }
 0xe35   :  { %10419 = vmatprep.subr.bf16.mxu0 %v18793_v18  ;;  %10460 = vmatprep.subr.bf16.mxu1 %v18799_v3 }
 0xe38   :  { %10420 = vmatpush1.bf16.msra.mxu0 %v18806_v5  ;;  %10461 = vmatpush1.bf16.msra.mxu1 %v18813_v21 }
 0xe39   :  { %10421 = vmatprep.subr.bf16.mxu0 %v18818_v8  ;;  %10462 = vmatprep.subr.bf16.mxu1 %v18824_v29 }
 0xe3c   :  { %10422 = vmatpush1.bf16.msra.mxu0 %v18830_v20  ;;  %10463 = vmatpush1.bf16.msra.mxu1 %v18837_v48 }
 0xe3d   :  { %10423 = vmatprep.subr.bf16.mxu0 %v18842_v14  ;;  %10464 = vmatprep.subr.bf16.mxu1 %v18848_v34 }
 0xe40   :  { %10424 = vmatpush1.bf16.msra.mxu0 %v18854_v43  ;;  %10465 = vmatpush1.bf16.msra.mxu1 %v18861_v32 }
 0xe41   :  { %10425 = vmatprep.subr.bf16.mxu0 %v18866_v22  ;;  %10466 = vmatprep.subr.bf16.mxu1 %v18872_v60 }
 0xe44   :  { %10426 = vmatpush1.bf16.msra.mxu0 %v18878_v54  ;;  %10467 = vmatpush1.bf16.msra.mxu1 %v18885_v35 }
 0xe45   :  { %10427 = vmatprep.subr.bf16.mxu0 %v18890_v12  ;;  %10468 = vmatprep.subr.bf16.mxu1 %v18896_v19 }
 0xe48   :  { %10428 = vmatpush1.bf16.msra.mxu0 %v18902_v11  ;;  %10469 = vmatpush1.bf16.msra.mxu1 %v18909_v26 }
 0xe49   :  { %10429 = vmatprep.subr.bf16.mxu0 %v18914_v51  ;;  %10470 = vmatprep.subr.bf16.mxu1 %v18920_v46 }
 0xe4c   :  { %10430 = vmatpush1.bf16.msra.mxu0 %v18926_v30  ;;  %10471 = vmatpush1.bf16.msra.mxu1 %v18933_v63 }
 0xe4d   :  { %10431 = vmatprep.subr.bf16.mxu0 %v18938_v10  ;;  %10472 = vmatprep.subr.bf16.mxu1 %v18944_v37 }
 0xe50   :  { %10432 = vmatpush1.bf16.msra.mxu0 %v18950_v47  ;;  %10473 = vmatpush1.bf16.msra.mxu1 %v18957_v25 }
 0xe51   :  { %10759 = vmatprep.subr.bf16.mxu0 %v18778_v40  ;;  %10800 = vmatprep.subr.bf16.mxu1 %v18788_v6 }
 0xef2   :  { %v10109_v42 = vpop.f32.mrf.mxu0  ;;  %v10150_v39 = vpop.f32.mrf.mxu1 }
 0xef3   :  { %v10162_v50 = vadd.f32 %v10109_v42, %v18612_v53  ;;  %v10169_v56 = vadd.f32 %v10150_v39, %v18648_v16 }
 0xef4   :  { %v10111_v31 = vpop.f32.mrf.mxu0  ;;  %v10152_v13 = vpop.f32.mrf.mxu1 }
 0xef5   :  { %v13229_v17 = vmul.f32 -1.442695, %v10162_v50  ;;  %v13231_v33 = vmul.f32 -1.442695, %v10169_v56  ;;  %v18755_v27 = vadd.f32 %v10111_v31, %v18618_v23  ;;  %v18758_v4 = vadd.f32 %v10152_v13, %v18654_v15 }
 0xef6   :  { %v10113_v9 = vpop.f32.mrf.mxu0  ;;  %v10154_v59 = vpop.f32.mrf.mxu1 }
 0xef7   :  { %13987 = vpow2.f32 %v13229_v17  ;;  %v13230_v0 = vmul.f32 -1.442695, %v18755_v27  ;;  %v13232_v2 = vmul.f32 -1.442695, %v18758_v4 }
 0xef8   :  { %13989 = vpow2.f32 %v13231_v33  ;;  %v10114_v57 = vpop.f32.mrf.mxu0  ;;  %v10155_v49 = vpop.f32.mrf.mxu1 }
 0xef9   :  { %13991 = vtanh.f32 %v18755_v27 }
 0xefa   :  { %13993 = vtanh.f32 %v18758_v4 }
 0xf04   :  { %v13988_v38 = vpop.eup %13987 }
 0xf05   :  { %v13990_v53 = vpop.eup %13989  ;;  %v10174_v45 = vadd.f32 1.0, %v13988_v38 }
 0xf06   :  { %v10196_v16 = vadd.f32 1.0, %v13990_v53  ;;  %v13992_v61 = vpop.eup %13991 }
 0xf07   :  { %13995 = vrcp.f32 %v10174_v45  ;;  %v13994_v41 = vpop.eup %13993 }
 0xf08   :  { %13997 = vrcp.f32 %v10196_v16 }
 0xf09   :  { %13999 = vpow2.f32 %v13230_v0 }
 0xf0a   :  { %14001 = vpow2.f32 %v13232_v2 }
 0xf14   :  { %v18762_v28 = vpop.eup %13995 }
 0xf15   :  { %v18764_v7 = vpop.eup %13997  ;;  %v10185_v23 = vmul.f32 %v18762_v28, %v13992_v61  ;;  %v10184_v56 = vmul.f32 %v18762_v28, %v18734_v44 }
 0xf16   :  { %v10207_v15 = vmul.f32 %v18764_v7, %v13994_v41  ;;  %v14000_v24 = vpop.eup %13999  ;;  %v10206_v31 = vmul.f32 %v18764_v7, %v18736_v62  ;;  %v20183_v41 = vld [vmem:[#allocation118_spill] sm:$0xff] }
 0xf17   :  { %10187 = vrot.lane.b32.xlu0 %v10185_v23, %s14133_s6  ;;  %v14002_v42 = vpop.eup %14001  ;;  %v10181_v39 = vadd.f32 1.0, %v14000_v24 }
 0xf18   :  { %10209 = vrot.lane.b32.xlu1 %v10207_v15, %s14133_s6  ;;  %v10203_v50 = vadd.f32 1.0, %v14002_v42 }
 0xf19   :  { %14003 = vrcp.f32 %v10181_v39 }
 0xf1a   :  { %14005 = vrcp.f32 %v10203_v50  ;;  %v20184_v50 = vld [vmem:[#allocation115_spill] sm:$0xff] }
 0xf26   :  { %v14004_v59 = vpop.eup %14003 }
 0xf27   :  { %v14006_v57 = vpop.eup %14005 }
 0xf89   :  { %v10188_v13 = vpop.permute.xlu0 %10187 }
 0xf8a   :  { %v10210_v17 = vpop.permute.xlu1 %10209  ;;  %v18970_v33 = vadd.f32 %v10188_v13, %v10184_v56 }
 0xf8b   :  { %v18972_v9 = vadd.f32 %v10210_v17, %v10206_v31  ;;  %v20185_v31 = vld [vmem:[#allocation120_spill] sm:$0xff] }
 0xf8c   :  { %14007 = vtanh.f32 %v18970_v33 }
 0xf8d   :  { %14009 = vtanh.f32 %v18972_v9 }
 0xf99   :  { %v14008_v49 = vpop.eup %14007 }
 0xf9a   :  { %v14010_v27 = vpop.eup %14009  ;;  %v10192_v44 = vmul.f32 %v14008_v49, %v14004_v59 }
 0xf9b   :  { %v10214_v4 = vmul.f32 %v14010_v27, %v14006_v57 }
 0xf9c   :  { %10216 = vrot.lane.b32.xlu0 %v10192_v44, %s14133_s6 }
 0xf9d   :  { %13234 = vst.msk [vmem:[%s19331_s7 + $0x28] sm:$0xff] %vm9537_vm1, %v10214_v4 }
0x100e   :  { %v10217_v62 = vpop.permute.xlu0 %10216 }
0x100f   :  { %13233 = vst.msk [vmem:[%s19331_s7 + $0x10] sm:$0xff] %vm9534_vm2, %v10217_v62  ;;  %v10223_v38 = vsel %vm9534_vm2, %v10217_v62, %v10214_v4 }
0x1010   :  { %v10224_v53 = vpack.c.bf16 %v10223_v38, %v10223_v38 }
0x1012   :  { %10450 = vmatmul.mubr.bf16.vlgmr.msra.gmra.mxu0 %v10224_v53  ;;  %10491 = vmatmul.mubr.bf16.vlgmr.msra.gmra.mxu1 %v10224_v53 }
0x1013   :  { %10760 = vmatpush1.bf16.msra.mxu0 %v18773_v1  ;;  %10801 = vmatpush1.bf16.msra.mxu1 %v18783_v52 }
0x1014   :  { %10761 = vmatprep.subr.bf16.mxu0 %v18793_v18  ;;  %10802 = vmatprep.subr.bf16.mxu1 %v18799_v3 }
0x1015   :  { %10791 = vmatprep.mubr.bf16.mxu0 %v20158_v36  ;;  %10832 = vmatprep.mubr.bf16.mxu1 %v20158_v36 }
0x1017   :  { %10762 = vmatpush1.bf16.msra.mxu0 %v18806_v5  ;;  %10803 = vmatpush1.bf16.msra.mxu1 %v18813_v21 }
0x1018   :  { %10763 = vmatprep.subr.bf16.mxu0 %v18818_v8  ;;  %10804 = vmatprep.subr.bf16.mxu1 %v18824_v29 }
0x101b   :  { %10764 = vmatpush1.bf16.msra.mxu0 %v18830_v20  ;;  %10805 = vmatpush1.bf16.msra.mxu1 %v18837_v48 }
0x101c   :  { %10765 = vmatprep.subr.bf16.mxu0 %v18842_v14  ;;  %10806 = vmatprep.subr.bf16.mxu1 %v18848_v34 }
0x101f   :  { %10766 = vmatpush1.bf16.msra.mxu0 %v18854_v43  ;;  %10807 = vmatpush1.bf16.msra.mxu1 %v18861_v32 }
0x1020   :  { %10767 = vmatprep.subr.bf16.mxu0 %v18866_v22  ;;  %10808 = vmatprep.subr.bf16.mxu1 %v18872_v60 }
0x1023   :  { %10768 = vmatpush1.bf16.msra.mxu0 %v18878_v54  ;;  %10809 = vmatpush1.bf16.msra.mxu1 %v18885_v35 }
0x1024   :  { %10769 = vmatprep.subr.bf16.mxu0 %v18890_v12  ;;  %10810 = vmatprep.subr.bf16.mxu1 %v18896_v19 }
0x1027   :  { %10770 = vmatpush1.bf16.msra.mxu0 %v18902_v11  ;;  %10811 = vmatpush1.bf16.msra.mxu1 %v18909_v26 }
0x1028   :  { %10771 = vmatprep.subr.bf16.mxu0 %v18914_v51  ;;  %10812 = vmatprep.subr.bf16.mxu1 %v18920_v46 }
0x102b   :  { %10772 = vmatpush1.bf16.msra.mxu0 %v18926_v30  ;;  %10813 = vmatpush1.bf16.msra.mxu1 %v18933_v63 }
0x102c   :  { %10773 = vmatprep.subr.bf16.mxu0 %v18938_v10  ;;  %10814 = vmatprep.subr.bf16.mxu1 %v18944_v37 }
0x102f   :  { %10774 = vmatpush1.bf16.msra.mxu0 %v18950_v47  ;;  %10815 = vmatpush1.bf16.msra.mxu1 %v18957_v25 }
0x1030   :  { %11093 = vmatprep.subr.bf16.mxu0 %v18778_v40  ;;  %11134 = vmatprep.subr.bf16.mxu1 %v18788_v6 }
0x10d2   :  { %v10451_v45 = vpop.f32.mrf.mxu0  ;;  %v10492_v16 = vpop.f32.mrf.mxu1 }
0x10d3   :  { %v10504_v61 = vadd.f32 %v10451_v45, %v18623_v58  ;;  %v10511_v28 = vadd.f32 %v10492_v16, %v20183_v41 }
0x10d4   :  { %v10453_v7 = vpop.f32.mrf.mxu0  ;;  %v10494_v23 = vpop.f32.mrf.mxu1 }
0x10d5   :  { %v13267_v15 = vmul.f32 -1.442695, %v10504_v61  ;;  %v13269_v0 = vmul.f32 -1.442695, %v10511_v28  ;;  %v10505_v56 = vadd.f32 %v10453_v7, %v20184_v50  ;;  %v10512_v13 = vadd.f32 %v10494_v23, %v20185_v31 }
0x10d6   :  { %v10455_v2 = vpop.f32.mrf.mxu0  ;;  %v10496_v24 = vpop.f32.mrf.mxu1 }
0x10d7   :  { %14011 = vpow2.f32 %v13267_v15  ;;  %v13268_v53 = vmul.f32 -1.442695, %v10505_v56  ;;  %v13270_v45 = vmul.f32 -1.442695, %v10512_v13 }
0x10d8   :  { %14013 = vpow2.f32 %v13269_v0  ;;  %v10456_v42 = vpop.f32.mrf.mxu0  ;;  %v10497_v39 = vpop.f32.mrf.mxu1 }
0x10d9   :  { %14015 = vtanh.f32 %v10505_v56 }
0x10da   :  { %14017 = vtanh.f32 %v10512_v13 }
0x10e4   :  { %v14012_v17 = vpop.eup %14011 }
0x10e5   :  { %v14014_v59 = vpop.eup %14013  ;;  %v10516_v57 = vadd.f32 1.0, %v14012_v17 }
0x10e6   :  { %v10538_v58 = vadd.f32 1.0, %v14014_v59  ;;  %v14016_v49 = vpop.eup %14015 }
0x10e7   :  { %14019 = vrcp.f32 %v10516_v57  ;;  %v14018_v27 = vpop.eup %14017 }
0x10e8   :  { %14021 = vrcp.f32 %v10538_v58  ;;  %v20186_v58 = vld [vmem:[#allocation117_spill] sm:$0xff] }
0x10e9   :  { %14023 = vpow2.f32 %v13268_v53 }
0x10ea   :  { %14025 = vpow2.f32 %v13270_v45 }
0x10f4   :  { %v14020_v44 = vpop.eup %14019 }
0x10f5   :  { %v14022_v4 = vpop.eup %14021  ;;  %v10527_v62 = vmul.f32 %v14020_v44, %v14016_v49  ;;  %v10526_v7 = vmul.f32 %v14020_v44, %v18970_v33 }
0x10f6   :  { %v10549_v38 = vmul.f32 %v14022_v4, %v14018_v27  ;;  %v14024_v16 = vpop.eup %14023  ;;  %v10548_v23 = vmul.f32 %v14022_v4, %v18972_v9  ;;  %v20187_v27 = vld [vmem:[#allocation114_spill] sm:$0xff] }
0x10f7   :  { %10529 = vrot.lane.b32.xlu1 %v10527_v62, %s14133_s6  ;;  %v14026_v61 = vpop.eup %14025  ;;  %v10523_v41 = vadd.f32 1.0, %v14024_v16 }
0x10f8   :  { %10551 = vrot.lane.b32.xlu0 %v10549_v38, %s14133_s6  ;;  %v10545_v28 = vadd.f32 1.0, %v14026_v61 }
0x10f9   :  { %14027 = vrcp.f32 %v10523_v41 }
0x10fa   :  { %14029 = vrcp.f32 %v10545_v28  ;;  %v20188_v28 = vld [vmem:[#allocation119_spill] sm:$0xff] }
0x1106   :  { %v14028_v42 = vpop.eup %14027 }
0x1107   :  { %v14030_v39 = vpop.eup %14029 }
0x1169   :  { %v10530_v15 = vpop.permute.xlu1 %10529 }
0x116a   :  { %v10552_v0 = vpop.permute.xlu0 %10551  ;;  %v19028_v2 = vadd.f32 %v10530_v15, %v10526_v7  ;;  %v20189_v7 = vld [vmem:[#allocation116_spill] sm:$0xff] }
0x116b   :  { %v19030_v24 = vadd.f32 %v10552_v0, %v10548_v23 }
0x116c   :  { %14031 = vtanh.f32 %v19028_v2 }
0x116d   :  { %14033 = vtanh.f32 %v19030_v24 }
0x1179   :  { %v14032_v50 = vpop.eup %14031 }
0x117a   :  { %v14034_v56 = vpop.eup %14033  ;;  %v10534_v31 = vmul.f32 %v14032_v50, %v14028_v42 }
0x117b   :  { %v10556_v33 = vmul.f32 %v14034_v56, %v14030_v39 }
0x117c   :  { %10558 = vrot.lane.b32.xlu1 %v10534_v31, %s14133_s6 }
0x117d   :  { %13272 = vst.msk [vmem:[%s19331_s7 + $0x20] sm:$0xff] %vm9537_vm1, %v10556_v33 }
0x11ee   :  { %v10559_v9 = vpop.permute.xlu1 %10558 }
0x11ef   :  { %13271 = vst.msk [vmem:[%s19331_s7 + $0x18] sm:$0xff] %vm9534_vm2, %v10559_v9  ;;  %v10565_v13 = vsel %vm9534_vm2, %v10559_v9, %v10556_v33 }
0x11f0   :  { %v10566_v17 = vpack.c.bf16 %v10565_v13, %v10565_v13 }
0x11f2   :  { %10792 = vmatmul.mubr.bf16.vlgmr.msra.gmra.mxu0 %v10566_v17  ;;  %10833 = vmatmul.mubr.bf16.vlgmr.msra.gmra.mxu1 %v10566_v17 }
0x11f3   :  { %11094 = vmatpush1.bf16.msra.mxu0 %v18773_v1  ;;  %11135 = vmatpush1.bf16.msra.mxu1 %v18783_v52 }
0x11f4   :  { %11095 = vmatprep.subr.bf16.mxu0 %v18793_v18  ;;  %11136 = vmatprep.subr.bf16.mxu1 %v18799_v3 }
0x11f5   :  { %11125 = vmatprep.mubr.bf16.mxu0 %v20158_v36  ;;  %11166 = vmatprep.mubr.bf16.mxu1 %v20158_v36 }
0x11f7   :  { %11096 = vmatpush1.bf16.msra.mxu0 %v18806_v5  ;;  %11137 = vmatpush1.bf16.msra.mxu1 %v18813_v21 }
0x11f8   :  { %11097 = vmatprep.subr.bf16.mxu0 %v18818_v8  ;;  %11138 = vmatprep.subr.bf16.mxu1 %v18824_v29 }
0x11fb   :  { %11098 = vmatpush1.bf16.msra.mxu0 %v18830_v20  ;;  %11139 = vmatpush1.bf16.msra.mxu1 %v18837_v48 }
0x11fc   :  { %11099 = vmatprep.subr.bf16.mxu0 %v18842_v14  ;;  %11140 = vmatprep.subr.bf16.mxu1 %v18848_v34 }
0x11ff   :  { %11100 = vmatpush1.bf16.msra.mxu0 %v18854_v43  ;;  %11141 = vmatpush1.bf16.msra.mxu1 %v18861_v32 }
0x1200   :  { %11101 = vmatprep.subr.bf16.mxu0 %v18866_v22  ;;  %11142 = vmatprep.subr.bf16.mxu1 %v18872_v60 }
0x1203   :  { %11102 = vmatpush1.bf16.msra.mxu0 %v18878_v54  ;;  %11143 = vmatpush1.bf16.msra.mxu1 %v18885_v35 }
0x1204   :  { %11103 = vmatprep.subr.bf16.mxu0 %v18890_v12  ;;  %11144 = vmatprep.subr.bf16.mxu1 %v18896_v19 }
0x1207   :  { %11104 = vmatpush1.bf16.msra.mxu0 %v18902_v11  ;;  %11145 = vmatpush1.bf16.msra.mxu1 %v18909_v26 }
0x1208   :  { %11105 = vmatprep.subr.bf16.mxu0 %v18914_v51  ;;  %11146 = vmatprep.subr.bf16.mxu1 %v18920_v46 }
0x120b   :  { %11106 = vmatpush1.bf16.msra.mxu0 %v18926_v30  ;;  %11147 = vmatpush1.bf16.msra.mxu1 %v18933_v63 }
0x120c   :  { %11107 = vmatprep.subr.bf16.mxu0 %v18938_v10  ;;  %11148 = vmatprep.subr.bf16.mxu1 %v18944_v37 }
0x120f   :  { %11108 = vmatpush1.bf16.msra.mxu0 %v18950_v47  ;;  %11149 = vmatpush1.bf16.msra.mxu1 %v18957_v25 }
0x1210   :  { %11427 = vmatprep.subr.bf16.mxu0 %v18778_v40  ;;  %11468 = vmatprep.subr.bf16.mxu1 %v18788_v6 }
0x12b2   :  { %v10793_v59 = vpop.f32.mrf.mxu0  ;;  %v10834_v57 = vpop.f32.mrf.mxu1 }
0x12b3   :  { %v10843_v49 = vadd.f32 %v10793_v59, %v20186_v58  ;;  %v10847_v44 = vadd.f32 %v10834_v57, %v20187_v27 }
0x12b4   :  { %v10795_v4 = vpop.f32.mrf.mxu0  ;;  %v10836_v62 = vpop.f32.mrf.mxu1 }
0x12b5   :  { %v13305_v38 = vmul.f32 -1.442695, %v10843_v49  ;;  %v13307_v53 = vmul.f32 -1.442695, %v10847_v44  ;;  %v10844_v40 = vadd.f32 %v10795_v4, %v20188_v28  ;;  %v10848_v6 = vadd.f32 %v10836_v62, %v20189_v7 }
0x12b6   :  { %v10797_v45 = vpop.f32.mrf.mxu0  ;;  %v10838_v16 = vpop.f32.mrf.mxu1 }
0x12b7   :  { %14035 = vpow2.f32 %v13305_v38  ;;  %v13306_v13 = vmul.f32 -1.442695, %v10844_v40  ;;  %v13308_v17 = vmul.f32 -1.442695, %v10848_v6 }
0x12b8   :  { %14037 = vpow2.f32 %v13307_v53  ;;  %v10798_v61 = vpop.f32.mrf.mxu0  ;;  %v10839_v41 = vpop.f32.mrf.mxu1 }
0x12b9   :  { %14039 = vtanh.f32 %v10844_v40 }
0x12ba   :  { %14041 = vtanh.f32 %v10848_v6 }
0x12c4   :  { %v14036_v23 = vpop.eup %14035 }
0x12c5   :  { %v14038_v15 = vpop.eup %14037  ;;  %v10852_v0 = vadd.f32 1.0, %v14036_v23 }
0x12c6   :  { %v10874_v42 = vadd.f32 1.0, %v14038_v15  ;;  %v14040_v39 = vpop.eup %14039 }
0x12c7   :  { %14043 = vrcp.f32 %v10852_v0  ;;  %v14042_v50 = vpop.eup %14041 }
0x12c8   :  { %14045 = vrcp.f32 %v10874_v42 }
0x12c9   :  { %14047 = vpow2.f32 %v13306_v13 }
0x12ca   :  { %14049 = vpow2.f32 %v13308_v17 }
0x12d4   :  { %v14044_v56 = vpop.eup %14043 }
0x12d5   :  { %v14046_v31 = vpop.eup %14045  ;;  %v10863_v33 = vmul.f32 %v14044_v56, %v14040_v39  ;;  %v10862_v27 = vmul.f32 %v14044_v56, %v19028_v2 }
0x12d6   :  { %v10885_v9 = vmul.f32 %v14046_v31, %v14042_v50  ;;  %v14048_v59 = vpop.eup %14047  ;;  %v10884_v44 = vmul.f32 %v14046_v31, %v19030_v24 }
0x12d7   :  { %10865 = vrot.lane.b32.xlu0 %v10863_v33, %s14133_s6  ;;  %v14050_v57 = vpop.eup %14049  ;;  %v10859_v58 = vadd.f32 1.0, %v14048_v59 }
0x12d8   :  { %10887 = vrot.lane.b32.xlu1 %v10885_v9, %s14133_s6  ;;  %v10881_v49 = vadd.f32 1.0, %v14050_v57 }
0x12d9   :  { %14051 = vrcp.f32 %v10859_v58 }
0x12da   :  { %14053 = vrcp.f32 %v10881_v49 }
0x12e6   :  { %v14052_v45 = vpop.eup %14051 }
0x12e7   :  { %v14054_v16 = vpop.eup %14053 }
0x1349   :  { %v10866_v4 = vpop.permute.xlu0 %10865 }
0x134a   :  { %v10888_v62 = vpop.permute.xlu1 %10887  ;;  %v19086_v38 = vadd.f32 %v10866_v4, %v10862_v27 }
0x134b   :  { %v19088_v53 = vadd.f32 %v10888_v62, %v10884_v44 }
0x134c   :  { %14055 = vtanh.f32 %v19086_v38 }
0x134d   :  { %14057 = vtanh.f32 %v19088_v53 }
0x1359   :  { %v14056_v61 = vpop.eup %14055 }
0x135a   :  { %v14058_v41 = vpop.eup %14057  ;;  %v10870_v28 = vmul.f32 %v14056_v61, %v14052_v45  ;;  %v20195_v45 = vld [vmem:[#allocation110_spill] sm:$0xff] }
0x135b   :  { %v10892_v2 = vmul.f32 %v14058_v41, %v14054_v16 }
0x135c   :  { %10894 = vrot.lane.b32.xlu0 %v10870_v28, %s14133_s6 }
0x135d   :  { %13310 = vst.msk [vmem:[%s19331_s7 + $0x18] sm:$0xff] %vm9537_vm1, %v10892_v2 }
0x13ce   :  { %v10895_v24 = vpop.permute.xlu0 %10894 }
0x13cf   :  { %13309 = vst.msk [vmem:[%s19331_s7 + $0x20] sm:$0xff] %vm9534_vm2, %v10895_v24  ;;  %v10899_v40 = vsel %vm9534_vm2, %v10895_v24, %v10892_v2 }
0x13d0   :  { %v10900_v7 = vpack.c.bf16 %v10899_v40, %v10899_v40 }
0x13d2   :  { %11126 = vmatmul.mubr.bf16.vlgmr.msra.gmra.mxu0 %v10900_v7  ;;  %11167 = vmatmul.mubr.bf16.vlgmr.msra.gmra.mxu1 %v10900_v7 }
0x13d3   :  { %11428 = vmatpush1.bf16.msra.mxu0 %v18773_v1  ;;  %11469 = vmatpush1.bf16.msra.mxu1 %v18783_v52 }
0x13d4   :  { %11429 = vmatprep.subr.bf16.mxu0 %v18793_v18  ;;  %11470 = vmatprep.subr.bf16.mxu1 %v18799_v3  ;;  %v20190_v18 = vld [vmem:[#allocation121_spill] sm:$0xff] }
0x13d5   :  { %11459 = vmatprep.mubr.bf16.mxu0 %v20158_v36  ;;  %11500 = vmatprep.mubr.bf16.mxu1 %v20158_v36 }
0x13d7   :  { %11430 = vmatpush1.bf16.msra.mxu0 %v18806_v5  ;;  %11471 = vmatpush1.bf16.msra.mxu1 %v18813_v21  ;;  %v20191_v5 = vld [vmem:[#allocation112_spill] sm:$0xff] }
0x13d8   :  { %11431 = vmatprep.subr.bf16.mxu0 %v18818_v8  ;;  %11472 = vmatprep.subr.bf16.mxu1 %v18824_v29 }
0x13db   :  { %11432 = vmatpush1.bf16.msra.mxu0 %v18830_v20  ;;  %11473 = vmatpush1.bf16.msra.mxu1 %v18837_v48 }
0x13dc   :  { %11433 = vmatprep.subr.bf16.mxu0 %v18842_v14  ;;  %11474 = vmatprep.subr.bf16.mxu1 %v18848_v34 }
0x13df   :  { %11434 = vmatpush1.bf16.msra.mxu0 %v18854_v43  ;;  %11475 = vmatpush1.bf16.msra.mxu1 %v18861_v32 }
0x13e0   :  { %11435 = vmatprep.subr.bf16.mxu0 %v18866_v22  ;;  %11476 = vmatprep.subr.bf16.mxu1 %v18872_v60  ;;  %v20192_v22 = vld [vmem:[#allocation122_spill] sm:$0xff] }
0x13e3   :  { %11436 = vmatpush1.bf16.msra.mxu0 %v18878_v54  ;;  %11477 = vmatpush1.bf16.msra.mxu1 %v18885_v35  ;;  %v20193_v54 = vld [vmem:[#allocation113_spill] sm:$0xff] }
0x13e4   :  { %11437 = vmatprep.subr.bf16.mxu0 %v18890_v12  ;;  %11478 = vmatprep.subr.bf16.mxu1 %v18896_v19 }
0x13e7   :  { %11438 = vmatpush1.bf16.msra.mxu0 %v18902_v11  ;;  %11479 = vmatpush1.bf16.msra.mxu1 %v18909_v26 }
0x13e8   :  { %11439 = vmatprep.subr.bf16.mxu0 %v18914_v51  ;;  %11480 = vmatprep.subr.bf16.mxu1 %v18920_v46 }
0x13eb   :  { %11440 = vmatpush1.bf16.msra.mxu0 %v18926_v30  ;;  %11481 = vmatpush1.bf16.msra.mxu1 %v18933_v63 }
0x13ec   :  { %11441 = vmatprep.subr.bf16.mxu0 %v18938_v10  ;;  %11482 = vmatprep.subr.bf16.mxu1 %v18944_v37 }
0x13ef   :  { %11442 = vmatpush1.bf16.msra.mxu0 %v18950_v47  ;;  %11483 = vmatpush1.bf16.msra.mxu1 %v18957_v25 }
0x1492   :  { %v11127_v1 = vpop.f32.mrf.mxu0  ;;  %v11168_v52 = vpop.f32.mrf.mxu1 }
0x1493   :  { %v11177_v3 = vadd.f32 %v11127_v1, %v20190_v18  ;;  %v11181_v21 = vadd.f32 %v11168_v52, %v20191_v5  ;;  %v20196_v52 = vld [vmem:[#allocation124_spill] sm:$0xff] }
0x1494   :  { %v11129_v8 = vpop.f32.mrf.mxu0  ;;  %v11170_v29 = vpop.f32.mrf.mxu1 }
0x1495   :  { %v13343_v20 = vmul.f32 -1.442695, %v11177_v3  ;;  %v13345_v48 = vmul.f32 -1.442695, %v11181_v21  ;;  %v11178_v60 = vadd.f32 %v11129_v8, %v20192_v22  ;;  %v11182_v35 = vadd.f32 %v11170_v29, %v20193_v54  ;;  %v13635_v22 = vld [vmem:[%s19329_s5 + $0xe0] ss:$16 sps:$4 sm:$0xff]  }
0x1496   :  { %v11131_v14 = vpop.f32.mrf.mxu0  ;;  %v11172_v34 = vpop.f32.mrf.mxu1  ;;  %v13638_v54 = vld [vmem:[%s19329_s5 + $0xe8] ss:$16 sps:$4 sm:$0xff]  }
0x1497   :  { %14059 = vpow2.f32 %v13343_v20  ;;  %v13344_v47 = vmul.f32 -1.442695, %v11178_v60  ;;  %v13346_v25 = vmul.f32 -1.442695, %v11182_v35 }
0x1498   :  { %14061 = vpow2.f32 %v13345_v48  ;;  %v11132_v43 = vpop.f32.mrf.mxu0  ;;  %v11173_v32 = vpop.f32.mrf.mxu1 }
0x1499   :  { %14063 = vtanh.f32 %v11178_v60  ;;  %v13637_v60 = vld [vmem:[%s19329_s5 + $0xe4] ss:$16 sps:$4 sm:$0xff]  }
0x149a   :  { %14065 = vtanh.f32 %v11182_v35  ;;  %v13640_v35 = vld [vmem:[%s19329_s5 + $0xec] ss:$16 sps:$4 sm:$0xff]   ;;  %11761 = vmatprep.subr.bf16.mxu0 %v13637_v60 }
0x149b   :  { %11802 = vmatprep.subr.bf16.mxu1 %v13640_v35 }
0x14a4   :  { %v14060_v12 = vpop.eup %14059 }
0x14a5   :  { %v14062_v19 = vpop.eup %14061  ;;  %v11186_v11 = vadd.f32 1.0, %v14060_v12  ;;  %v13643_v12 = vld [vmem:[%s19329_s5 + $0xc4] ss:$16 sps:$4 sm:$0xff]  }
0x14a6   :  { %v11208_v26 = vadd.f32 1.0, %v14062_v19  ;;  %v14064_v51 = vpop.eup %14063  ;;  %v13646_v19 = vld [vmem:[%s19329_s5 + $0xcc] ss:$16 sps:$4 sm:$0xff]  }
0x14a7   :  { %14067 = vrcp.f32 %v11186_v11  ;;  %v14066_v46 = vpop.eup %14065  ;;  %v13641_v11 = vld [vmem:[%s19329_s5 + $0xc0] ss:$16 sps:$4 sm:$0xff]  }
0x14a8   :  { %14069 = vrcp.f32 %v11208_v26  ;;  %v13644_v26 = vld [vmem:[%s19329_s5 + $0xc8] ss:$16 sps:$4 sm:$0xff]  }
0x14a9   :  { %14071 = vpow2.f32 %v13344_v47  ;;  %v13653_v47 = vld [vmem:[%s19329_s5 + $0x80] ss:$16 sps:$4 sm:$0xff]  }
0x14aa   :  { %14073 = vpow2.f32 %v13346_v25  ;;  %v13656_v25 = vld [vmem:[%s19329_s5 + $0x88] ss:$16 sps:$4 sm:$0xff]  }
0x14b4   :  { %v14068_v30 = vpop.eup %14067 }
0x14b5   :  { %v14070_v63 = vpop.eup %14069  ;;  %v11197_v10 = vmul.f32 %v14068_v30, %v14064_v51  ;;  %v11196_v42 = vmul.f32 %v14068_v30, %v19086_v38  ;;  %v20194_v38 = vld [vmem:[#allocation123_spill] sm:$0xff] }
0x14b6   :  { %v11219_v37 = vmul.f32 %v14070_v63, %v14066_v46  ;;  %v14072_v6 = vpop.eup %14071  ;;  %v11218_v39 = vmul.f32 %v14070_v63, %v19088_v53  ;;  %v13649_v51 = vld [vmem:[%s19329_s5 + $0xa4] ss:$16 sps:$4 sm:$0xff]   ;;  %v13652_v46 = vld [vmem:[%s19329_s5 + $0xac] ss:$16 sps:$4 sm:$0xff]   ;;  %v13647_v30 = vld [vmem:[%s19329_s5 + $0xa0] ss:$16 sps:$4 sm:$0xff]  }
0x14b7   :  { %11199 = vrot.lane.b32.xlu1 %v11197_v10, %s14133_s6  ;;  %v14074_v23 = vpop.eup %14073  ;;  %v11193_v15 = vadd.f32 1.0, %v14072_v6  ;;  %v13650_v63 = vld [vmem:[%s19329_s5 + $0xa8] ss:$16 sps:$4 sm:$0xff]   ;;  %v13655_v10 = vld [vmem:[%s19329_s5 + $0x84] ss:$16 sps:$4 sm:$0xff]  }
0x14b8   :  { %11221 = vrot.lane.b32.xlu0 %v11219_v37, %s14133_s6  ;;  %v11215_v0 = vadd.f32 1.0, %v14074_v23  ;;  %v13658_v37 = vld [vmem:[%s19329_s5 + $0x8c] ss:$16 sps:$4 sm:$0xff]   ;;  %v13661_v6 = vld [vmem:[%s19329_s5 + $0x64] ss:$16 sps:$4 sm:$0xff]  }
0x14b9   :  { %14075 = vrcp.f32 %v11193_v15  ;;  %v13664_v23 = vld [vmem:[%s19329_s5 + $0x6c] ss:$16 sps:$4 sm:$0xff]   ;;  %v13659_v15 = vld [vmem:[%s19329_s5 + $0x60] ss:$16 sps:$4 sm:$0xff]  }
0x14ba   :  { %14077 = vrcp.f32 %v11215_v0  ;;  %v13662_v0 = vld [vmem:[%s19329_s5 + $0x68] ss:$16 sps:$4 sm:$0xff]  }
0x14c6   :  { %v14076_v9 = vpop.eup %14075 }
0x14c7   :  { %v14078_v13 = vpop.eup %14077 }
0x1529   :  { %v11200_v50 = vpop.permute.xlu1 %11199 }
0x152a   :  { %v11222_v56 = vpop.permute.xlu0 %11221  ;;  %v19142_v31 = vadd.f32 %v11200_v50, %v11196_v42  ;;  %v13667_v42 = vld [vmem:[%s19329_s5 + $0x44] ss:$16 sps:$4 sm:$0xff]   ;;  %v13665_v50 = vld [vmem:[%s19329_s5 + $0x40] ss:$16 sps:$4 sm:$0xff]  }
0x152b   :  { %v19144_v33 = vadd.f32 %v11222_v56, %v11218_v39  ;;  %v13670_v39 = vld [vmem:[%s19329_s5 + $0x4c] ss:$16 sps:$4 sm:$0xff]   ;;  %v13668_v56 = vld [vmem:[%s19329_s5 + $0x48] ss:$16 sps:$4 sm:$0xff]  }
0x152c   :  { %14079 = vtanh.f32 %v19142_v31 }
0x152d   :  { %14081 = vtanh.f32 %v19144_v33 }
0x1539   :  { %v14080_v17 = vpop.eup %14079 }
0x153a   :  { %v14082_v59 = vpop.eup %14081  ;;  %v11204_v57 = vmul.f32 %v14080_v17, %v14076_v9  ;;  %v13673_v9 = vld [vmem:[%s19329_s5 + $0x24] ss:$16 sps:$4 sm:$0xff]   ;;  %v13671_v17 = vld [vmem:[%s19329_s5 + $0x20] ss:$16 sps:$4 sm:$0xff]  }
0x153b   :  { %v11226_v58 = vmul.f32 %v14082_v59, %v14078_v13  ;;  %v13676_v13 = vld [vmem:[%s19329_s5 + $0x2c] ss:$16 sps:$4 sm:$0xff]   ;;  %v13674_v59 = vld [vmem:[%s19329_s5 + $0x28] ss:$16 sps:$4 sm:$0xff]  }
0x153c   :  { %11228 = vrot.lane.b32.xlu1 %v11204_v57, %s14133_s6  ;;  %v13679_v57 = vld [vmem:[%s19329_s5 + $0x4] ss:$16 sps:$4 sm:$0xff]  }
0x153d   :  { %13348 = vst.msk [vmem:[%s19331_s7 + $0x10] sm:$0xff] %vm9537_vm1, %v11226_v58 }
0x15ae   :  { %v11229_v49 = vpop.permute.xlu1 %11228 }
0x15af   :  { %13347 = vst.msk [vmem:[%s19331_s7 + $0x28] sm:$0xff] %vm9534_vm2, %v11229_v49  ;;  %v11233_v27 = vsel %vm9534_vm2, %v11229_v49, %v11226_v58  ;;  %v13682_v58 = vld [vmem:[%s19329_s5 + $0xc] ss:$16 sps:$4 sm:$0xff]   ;;  %v13677_v49 = vld [vmem:[%s19329_s5] ss:$16 sps:$4 sm:$0xff]  }
0x15b0   :  { %v11234_v44 = vpack.c.bf16 %v11233_v27, %v11233_v27  ;;  %v13680_v27 = vld [vmem:[%s19329_s5 + $0x8] ss:$16 sps:$4 sm:$0xff]  }
0x15b2   :  { %11460 = vmatmul.mubr.bf16.vlgmr.msra.gmra.mxu0 %v11234_v44  ;;  %11501 = vmatmul.mubr.bf16.vlgmr.msra.gmra.mxu1 %v11234_v44 }
0x15b3   :  { %11793 = vmatprep.mubr.bf16.mxu0 %v20158_v36  ;;  %11834 = vmatprep.mubr.bf16.mxu1 %v20158_v36  ;;  %v20197_v36 = vld [vmem:[#allocation111_spill] sm:$0xff] }
0x15b4   :  { %11762 = vmatpush1.bf16.msra.mxu0 %v13635_v22  ;;  %11803 = vmatpush1.bf16.msra.mxu1 %v13638_v54 }
0x15b5   :  { %11763 = vmatprep.subr.bf16.mxu0 %v13643_v12  ;;  %11804 = vmatprep.subr.bf16.mxu1 %v13646_v19  ;;  %v20200_v19 = vld [vmem:[#allocation109_spill] sm:$0xff] }
0x15b8   :  { %11764 = vmatpush1.bf16.msra.mxu0 %v13641_v11  ;;  %11805 = vmatpush1.bf16.msra.mxu1 %v13644_v26 }
0x15b9   :  { %11765 = vmatprep.subr.bf16.mxu0 %v13649_v51  ;;  %11806 = vmatprep.subr.bf16.mxu1 %v13652_v46 }
0x15bc   :  { %11766 = vmatpush1.bf16.msra.mxu0 %v13647_v30  ;;  %11807 = vmatpush1.bf16.msra.mxu1 %v13650_v63 }
0x15bd   :  { %11767 = vmatprep.subr.bf16.mxu0 %v13655_v10  ;;  %11808 = vmatprep.subr.bf16.mxu1 %v13658_v37 }
0x15c0   :  { %11768 = vmatpush1.bf16.msra.mxu0 %v13653_v47  ;;  %11809 = vmatpush1.bf16.msra.mxu1 %v13656_v25 }
0x15c1   :  { %11769 = vmatprep.subr.bf16.mxu0 %v13661_v6  ;;  %11810 = vmatprep.subr.bf16.mxu1 %v13664_v23 }
0x15c4   :  { %11770 = vmatpush1.bf16.msra.mxu0 %v13659_v15  ;;  %11811 = vmatpush1.bf16.msra.mxu1 %v13662_v0 }
0x15c5   :  { %11771 = vmatprep.subr.bf16.mxu0 %v13667_v42  ;;  %11812 = vmatprep.subr.bf16.mxu1 %v13670_v39 }
0x15c8   :  { %11772 = vmatpush1.bf16.msra.mxu0 %v13665_v50  ;;  %11813 = vmatpush1.bf16.msra.mxu1 %v13668_v56 }
0x15c9   :  { %11773 = vmatprep.subr.bf16.mxu0 %v13673_v9  ;;  %11814 = vmatprep.subr.bf16.mxu1 %v13676_v13 }
0x15cc   :  { %11774 = vmatpush1.bf16.msra.mxu0 %v13671_v17  ;;  %11815 = vmatpush1.bf16.msra.mxu1 %v13674_v59 }
0x15cd   :  { %11775 = vmatprep.subr.bf16.mxu0 %v13679_v57  ;;  %11816 = vmatprep.subr.bf16.mxu1 %v13682_v58 }
0x15d0   :  { %11776 = vmatpush1.bf16.msra.mxu0 %v13677_v49  ;;  %11817 = vmatpush1.bf16.msra.mxu1 %v13680_v27 }
0x1672   :  { %v11461_v4 = vpop.f32.mrf.mxu0  ;;  %v11502_v62 = vpop.f32.mrf.mxu1 }
0x1673   :  { %v11511_v53 = vadd.f32 %v11461_v4, %v20194_v38  ;;  %v11515_v16 = vadd.f32 %v11502_v62, %v20195_v45 }
0x1674   :  { %v11463_v61 = vpop.f32.mrf.mxu0  ;;  %v11504_v41 = vpop.f32.mrf.mxu1 }
0x1675   :  { %v13381_v28 = vmul.f32 -1.442695, %v11511_v53  ;;  %v13383_v2 = vmul.f32 -1.442695, %v11515_v16  ;;  %v19163_v18 = vadd.f32 %v11463_v61, %v20196_v52  ;;  %v19166_v3 = vadd.f32 %v11504_v41, %v20197_v36 }
0x1676   :  { %v11465_v24 = vpop.f32.mrf.mxu0  ;;  %v11506_v40 = vpop.f32.mrf.mxu1 }
0x1677   :  { %14083 = vpow2.f32 %v13381_v28  ;;  %v13382_v44 = vmul.f32 -1.442695, %v19163_v18  ;;  %v13384_v4 = vmul.f32 -1.442695, %v19166_v3 }
0x1678   :  { %14085 = vpow2.f32 %v13383_v2  ;;  %v11466_v7 = vpop.f32.mrf.mxu0  ;;  %v11507_v1 = vpop.f32.mrf.mxu1 }
0x1679   :  { %14087 = vtanh.f32 %v19163_v18 }
0x167a   :  { %14089 = vtanh.f32 %v19166_v3 }
0x1684   :  { %v14084_v5 = vpop.eup %14083 }
0x1685   :  { %v14086_v21 = vpop.eup %14085  ;;  %v11520_v8 = vadd.f32 1.0, %v14084_v5 }
0x1686   :  { %v11542_v29 = vadd.f32 1.0, %v14086_v21  ;;  %v14088_v20 = vpop.eup %14087 }
0x1687   :  { %14091 = vrcp.f32 %v11520_v8  ;;  %v14090_v48 = vpop.eup %14089  ;;  %v20198_v8 = vld [vmem:[#allocation125_spill] sm:$0xff] }
0x1688   :  { %14093 = vrcp.f32 %v11542_v29 }
0x1689   :  { %14095 = vpow2.f32 %v13382_v44 }
0x168a   :  { %14097 = vpow2.f32 %v13384_v4 }
0x1694   :  { %v19170_v14 = vpop.eup %14091 }
0x1695   :  { %v19172_v34 = vpop.eup %14093  ;;  %v11531_v43 = vmul.f32 %v19170_v14, %v14088_v20  ;;  %v11530_v16 = vmul.f32 %v19170_v14, %v19142_v31  ;;  %v20199_v20 = vld [vmem:[#allocation108_spill] sm:$0xff] }
0x1696   :  { %v11553_v32 = vmul.f32 %v19172_v34, %v14090_v48  ;;  %v14096_v62 = vpop.eup %14095  ;;  %v11552_v61 = vmul.f32 %v19172_v34, %v19144_v33 }
0x1697   :  { %11533 = vrot.lane.b32.xlu0 %v11531_v43, %s14133_s6  ;;  %v14098_v38 = vpop.eup %14097  ;;  %v11527_v53 = vadd.f32 1.0, %v14096_v62 }
0x1698   :  { %11555 = vrot.lane.b32.xlu1 %v11553_v32, %s14133_s6  ;;  %v11549_v45 = vadd.f32 1.0, %v14098_v38 }
0x1699   :  { %14099 = vrcp.f32 %v11527_v53 }
0x169a   :  { %14101 = vrcp.f32 %v11549_v45 }
0x16a6   :  { %v14100_v40 = vpop.eup %14099 }
0x16a7   :  { %v14102_v7 = vpop.eup %14101 }
0x1709   :  { %v11534_v41 = vpop.permute.xlu0 %11533 }
0x170a   :  { %v11556_v28 = vpop.permute.xlu1 %11555  ;;  %v11536_v2 = vadd.f32 %v11534_v41, %v11530_v16 }
0x170b   :  { %v11558_v24 = vadd.f32 %v11556_v28, %v11552_v61 }
0x170c   :  { %14103 = vtanh.f32 %v11536_v2 }
0x170d   :  { %14105 = vtanh.f32 %v11558_v24 }
0x1719   :  { %v14104_v1 = vpop.eup %14103 }
0x171a   :  { %v14106_v52 = vpop.eup %14105  ;;  %v11538_v18 = vmul.f32 %v14104_v1, %v14100_v40 }
0x171b   :  { %v11560_v36 = vmul.f32 %v14106_v52, %v14102_v7 }
0x171c   :  { %11562 = vrot.lane.b32.xlu0 %v11538_v18, %s14133_s6 }
0x171d   :  { %13386 = vst.msk [vmem:[%s19331_s7 + $0x8] sm:$0xff] %vm9537_vm1, %v11560_v36 }
0x178e   :  { %v11563_v31 = vpop.permute.xlu0 %11562 }
0x178f   :  { %13385 = vst.msk [vmem:[%s19331_s7 + $0x30] sm:$0xff] %vm9534_vm2, %v11563_v31  ;;  %v11567_v33 = vsel %vm9534_vm2, %v11563_v31, %v11560_v36 }
0x1790   :  { %v11568_v3 = vpack.c.bf16 %v11567_v33, %v11567_v33 }
0x1792   :  { %11794 = vmatmul.mubr.bf16.vlgmr.msra.gmra.mxu0 %v11568_v3  ;;  %11835 = vmatmul.mubr.bf16.vlgmr.msra.gmra.mxu1 %v11568_v3 }
0x1852   :  { %v11795_v5 = vpop.f32.mrf.mxu0  ;;  %v11836_v21 = vpop.f32.mrf.mxu1 }
0x1853   :  { %v11845_v29 = vadd.f32 %v11795_v5, %v20198_v8  ;;  %v11849_v48 = vadd.f32 %v11836_v21, %v20199_v20 }
0x1854   :  { %v11797_v14 = vpop.f32.mrf.mxu0  ;;  %v11838_v34 = vpop.f32.mrf.mxu1 }
0x1855   :  { %v13419_v43 = vmul.f32 -1.442695, %v11845_v29  ;;  %v13421_v32 = vmul.f32 -1.442695, %v11849_v48  ;;  %v11846_v12 = vadd.f32 %v11797_v14, %v18670_v55  ;;  %v11850_v11 = vadd.f32 %v11838_v34, %v20200_v19 }
0x1856   :  { %v11799_v22 = vpop.f32.mrf.mxu0  ;;  %v11840_v60 = vpop.f32.mrf.mxu1 }
0x1857   :  { %14107 = vpow2.f32 %v13419_v43  ;;  %v13420_v55 = vmul.f32 -1.442695, %v11846_v12  ;;  %v13422_v23 = vmul.f32 -1.442695, %v11850_v11 }
0x1858   :  { %14109 = vpow2.f32 %v13421_v32  ;;  %v11800_v54 = vpop.f32.mrf.mxu0  ;;  %v11841_v35 = vpop.f32.mrf.mxu1 }
0x1859   :  { %14111 = vtanh.f32 %v11846_v12 }
0x185a   :  { %14113 = vtanh.f32 %v11850_v11 }
0x1864   :  { %v14108_v26 = vpop.eup %14107 }
0x1865   :  { %v14110_v51 = vpop.eup %14109  ;;  %v11854_v46 = vadd.f32 1.0, %v14108_v26 }
0x1866   :  { %v11876_v30 = vadd.f32 1.0, %v14110_v51  ;;  %v14112_v63 = vpop.eup %14111 }
0x1867   :  { %14115 = vrcp.f32 %v11854_v46  ;;  %v14114_v10 = vpop.eup %14113 }
0x1868   :  { %14117 = vrcp.f32 %v11876_v30 }
0x1869   :  { %14119 = vpow2.f32 %v13420_v55 }
0x186a   :  { %14121 = vpow2.f32 %v13422_v23 }
0x1874   :  { %v14116_v37 = vpop.eup %14115 }
0x1875   :  { %v14118_v47 = vpop.eup %14117  ;;  %v11865_v25 = vmul.f32 %v14116_v37, %v14112_v63  ;;  %v11864_v50 = vmul.f32 %v14116_v37, %v11536_v2 }
0x1876   :  { %v11887_v6 = vmul.f32 %v14118_v47, %v14114_v10  ;;  %v14120_v15 = vpop.eup %14119  ;;  %v11886_v56 = vmul.f32 %v14118_v47, %v11558_v24 }
0x1877   :  { %11867 = vrot.lane.b32.xlu1 %v11865_v25, %s14133_s6  ;;  %v14122_v0 = vpop.eup %14121  ;;  %v11861_v42 = vadd.f32 1.0, %v14120_v15 }
0x1878   :  { %11889 = vrot.lane.b32.xlu0 %v11887_v6, %s14133_s6  ;;  %v11883_v39 = vadd.f32 1.0, %v14122_v0 }
0x1879   :  { %14123 = vrcp.f32 %v11861_v42 }
0x187a   :  { %14125 = vrcp.f32 %v11883_v39 }
0x1886   :  { %v14124_v57 = vpop.eup %14123 }
0x1887   :  { %v14126_v58 = vpop.eup %14125 }
0x18e9   :  { %v11868_v9 = vpop.permute.xlu1 %11867 }
0x18ea   :  { %v11890_v13 = vpop.permute.xlu0 %11889  ;;  %v11870_v17 = vadd.f32 %v11868_v9, %v11864_v50 }
0x18eb   :  { %v11892_v59 = vadd.f32 %v11890_v13, %v11886_v56 }
0x18ec   :  { %14127 = vtanh.f32 %v11870_v17 }
0x18ed   :  { %14129 = vtanh.f32 %v11892_v59 }
0x18f9   :  { %v14128_v49 = vpop.eup %14127 }
0x18fa   :  { %v14130_v27 = vpop.eup %14129  ;;  %v11872_v44 = vmul.f32 %v14128_v49, %v14124_v57 }
0x18fb   :  { %v11894_v4 = vmul.f32 %v14130_v27, %v14126_v58 }
0x18fc   :  { %11896 = vrot.lane.b32.xlu1 %v11872_v44, %s14133_s6 }
0x18fd   :  { %11903 = vrot.lane.b32.xlu0 %v11894_v4, %s14133_s6  ;;  %11900 = vst.msk [vmem:[%s19331_s7] sm:$0xff] %vm9537_vm1, %v11894_v4 }
0x1900   :  { %11908 = vrot.lane.b32.xlu1 %v11870_v17, %s14133_s6 }
0x1901   :  { %11913 = vrot.lane.b32.xlu0 %v11892_v59, %s14133_s6 }
0x196e   :  { %v11897_v62 = vpop.permute.xlu1 %11896 }
0x196f   :  { %v11904_v38 = vpop.permute.xlu0 %11903  ;;  %13423 = vst.msk [vmem:[%s19331_s7 + $0x38] sm:$0xff] %vm9534_vm2, %v11897_v62  ;;  %11901 = vst.msk [vmem:[%s19332_s8] sm:$0xff] %vm9534_vm2, %v11897_v62 }
0x1970   :  { %11906 = vst.msk [vmem:[%s19332_s8 + $0x8] sm:$0xff] %vm9534_vm2, %v11904_v38 }
0x1972   :  { %v11909_v53 = vpop.permute.xlu1 %11908 }
0x1973   :  { %v11914_v45 = vpop.permute.xlu0 %11913  ;;  %11911 = vst.msk [vmem:[%s19333_s9] sm:$0xff] %vm9534_vm2, %v11909_v53 }
0x1974   :  { %11916 = vst.msk [vmem:[%s19333_s9 + $0x8] sm:$0xff] %vm9534_vm2, %v11914_v45 }

</bundles_post_ra>
